<compile_context>
chip_gen: v7x
topology: tpu7x:2x2x1
jax: 0.10.0
libtpu: 0.0.40
codegen_flags: <defaults>
</compile_context>

<pallas_src>
import numpy as np

import jax
import jax.numpy as jnp
from jax.experimental import pallas as pl
from jax.experimental.pallas import tpu as pltpu


# ----------------------------------------------------------------------------
# Fused encoder kernel: 3 x (conv3d k=3 s=2 p=1 + ReLU), everything in VMEM.
# ----------------------------------------------------------------------------
def _encoder_kernel(a_ref,
                    g1_ref, m1_ref, b1_ref,
                    g2_ref, m2_ref, b2_ref,
                    g3_ref, m3_ref, b3_ref,
                    out_ref):
    a = a_ref[...]                                     # (N*S*S, S*C_in)
    for g_ref, m_ref, b_ref in ((g1_ref, m1_ref, b1_ref),
                                (g2_ref, m2_ref, b2_ref),
                                (g3_ref, m3_ref, b3_ref)):
        rows_out = g_ref.shape[1]                      # N * T * T
        lanes_out = m_ref.shape[2]                     # T * C_out
        acc = jnp.zeros((rows_out, lanes_out), jnp.float32) + b_ref[...]
        for t in range(9):                             # taps over (kd, kh)
            # stride-2 / pad-1 gather along (d, h) as a 0/1 matmul (MXU)
            sel = jnp.dot(g_ref[t], a, preferred_element_type=jnp.float32)
            # kw taps + stride-2 along w + channel contraction as one matmul
            acc = acc + jnp.dot(sel, m_ref[t],
                                preferred_element_type=jnp.float32)
        a = jnp.maximum(acc, 0.0)                      # ReLU, f32 epilogue
    out_ref[...] = a                                   # lane-dense (rows, 128)


def _full_spec(shape):
    zeros = (0,) * len(shape)
    return pl.BlockSpec(shape, lambda i, _z=zeros: _z)


def encoder_forward_pallas(x, ops):
    """x: (N, 1, D, H, W) float32.  ops: tuple from prepare_encoder_ops."""
    g1, m1, b1, g2, m2, b2, g3, m3, b3 = ops
    N, C, D, H, W = x.shape
    assert C == 1 and D % 8 == 0 and H % 8 == 0 and W % 8 == 0

    # Boundary layout change only: rows=(n,d,h), lanes=(w*C_in + c); C_in == 1
    # so this is a pure reshape (no transposes, no padding, no im2col in HBM).
    a0 = x.reshape(N * D * H, W)

    out_rows = g3.shape[1]            # N * (D//8) * (H//8)
    out_lanes = m3.shape[2]           # (W//8) * 64   (= 128 here: lane-dense)

    inputs = (a0, g1, m1, b1, g2, m2, b2, g3, m3, b3)

    flops = 0
    for g, m in ((g1, m1), (g2, m2), (g3, m3)):
        r_out, r_in = g.shape[1], g.shape[2]
        l_in, l_out = m.shape[1], m.shape[2]
        flops += 9 * (2 * r_out * r_in * l_in + 2 * r_out * l_in * l_out)
    bytes_accessed = (sum(int(np.prod(op.shape)) * 4 for op in inputs)
                      + out_rows * out_lanes * 4)

    out = pl.pallas_call(
        _encoder_kernel,
        out_shape=jax.ShapeDtypeStruct((out_rows, out_lanes), jnp.float32),
        grid=(1,),
        in_specs=[_full_spec(op.shape) for op in inputs],
        out_specs=_full_spec((out_rows, out_lanes)),
        compiler_params=pltpu.CompilerParams(
            dimension_semantics=("arbitrary",)),
        cost_estimate=pl.CostEstimate(
            flops=int(flops), transcendentals=0,
            bytes_accessed=int(bytes_accessed)),
    )(*inputs)

    # Boundary layout change back to PyTorch NCDHW.
    Do, Ho, Wo = D // 8, H // 8, W // 8
    out = out.reshape(N, Do, Ho, Wo, 64)          # rows=(n,do,ho), lanes=(wo,co)
    return jnp.transpose(out, (0, 4, 1, 2, 3))    # (N, 64, Do, Ho, Wo)


# ----------------------------------------------------------------------------
# One-time parameter packing (pre-flattened weights; feedback item).
# ----------------------------------------------------------------------------
def _build_layer_ops(w, b, N, S):
    """Pack one Conv3d(k=3, s=2, p=1) layer for the fused kernel.

    Returns
      G: (9, N*T*T, N*S*S) 0/1 row-selection per (kd, kh) tap (d/h gather+pad)
      M: (9, S*C_in, T*C_out) packed weights (kw taps, w stride-2, w padding,
         channel contraction)
      B: (1, T*C_out) bias tiled over wo
    with T = S // 2.
    """
    w = np.asarray(jax.device_get(w), np.float32)   # (C_out, C_in, 3, 3, 3)
    b = np.asarray(jax.device_get(b), np.float32)   # (C_out,)
    C_out, C_in = w.shape[0], w.shape[1]
    T = S // 2
    G = np.zeros((9, N * T * T, N * S * S), np.float32)
    M = np.zeros((9, S * C_in, T * C_out), np.float32)
    for kd in range(3):
        for kh in range(3):
            t = kd * 3 + kh
            for n in range(N):
                for do in range(T):
                    d = 2 * do + kd - 1
                    if d < 0 or d >= S:
                        continue
                    for ho in range(T):
                        h = 2 * ho + kh - 1
                        if h < 0 or h >= S:
                            continue
                        G[t, (n * T + do) * T + ho, (n * S + d) * S + h] = 1.0
            for kw in range(3):
                wtap = w[:, :, kd, kh, kw].T        # (C_in, C_out)
                for wo in range(T):
                    wi = 2 * wo + kw - 1
                    if wi < 0 or wi >= S:
                        continue                     # w padding -> contributes 0
                    M[t, wi * C_in:(wi + 1) * C_in,
                         wo * C_out:(wo + 1) * C_out] += wtap
    B = np.tile(b, T).reshape(1, T * C_out)
    return jnp.asarray(G), jnp.asarray(M), jnp.asarray(B)


def prepare_encoder_ops(params, N, spatial):
    """Pre-pack all three layers once for a given (batch, spatial) size."""
    ops = []
    S = spatial
    for (w, b) in params:
        g, m, bt = _build_layer_ops(w, b, N, S)
        ops.extend([g, m, bt])
        S //= 2
    return tuple(ops)


# ----------------------------------------------------------------------------
# Parameters + pure-JAX reference (for correctness verification).
# ----------------------------------------------------------------------------
def init_encoder_params(key):
    dims = [(1, 16), (16, 32), (32, 64)]
    params = []
    for i, (cin, cout) in enumerate(dims):
        kw_, kb_ = jax.random.split(jax.random.fold_in(key, i))
        fan_in = cin * 27
        w = jax.random.normal(kw_, (cout, cin, 3, 3, 3), jnp.float32) / jnp.sqrt(fan_in)
        b = 0.01 * jax.random.normal(kb_, (cout,), jnp.float32)
        params.append((w, b))
    return params


def encoder_reference(x, params):
    for w, b in params:
        y = jax.lax.conv_general_dilated(
            x, w, window_strides=(2, 2, 2),
            padding=((1, 1), (1, 1), (1, 1)),
            dimension_numbers=("NCDHW", "OIDHW", "NCDHW"),
            precision=jax.lax.Precision.HIGHEST)
        x = jnp.maximum(y + b[None, :, None, None, None], 0.0)
    return x


if __name__ == "__main__":
    key = jax.random.PRNGKey(0)
    kx, kp = jax.random.split(key)

    # Input consistent with the module: N=2, C=1, D=H=W=16.
    N, D = 2, 16
    x = jax.random.normal(kx, (N, 1, D, D, D), jnp.float32)
    params = init_encoder_params(kp)
    ops = prepare_encoder_ops(params, N, D)

    fwd = jax.jit(encoder_forward_pallas)
    out = jax.block_until_ready(fwd(x, ops))
    assert out.shape == (N, 64, D // 8, D // 8, D // 8), out.shape

    ref = jax.block_until_ready(encoder_reference(x, params))
    max_err = float(jnp.max(jnp.abs(out - ref)))
    assert jnp.allclose(out, ref, rtol=1e-3, atol=1e-3), max_err

    print("KERNEL_OK")
</pallas_src>

<mosaic_0001>
module attributes {stable_mosaic.version = 11 : i64} {
  func.func @_encoder_kernel(%arg0: i32, %arg1: memref<512x16xf32, #tpu.memory_space<vmem>>, %arg2: memref<9x128x512xf32, #tpu.memory_space<vmem>>, %arg3: memref<9x16x128xf32, #tpu.memory_space<vmem>>, %arg4: memref<1x128xf32, #tpu.memory_space<vmem>>, %arg5: memref<9x32x128xf32, #tpu.memory_space<vmem>>, %arg6: memref<9x128x128xf32, #tpu.memory_space<vmem>>, %arg7: memref<1x128xf32, #tpu.memory_space<vmem>>, %arg8: memref<9x8x32xf32, #tpu.memory_space<vmem>>, %arg9: memref<9x128x128xf32, #tpu.memory_space<vmem>>, %arg10: memref<1x128xf32, #tpu.memory_space<vmem>>, %arg11: memref<8x128xf32, #tpu.memory_space<vmem>>) attributes {dimension_semantics = [#tpu.dimension_semantics<arbitrary>], iteration_bounds = array<i64: 1>, scalar_prefetch = 0 : i64, scratch_operands = 0 : i64, tpu.core_type = #tpu.core_type<tc>, window_params = [{pipeline_mode = #tpu.pipeline_mode<synchronous>, transform_indices = @transform_0, window_bounds = array<i64: 512, 16>}, {pipeline_mode = #tpu.pipeline_mode<synchronous>, transform_indices = @transform_1, window_bounds = array<i64: 9, 128, 512>}, {pipeline_mode = #tpu.pipeline_mode<synchronous>, transform_indices = @transform_2, window_bounds = array<i64: 9, 16, 128>}, {pipeline_mode = #tpu.pipeline_mode<synchronous>, transform_indices = @transform_3, window_bounds = array<i64: 1, 128>}, {pipeline_mode = #tpu.pipeline_mode<synchronous>, transform_indices = @transform_4, window_bounds = array<i64: 9, 32, 128>}, {pipeline_mode = #tpu.pipeline_mode<synchronous>, transform_indices = @transform_5, window_bounds = array<i64: 9, 128, 128>}, {pipeline_mode = #tpu.pipeline_mode<synchronous>, transform_indices = @transform_6, window_bounds = array<i64: 1, 128>}, {pipeline_mode = #tpu.pipeline_mode<synchronous>, transform_indices = @transform_7, window_bounds = array<i64: 9, 8, 32>}, {pipeline_mode = #tpu.pipeline_mode<synchronous>, transform_indices = @transform_8, window_bounds = array<i64: 9, 128, 128>}, {pipeline_mode = #tpu.pipeline_mode<synchronous>, transform_indices = @transform_9, window_bounds = array<i64: 1, 128>}, {pipeline_mode = #tpu.pipeline_mode<synchronous>, transform_indices = @transform_10, window_bounds = array<i64: 8, 128>}]} {
    %c0 = arith.constant 0 : index
    %c0_0 = arith.constant 0 : index
    %0 = vector.load %arg1[%c0, %c0_0] : memref<512x16xf32, #tpu.memory_space<vmem>>, vector<512x16xf32>
    %cst = arith.constant 0.000000e+00 : f32
    %1 = vector.broadcast %cst : f32 to vector<128x128xf32>
    %c0_1 = arith.constant 0 : index
    %c0_2 = arith.constant 0 : index
    %2 = vector.load %arg4[%c0_1, %c0_2] : memref<1x128xf32, #tpu.memory_space<vmem>>, vector<1x128xf32>
    %3 = vector.broadcast %2 : vector<1x128xf32> to vector<128x128xf32>
    %4 = arith.addf %1, %3 : vector<128x128xf32>
    %c0_3 = arith.constant 0 : index
    %c0_4 = arith.constant 0 : index
    %c0_5 = arith.constant 0 : index
    %5 = vector.load %arg2[%c0_3, %c0_4, %c0_5] : memref<9x128x512xf32, #tpu.memory_space<vmem>>, vector<1x128x512xf32>
    %6 = vector.shape_cast %5 : vector<1x128x512xf32> to vector<128x512xf32>
    %cst_6 = arith.constant dense<0.000000e+00> : vector<128x16xf32>
    %7 = tpu.matmul %6, %0, %cst_6 {dimension_numbers = #tpu.dot_dimension_numbers<[1], [0], [0], [1], [0, 0, 1, 1], [], []>} : vector<128x512xf32>, vector<512x16xf32>, vector<128x16xf32> -> vector<128x16xf32>
    %c0_7 = arith.constant 0 : index
    %c0_8 = arith.constant 0 : index
    %c0_9 = arith.constant 0 : index
    %8 = vector.load %arg3[%c0_7, %c0_8, %c0_9] : memref<9x16x128xf32, #tpu.memory_space<vmem>>, vector<1x16x128xf32>
    %9 = vector.shape_cast %8 : vector<1x16x128xf32> to vector<16x128xf32>
    %cst_10 = arith.constant dense<0.000000e+00> : vector<128x128xf32>
    %10 = tpu.matmul %7, %9, %cst_10 {dimension_numbers = #tpu.dot_dimension_numbers<[1], [0], [0], [1], [0, 0, 1, 1], [], []>} : vector<128x16xf32>, vector<16x128xf32>, vector<128x128xf32> -> vector<128x128xf32>
    %11 = arith.addf %4, %10 : vector<128x128xf32>
    %c1 = arith.constant 1 : index
    %c0_11 = arith.constant 0 : index
    %c0_12 = arith.constant 0 : index
    %12 = vector.load %arg2[%c1, %c0_11, %c0_12] : memref<9x128x512xf32, #tpu.memory_space<vmem>>, vector<1x128x512xf32>
    %13 = vector.shape_cast %12 : vector<1x128x512xf32> to vector<128x512xf32>
    %cst_13 = arith.constant dense<0.000000e+00> : vector<128x16xf32>
    %14 = tpu.matmul %13, %0, %cst_13 {dimension_numbers = #tpu.dot_dimension_numbers<[1], [0], [0], [1], [0, 0, 1, 1], [], []>} : vector<128x512xf32>, vector<512x16xf32>, vector<128x16xf32> -> vector<128x16xf32>
    %c1_14 = arith.constant 1 : index
    %c0_15 = arith.constant 0 : index
    %c0_16 = arith.constant 0 : index
    %15 = vector.load %arg3[%c1_14, %c0_15, %c0_16] : memref<9x16x128xf32, #tpu.memory_space<vmem>>, vector<1x16x128xf32>
    %16 = vector.shape_cast %15 : vector<1x16x128xf32> to vector<16x128xf32>
    %cst_17 = arith.constant dense<0.000000e+00> : vector<128x128xf32>
    %17 = tpu.matmul %14, %16, %cst_17 {dimension_numbers = #tpu.dot_dimension_numbers<[1], [0], [0], [1], [0, 0, 1, 1], [], []>} : vector<128x16xf32>, vector<16x128xf32>, vector<128x128xf32> -> vector<128x128xf32>
    %18 = arith.addf %11, %17 : vector<128x128xf32>
    %c2 = arith.constant 2 : index
    %c0_18 = arith.constant 0 : index
    %c0_19 = arith.constant 0 : index
    %19 = vector.load %arg2[%c2, %c0_18, %c0_19] : memref<9x128x512xf32, #tpu.memory_space<vmem>>, vector<1x128x512xf32>
    %20 = vector.shape_cast %19 : vector<1x128x512xf32> to vector<128x512xf32>
    %cst_20 = arith.constant dense<0.000000e+00> : vector<128x16xf32>
    %21 = tpu.matmul %20, %0, %cst_20 {dimension_numbers = #tpu.dot_dimension_numbers<[1], [0], [0], [1], [0, 0, 1, 1], [], []>} : vector<128x512xf32>, vector<512x16xf32>, vector<128x16xf32> -> vector<128x16xf32>
    %c2_21 = arith.constant 2 : index
    %c0_22 = arith.constant 0 : index
    %c0_23 = arith.constant 0 : index
    %22 = vector.load %arg3[%c2_21, %c0_22, %c0_23] : memref<9x16x128xf32, #tpu.memory_space<vmem>>, vector<1x16x128xf32>
    %23 = vector.shape_cast %22 : vector<1x16x128xf32> to vector<16x128xf32>
    %cst_24 = arith.constant dense<0.000000e+00> : vector<128x128xf32>
    %24 = tpu.matmul %21, %23, %cst_24 {dimension_numbers = #tpu.dot_dimension_numbers<[1], [0], [0], [1], [0, 0, 1, 1], [], []>} : vector<128x16xf32>, vector<16x128xf32>, vector<128x128xf32> -> vector<128x128xf32>
    %25 = arith.addf %18, %24 : vector<128x128xf32>
    %c3 = arith.constant 3 : index
    %c0_25 = arith.constant 0 : index
    %c0_26 = arith.constant 0 : index
    %26 = vector.load %arg2[%c3, %c0_25, %c0_26] : memref<9x128x512xf32, #tpu.memory_space<vmem>>, vector<1x128x512xf32>
    %27 = vector.shape_cast %26 : vector<1x128x512xf32> to vector<128x512xf32>
    %cst_27 = arith.constant dense<0.000000e+00> : vector<128x16xf32>
    %28 = tpu.matmul %27, %0, %cst_27 {dimension_numbers = #tpu.dot_dimension_numbers<[1], [0], [0], [1], [0, 0, 1, 1], [], []>} : vector<128x512xf32>, vector<512x16xf32>, vector<128x16xf32> -> vector<128x16xf32>
    %c3_28 = arith.constant 3 : index
    %c0_29 = arith.constant 0 : index
    %c0_30 = arith.constant 0 : index
    %29 = vector.load %arg3[%c3_28, %c0_29, %c0_30] : memref<9x16x128xf32, #tpu.memory_space<vmem>>, vector<1x16x128xf32>
    %30 = vector.shape_cast %29 : vector<1x16x128xf32> to vector<16x128xf32>
    %cst_31 = arith.constant dense<0.000000e+00> : vector<128x128xf32>
    %31 = tpu.matmul %28, %30, %cst_31 {dimension_numbers = #tpu.dot_dimension_numbers<[1], [0], [0], [1], [0, 0, 1, 1], [], []>} : vector<128x16xf32>, vector<16x128xf32>, vector<128x128xf32> -> vector<128x128xf32>
    %32 = arith.addf %25, %31 : vector<128x128xf32>
    %c4 = arith.constant 4 : index
    %c0_32 = arith.constant 0 : index
    %c0_33 = arith.constant 0 : index
    %33 = vector.load %arg2[%c4, %c0_32, %c0_33] : memref<9x128x512xf32, #tpu.memory_space<vmem>>, vector<1x128x512xf32>
    %34 = vector.shape_cast %33 : vector<1x128x512xf32> to vector<128x512xf32>
    %cst_34 = arith.constant dense<0.000000e+00> : vector<128x16xf32>
    %35 = tpu.matmul %34, %0, %cst_34 {dimension_numbers = #tpu.dot_dimension_numbers<[1], [0], [0], [1], [0, 0, 1, 1], [], []>} : vector<128x512xf32>, vector<512x16xf32>, vector<128x16xf32> -> vector<128x16xf32>
    %c4_35 = arith.constant 4 : index
    %c0_36 = arith.constant 0 : index
    %c0_37 = arith.constant 0 : index
    %36 = vector.load %arg3[%c4_35, %c0_36, %c0_37] : memref<9x16x128xf32, #tpu.memory_space<vmem>>, vector<1x16x128xf32>
    %37 = vector.shape_cast %36 : vector<1x16x128xf32> to vector<16x128xf32>
    %cst_38 = arith.constant dense<0.000000e+00> : vector<128x128xf32>
    %38 = tpu.matmul %35, %37, %cst_38 {dimension_numbers = #tpu.dot_dimension_numbers<[1], [0], [0], [1], [0, 0, 1, 1], [], []>} : vector<128x16xf32>, vector<16x128xf32>, vector<128x128xf32> -> vector<128x128xf32>
    %39 = arith.addf %32, %38 : vector<128x128xf32>
    %c5 = arith.constant 5 : index
    %c0_39 = arith.constant 0 : index
    %c0_40 = arith.constant 0 : index
    %40 = vector.load %arg2[%c5, %c0_39, %c0_40] : memref<9x128x512xf32, #tpu.memory_space<vmem>>, vector<1x128x512xf32>
    %41 = vector.shape_cast %40 : vector<1x128x512xf32> to vector<128x512xf32>
    %cst_41 = arith.constant dense<0.000000e+00> : vector<128x16xf32>
    %42 = tpu.matmul %41, %0, %cst_41 {dimension_numbers = #tpu.dot_dimension_numbers<[1], [0], [0], [1], [0, 0, 1, 1], [], []>} : vector<128x512xf32>, vector<512x16xf32>, vector<128x16xf32> -> vector<128x16xf32>
    %c5_42 = arith.constant 5 : index
    %c0_43 = arith.constant 0 : index
    %c0_44 = arith.constant 0 : index
    %43 = vector.load %arg3[%c5_42, %c0_43, %c0_44] : memref<9x16x128xf32, #tpu.memory_space<vmem>>, vector<1x16x128xf32>
    %44 = vector.shape_cast %43 : vector<1x16x128xf32> to vector<16x128xf32>
    %cst_45 = arith.constant dense<0.000000e+00> : vector<128x128xf32>
    %45 = tpu.matmul %42, %44, %cst_45 {dimension_numbers = #tpu.dot_dimension_numbers<[1], [0], [0], [1], [0, 0, 1, 1], [], []>} : vector<128x16xf32>, vector<16x128xf32>, vector<128x128xf32> -> vector<128x128xf32>
    %46 = arith.addf %39, %45 : vector<128x128xf32>
    %c6 = arith.constant 6 : index
    %c0_46 = arith.constant 0 : index
    %c0_47 = arith.constant 0 : index
    %47 = vector.load %arg2[%c6, %c0_46, %c0_47] : memref<9x128x512xf32, #tpu.memory_space<vmem>>, vector<1x128x512xf32>
    %48 = vector.shape_cast %47 : vector<1x128x512xf32> to vector<128x512xf32>
    %cst_48 = arith.constant dense<0.000000e+00> : vector<128x16xf32>
    %49 = tpu.matmul %48, %0, %cst_48 {dimension_numbers = #tpu.dot_dimension_numbers<[1], [0], [0], [1], [0, 0, 1, 1], [], []>} : vector<128x512xf32>, vector<512x16xf32>, vector<128x16xf32> -> vector<128x16xf32>
    %c6_49 = arith.constant 6 : index
    %c0_50 = arith.constant 0 : index
    %c0_51 = arith.constant 0 : index
    %50 = vector.load %arg3[%c6_49, %c0_50, %c0_51] : memref<9x16x128xf32, #tpu.memory_space<vmem>>, vector<1x16x128xf32>
    %51 = vector.shape_cast %50 : vector<1x16x128xf32> to vector<16x128xf32>
    %cst_52 = arith.constant dense<0.000000e+00> : vector<128x128xf32>
    %52 = tpu.matmul %49, %51, %cst_52 {dimension_numbers = #tpu.dot_dimension_numbers<[1], [0], [0], [1], [0, 0, 1, 1], [], []>} : vector<128x16xf32>, vector<16x128xf32>, vector<128x128xf32> -> vector<128x128xf32>
    %53 = arith.addf %46, %52 : vector<128x128xf32>
    %c7 = arith.constant 7 : index
    %c0_53 = arith.constant 0 : index
    %c0_54 = arith.constant 0 : index
    %54 = vector.load %arg2[%c7, %c0_53, %c0_54] : memref<9x128x512xf32, #tpu.memory_space<vmem>>, vector<1x128x512xf32>
    %55 = vector.shape_cast %54 : vector<1x128x512xf32> to vector<128x512xf32>
    %cst_55 = arith.constant dense<0.000000e+00> : vector<128x16xf32>
    %56 = tpu.matmul %55, %0, %cst_55 {dimension_numbers = #tpu.dot_dimension_numbers<[1], [0], [0], [1], [0, 0, 1, 1], [], []>} : vector<128x512xf32>, vector<512x16xf32>, vector<128x16xf32> -> vector<128x16xf32>
    %c7_56 = arith.constant 7 : index
    %c0_57 = arith.constant 0 : index
    %c0_58 = arith.constant 0 : index
    %57 = vector.load %arg3[%c7_56, %c0_57, %c0_58] : memref<9x16x128xf32, #tpu.memory_space<vmem>>, vector<1x16x128xf32>
    %58 = vector.shape_cast %57 : vector<1x16x128xf32> to vector<16x128xf32>
    %cst_59 = arith.constant dense<0.000000e+00> : vector<128x128xf32>
    %59 = tpu.matmul %56, %58, %cst_59 {dimension_numbers = #tpu.dot_dimension_numbers<[1], [0], [0], [1], [0, 0, 1, 1], [], []>} : vector<128x16xf32>, vector<16x128xf32>, vector<128x128xf32> -> vector<128x128xf32>
    %60 = arith.addf %53, %59 : vector<128x128xf32>
    %c8 = arith.constant 8 : index
    %c0_60 = arith.constant 0 : index
    %c0_61 = arith.constant 0 : index
    %61 = vector.load %arg2[%c8, %c0_60, %c0_61] : memref<9x128x512xf32, #tpu.memory_space<vmem>>, vector<1x128x512xf32>
    %62 = vector.shape_cast %61 : vector<1x128x512xf32> to vector<128x512xf32>
    %cst_62 = arith.constant dense<0.000000e+00> : vector<128x16xf32>
    %63 = tpu.matmul %62, %0, %cst_62 {dimension_numbers = #tpu.dot_dimension_numbers<[1], [0], [0], [1], [0, 0, 1, 1], [], []>} : vector<128x512xf32>, vector<512x16xf32>, vector<128x16xf32> -> vector<128x16xf32>
    %c8_63 = arith.constant 8 : index
    %c0_64 = arith.constant 0 : index
    %c0_65 = arith.constant 0 : index
    %64 = vector.load %arg3[%c8_63, %c0_64, %c0_65] : memref<9x16x128xf32, #tpu.memory_space<vmem>>, vector<1x16x128xf32>
    %65 = vector.shape_cast %64 : vector<1x16x128xf32> to vector<16x128xf32>
    %cst_66 = arith.constant dense<0.000000e+00> : vector<128x128xf32>
    %66 = tpu.matmul %63, %65, %cst_66 {dimension_numbers = #tpu.dot_dimension_numbers<[1], [0], [0], [1], [0, 0, 1, 1], [], []>} : vector<128x16xf32>, vector<16x128xf32>, vector<128x128xf32> -> vector<128x128xf32>
    %67 = arith.addf %60, %66 : vector<128x128xf32>
    %cst_67 = arith.constant 0.000000e+00 : f32
    %68 = vector.broadcast %cst_67 : f32 to vector<128x128xf32>
    %69 = arith.maximumf %67, %68 : vector<128x128xf32>
    %cst_68 = arith.constant 0.000000e+00 : f32
    %70 = vector.broadcast %cst_68 : f32 to vector<32x128xf32>
    %c0_69 = arith.constant 0 : index
    %c0_70 = arith.constant 0 : index
    %71 = vector.load %arg7[%c0_69, %c0_70] : memref<1x128xf32, #tpu.memory_space<vmem>>, vector<1x128xf32>
    %72 = vector.broadcast %71 : vector<1x128xf32> to vector<32x128xf32>
    %73 = arith.addf %70, %72 : vector<32x128xf32>
    %c0_71 = arith.constant 0 : index
    %c0_72 = arith.constant 0 : index
    %c0_73 = arith.constant 0 : index
    %74 = vector.load %arg5[%c0_71, %c0_72, %c0_73] : memref<9x32x128xf32, #tpu.memory_space<vmem>>, vector<1x32x128xf32>
    %75 = vector.shape_cast %74 : vector<1x32x128xf32> to vector<32x128xf32>
    %cst_74 = arith.constant dense<0.000000e+00> : vector<32x128xf32>
    %76 = tpu.matmul %75, %69, %cst_74 {dimension_numbers = #tpu.dot_dimension_numbers<[1], [0], [0], [1], [0, 0, 1, 1], [], []>} : vector<32x128xf32>, vector<128x128xf32>, vector<32x128xf32> -> vector<32x128xf32>
    %c0_75 = arith.constant 0 : index
    %c0_76 = arith.constant 0 : index
    %c0_77 = arith.constant 0 : index
    %77 = vector.load %arg6[%c0_75, %c0_76, %c0_77] : memref<9x128x128xf32, #tpu.memory_space<vmem>>, vector<1x128x128xf32>
    %78 = vector.shape_cast %77 : vector<1x128x128xf32> to vector<128x128xf32>
    %cst_78 = arith.constant dense<0.000000e+00> : vector<32x128xf32>
    %79 = tpu.matmul %76, %78, %cst_78 {dimension_numbers = #tpu.dot_dimension_numbers<[1], [0], [0], [1], [0, 0, 1, 1], [], []>} : vector<32x128xf32>, vector<128x128xf32>, vector<32x128xf32> -> vector<32x128xf32>
    %80 = arith.addf %73, %79 : vector<32x128xf32>
    %c1_79 = arith.constant 1 : index
    %c0_80 = arith.constant 0 : index
    %c0_81 = arith.constant 0 : index
    %81 = vector.load %arg5[%c1_79, %c0_80, %c0_81] : memref<9x32x128xf32, #tpu.memory_space<vmem>>, vector<1x32x128xf32>
    %82 = vector.shape_cast %81 : vector<1x32x128xf32> to vector<32x128xf32>
    %cst_82 = arith.constant dense<0.000000e+00> : vector<32x128xf32>
    %83 = tpu.matmul %82, %69, %cst_82 {dimension_numbers = #tpu.dot_dimension_numbers<[1], [0], [0], [1], [0, 0, 1, 1], [], []>} : vector<32x128xf32>, vector<128x128xf32>, vector<32x128xf32> -> vector<32x128xf32>
    %c1_83 = arith.constant 1 : index
    %c0_84 = arith.constant 0 : index
    %c0_85 = arith.constant 0 : index
    %84 = vector.load %arg6[%c1_83, %c0_84, %c0_85] : memref<9x128x128xf32, #tpu.memory_space<vmem>>, vector<1x128x128xf32>
    %85 = vector.shape_cast %84 : vector<1x128x128xf32> to vector<128x128xf32>
    %cst_86 = arith.constant dense<0.000000e+00> : vector<32x128xf32>
    %86 = tpu.matmul %83, %85, %cst_86 {dimension_numbers = #tpu.dot_dimension_numbers<[1], [0], [0], [1], [0, 0, 1, 1], [], []>} : vector<32x128xf32>, vector<128x128xf32>, vector<32x128xf32> -> vector<32x128xf32>
    %87 = arith.addf %80, %86 : vector<32x128xf32>
    %c2_87 = arith.constant 2 : index
    %c0_88 = arith.constant 0 : index
    %c0_89 = arith.constant 0 : index
    %88 = vector.load %arg5[%c2_87, %c0_88, %c0_89] : memref<9x32x128xf32, #tpu.memory_space<vmem>>, vector<1x32x128xf32>
    %89 = vector.shape_cast %88 : vector<1x32x128xf32> to vector<32x128xf32>
    %cst_90 = arith.constant dense<0.000000e+00> : vector<32x128xf32>
    %90 = tpu.matmul %89, %69, %cst_90 {dimension_numbers = #tpu.dot_dimension_numbers<[1], [0], [0], [1], [0, 0, 1, 1], [], []>} : vector<32x128xf32>, vector<128x128xf32>, vector<32x128xf32> -> vector<32x128xf32>
    %c2_91 = arith.constant 2 : index
    %c0_92 = arith.constant 0 : index
    %c0_93 = arith.constant 0 : index
    %91 = vector.load %arg6[%c2_91, %c0_92, %c0_93] : memref<9x128x128xf32, #tpu.memory_space<vmem>>, vector<1x128x128xf32>
    %92 = vector.shape_cast %91 : vector<1x128x128xf32> to vector<128x128xf32>
    %cst_94 = arith.constant dense<0.000000e+00> : vector<32x128xf32>
    %93 = tpu.matmul %90, %92, %cst_94 {dimension_numbers = #tpu.dot_dimension_numbers<[1], [0], [0], [1], [0, 0, 1, 1], [], []>} : vector<32x128xf32>, vector<128x128xf32>, vector<32x128xf32> -> vector<32x128xf32>
    %94 = arith.addf %87, %93 : vector<32x128xf32>
    %c3_95 = arith.constant 3 : index
    %c0_96 = arith.constant 0 : index
    %c0_97 = arith.constant 0 : index
    %95 = vector.load %arg5[%c3_95, %c0_96, %c0_97] : memref<9x32x128xf32, #tpu.memory_space<vmem>>, vector<1x32x128xf32>
    %96 = vector.shape_cast %95 : vector<1x32x128xf32> to vector<32x128xf32>
    %cst_98 = arith.constant dense<0.000000e+00> : vector<32x128xf32>
    %97 = tpu.matmul %96, %69, %cst_98 {dimension_numbers = #tpu.dot_dimension_numbers<[1], [0], [0], [1], [0, 0, 1, 1], [], []>} : vector<32x128xf32>, vector<128x128xf32>, vector<32x128xf32> -> vector<32x128xf32>
    %c3_99 = arith.constant 3 : index
    %c0_100 = arith.constant 0 : index
    %c0_101 = arith.constant 0 : index
    %98 = vector.load %arg6[%c3_99, %c0_100, %c0_101] : memref<9x128x128xf32, #tpu.memory_space<vmem>>, vector<1x128x128xf32>
    %99 = vector.shape_cast %98 : vector<1x128x128xf32> to vector<128x128xf32>
    %cst_102 = arith.constant dense<0.000000e+00> : vector<32x128xf32>
    %100 = tpu.matmul %97, %99, %cst_102 {dimension_numbers = #tpu.dot_dimension_numbers<[1], [0], [0], [1], [0, 0, 1, 1], [], []>} : vector<32x128xf32>, vector<128x128xf32>, vector<32x128xf32> -> vector<32x128xf32>
    %101 = arith.addf %94, %100 : vector<32x128xf32>
    %c4_103 = arith.constant 4 : index
    %c0_104 = arith.constant 0 : index
    %c0_105 = arith.constant 0 : index
    %102 = vector.load %arg5[%c4_103, %c0_104, %c0_105] : memref<9x32x128xf32, #tpu.memory_space<vmem>>, vector<1x32x128xf32>
    %103 = vector.shape_cast %102 : vector<1x32x128xf32> to vector<32x128xf32>
    %cst_106 = arith.constant dense<0.000000e+00> : vector<32x128xf32>
    %104 = tpu.matmul %103, %69, %cst_106 {dimension_numbers = #tpu.dot_dimension_numbers<[1], [0], [0], [1], [0, 0, 1, 1], [], []>} : vector<32x128xf32>, vector<128x128xf32>, vector<32x128xf32> -> vector<32x128xf32>
    %c4_107 = arith.constant 4 : index
    %c0_108 = arith.constant 0 : index
    %c0_109 = arith.constant 0 : index
    %105 = vector.load %arg6[%c4_107, %c0_108, %c0_109] : memref<9x128x128xf32, #tpu.memory_space<vmem>>, vector<1x128x128xf32>
    %106 = vector.shape_cast %105 : vector<1x128x128xf32> to vector<128x128xf32>
    %cst_110 = arith.constant dense<0.000000e+00> : vector<32x128xf32>
    %107 = tpu.matmul %104, %106, %cst_110 {dimension_numbers = #tpu.dot_dimension_numbers<[1], [0], [0], [1], [0, 0, 1, 1], [], []>} : vector<32x128xf32>, vector<128x128xf32>, vector<32x128xf32> -> vector<32x128xf32>
    %108 = arith.addf %101, %107 : vector<32x128xf32>
    %c5_111 = arith.constant 5 : index
    %c0_112 = arith.constant 0 : index
    %c0_113 = arith.constant 0 : index
    %109 = vector.load %arg5[%c5_111, %c0_112, %c0_113] : memref<9x32x128xf32, #tpu.memory_space<vmem>>, vector<1x32x128xf32>
    %110 = vector.shape_cast %109 : vector<1x32x128xf32> to vector<32x128xf32>
    %cst_114 = arith.constant dense<0.000000e+00> : vector<32x128xf32>
    %111 = tpu.matmul %110, %69, %cst_114 {dimension_numbers = #tpu.dot_dimension_numbers<[1], [0], [0], [1], [0, 0, 1, 1], [], []>} : vector<32x128xf32>, vector<128x128xf32>, vector<32x128xf32> -> vector<32x128xf32>
    %c5_115 = arith.constant 5 : index
    %c0_116 = arith.constant 0 : index
    %c0_117 = arith.constant 0 : index
    %112 = vector.load %arg6[%c5_115, %c0_116, %c0_117] : memref<9x128x128xf32, #tpu.memory_space<vmem>>, vector<1x128x128xf32>
    %113 = vector.shape_cast %112 : vector<1x128x128xf32> to vector<128x128xf32>
    %cst_118 = arith.constant dense<0.000000e+00> : vector<32x128xf32>
    %114 = tpu.matmul %111, %113, %cst_118 {dimension_numbers = #tpu.dot_dimension_numbers<[1], [0], [0], [1], [0, 0, 1, 1], [], []>} : vector<32x128xf32>, vector<128x128xf32>, vector<32x128xf32> -> vector<32x128xf32>
    %115 = arith.addf %108, %114 : vector<32x128xf32>
    %c6_119 = arith.constant 6 : index
    %c0_120 = arith.constant 0 : index
    %c0_121 = arith.constant 0 : index
    %116 = vector.load %arg5[%c6_119, %c0_120, %c0_121] : memref<9x32x128xf32, #tpu.memory_space<vmem>>, vector<1x32x128xf32>
    %117 = vector.shape_cast %116 : vector<1x32x128xf32> to vector<32x128xf32>
    %cst_122 = arith.constant dense<0.000000e+00> : vector<32x128xf32>
    %118 = tpu.matmul %117, %69, %cst_122 {dimension_numbers = #tpu.dot_dimension_numbers<[1], [0], [0], [1], [0, 0, 1, 1], [], []>} : vector<32x128xf32>, vector<128x128xf32>, vector<32x128xf32> -> vector<32x128xf32>
    %c6_123 = arith.constant 6 : index
    %c0_124 = arith.constant 0 : index
    %c0_125 = arith.constant 0 : index
    %119 = vector.load %arg6[%c6_123, %c0_124, %c0_125] : memref<9x128x128xf32, #tpu.memory_space<vmem>>, vector<1x128x128xf32>
    %120 = vector.shape_cast %119 : vector<1x128x128xf32> to vector<128x128xf32>
    %cst_126 = arith.constant dense<0.000000e+00> : vector<32x128xf32>
    %121 = tpu.matmul %118, %120, %cst_126 {dimension_numbers = #tpu.dot_dimension_numbers<[1], [0], [0], [1], [0, 0, 1, 1], [], []>} : vector<32x128xf32>, vector<128x128xf32>, vector<32x128xf32> -> vector<32x128xf32>
    %122 = arith.addf %115, %121 : vector<32x128xf32>
    %c7_127 = arith.constant 7 : index
    %c0_128 = arith.constant 0 : index
    %c0_129 = arith.constant 0 : index
    %123 = vector.load %arg5[%c7_127, %c0_128, %c0_129] : memref<9x32x128xf32, #tpu.memory_space<vmem>>, vector<1x32x128xf32>
    %124 = vector.shape_cast %123 : vector<1x32x128xf32> to vector<32x128xf32>
    %cst_130 = arith.constant dense<0.000000e+00> : vector<32x128xf32>
    %125 = tpu.matmul %124, %69, %cst_130 {dimension_numbers = #tpu.dot_dimension_numbers<[1], [0], [0], [1], [0, 0, 1, 1], [], []>} : vector<32x128xf32>, vector<128x128xf32>, vector<32x128xf32> -> vector<32x128xf32>
    %c7_131 = arith.constant 7 : index
    %c0_132 = arith.constant 0 : index
    %c0_133 = arith.constant 0 : index
    %126 = vector.load %arg6[%c7_131, %c0_132, %c0_133] : memref<9x128x128xf32, #tpu.memory_space<vmem>>, vector<1x128x128xf32>
    %127 = vector.shape_cast %126 : vector<1x128x128xf32> to vector<128x128xf32>
    %cst_134 = arith.constant dense<0.000000e+00> : vector<32x128xf32>
    %128 = tpu.matmul %125, %127, %cst_134 {dimension_numbers = #tpu.dot_dimension_numbers<[1], [0], [0], [1], [0, 0, 1, 1], [], []>} : vector<32x128xf32>, vector<128x128xf32>, vector<32x128xf32> -> vector<32x128xf32>
    %129 = arith.addf %122, %128 : vector<32x128xf32>
    %c8_135 = arith.constant 8 : index
    %c0_136 = arith.constant 0 : index
    %c0_137 = arith.constant 0 : index
    %130 = vector.load %arg5[%c8_135, %c0_136, %c0_137] : memref<9x32x128xf32, #tpu.memory_space<vmem>>, vector<1x32x128xf32>
    %131 = vector.shape_cast %130 : vector<1x32x128xf32> to vector<32x128xf32>
    %cst_138 = arith.constant dense<0.000000e+00> : vector<32x128xf32>
    %132 = tpu.matmul %131, %69, %cst_138 {dimension_numbers = #tpu.dot_dimension_numbers<[1], [0], [0], [1], [0, 0, 1, 1], [], []>} : vector<32x128xf32>, vector<128x128xf32>, vector<32x128xf32> -> vector<32x128xf32>
    %c8_139 = arith.constant 8 : index
    %c0_140 = arith.constant 0 : index
    %c0_141 = arith.constant 0 : index
    %133 = vector.load %arg6[%c8_139, %c0_140, %c0_141] : memref<9x128x128xf32, #tpu.memory_space<vmem>>, vector<1x128x128xf32>
    %134 = vector.shape_cast %133 : vector<1x128x128xf32> to vector<128x128xf32>
    %cst_142 = arith.constant dense<0.000000e+00> : vector<32x128xf32>
    %135 = tpu.matmul %132, %134, %cst_142 {dimension_numbers = #tpu.dot_dimension_numbers<[1], [0], [0], [1], [0, 0, 1, 1], [], []>} : vector<32x128xf32>, vector<128x128xf32>, vector<32x128xf32> -> vector<32x128xf32>
    %136 = arith.addf %129, %135 : vector<32x128xf32>
    %cst_143 = arith.constant 0.000000e+00 : f32
    %137 = vector.broadcast %cst_143 : f32 to vector<32x128xf32>
    %138 = arith.maximumf %136, %137 : vector<32x128xf32>
    %cst_144 = arith.constant 0.000000e+00 : f32
    %139 = vector.broadcast %cst_144 : f32 to vector<8x128xf32>
    %c0_145 = arith.constant 0 : index
    %c0_146 = arith.constant 0 : index
    %140 = vector.load %arg10[%c0_145, %c0_146] : memref<1x128xf32, #tpu.memory_space<vmem>>, vector<1x128xf32>
    %141 = vector.broadcast %140 : vector<1x128xf32> to vector<8x128xf32>
    %142 = arith.addf %139, %141 : vector<8x128xf32>
    %c0_147 = arith.constant 0 : index
    %c0_148 = arith.constant 0 : index
    %c0_149 = arith.constant 0 : index
    %143 = vector.load %arg8[%c0_147, %c0_148, %c0_149] : memref<9x8x32xf32, #tpu.memory_space<vmem>>, vector<1x8x32xf32>
    %144 = vector.shape_cast %143 : vector<1x8x32xf32> to vector<8x32xf32>
    %cst_150 = arith.constant dense<0.000000e+00> : vector<8x128xf32>
    %145 = tpu.matmul %144, %138, %cst_150 {dimension_numbers = #tpu.dot_dimension_numbers<[1], [0], [0], [1], [0, 0, 1, 1], [], []>} : vector<8x32xf32>, vector<32x128xf32>, vector<8x128xf32> -> vector<8x128xf32>
    %c0_151 = arith.constant 0 : index
    %c0_152 = arith.constant 0 : index
    %c0_153 = arith.constant 0 : index
    %146 = vector.load %arg9[%c0_151, %c0_152, %c0_153] : memref<9x128x128xf32, #tpu.memory_space<vmem>>, vector<1x128x128xf32>
    %147 = vector.shape_cast %146 : vector<1x128x128xf32> to vector<128x128xf32>
    %cst_154 = arith.constant dense<0.000000e+00> : vector<8x128xf32>
    %148 = tpu.matmul %145, %147, %cst_154 {dimension_numbers = #tpu.dot_dimension_numbers<[1], [0], [0], [1], [0, 0, 1, 1], [], []>} : vector<8x128xf32>, vector<128x128xf32>, vector<8x128xf32> -> vector<8x128xf32>
    %149 = arith.addf %142, %148 : vector<8x128xf32>
    %c1_155 = arith.constant 1 : index
    %c0_156 = arith.constant 0 : index
    %c0_157 = arith.constant 0 : index
    %150 = vector.load %arg8[%c1_155, %c0_156, %c0_157] : memref<9x8x32xf32, #tpu.memory_space<vmem>>, vector<1x8x32xf32>
    %151 = vector.shape_cast %150 : vector<1x8x32xf32> to vector<8x32xf32>
    %cst_158 = arith.constant dense<0.000000e+00> : vector<8x128xf32>
    %152 = tpu.matmul %151, %138, %cst_158 {dimension_numbers = #tpu.dot_dimension_numbers<[1], [0], [0], [1], [0, 0, 1, 1], [], []>} : vector<8x32xf32>, vector<32x128xf32>, vector<8x128xf32> -> vector<8x128xf32>
    %c1_159 = arith.constant 1 : index
    %c0_160 = arith.constant 0 : index
    %c0_161 = arith.constant 0 : index
    %153 = vector.load %arg9[%c1_159, %c0_160, %c0_161] : memref<9x128x128xf32, #tpu.memory_space<vmem>>, vector<1x128x128xf32>
    %154 = vector.shape_cast %153 : vector<1x128x128xf32> to vector<128x128xf32>
    %cst_162 = arith.constant dense<0.000000e+00> : vector<8x128xf32>
    %155 = tpu.matmul %152, %154, %cst_162 {dimension_numbers = #tpu.dot_dimension_numbers<[1], [0], [0], [1], [0, 0, 1, 1], [], []>} : vector<8x128xf32>, vector<128x128xf32>, vector<8x128xf32> -> vector<8x128xf32>
    %156 = arith.addf %149, %155 : vector<8x128xf32>
    %c2_163 = arith.constant 2 : index
    %c0_164 = arith.constant 0 : index
    %c0_165 = arith.constant 0 : index
    %157 = vector.load %arg8[%c2_163, %c0_164, %c0_165] : memref<9x8x32xf32, #tpu.memory_space<vmem>>, vector<1x8x32xf32>
    %158 = vector.shape_cast %157 : vector<1x8x32xf32> to vector<8x32xf32>
    %cst_166 = arith.constant dense<0.000000e+00> : vector<8x128xf32>
    %159 = tpu.matmul %158, %138, %cst_166 {dimension_numbers = #tpu.dot_dimension_numbers<[1], [0], [0], [1], [0, 0, 1, 1], [], []>} : vector<8x32xf32>, vector<32x128xf32>, vector<8x128xf32> -> vector<8x128xf32>
    %c2_167 = arith.constant 2 : index
    %c0_168 = arith.constant 0 : index
    %c0_169 = arith.constant 0 : index
    %160 = vector.load %arg9[%c2_167, %c0_168, %c0_169] : memref<9x128x128xf32, #tpu.memory_space<vmem>>, vector<1x128x128xf32>
    %161 = vector.shape_cast %160 : vector<1x128x128xf32> to vector<128x128xf32>
    %cst_170 = arith.constant dense<0.000000e+00> : vector<8x128xf32>
    %162 = tpu.matmul %159, %161, %cst_170 {dimension_numbers = #tpu.dot_dimension_numbers<[1], [0], [0], [1], [0, 0, 1, 1], [], []>} : vector<8x128xf32>, vector<128x128xf32>, vector<8x128xf32> -> vector<8x128xf32>
    %163 = arith.addf %156, %162 : vector<8x128xf32>
    %c3_171 = arith.constant 3 : index
    %c0_172 = arith.constant 0 : index
    %c0_173 = arith.constant 0 : index
    %164 = vector.load %arg8[%c3_171, %c0_172, %c0_173] : memref<9x8x32xf32, #tpu.memory_space<vmem>>, vector<1x8x32xf32>
    %165 = vector.shape_cast %164 : vector<1x8x32xf32> to vector<8x32xf32>
    %cst_174 = arith.constant dense<0.000000e+00> : vector<8x128xf32>
    %166 = tpu.matmul %165, %138, %cst_174 {dimension_numbers = #tpu.dot_dimension_numbers<[1], [0], [0], [1], [0, 0, 1, 1], [], []>} : vector<8x32xf32>, vector<32x128xf32>, vector<8x128xf32> -> vector<8x128xf32>
    %c3_175 = arith.constant 3 : index
    %c0_176 = arith.constant 0 : index
    %c0_177 = arith.constant 0 : index
    %167 = vector.load %arg9[%c3_175, %c0_176, %c0_177] : memref<9x128x128xf32, #tpu.memory_space<vmem>>, vector<1x128x128xf32>
    %168 = vector.shape_cast %167 : vector<1x128x128xf32> to vector<128x128xf32>
    %cst_178 = arith.constant dense<0.000000e+00> : vector<8x128xf32>
    %169 = tpu.matmul %166, %168, %cst_178 {dimension_numbers = #tpu.dot_dimension_numbers<[1], [0], [0], [1], [0, 0, 1, 1], [], []>} : vector<8x128xf32>, vector<128x128xf32>, vector<8x128xf32> -> vector<8x128xf32>
    %170 = arith.addf %163, %169 : vector<8x128xf32>
    %c4_179 = arith.constant 4 : index
    %c0_180 = arith.constant 0 : index
    %c0_181 = arith.constant 0 : index
    %171 = vector.load %arg8[%c4_179, %c0_180, %c0_181] : memref<9x8x32xf32, #tpu.memory_space<vmem>>, vector<1x8x32xf32>
    %172 = vector.shape_cast %171 : vector<1x8x32xf32> to vector<8x32xf32>
    %cst_182 = arith.constant dense<0.000000e+00> : vector<8x128xf32>
    %173 = tpu.matmul %172, %138, %cst_182 {dimension_numbers = #tpu.dot_dimension_numbers<[1], [0], [0], [1], [0, 0, 1, 1], [], []>} : vector<8x32xf32>, vector<32x128xf32>, vector<8x128xf32> -> vector<8x128xf32>
    %c4_183 = arith.constant 4 : index
    %c0_184 = arith.constant 0 : index
    %c0_185 = arith.constant 0 : index
    %174 = vector.load %arg9[%c4_183, %c0_184, %c0_185] : memref<9x128x128xf32, #tpu.memory_space<vmem>>, vector<1x128x128xf32>
    %175 = vector.shape_cast %174 : vector<1x128x128xf32> to vector<128x128xf32>
    %cst_186 = arith.constant dense<0.000000e+00> : vector<8x128xf32>
    %176 = tpu.matmul %173, %175, %cst_186 {dimension_numbers = #tpu.dot_dimension_numbers<[1], [0], [0], [1], [0, 0, 1, 1], [], []>} : vector<8x128xf32>, vector<128x128xf32>, vector<8x128xf32> -> vector<8x128xf32>
    %177 = arith.addf %170, %176 : vector<8x128xf32>
    %c5_187 = arith.constant 5 : index
    %c0_188 = arith.constant 0 : index
    %c0_189 = arith.constant 0 : index
    %178 = vector.load %arg8[%c5_187, %c0_188, %c0_189] : memref<9x8x32xf32, #tpu.memory_space<vmem>>, vector<1x8x32xf32>
    %179 = vector.shape_cast %178 : vector<1x8x32xf32> to vector<8x32xf32>
    %cst_190 = arith.constant dense<0.000000e+00> : vector<8x128xf32>
    %180 = tpu.matmul %179, %138, %cst_190 {dimension_numbers = #tpu.dot_dimension_numbers<[1], [0], [0], [1], [0, 0, 1, 1], [], []>} : vector<8x32xf32>, vector<32x128xf32>, vector<8x128xf32> -> vector<8x128xf32>
    %c5_191 = arith.constant 5 : index
    %c0_192 = arith.constant 0 : index
    %c0_193 = arith.constant 0 : index
    %181 = vector.load %arg9[%c5_191, %c0_192, %c0_193] : memref<9x128x128xf32, #tpu.memory_space<vmem>>, vector<1x128x128xf32>
    %182 = vector.shape_cast %181 : vector<1x128x128xf32> to vector<128x128xf32>
    %cst_194 = arith.constant dense<0.000000e+00> : vector<8x128xf32>
    %183 = tpu.matmul %180, %182, %cst_194 {dimension_numbers = #tpu.dot_dimension_numbers<[1], [0], [0], [1], [0, 0, 1, 1], [], []>} : vector<8x128xf32>, vector<128x128xf32>, vector<8x128xf32> -> vector<8x128xf32>
    %184 = arith.addf %177, %183 : vector<8x128xf32>
    %c6_195 = arith.constant 6 : index
    %c0_196 = arith.constant 0 : index
    %c0_197 = arith.constant 0 : index
    %185 = vector.load %arg8[%c6_195, %c0_196, %c0_197] : memref<9x8x32xf32, #tpu.memory_space<vmem>>, vector<1x8x32xf32>
    %186 = vector.shape_cast %185 : vector<1x8x32xf32> to vector<8x32xf32>
    %cst_198 = arith.constant dense<0.000000e+00> : vector<8x128xf32>
    %187 = tpu.matmul %186, %138, %cst_198 {dimension_numbers = #tpu.dot_dimension_numbers<[1], [0], [0], [1], [0, 0, 1, 1], [], []>} : vector<8x32xf32>, vector<32x128xf32>, vector<8x128xf32> -> vector<8x128xf32>
    %c6_199 = arith.constant 6 : index
    %c0_200 = arith.constant 0 : index
    %c0_201 = arith.constant 0 : index
    %188 = vector.load %arg9[%c6_199, %c0_200, %c0_201] : memref<9x128x128xf32, #tpu.memory_space<vmem>>, vector<1x128x128xf32>
    %189 = vector.shape_cast %188 : vector<1x128x128xf32> to vector<128x128xf32>
    %cst_202 = arith.constant dense<0.000000e+00> : vector<8x128xf32>
    %190 = tpu.matmul %187, %189, %cst_202 {dimension_numbers = #tpu.dot_dimension_numbers<[1], [0], [0], [1], [0, 0, 1, 1], [], []>} : vector<8x128xf32>, vector<128x128xf32>, vector<8x128xf32> -> vector<8x128xf32>
    %191 = arith.addf %184, %190 : vector<8x128xf32>
    %c7_203 = arith.constant 7 : index
    %c0_204 = arith.constant 0 : index
    %c0_205 = arith.constant 0 : index
    %192 = vector.load %arg8[%c7_203, %c0_204, %c0_205] : memref<9x8x32xf32, #tpu.memory_space<vmem>>, vector<1x8x32xf32>
    %193 = vector.shape_cast %192 : vector<1x8x32xf32> to vector<8x32xf32>
    %cst_206 = arith.constant dense<0.000000e+00> : vector<8x128xf32>
    %194 = tpu.matmul %193, %138, %cst_206 {dimension_numbers = #tpu.dot_dimension_numbers<[1], [0], [0], [1], [0, 0, 1, 1], [], []>} : vector<8x32xf32>, vector<32x128xf32>, vector<8x128xf32> -> vector<8x128xf32>
    %c7_207 = arith.constant 7 : index
    %c0_208 = arith.constant 0 : index
    %c0_209 = arith.constant 0 : index
    %195 = vector.load %arg9[%c7_207, %c0_208, %c0_209] : memref<9x128x128xf32, #tpu.memory_space<vmem>>, vector<1x128x128xf32>
    %196 = vector.shape_cast %195 : vector<1x128x128xf32> to vector<128x128xf32>
    %cst_210 = arith.constant dense<0.000000e+00> : vector<8x128xf32>
    %197 = tpu.matmul %194, %196, %cst_210 {dimension_numbers = #tpu.dot_dimension_numbers<[1], [0], [0], [1], [0, 0, 1, 1], [], []>} : vector<8x128xf32>, vector<128x128xf32>, vector<8x128xf32> -> vector<8x128xf32>
    %198 = arith.addf %191, %197 : vector<8x128xf32>
    %c8_211 = arith.constant 8 : index
    %c0_212 = arith.constant 0 : index
    %c0_213 = arith.constant 0 : index
    %199 = vector.load %arg8[%c8_211, %c0_212, %c0_213] : memref<9x8x32xf32, #tpu.memory_space<vmem>>, vector<1x8x32xf32>
    %200 = vector.shape_cast %199 : vector<1x8x32xf32> to vector<8x32xf32>
    %cst_214 = arith.constant dense<0.000000e+00> : vector<8x128xf32>
    %201 = tpu.matmul %200, %138, %cst_214 {dimension_numbers = #tpu.dot_dimension_numbers<[1], [0], [0], [1], [0, 0, 1, 1], [], []>} : vector<8x32xf32>, vector<32x128xf32>, vector<8x128xf32> -> vector<8x128xf32>
    %c8_215 = arith.constant 8 : index
    %c0_216 = arith.constant 0 : index
    %c0_217 = arith.constant 0 : index
    %202 = vector.load %arg9[%c8_215, %c0_216, %c0_217] : memref<9x128x128xf32, #tpu.memory_space<vmem>>, vector<1x128x128xf32>
    %203 = vector.shape_cast %202 : vector<1x128x128xf32> to vector<128x128xf32>
    %cst_218 = arith.constant dense<0.000000e+00> : vector<8x128xf32>
    %204 = tpu.matmul %201, %203, %cst_218 {dimension_numbers = #tpu.dot_dimension_numbers<[1], [0], [0], [1], [0, 0, 1, 1], [], []>} : vector<8x128xf32>, vector<128x128xf32>, vector<8x128xf32> -> vector<8x128xf32>
    %205 = arith.addf %198, %204 : vector<8x128xf32>
    %cst_219 = arith.constant 0.000000e+00 : f32
    %206 = vector.broadcast %cst_219 : f32 to vector<8x128xf32>
    %207 = arith.maximumf %205, %206 : vector<8x128xf32>
    %c0_220 = arith.constant 0 : index
    %c0_221 = arith.constant 0 : index
    %208 = vector.load %arg11[%c0_220, %c0_221] : memref<8x128xf32, #tpu.memory_space<vmem>>, vector<8x128xf32>
    tpu.vector_store %arg11[%c0_220, %c0_221], %207 {strides = array<i32>} : memref<8x128xf32, #tpu.memory_space<vmem>>, vector<8x128xf32>,
    return
  }
  func.func @transform_0(%arg0: i32) -> (i32, i32) {
    %c0_i32 = arith.constant 0 : i32
    %c0_i32_0 = arith.constant 0 : i32
    %c0_i32_1 = arith.constant 0 : i32
    return %c0_i32, %c0_i32_0 : i32, i32
  }
  func.func @transform_1(%arg0: i32) -> (i32, i32, i32) {
    %c0_i32 = arith.constant 0 : i32
    %c0_i32_0 = arith.constant 0 : i32
    %c0_i32_1 = arith.constant 0 : i32
    %c0_i32_2 = arith.constant 0 : i32
    return %c0_i32, %c0_i32_0, %c0_i32_1 : i32, i32, i32
  }
  func.func @transform_2(%arg0: i32) -> (i32, i32, i32) {
    %c0_i32 = arith.constant 0 : i32
    %c0_i32_0 = arith.constant 0 : i32
    %c0_i32_1 = arith.constant 0 : i32
    %c0_i32_2 = arith.constant 0 : i32
    return %c0_i32, %c0_i32_0, %c0_i32_1 : i32, i32, i32
  }
  func.func @transform_3(%arg0: i32) -> (i32, i32) {
    %c0_i32 = arith.constant 0 : i32
    %c0_i32_0 = arith.constant 0 : i32
    %c0_i32_1 = arith.constant 0 : i32
    return %c0_i32, %c0_i32_0 : i32, i32
  }
  func.func @transform_4(%arg0: i32) -> (i32, i32, i32) {
    %c0_i32 = arith.constant 0 : i32
    %c0_i32_0 = arith.constant 0 : i32
    %c0_i32_1 = arith.constant 0 : i32
    %c0_i32_2 = arith.constant 0 : i32
    return %c0_i32, %c0_i32_0, %c0_i32_1 : i32, i32, i32
  }
  func.func @transform_5(%arg0: i32) -> (i32, i32, i32) {
    %c0_i32 = arith.constant 0 : i32
    %c0_i32_0 = arith.constant 0 : i32
    %c0_i32_1 = arith.constant 0 : i32
    %c0_i32_2 = arith.constant 0 : i32
    return %c0_i32, %c0_i32_0, %c0_i32_1 : i32, i32, i32
  }
  func.func @transform_6(%arg0: i32) -> (i32, i32) {
    %c0_i32 = arith.constant 0 : i32
    %c0_i32_0 = arith.constant 0 : i32
    %c0_i32_1 = arith.constant 0 : i32
    return %c0_i32, %c0_i32_0 : i32, i32
  }
  func.func @transform_7(%arg0: i32) -> (i32, i32, i32) {
    %c0_i32 = arith.constant 0 : i32
    %c0_i32_0 = arith.constant 0 : i32
    %c0_i32_1 = arith.constant 0 : i32
    %c0_i32_2 = arith.constant 0 : i32
    return %c0_i32, %c0_i32_0, %c0_i32_1 : i32, i32, i32
  }
  func.func @transform_8(%arg0: i32) -> (i32, i32, i32) {
    %c0_i32 = arith.constant 0 : i32
    %c0_i32_0 = arith.constant 0 : i32
    %c0_i32_1 = arith.constant 0 : i32
    %c0_i32_2 = arith.constant 0 : i32
    return %c0_i32, %c0_i32_0, %c0_i32_1 : i32, i32, i32
  }
  func.func @transform_9(%arg0: i32) -> (i32, i32) {
    %c0_i32 = arith.constant 0 : i32
    %c0_i32_0 = arith.constant 0 : i32
    %c0_i32_1 = arith.constant 0 : i32
    return %c0_i32, %c0_i32_0 : i32, i32
  }
  func.func @transform_10(%arg0: i32) -> (i32, i32) {
    %c0_i32 = arith.constant 0 : i32
    %c0_i32_0 = arith.constant 0 : i32
    %c0_i32_1 = arith.constant 0 : i32
    return %c0_i32, %c0_i32_0 : i32, i32
  }
}

</mosaic_0001>

<bundles_post_ra>
// kernel: encoder_forward_pallas.1
= control target key start
LH: loop header
LB: loop body
LE: loop exit
PB: predicated region body
PF: predicated region fallthrough
CT: control target
= control target key end

     0   :  { %15 = vsyncpa [#allocation3], 0  ;;  %s15835_s0 = inlined_call_operand.hbm [shape: f32[512,16], index: 0, kind: input, shape index: {}]   ;;  %s15836_s1 = inlined_call_operand.hbm [shape: f32[9,128,512], index: 1, kind: input, shape index: {}]   ;;  %s15837_s2 = inlined_call_operand.hbm [shape: f32[9,16,128], index: 2, kind: input, shape index: {}]   ;;  %s15838_s3 = inlined_call_operand.hbm [shape: f32[1,128], index: 3, kind: input, shape index: {}]   ;;  %s15839_s4 = inlined_call_operand.hbm [shape: f32[9,32,128], index: 4, kind: input, shape index: {}]   ;;  %s15840_s5 = inlined_call_operand.hbm [shape: f32[9,128,128], index: 5, kind: input, shape index: {}]   ;;  %s15841_s6 = inlined_call_operand.hbm [shape: f32[1,128], index: 6, kind: input, shape index: {}]   ;;  %s15842_s7 = inlined_call_operand.hbm [shape: f32[9,8,32], index: 7, kind: input, shape index: {}]   ;;  %s15843_s8 = inlined_call_operand.hbm [shape: f32[9,128,128], index: 8, kind: input, shape index: {}]   ;;  %s15844_s9 = inlined_call_operand.hbm [shape: f32[1,128], index: 9, kind: input, shape index: {}]   ;;  %s15845_s10 = inlined_call_operand.vmem [shape: f32[8,128], index: 10, kind: output, shape index: {}]  }
   0x1   :  { %16 = vsyncpa [#allocation5], 0 }
   0x2   :  { %17 = vsyncpa [#allocation8], 0 }
   0x3   :  { %18 = vsyncpa [#allocation11], 0 }
   0x4   :  { %19 = vsyncpa [#allocation14], 0 }
   0x5   :  { %20 = vsyncpa [#allocation17], 0  ;;  %s14217_s13 = smov [#allocation4]   ;;  %s13985_s17 = scalar_lea.hbm %s15836_s1, 73728 }
   0x6   :  { %s38_s14 = sshll.u32 %s14217_s13, 4  ;;  %p13986_p0 = scmp.ne.s32.totalorder %s15836_s1, %s13985_s17  ;;  %s39_s14 = int_to_ptr.vmem [resolvable:$true] %s38_s14 }
   0x7   :  { %p13989_p1 = scmp.lt.u32.totalorder %s13985_s17, %s15836_s1 }
   0x9   :  { %p13991_p2 = pnand %p13989_p1, %p13986_p0 }
   0xb   :  { %13994 = shalt.err (!%p13991_p2)
}
   0xc   :  { %s13995_s22 = scalar_lea.vmem %s39_s14, 73728  ;;  %p14000_p4 = scmp.lt.s32.totalorder %s39_s14, %s39_s14 }
   0xd   :  { %p13996_p3 = scmp.ne.s32.totalorder %s39_s14, %s13995_s22  ;;  %p14001_p5 = scmp.lt.s32.totalorder %s13995_s22, %s13995_s22 }
   0xf   :  { %p14002_p6 = por %p14001_p5, %p14000_p4 }
  0x11   :  { %p14003_p7 = pnand %p14002_p6, %p13996_p3 }
  0x13   :  { %14006 = shalt.err (!%p14003_p7)
}
  0x14   :  { %s14218_s23 = smov 512   ;;  %s14219_s24 = smov 32  }
  0x15   :  { %44 = dma.hbm_to_vmem [thread:$0]  %s15836_s1, 73728, %s39_s14, [#allocation5], %s14218_s23, %s14218_s23, %s14219_s24  }
  0x16   :  { %s14220_s27 = smov [#allocation7]   ;;  %s14007_s11 = scalar_lea.hbm %s15838_s3, 16 }
  0x17   :  { %s63_s28 = sshll.u32 %s14220_s27, 4  ;;  %p14008_p8 = scmp.ne.s32.totalorder %s15838_s3, %s14007_s11  ;;  %s64_s28 = int_to_ptr.vmem [resolvable:$true] %s63_s28 }
  0x18   :  { %p14011_p9 = scmp.lt.u32.totalorder %s14007_s11, %s15838_s3 }
  0x1a   :  { %p14013_p10 = pnand %p14011_p9, %p14008_p8 }
  0x1c   :  { %14016 = shalt.err (!%p14013_p10)
}
  0x1d   :  { %s14017_s17 = scalar_lea.vmem %s64_s28, 16  ;;  %s14021_s1 = scalar_lea.vmem %s64_s28, 32 }
  0x1e   :  { %p14018_p11 = scmp.ne.s32.totalorder %s64_s28, %s14017_s17  ;;  %p14022_p12 = scmp.lt.s32.totalorder %s64_s28, %s64_s28 }
  0x1f   :  { %p14023_p13 = scmp.lt.s32.totalorder %s14021_s1, %s14017_s17 }
  0x21   :  { %p14024_p0 = por %p14023_p13, %p14022_p12 }
  0x23   :  { %p14025_p1 = pnand %p14024_p0, %p14018_p11 }
  0x25   :  { %14028 = shalt.err (!%p14025_p1)
}
  0x26   :  { %66 = dma.hbm_to_vmem [thread:$0]  %s15838_s3, 16, %s64_s28, [#allocation8]  }
  0x27   :  { %s14221_s19 = smov [#allocation10]   ;;  %s14222_s21 = smov [#allocation13]  }
  0x28   :  { %s84_s20 = sshll.u32 %s14221_s19, 4  ;;  %s106_s22 = sshll.u32 %s14222_s21, 4  ;;  %s85_s20 = int_to_ptr.vmem [resolvable:$true] %s84_s20  ;;  %s14313_s22 = int_to_ptr.vmem [resolvable:$true] %s106_s22 }
  0x29   :  { %s14029_s25 = scalar_lea.hbm %s15840_s5, 18432 }
  0x2a   :  { %p14030_p2 = scmp.ne.s32.totalorder %s15840_s5, %s14029_s25  ;;  %p14033_p3 = scmp.lt.u32.totalorder %s14029_s25, %s15840_s5 }
  0x2c   :  { %p14035_p4 = pnand %p14033_p3, %p14030_p2 }
  0x2e   :  { %14038 = shalt.err (!%p14035_p4)
}
  0x2f   :  { %s14039_s3 = scalar_lea.vmem %s85_s20, 18432  ;;  %p14044_p6 = scmp.lt.s32.totalorder %s85_s20, %s85_s20 }
  0x30   :  { %p14040_p5 = scmp.ne.s32.totalorder %s85_s20, %s14039_s3  ;;  %p14045_p7 = scmp.lt.s32.totalorder %s14039_s3, %s14039_s3 }
  0x32   :  { %p14046_p8 = por %p14045_p7, %p14044_p6 }
  0x34   :  { %p14047_p9 = pnand %p14046_p8, %p14040_p5 }
  0x36   :  { %14050 = shalt.err (!%p14047_p9)
}
  0x37   :  { %s14223_s28 = smov 128   ;;  %s14224_s11 = smov 8  }
  0x38   :  { %90 = dma.hbm_to_vmem [thread:$0]  %s15840_s5, 18432, %s85_s20, [#allocation11], %s14223_s28, %s14223_s28, %s14224_s11  }
  0x39   :  { %s14051_s17 = scalar_lea.hbm %s15842_s7, 1152 }
  0x3a   :  { %p14052_p10 = scmp.ne.s32.totalorder %s15842_s7, %s14051_s17  ;;  %p14055_p11 = scmp.lt.u32.totalorder %s14051_s17, %s15842_s7 }
  0x3c   :  { %p14057_p12 = pnand %p14055_p11, %p14052_p10 }
  0x3e   :  { %14060 = shalt.err (!%p14057_p12)
}
  0x3f   :  { %s14061_s21 = scalar_lea.vmem %s14313_s22, 1152  ;;  %p14066_p0 = scmp.lt.s32.totalorder %s14313_s22, %s14313_s22 }
  0x40   :  { %p14062_p13 = scmp.ne.s32.totalorder %s14313_s22, %s14061_s21  ;;  %p14067_p1 = scmp.lt.s32.totalorder %s14061_s21, %s14061_s21 }
  0x42   :  { %p14068_p2 = por %p14067_p1, %p14066_p0 }
  0x44   :  { %p14069_p3 = pnand %p14068_p2, %p14062_p13 }
  0x46   :  { %14072 = shalt.err (!%p14069_p3)
}
  0x47   :  { %112 = dma.hbm_to_vmem [thread:$0]  %s15842_s7, 1152, %s14313_s22, [#allocation14], %s14223_s28, %s14223_s28, %s14224_s11  }
  0x48   :  { %s14225_s23 = smov [#allocation2]   ;;  %s14226_s25 = smov [#allocation6]  }
  0x49   :  { %s26_s24 = sshll.u32 %s14225_s23, 4  ;;  %s50_s26 = sshll.u32 %s14226_s25, 4  ;;  %s27_s24 = int_to_ptr.vmem [resolvable:$true] %s26_s24  ;;  %s14350_s26 = int_to_ptr.vmem [resolvable:$true] %s50_s26 }
  0x4a   :  { %s14073_s30 = scalar_lea.hbm %s15835_s0, 8192 }
  0x4b   :  { %p14074_p4 = scmp.ne.s32.totalorder %s15835_s0, %s14073_s30  ;;  %p14077_p5 = scmp.lt.u32.totalorder %s14073_s30, %s15835_s0 }
  0x4d   :  { %p14079_p6 = pnand %p14077_p5, %p14074_p4 }
  0x4f   :  { %14082 = shalt.err (!%p14079_p6)
}
  0x50   :  { %s14083_s7 = scalar_lea.vmem %s27_s24, 8192  ;;  %p14088_p8 = scmp.lt.s32.totalorder %s27_s24, %s27_s24 }
  0x51   :  { %p14084_p7 = scmp.ne.s32.totalorder %s27_s24, %s14083_s7  ;;  %p14089_p9 = scmp.lt.s32.totalorder %s14083_s7, %s14083_s7 }
  0x53   :  { %p14090_p10 = por %p14089_p9, %p14088_p8 }
  0x55   :  { %p14091_p11 = pnand %p14090_p10, %p14084_p7 }
  0x57   :  { %14094 = shalt.err (!%p14091_p11)
}
  0x58   :  { %32 = dma.hbm_to_vmem [thread:$0]  %s15835_s0, 8192, %s27_s24, [#allocation3], %s14223_s28, %s14223_s28, %s14224_s11  }
  0x59   :  { %s14095_s14 = scalar_lea.hbm %s15837_s2, 2304 }
  0x5a   :  { %p14096_p12 = scmp.ne.s32.totalorder %s15837_s2, %s14095_s14  ;;  %p14099_p13 = scmp.lt.u32.totalorder %s14095_s14, %s15837_s2 }
  0x5c   :  { %p14101_p0 = pnand %p14099_p13, %p14096_p12 }
  0x5e   :  { %14104 = shalt.err (!%p14101_p0)
}
  0x5f   :  { %s14105_s20 = scalar_lea.vmem %s14350_s26, 2304  ;;  %p14110_p2 = scmp.lt.s32.totalorder %s14350_s26, %s14350_s26 }
  0x60   :  { %p14106_p1 = scmp.ne.s32.totalorder %s14350_s26, %s14105_s20  ;;  %p14111_p3 = scmp.lt.s32.totalorder %s14105_s20, %s14105_s20 }
  0x62   :  { %p14112_p4 = por %p14111_p3, %p14110_p2 }
  0x64   :  { %p14113_p5 = pnand %p14112_p4, %p14106_p1 }
  0x66   :  { %14116 = shalt.err (!%p14113_p5)
}
  0x67   :  { %56 = dma.hbm_to_vmem [thread:$0]  %s15837_s2, 2304, %s14350_s26, [#allocation5], %s14223_s28, %s14223_s28, %s14224_s11  }
  0x68   :  { %s14227_s24 = smov [#allocation9]   ;;  %s14228_s27 = smov [#allocation12]  }
  0x69   :  { %s72_s25 = sshll.u32 %s14227_s24, 4  ;;  %s97_s29 = sshll.u32 %s14228_s27, 4  ;;  %s73_s25 = int_to_ptr.vmem [resolvable:$true] %s72_s25  ;;  %s98_s29 = int_to_ptr.vmem [resolvable:$true] %s97_s29 }
  0x6a   :  { %s14117_s12 = scalar_lea.hbm %s15839_s4, 4608 }
  0x6b   :  { %p14118_p6 = scmp.ne.s32.totalorder %s15839_s4, %s14117_s12  ;;  %p14121_p7 = scmp.lt.u32.totalorder %s14117_s12, %s15839_s4 }
  0x6d   :  { %p14123_p8 = pnand %p14121_p7, %p14118_p6 }
  0x6f   :  { %14126 = shalt.err (!%p14123_p8)
}
  0x70   :  { %s14127_s2 = scalar_lea.vmem %s73_s25, 4608  ;;  %p14132_p10 = scmp.lt.s32.totalorder %s73_s25, %s73_s25 }
  0x71   :  { %p14128_p9 = scmp.ne.s32.totalorder %s73_s25, %s14127_s2  ;;  %p14133_p11 = scmp.lt.s32.totalorder %s14127_s2, %s14127_s2 }
  0x73   :  { %p14134_p12 = por %p14133_p11, %p14132_p10 }
  0x75   :  { %p14135_p13 = pnand %p14134_p12, %p14128_p9 }
  0x77   :  { %14138 = shalt.err (!%p14135_p13)
}
  0x78   :  { %78 = dma.hbm_to_vmem [thread:$0]  %s15839_s4, 4608, %s73_s25, [#allocation8], %s14223_s28, %s14223_s28, %s14224_s11  }
  0x79   :  { %s14139_s14 = scalar_lea.hbm %s15841_s6, 16 }
  0x7a   :  { %p14140_p0 = scmp.ne.s32.totalorder %s15841_s6, %s14139_s14  ;;  %p14143_p1 = scmp.lt.u32.totalorder %s14139_s14, %s15841_s6 }
  0x7c   :  { %p14145_p2 = pnand %p14143_p1, %p14140_p0 }
  0x7e   :  { %14148 = shalt.err (!%p14145_p2)
}
  0x7f   :  { %s14149_s20 = scalar_lea.vmem %s98_s29, 16  ;;  %s14153_s0 = scalar_lea.vmem %s98_s29, 32 }
  0x80   :  { %p14150_p3 = scmp.ne.s32.totalorder %s98_s29, %s14149_s20  ;;  %p14154_p4 = scmp.lt.s32.totalorder %s98_s29, %s98_s29 }
  0x81   :  { %p14155_p5 = scmp.lt.s32.totalorder %s14153_s0, %s14149_s20 }
  0x83   :  { %p14156_p6 = por %p14155_p5, %p14154_p4 }
  0x85   :  { %p14157_p7 = pnand %p14156_p6, %p14150_p3 }
  0x87   :  { %14160 = shalt.err (!%p14157_p7)
}
  0x88   :  { %100 = dma.hbm_to_vmem [thread:$0]  %s15841_s6, 16, %s98_s29, [#allocation11]  }
  0x89   :  { %s14229_s24 = smov [#allocation15]   ;;  %s14230_s27 = smov [#allocation16]  }
  0x8a   :  { %s118_s25 = sshll.u32 %s14229_s24, 4  ;;  %s131_s30 = sshll.u32 %s14230_s27, 4  ;;  %s119_s25 = int_to_ptr.vmem [resolvable:$true] %s118_s25  ;;  %s132_s30 = int_to_ptr.vmem [resolvable:$true] %s131_s30 }
  0x8b   :  { %s14161_s13 = scalar_lea.hbm %s15843_s8, 18432 }
  0x8c   :  { %p14162_p8 = scmp.ne.s32.totalorder %s15843_s8, %s14161_s13  ;;  %p14165_p9 = scmp.lt.u32.totalorder %s14161_s13, %s15843_s8 }
  0x8e   :  { %p14167_p10 = pnand %p14165_p9, %p14162_p8 }
  0x90   :  { %14170 = shalt.err (!%p14167_p10)
}
  0x91   :  { %s14171_s6 = scalar_lea.vmem %s119_s25, 18432  ;;  %p14176_p12 = scmp.lt.s32.totalorder %s119_s25, %s119_s25 }
  0x92   :  { %p14172_p11 = scmp.ne.s32.totalorder %s119_s25, %s14171_s6  ;;  %p14177_p13 = scmp.lt.s32.totalorder %s14171_s6, %s14171_s6 }
  0x94   :  { %p14178_p0 = por %p14177_p13, %p14176_p12 }
  0x96   :  { %p14179_p1 = pnand %p14178_p0, %p14172_p11 }
  0x98   :  { %14182 = shalt.err (!%p14179_p1)
}
  0x99   :  { %124 = dma.hbm_to_vmem [thread:$0]  %s15843_s8, 18432, %s119_s25, [#allocation14], %s14223_s28, %s14223_s28, %s14224_s11  }
  0x9a   :  { %s14183_s1 = scalar_lea.hbm %s15844_s9, 16 }
  0x9b   :  { %p14184_p2 = scmp.ne.s32.totalorder %s15844_s9, %s14183_s1  ;;  %p14187_p3 = scmp.lt.u32.totalorder %s14183_s1, %s15844_s9 }
  0x9d   :  { %p14189_p4 = pnand %p14187_p3, %p14184_p2 }
  0x9f   :  { %14192 = shalt.err (!%p14189_p4)
}
  0xa0   :  { %s14193_s5 = scalar_lea.vmem %s132_s30, 16  ;;  %s14197_s20 = scalar_lea.vmem %s132_s30, 32 }
  0xa1   :  { %p14194_p5 = scmp.ne.s32.totalorder %s132_s30, %s14193_s5  ;;  %p14198_p6 = scmp.lt.s32.totalorder %s132_s30, %s132_s30 }
  0xa2   :  { %p14199_p7 = scmp.lt.s32.totalorder %s14197_s20, %s14193_s5 }
  0xa4   :  { %p14200_p8 = por %p14199_p7, %p14198_p6 }
  0xa6   :  { %p14201_p9 = pnand %p14200_p8, %p14194_p5 }
  0xa8   :  { %14204 = shalt.err (!%p14201_p9)
}
  0xa9   :  { %134 = dma.hbm_to_vmem [thread:$0]  %s15844_s9, 16, %s132_s30, [#allocation17]  }
  0xaa   :  { %14205 = dma.done.wait [#allocation3], 8192  }
  0xab   :  { %14206 = vsyncadd [#allocation3], 4294959104 }
  0xac   :  { %14207 = dma.done.wait [#allocation5], 76032  }
  0xad   :  { %14208 = vsyncadd [#allocation5], 4294891264 }
  0xae   :  { %14209 = dma.done.wait [#allocation8], 4624  }
  0xaf   :  { %14210 = vsyncadd [#allocation8], 4294962672 }
  0xb0   :  { %14211 = dma.done.wait [#allocation11], 18448  }
  0xb1   :  { %14212 = vsyncadd [#allocation11], 4294948848 }
  0xb2   :  { %14213 = dma.done.wait [#allocation14], 19584  }
  0xb3   :  { %14214 = vsyncadd [#allocation14], 4294947712 }
  0xb4   :  { %14215 = dma.done.wait [#allocation17], 16  }
  0xb5   :  { %14216 = vsyncadd [#allocation17], 4294967280  ;;  %v181_v0 = vld [vmem:[#allocation2 + $0x80] sm:$0xff]  ;;  %v182_v1 = vld [vmem:[#allocation2 + $0x88] sm:$0xff]  ;;  %vm593_vm0 = vcmask 130048   ;;  %vm14232_vm1 = vmmov 0  }
  0xb6   :  { %v165_v2 = vld [vmem:[#allocation2] sm:$0xff]  ;;  %v14441_v3 = vpack.c.bf16 %v182_v1, %v181_v0  ;;  %v166_v4 = vld [vmem:[#allocation2 + $0x8] sm:$0xff]  ;;  %v183_v5 = vld [vmem:[#allocation2 + $0x90] sm:$0xff]  ;;  %vm7138_vm2 = vcmask 261120  }
  0xb7   :  { %v184_v6 = vld [vmem:[#allocation2 + $0x98] sm:$0xff]  ;;  %v14443_v7 = vpack.c.bf16 %v166_v4, %v165_v2  ;;  %v167_v9 = vld [vmem:[#allocation2 + $0x10] sm:$0xff]  ;;  %v185_v11 = vld [vmem:[#allocation2 + $0xa0] sm:$0xff] }
  0xb8   :  { %v14445_v8 = vpack.c.bf16 %v184_v6, %v183_v5  ;;  %v168_v10 = vld [vmem:[#allocation2 + $0x18] sm:$0xff]  ;;  %12282 = vmatprep.subr.bf16.mxu0 %v14441_v3  ;;  %v186_v12 = vld [vmem:[#allocation2 + $0xa8] sm:$0xff]  ;;  %13739 = vmatprep.subr.bf16.mxu1 %v14441_v3  ;;  %v169_v15 = vld [vmem:[#allocation2 + $0x20] sm:$0xff] }
  0xb9   :  { %12284 = vmatpush3.bf16.msra.mxu0 %v14443_v7  ;;  %v14450_v13 = vpack.c.bf16 %v168_v10, %v167_v9  ;;  %13747 = vmatpush3.bf16.msra.mxu1 %v14443_v7  ;;  %v14454_v14 = vpack.c.bf16 %v186_v12, %v185_v11  ;;  %v170_v16 = vld [vmem:[#allocation2 + $0x28] sm:$0xff]  ;;  %v187_v17 = vld [vmem:[#allocation2 + $0xb0] sm:$0xff]  ;;  %v188_v18 = vld [vmem:[#allocation2 + $0xb8] sm:$0xff] }
  0xba   :  { %12286 = vmatprep.subr.bf16.mxu0 %v14445_v8  ;;  %13740 = vmatprep.subr.bf16.mxu1 %v14445_v8  ;;  %v14458_v19 = vpack.c.bf16 %v170_v16, %v169_v15  ;;  %v14462_v20 = vpack.c.bf16 %v188_v18, %v187_v17  ;;  %v171_v21 = vld [vmem:[#allocation2 + $0x30] sm:$0xff]  ;;  %v172_v22 = vld [vmem:[#allocation2 + $0x38] sm:$0xff]  ;;  %v189_v23 = vld [vmem:[#allocation2 + $0xc0] sm:$0xff] }
  0xbb   :  { %v190_v24 = vld [vmem:[#allocation2 + $0xc8] sm:$0xff]  ;;  %v14466_v26 = vpack.c.bf16 %v172_v22, %v171_v21  ;;  %v173_v28 = vld [vmem:[#allocation2 + $0x40] sm:$0xff]  ;;  %v191_v30 = vld [vmem:[#allocation2 + $0xd0] sm:$0xff] }
  0xbc   :  { %v238_v25 = vld [vmem:[#allocation4 + $0x8] sm:$0xff]  ;;  %v14470_v27 = vpack.c.bf16 %v190_v24, %v189_v23  ;;  %v192_v31 = vld [vmem:[#allocation2 + $0xd8] sm:$0xff]  ;;  %v175_v34 = vld [vmem:[#allocation2 + $0x50] sm:$0xff] }
  0xbd   :  { %12288 = vmatpush3.bf16.msra.mxu0 %v14450_v13  ;;  %13748 = vmatpush3.bf16.msra.mxu1 %v14450_v13  ;;  %v174_v29 = vld [vmem:[#allocation2 + $0x48] sm:$0xff]  ;;  %v14478_v33 = vpack.c.bf16 %v192_v31, %v191_v30  ;;  %v176_v35 = vld [vmem:[#allocation2 + $0x58] sm:$0xff]  ;;  %v193_v36 = vld [vmem:[#allocation2 + $0xe0] sm:$0xff] }
  0xbe   :  { %12290 = vmatprep.subr.bf16.mxu0 %v14454_v14  ;;  %13741 = vmatprep.subr.bf16.mxu1 %v14454_v14  ;;  %v14474_v32 = vpack.c.bf16 %v174_v29, %v173_v28  ;;  %v194_v37 = vld [vmem:[#allocation2 + $0xe8] sm:$0xff]  ;;  %v14482_v38 = vpack.c.bf16 %v176_v35, %v175_v34  ;;  %v177_v40 = vld [vmem:[#allocation2 + $0x60] sm:$0xff]  ;;  %v195_v42 = vld [vmem:[#allocation2 + $0xf0] sm:$0xff] }
  0xbf   :  { %365 = vmatprep.mubr.f32.mxu0 %v238_v25  ;;  %v14486_v39 = vpack.c.bf16 %v194_v37, %v193_v36  ;;  %v178_v41 = vld [vmem:[#allocation2 + $0x68] sm:$0xff]  ;;  %v196_v43 = vld [vmem:[#allocation2 + $0xf8] sm:$0xff]  ;;  %v179_v46 = vld [vmem:[#allocation2 + $0x70] sm:$0xff] }
  0xc0   :  { %v14490_v44 = vpack.c.bf16 %v178_v41, %v177_v40  ;;  %v14494_v45 = vpack.c.bf16 %v196_v43, %v195_v42  ;;  %v180_v47 = vld [vmem:[#allocation2 + $0x78] sm:$0xff]  ;;  %v213_v48 = vld [vmem:[#allocation2 + $0x180] sm:$0xff]  ;;  %v214_v49 = vld [vmem:[#allocation2 + $0x188] sm:$0xff] }
  0xc1   :  { %12292 = vmatpush3.bf16.msra.mxu0 %v14458_v19  ;;  %13749 = vmatpush3.bf16.msra.mxu1 %v14458_v19  ;;  %v14498_v50 = vpack.c.bf16 %v180_v47, %v179_v46  ;;  %v14502_v51 = vpack.c.bf16 %v214_v49, %v213_v48  ;;  %v197_v52 = vld [vmem:[#allocation2 + $0x100] sm:$0xff]  ;;  %v198_v53 = vld [vmem:[#allocation2 + $0x108] sm:$0xff]  ;;  %v215_v54 = vld [vmem:[#allocation2 + $0x190] sm:$0xff] }
  0xc2   :  { %12294 = vmatprep.subr.bf16.mxu0 %v14462_v20  ;;  %13742 = vmatprep.subr.bf16.mxu1 %v14462_v20  ;;  %v216_v55 = vld [vmem:[#allocation2 + $0x198] sm:$0xff]  ;;  %v237_v56 = vld [vmem:[#allocation4] sm:$0xff]  ;;  %v14506_v57 = vpack.c.bf16 %v198_v53, %v197_v52  ;;  %v242_v58 = vld [vmem:[#allocation4 + $0x28] sm:$0xff] }
  0xc3   :  { %15878 = vst [vmem:[#allocation24_spill] sm:$0xff] %v14502_v51  ;;  %v14510_v59 = vpack.c.bf16 %v216_v55, %v215_v54  ;;  %v199_v60 = vld [vmem:[#allocation2 + $0x110] sm:$0xff]  ;;  %v200_v61 = vld [vmem:[#allocation2 + $0x118] sm:$0xff]  ;;  %v217_v62 = vld [vmem:[#allocation2 + $0x1a0] sm:$0xff] }
  0xc4   :  { %15879 = vst [vmem:[#allocation25_spill] sm:$0xff] %v14506_v57  ;;  %v218_v63 = vld [vmem:[#allocation2 + $0x1a8] sm:$0xff]  ;;  %v241_v0 = vld [vmem:[#allocation4 + $0x20] sm:$0xff]  ;;  %v14514_v1 = vpack.c.bf16 %v200_v61, %v199_v60  ;;  %v219_v9 = vld [vmem:[#allocation2 + $0x1b0] sm:$0xff] }
  0xc5   :  { %12296 = vmatpush3.bf16.msra.mxu0 %v14466_v26  ;;  %13750 = vmatpush3.bf16.msra.mxu1 %v14466_v26  ;;  %15880 = vst [vmem:[#allocation26_spill] sm:$0xff] %v14510_v59  ;;  %v246_v2 = vld [vmem:[#allocation4 + $0x48] sm:$0xff]  ;;  %v14517_v4 = vpack.c.bf16 %v218_v63, %v217_v62  ;;  %v201_v5 = vld [vmem:[#allocation2 + $0x120] sm:$0xff]  ;;  %v220_v10 = vld [vmem:[#allocation2 + $0x1b8] sm:$0xff] }
  0xc6   :  { %12298 = vmatprep.subr.bf16.mxu0 %v14470_v27  ;;  %13743 = vmatprep.subr.bf16.mxu1 %v14470_v27  ;;  %15881 = vst [vmem:[#allocation27_spill] sm:$0xff] %v14514_v1  ;;  %v202_v6 = vld [vmem:[#allocation2 + $0x128] sm:$0xff]  ;;  %v245_v11 = vld [vmem:[#allocation4 + $0x40] sm:$0xff]  ;;  %v14523_v16 = vpack.c.bf16 %v220_v10, %v219_v9  ;;  %v203_v17 = vld [vmem:[#allocation2 + $0x130] sm:$0xff] }
  0xc7   :  { %15882 = vst [vmem:[#allocation28_spill] sm:$0xff] %v14517_v4  ;;  %v14520_v12 = vpack.c.bf16 %v202_v6, %v201_v5  ;;  %v250_v15 = vld [vmem:[#allocation4 + $0x68] sm:$0xff]  ;;  %v204_v18 = vld [vmem:[#allocation2 + $0x138] sm:$0xff]  ;;  %v221_v21 = vld [vmem:[#allocation2 + $0x1c0] sm:$0xff] }
  0xc8   :  { %15884 = vst [vmem:[#allocation30_spill] sm:$0xff] %v14523_v16  ;;  %v222_v22 = vld [vmem:[#allocation2 + $0x1c8] sm:$0xff]  ;;  %v249_v23 = vld [vmem:[#allocation4 + $0x60] sm:$0xff]  ;;  %v14526_v24 = vpack.c.bf16 %v204_v18, %v203_v17  ;;  %v223_v31 = vld [vmem:[#allocation2 + $0x1d0] sm:$0xff] }
  0xc9   :  { %12300 = vmatpush3.bf16.msra.mxu0 %v14474_v32  ;;  %13751 = vmatpush3.bf16.msra.mxu1 %v14474_v32  ;;  %15883 = vst [vmem:[#allocation29_spill] sm:$0xff] %v14520_v12  ;;  %v254_v25 = vld [vmem:[#allocation4 + $0x88] sm:$0xff]  ;;  %v14529_v28 = vpack.c.bf16 %v222_v22, %v221_v21  ;;  %v205_v29 = vld [vmem:[#allocation2 + $0x140] sm:$0xff]  ;;  %v224_v34 = vld [vmem:[#allocation2 + $0x1d8] sm:$0xff] }
  0xca   :  { %12302 = vmatprep.subr.bf16.mxu0 %v14478_v33  ;;  %13744 = vmatprep.subr.bf16.mxu1 %v14478_v33  ;;  %15885 = vst [vmem:[#allocation31_spill] sm:$0xff] %v14526_v24  ;;  %v206_v30 = vld [vmem:[#allocation2 + $0x148] sm:$0xff]  ;;  %v253_v35 = vld [vmem:[#allocation4 + $0x80] sm:$0xff]  ;;  %v14535_v40 = vpack.c.bf16 %v224_v34, %v223_v31  ;;  %v207_v41 = vld [vmem:[#allocation2 + $0x150] sm:$0xff] }
  0xcb   :  { %15886 = vst [vmem:[#allocation32_spill] sm:$0xff] %v14529_v28  ;;  %v14532_v36 = vpack.c.bf16 %v206_v30, %v205_v29  ;;  %v258_v37 = vld [vmem:[#allocation4 + $0xa8] sm:$0xff]  ;;  %v208_v42 = vld [vmem:[#allocation2 + $0x158] sm:$0xff]  ;;  %v225_v43 = vld [vmem:[#allocation2 + $0x1e0] sm:$0xff] }
  0xcc   :  { %15888 = vst [vmem:[#allocation34_spill] sm:$0xff] %v14535_v40  ;;  %v226_v46 = vld [vmem:[#allocation2 + $0x1e8] sm:$0xff]  ;;  %v257_v47 = vld [vmem:[#allocation4 + $0xa0] sm:$0xff]  ;;  %v14538_v48 = vpack.c.bf16 %v208_v42, %v207_v41  ;;  %v227_v55 = vld [vmem:[#allocation2 + $0x1f0] sm:$0xff] }
  0xcd   :  { %12304 = vmatpush3.bf16.msra.mxu0 %v14482_v38  ;;  %13752 = vmatpush3.bf16.msra.mxu1 %v14482_v38  ;;  %15887 = vst [vmem:[#allocation33_spill] sm:$0xff] %v14532_v36  ;;  %v262_v49 = vld [vmem:[#allocation4 + $0xc8] sm:$0xff]  ;;  %v14541_v52 = vpack.c.bf16 %v226_v46, %v225_v43  ;;  %v209_v53 = vld [vmem:[#allocation2 + $0x160] sm:$0xff]  ;;  %v211_v63 = vld [vmem:[#allocation2 + $0x170] sm:$0xff] }
  0xce   :  { %12306 = vmatprep.subr.bf16.mxu0 %v14486_v39  ;;  %13745 = vmatprep.subr.bf16.mxu1 %v14486_v39  ;;  %15889 = vst [vmem:[#allocation35_spill] sm:$0xff] %v14538_v48  ;;  %v210_v54 = vld [vmem:[#allocation2 + $0x168] sm:$0xff]  ;;  %v269_v9 = vld [vmem:[#allocation4 + $0x100] sm:$0xff]  ;;  %v239_v41 = vld [vmem:[#allocation4 + $0x10] sm:$0xff] }
  0xcf   :  { %15890 = vst [vmem:[#allocation36_spill] sm:$0xff] %v14541_v52  ;;  %v14544_v60 = vpack.c.bf16 %v210_v54, %v209_v53  ;;  %v266_v61 = vld [vmem:[#allocation4 + $0xe8] sm:$0xff]  ;;  %v277_v17 = vld [vmem:[#allocation4 + $0x140] sm:$0xff]  ;;  %v244_v42 = vld [vmem:[#allocation4 + $0x38] sm:$0xff] }
  0xd0   :  { %v270_v6 = vld [vmem:[#allocation4 + $0x108] sm:$0xff]  ;;  %v281_v21 = vld [vmem:[#allocation4 + $0x160] sm:$0xff]  ;;  %v243_v43 = vld [vmem:[#allocation4 + $0x30] sm:$0xff] }
  0xd1   :  { %12308 = vmatpush3.bf16.msra.mxu0 %v14490_v44  ;;  %13753 = vmatpush3.bf16.msra.mxu1 %v14490_v44  ;;  %15891 = vst [vmem:[#allocation37_spill] sm:$0xff] %v14544_v60  ;;  %v274_v10 = vld [vmem:[#allocation4 + $0x128] sm:$0xff]  ;;  %v289_v29 = vld [vmem:[#allocation4 + $0x1a0] sm:$0xff]  ;;  %v248_v46 = vld [vmem:[#allocation4 + $0x58] sm:$0xff] }
  0xd2   :  { %12310 = vmatprep.subr.bf16.mxu0 %v14494_v45  ;;  %13746 = vmatprep.subr.bf16.mxu1 %v14494_v45  ;;  %v282_v18 = vld [vmem:[#allocation4 + $0x168] sm:$0xff]  ;;  %v293_v31 = vld [vmem:[#allocation4 + $0x1c0] sm:$0xff]  ;;  %v251_v53 = vld [vmem:[#allocation4 + $0x70] sm:$0xff] }
  0xd3   :  { %v286_v22 = vld [vmem:[#allocation4 + $0x188] sm:$0xff]  ;;  %v256_v54 = vld [vmem:[#allocation4 + $0x98] sm:$0xff] }
  0xd4   :  { %v294_v30 = vld [vmem:[#allocation4 + $0x1c8] sm:$0xff] }
  0xd5   :  { %12312 = vmatpush3.bf16.msra.mxu0 %v14498_v50  ;;  %13754 = vmatpush3.bf16.msra.mxu1 %v14498_v50  ;;  %v298_v34 = vld [vmem:[#allocation4 + $0x1e8] sm:$0xff] }
  0xd6   :  { %12314 = vmatprep.subr.bf16.mxu0 %v14502_v51  ;;  %12418 = vmatprep.subr.bf16.mxu1 %v14441_v3 }
  0xd8   :  { %366 = vmatmul.mubr.f32.vlgmr.msra.gmra.mrb[0].mxu0 %v237_v56  ;;  %v228_v56 = vld [vmem:[#allocation2 + $0x1f8] sm:$0xff] }
  0xd9   :  { %370 = vmatprep.mubr.f32.mxu0 %v242_v58  ;;  %12316 = vmatpush3.bf16.msra.mxu0 %v14506_v57  ;;  %v261_v58 = vld [vmem:[#allocation4 + $0xc0] sm:$0xff]  ;;  %v14547_v62 = vpack.c.bf16 %v228_v56, %v227_v55  ;;  %v255_v55 = vld [vmem:[#allocation4 + $0x90] sm:$0xff]  ;;  %v260_v56 = vld [vmem:[#allocation4 + $0xb8] sm:$0xff] }
  0xda   :  { %12318 = vmatprep.subr.bf16.mxu0 %v14510_v59 }
  0xdb   :  { %15892 = vst [vmem:[#allocation38_spill] sm:$0xff] %v14547_v62 }
  0xdc   :  { %371 = vmatmul.mubr.f32.gmra.mrb[2].mxu0 %v241_v0  ;;  %v212_v0 = vld [vmem:[#allocation2 + $0x178] sm:$0xff] }
  0xdd   :  { %375 = vmatprep.mubr.f32.mxu0 %v246_v2  ;;  %12320 = vmatpush3.bf16.msra.mxu0 %v14514_v1  ;;  %v265_v2 = vld [vmem:[#allocation4 + $0xe0] sm:$0xff]  ;;  %v14550_v5 = vpack.c.bf16 %v212_v0, %v211_v63  ;;  %v263_v63 = vld [vmem:[#allocation4 + $0xd0] sm:$0xff]  ;;  %v268_v0 = vld [vmem:[#allocation4 + $0xf8] sm:$0xff] }
  0xde   :  { %12322 = vmatprep.subr.bf16.mxu0 %v14517_v4 }
  0xdf   :  { %15893 = vst [vmem:[#allocation39_spill] sm:$0xff] %v14550_v5 }
  0xe0   :  { %376 = vmatmul.mubr.f32.gmra.mrb[4].mxu0 %v245_v11  ;;  %v273_v11 = vld [vmem:[#allocation4 + $0x120] sm:$0xff] }
  0xe1   :  { %380 = vmatprep.mubr.f32.mxu0 %v250_v15  ;;  %12324 = vmatpush3.bf16.msra.mxu0 %v14520_v12  ;;  %v278_v15 = vld [vmem:[#allocation4 + $0x148] sm:$0xff] }
  0xe2   :  { %12326 = vmatprep.subr.bf16.mxu0 %v14523_v16 }
  0xe4   :  { %381 = vmatmul.mubr.f32.gmra.mrb[6].mxu0 %v249_v23  ;;  %v285_v23 = vld [vmem:[#allocation4 + $0x180] sm:$0xff] }
  0xe5   :  { %385 = vmatprep.mubr.f32.mxu0 %v254_v25  ;;  %12328 = vmatpush3.bf16.msra.mxu0 %v14526_v24  ;;  %v290_v25 = vld [vmem:[#allocation4 + $0x1a8] sm:$0xff] }
  0xe6   :  { %12330 = vmatprep.subr.bf16.mxu0 %v14529_v28 }
  0xe8   :  { %386 = vmatmul.mubr.f32.gmra.mrb[8].mxu0 %v253_v35  ;;  %v297_v35 = vld [vmem:[#allocation4 + $0x1e0] sm:$0xff] }
  0xe9   :  { %390 = vmatprep.mubr.f32.mxu0 %v258_v37  ;;  %12332 = vmatpush3.bf16.msra.mxu0 %v14532_v36  ;;  %v240_v37 = vld [vmem:[#allocation4 + $0x18] sm:$0xff] }
  0xea   :  { %12334 = vmatprep.subr.bf16.mxu0 %v14535_v40 }
  0xec   :  { %391 = vmatmul.mubr.f32.gmra.mrb[10].mxu0 %v257_v47  ;;  %v247_v47 = vld [vmem:[#allocation4 + $0x50] sm:$0xff] }
  0xed   :  { %395 = vmatprep.mubr.f32.mxu0 %v262_v49  ;;  %12336 = vmatpush3.bf16.msra.mxu0 %v14538_v48  ;;  %v252_v49 = vld [vmem:[#allocation4 + $0x78] sm:$0xff] }
  0xee   :  { %12338 = vmatprep.subr.bf16.mxu0 %v14541_v52 }
  0xf0   :  { %396 = vmatmul.mubr.f32.gmra.mrb[12].mxu0 %v261_v58  ;;  %v259_v58 = vld [vmem:[#allocation4 + $0xb0] sm:$0xff] }
  0xf1   :  { %400 = vmatprep.mubr.f32.mxu0 %v266_v61  ;;  %12340 = vmatpush3.bf16.msra.mxu0 %v14544_v60  ;;  %v264_v61 = vld [vmem:[#allocation4 + $0xd8] sm:$0xff] }
  0xf2   :  { %12342 = vmatprep.subr.bf16.mxu0 %v14547_v62 }
  0xf4   :  { %401 = vmatmul.mubr.f32.gmra.mrb[14].mxu0 %v265_v2  ;;  %v267_v2 = vld [vmem:[#allocation4 + $0xf0] sm:$0xff] }
  0xf5   :  { %405 = vmatprep.mubr.f32.mxu0 %v270_v6  ;;  %12344 = vmatpush3.bf16.msra.mxu0 %v14550_v5  ;;  %v272_v6 = vld [vmem:[#allocation4 + $0x118] sm:$0xff] }
  0xf8   :  { %406 = vmatmul.mubr.f32.gmra.mrb[16].mxu0 %v269_v9  ;;  %v271_v9 = vld [vmem:[#allocation4 + $0x110] sm:$0xff] }
  0xf9   :  { %410 = vmatprep.mubr.f32.mxu0 %v274_v10  ;;  %v276_v10 = vld [vmem:[#allocation4 + $0x138] sm:$0xff] }
  0xfc   :  { %411 = vmatmul.mubr.f32.gmra.mrb[18].mxu0 %v273_v11  ;;  %v275_v11 = vld [vmem:[#allocation4 + $0x130] sm:$0xff] }
  0xfd   :  { %415 = vmatprep.mubr.f32.mxu0 %v278_v15  ;;  %v280_v15 = vld [vmem:[#allocation4 + $0x158] sm:$0xff] }
 0x100   :  { %416 = vmatmul.mubr.f32.gmra.mrb[20].mxu0 %v277_v17  ;;  %v279_v17 = vld [vmem:[#allocation4 + $0x150] sm:$0xff] }
 0x101   :  { %420 = vmatprep.mubr.f32.mxu0 %v282_v18  ;;  %v284_v18 = vld [vmem:[#allocation4 + $0x178] sm:$0xff] }
 0x104   :  { %421 = vmatmul.mubr.f32.gmra.mrb[22].mxu0 %v281_v21  ;;  %v283_v21 = vld [vmem:[#allocation4 + $0x170] sm:$0xff] }
 0x105   :  { %425 = vmatprep.mubr.f32.mxu0 %v286_v22  ;;  %v288_v22 = vld [vmem:[#allocation4 + $0x198] sm:$0xff] }
 0x108   :  { %426 = vmatmul.mubr.f32.gmra.mrb[24].mxu0 %v285_v23  ;;  %v287_v23 = vld [vmem:[#allocation4 + $0x190] sm:$0xff] }
 0x109   :  { %430 = vmatprep.mubr.f32.mxu0 %v290_v25  ;;  %v292_v25 = vld [vmem:[#allocation4 + $0x1b8] sm:$0xff] }
 0x10c   :  { %431 = vmatmul.mubr.f32.gmra.mrb[26].mxu0 %v289_v29  ;;  %v291_v29 = vld [vmem:[#allocation4 + $0x1b0] sm:$0xff] }
 0x10d   :  { %435 = vmatprep.mubr.f32.mxu0 %v294_v30  ;;  %v296_v30 = vld [vmem:[#allocation4 + $0x1d8] sm:$0xff] }
 0x110   :  { %436 = vmatmul.mubr.f32.gmra.mrb[28].mxu0 %v293_v31  ;;  %v295_v31 = vld [vmem:[#allocation4 + $0x1d0] sm:$0xff] }
 0x111   :  { %440 = vmatprep.mubr.f32.mxu0 %v298_v34  ;;  %v300_v34 = vld [vmem:[#allocation4 + $0x1f8] sm:$0xff] }
 0x114   :  { %441 = vmatmul.mubr.f32.gmra.mrb[30].mxu0 %v297_v35  ;;  %v299_v35 = vld [vmem:[#allocation4 + $0x1f0] sm:$0xff] }
 0x115   :  { %510 = vmatprep.mubr.f32.mxu0 %v240_v37  ;;  %v591_v37 = vld [vmem:[#allocation6] sm:$0xff] }
 0x118   :  { %511 = vmatmul.mubr.f32.vlgmr.msra.gmra.mrb[32].mxu0 %v239_v41  ;;  %v592_v41 = vld [vmem:[#allocation6 + $0x8] sm:$0xff] }
 0x119   :  { %515 = vmatprep.mubr.f32.mxu0 %v244_v42  ;;  %v12345_v42 = vpack.c.bf16 %v592_v41, %v591_v37 }
 0x11b   :  { %12346 = vmatprep.subr.bf16.mxu0 %v12345_v42 }
 0x11c   :  { %516 = vmatmul.mubr.f32.gmra.mrb[34].mxu0 %v243_v43 }
 0x11d   :  { %520 = vmatprep.mubr.f32.mxu0 %v248_v46  ;;  %12348 = vmatpush3.bf16.msra.mxu0 %v12345_v42 }
 0x11e   :  { %12350 = vmatprep.subr.bf16.mxu0 %v14441_v3 }
 0x120   :  { %521 = vmatmul.mubr.f32.gmra.mrb[36].mxu0 %v247_v47 }
 0x121   :  { %525 = vmatprep.mubr.f32.mxu0 %v252_v49 }
 0x124   :  { %526 = vmatmul.mubr.f32.gmra.mrb[38].mxu0 %v251_v53 }
 0x125   :  { %530 = vmatprep.mubr.f32.mxu0 %v256_v54 }
 0x128   :  { %531 = vmatmul.mubr.f32.gmra.mrb[40].mxu0 %v255_v55 }
 0x129   :  { %535 = vmatprep.mubr.f32.mxu0 %v260_v56 }
 0x12c   :  { %536 = vmatmul.mubr.f32.gmra.mrb[42].mxu0 %v259_v58 }
 0x12d   :  { %540 = vmatprep.mubr.f32.mxu0 %v264_v61 }
 0x130   :  { %541 = vmatmul.mubr.f32.gmra.mrb[44].mxu0 %v263_v63 }
 0x131   :  { %545 = vmatprep.mubr.f32.mxu0 %v268_v0 }
 0x134   :  { %546 = vmatmul.mubr.f32.gmra.mrb[46].mxu0 %v267_v2 }
 0x135   :  { %550 = vmatprep.mubr.f32.mxu0 %v272_v6 }
 0x138   :  { %551 = vmatmul.mubr.f32.gmra.mrb[48].mxu0 %v271_v9 }
 0x139   :  { %555 = vmatprep.mubr.f32.mxu0 %v276_v10 }
 0x13c   :  { %556 = vmatmul.mubr.f32.gmra.mrb[50].mxu0 %v275_v11 }
 0x13d   :  { %560 = vmatprep.mubr.f32.mxu0 %v280_v15 }
 0x140   :  { %561 = vmatmul.mubr.f32.gmra.mrb[52].mxu0 %v279_v17 }
 0x141   :  { %565 = vmatprep.mubr.f32.mxu0 %v284_v18 }
 0x144   :  { %566 = vmatmul.mubr.f32.gmra.mrb[54].mxu0 %v283_v21 }
 0x145   :  { %570 = vmatprep.mubr.f32.mxu0 %v288_v22 }
 0x148   :  { %571 = vmatmul.mubr.f32.gmra.mrb[56].mxu0 %v287_v23 }
 0x149   :  { %575 = vmatprep.mubr.f32.mxu0 %v292_v25 }
 0x14c   :  { %576 = vmatmul.mubr.f32.gmra.mrb[58].mxu0 %v291_v29 }
 0x14d   :  { %580 = vmatprep.mubr.f32.mxu0 %v296_v30 }
 0x150   :  { %581 = vmatmul.mubr.f32.gmra.mrb[60].mxu0 %v295_v31 }
 0x151   :  { %585 = vmatprep.mubr.f32.mxu0 %v300_v34 }
 0x154   :  { %586 = vmatmul.mubr.f32.gmra.mrb[62].mxu0 %v299_v35 }
 0x1ab   :  { %v8803_v43 = vpop.f32.mrb[0].mxu0 }
 0x1ac   :  { %v8804_v46 = vpop.f32.mrb[1].mxu0 }
 0x1ad   :  { %v8805_v47 = vadd.f32 %v8804_v46, %v8803_v43 }
 0x1af   :  { %v8806_v49 = vpop.f32.mrb[2].mxu0 }
 0x1b0   :  { %v8807_v53 = vpop.f32.mrb[3].mxu0 }
 0x1b1   :  { %v8808_v54 = vadd.f32 %v8807_v53, %v8806_v49 }
 0x1b3   :  { %v8809_v55 = vpop.f32.mrb[4].mxu0 }
 0x1b4   :  { %v8810_v56 = vpop.f32.mrb[5].mxu0 }
 0x1b5   :  { %v14555_v58 = vadd.f32 %v8810_v56, %v8809_v55 }
 0x1b7   :  { %v8812_v61 = vpop.f32.mrb[6].mxu0 }
 0x1b8   :  { %v8813_v63 = vpop.f32.mrb[7].mxu0 }
 0x1b9   :  { %v14557_v0 = vadd.f32 %v8813_v63, %v8812_v61 }
 0x1bb   :  { %v8815_v2 = vpop.f32.mrb[8].mxu0 }
 0x1bc   :  { %v8816_v6 = vpop.f32.mrb[9].mxu0 }
 0x1bd   :  { %v14559_v9 = vadd.f32 %v8816_v6, %v8815_v2 }
 0x1bf   :  { %v8818_v10 = vpop.f32.mrb[10].mxu0 }
 0x1c0   :  { %v8819_v11 = vpop.f32.mrb[11].mxu0 }
 0x1c1   :  { %v14561_v15 = vadd.f32 %v8819_v11, %v8818_v10 }
 0x1c3   :  { %v8821_v17 = vpop.f32.mrb[12].mxu0 }
 0x1c4   :  { %v8822_v18 = vpop.f32.mrb[13].mxu0 }
 0x1c5   :  { %v14563_v21 = vadd.f32 %v8822_v18, %v8821_v17 }
 0x1c7   :  { %v8824_v22 = vpop.f32.mrb[14].mxu0 }
 0x1c8   :  { %v8825_v23 = vpop.f32.mrb[15].mxu0 }
 0x1c9   :  { %v14565_v25 = vadd.f32 %v8825_v23, %v8824_v22 }
 0x1cb   :  { %v8827_v29 = vpop.f32.mrb[16].mxu0 }
 0x1cc   :  { %v8828_v30 = vpop.f32.mrb[17].mxu0 }
 0x1cd   :  { %v14567_v31 = vadd.f32 %v8828_v30, %v8827_v29 }
 0x1cf   :  { %v8830_v34 = vpop.f32.mrb[18].mxu0 }
 0x1d0   :  { %v8831_v35 = vpop.f32.mrb[19].mxu0 }
 0x1d1   :  { %v14569_v37 = vadd.f32 %v8831_v35, %v8830_v34  ;;  %v837_v35 = vld [vmem:[#allocation4 + $0x308] sm:$0xff] }
 0x1d2   :  { %972 = vmatprep.mubr.f32.mxu1 %v837_v35  ;;  %v849_v35 = vld [vmem:[#allocation4 + $0x368] sm:$0xff] }
 0x1d3   :  { %v8833_v41 = vpop.f32.mrb[20].mxu0 }
 0x1d4   :  { %v8834_v42 = vpop.f32.mrb[21].mxu0 }
 0x1d5   :  { %v14571_v43 = vadd.f32 %v8834_v42, %v8833_v41  ;;  %v836_v41 = vld [vmem:[#allocation4 + $0x300] sm:$0xff] }
 0x1d6   :  { %973 = vmatmul.mubr.f32.vlgmr.msra.gmra.mrb[0].mxu1 %v836_v41  ;;  %v848_v41 = vld [vmem:[#allocation4 + $0x360] sm:$0xff] }
 0x1d7   :  { %v8836_v46 = vpop.f32.mrb[22].mxu0  ;;  %12420 = vmatpush3.bf16.msra.mxu1 %v14443_v7 }
 0x1d8   :  { %v8837_v49 = vpop.f32.mrb[23].mxu0  ;;  %12422 = vmatprep.subr.bf16.mxu1 %v14445_v8 }
 0x1d9   :  { %v14573_v53 = vadd.f32 %v8837_v49, %v8836_v46 }
 0x1db   :  { %v8839_v55 = vpop.f32.mrb[24].mxu0  ;;  %12424 = vmatpush3.bf16.msra.mxu1 %v14450_v13 }
 0x1dc   :  { %v8840_v56 = vpop.f32.mrb[25].mxu0  ;;  %12426 = vmatprep.subr.bf16.mxu1 %v14454_v14 }
 0x1dd   :  { %v14575_v61 = vadd.f32 %v8840_v56, %v8839_v55  ;;  %v841_v56 = vld [vmem:[#allocation4 + $0x328] sm:$0xff] }
 0x1de   :  { %977 = vmatprep.mubr.f32.mxu1 %v841_v56  ;;  %v852_v56 = vld [vmem:[#allocation4 + $0x380] sm:$0xff] }
 0x1df   :  { %v8842_v63 = vpop.f32.mrb[26].mxu0  ;;  %12428 = vmatpush3.bf16.msra.mxu1 %v14458_v19 }
 0x1e0   :  { %v8843_v2 = vpop.f32.mrb[27].mxu0  ;;  %12430 = vmatprep.subr.bf16.mxu1 %v14462_v20 }
 0x1e1   :  { %v14577_v6 = vadd.f32 %v8843_v2, %v8842_v63  ;;  %v840_v63 = vld [vmem:[#allocation4 + $0x320] sm:$0xff] }
 0x1e2   :  { %978 = vmatmul.mubr.f32.gmra.mrb[2].mxu1 %v840_v63 }
 0x1e3   :  { %v8845_v10 = vpop.f32.mrb[28].mxu0  ;;  %12432 = vmatpush3.bf16.msra.mxu1 %v14466_v26 }
 0x1e4   :  { %v8846_v11 = vpop.f32.mrb[29].mxu0  ;;  %12434 = vmatprep.subr.bf16.mxu1 %v14470_v27 }
 0x1e5   :  { %v14579_v17 = vadd.f32 %v8846_v11, %v8845_v10 }
 0x1e7   :  { %v8848_v18 = vpop.f32.mrb[30].mxu0  ;;  %12436 = vmatpush3.bf16.msra.mxu1 %v14474_v32 }
 0x1e8   :  { %v8849_v22 = vpop.f32.mrb[31].mxu0  ;;  %12438 = vmatprep.subr.bf16.mxu1 %v14478_v33 }
 0x1e9   :  { %v14581_v23 = vadd.f32 %v8849_v22, %v8848_v18  ;;  %v845_v18 = vld [vmem:[#allocation4 + $0x348] sm:$0xff]  ;;  %v844_v22 = vld [vmem:[#allocation4 + $0x340] sm:$0xff] }
 0x1ea   :  { %982 = vmatprep.mubr.f32.mxu1 %v845_v18 }
 0x1eb   :  { %v8883_v29 = vpop.f32.mrb[32].mxu0  ;;  %983 = vmatmul.mubr.f32.gmra.mrb[4].mxu1 %v844_v22 }
 0x1ec   :  { %v8884_v30 = vpop.f32.mrb[33].mxu0  ;;  %987 = vmatprep.mubr.f32.mxu1 %v849_v35  ;;  %12440 = vmatpush3.bf16.msra.mxu1 %v14482_v38 }
 0x1ed   :  { %v8885_v34 = vadd.f32 %v8884_v30, %v8883_v29  ;;  %12442 = vmatprep.subr.bf16.mxu1 %v14486_v39 }
 0x1ef   :  { %v513_v42 = vadd.f32 %v8885_v34, %v8805_v47  ;;  %v8886_v46 = vpop.f32.mrb[34].mxu0  ;;  %988 = vmatmul.mubr.f32.gmra.mrb[6].mxu1 %v848_v41 }
 0x1f0   :  { %v8887_v49 = vpop.f32.mrb[35].mxu0  ;;  %12444 = vmatpush3.bf16.msra.mxu1 %v14490_v44 }
 0x1f1   :  { %10935 = vmatprep.mubr.msk.f32.mxu0 %vm593_vm0, %v513_v42  ;;  %v8888_v55 = vadd.f32 %v8887_v49, %v8886_v46  ;;  %12446 = vmatprep.subr.bf16.mxu1 %v14494_v45 }
 0x1f3   :  { %v8889_v2 = vpop.f32.mrb[36].mxu0  ;;  %v518_v10 = vadd.f32 %v8888_v55, %v8808_v54  ;;  %v853_v55 = vld [vmem:[#allocation4 + $0x388] sm:$0xff] }
 0x1f4   :  { %v8890_v11 = vpop.f32.mrb[37].mxu0  ;;  %992 = vmatprep.mubr.f32.mxu1 %v853_v55  ;;  %12448 = vmatpush3.bf16.msra.mxu1 %v14498_v50 }
 0x1f5   :  { %10936 = vmatmul.mubr.msk.f32.vlgmr.msra.gmra.mrb[64].mxu0 %vm593_vm0, %v518_v10  ;;  %v8891_v47 = vadd.f32 %v8890_v11, %v8889_v2  ;;  %993 = vmatmul.mubr.f32.gmra.mrb[8].mxu1 %v852_v56  ;;  %v857_v11 = vld [vmem:[#allocation4 + $0x3a8] sm:$0xff] }
 0x1f6   :  { %12352 = vmatpush3.bf16.msra.mxu0 %v14443_v7  ;;  %997 = vmatprep.mubr.f32.mxu1 %v857_v11 }
 0x1f7   :  { %v8892_v29 = vpop.f32.mrb[38].mxu0  ;;  %v523_v30 = vadd.f32 %v8891_v47, %v14555_v58  ;;  %12354 = vmatprep.subr.bf16.mxu0 %v14445_v8  ;;  %v856_v47 = vld [vmem:[#allocation4 + $0x3a0] sm:$0xff]  ;;  %13755 = vmatprep.subr.bf16.mxu1 %v14441_v3 }
 0x1f8   :  { %v8893_v54 = vpop.f32.mrb[39].mxu0 }
 0x1f9   :  { %v8894_v34 = vadd.f32 %v8893_v54, %v8892_v29  ;;  %10938 = vmatprep.mubr.msk.f32.mxu0 %vm593_vm0, %v523_v30  ;;  %998 = vmatmul.mubr.f32.gmra.mrb[10].mxu1 %v856_v47  ;;  %v861_v30 = vld [vmem:[#allocation4 + $0x3c8] sm:$0xff]  ;;  %v860_v54 = vld [vmem:[#allocation4 + $0x3c0] sm:$0xff] }
 0x1fa   :  { %12356 = vmatpush3.bf16.msra.mxu0 %v14450_v13  ;;  %1002 = vmatprep.mubr.f32.mxu1 %v861_v30 }
 0x1fb   :  { %v528_v42 = vadd.f32 %v8894_v34, %v14557_v0  ;;  %v8895_v46 = vpop.f32.mrb[40].mxu0  ;;  %12358 = vmatprep.subr.bf16.mxu0 %v14454_v14 }
 0x1fc   :  { %v8896_v58 = vpop.f32.mrb[41].mxu0 }
 0x1fd   :  { %v8897_v49 = vadd.f32 %v8896_v58, %v8895_v46  ;;  %10939 = vmatmul.mubr.msk.f32.gmra.mrb[66].mxu0 %vm593_vm0, %v528_v42  ;;  %1003 = vmatmul.mubr.f32.gmra.mrb[12].mxu1 %v860_v54  ;;  %v865_v42 = vld [vmem:[#allocation4 + $0x3e8] sm:$0xff]  ;;  %v864_v46 = vld [vmem:[#allocation4 + $0x3e0] sm:$0xff] }
 0x1fe   :  { %12360 = vmatpush3.bf16.msra.mxu0 %v14458_v19  ;;  %1007 = vmatprep.mubr.f32.mxu1 %v865_v42 }
 0x1ff   :  { %v533_v63 = vadd.f32 %v8897_v49, %v14559_v9  ;;  %v8898_v0 = vpop.f32.mrb[42].mxu0  ;;  %12362 = vmatprep.subr.bf16.mxu0 %v14462_v20 }
 0x200   :  { %v8899_v2 = vpop.f32.mrb[43].mxu0 }
 0x201   :  { %v8900_v10 = vadd.f32 %v8899_v2, %v8898_v0  ;;  %10941 = vmatprep.mubr.msk.f32.mxu0 %vm593_vm0, %v533_v63  ;;  %1008 = vmatmul.mubr.f32.gmra.mrb[14].mxu1 %v864_v46 }
 0x202   :  { %12364 = vmatpush3.bf16.msra.mxu0 %v14466_v26 }
 0x203   :  { %v538_v18 = vadd.f32 %v8900_v10, %v14561_v15  ;;  %v8901_v9 = vpop.f32.mrb[44].mxu0  ;;  %12366 = vmatprep.subr.bf16.mxu0 %v14470_v27 }
 0x204   :  { %v8902_v22 = vpop.f32.mrb[45].mxu0 }
 0x205   :  { %v8903_v29 = vadd.f32 %v8902_v22, %v8901_v9  ;;  %10942 = vmatmul.mubr.msk.f32.gmra.mrb[68].mxu0 %vm593_vm0, %v538_v18 }
 0x206   :  { %12368 = vmatpush3.bf16.msra.mxu0 %v14474_v32 }
 0x207   :  { %v543_v34 = vadd.f32 %v8903_v29, %v14563_v21  ;;  %v8904_v15 = vpop.f32.mrb[46].mxu0  ;;  %12370 = vmatprep.subr.bf16.mxu0 %v14478_v33 }
 0x208   :  { %v8905_v35 = vpop.f32.mrb[47].mxu0 }
 0x209   :  { %v8906_v41 = vadd.f32 %v8905_v35, %v8904_v15  ;;  %10944 = vmatprep.mubr.msk.f32.mxu0 %vm593_vm0, %v543_v34 }
 0x20a   :  { %12372 = vmatpush3.bf16.msra.mxu0 %v14482_v38 }
 0x20b   :  { %v548_v58 = vadd.f32 %v8906_v41, %v14565_v25  ;;  %v8907_v21 = vpop.f32.mrb[48].mxu0  ;;  %12374 = vmatprep.subr.bf16.mxu0 %v14486_v39 }
 0x20c   :  { %v8908_v49 = vpop.f32.mrb[49].mxu0 }
 0x20d   :  { %v8909_v55 = vadd.f32 %v8908_v49, %v8907_v21  ;;  %10945 = vmatmul.mubr.msk.f32.gmra.mrb[70].mxu0 %vm593_vm0, %v548_v58 }
 0x20e   :  { %12376 = vmatpush3.bf16.msra.mxu0 %v14490_v44 }
 0x20f   :  { %v553_v56 = vadd.f32 %v8909_v55, %v14567_v31  ;;  %v8910_v63 = vpop.f32.mrb[50].mxu0  ;;  %12378 = vmatprep.subr.bf16.mxu0 %v14494_v45 }
 0x210   :  { %v8911_v25 = vpop.f32.mrb[51].mxu0 }
 0x211   :  { %v8912_v0 = vadd.f32 %v8911_v25, %v8910_v63  ;;  %10947 = vmatprep.mubr.msk.f32.mxu0 %vm593_vm0, %v553_v56  ;;  %v805_v56 = vld [vmem:[#allocation4 + $0x208] sm:$0xff]  ;;  %v804_v63 = vld [vmem:[#allocation4 + $0x200] sm:$0xff] }
 0x212   :  { %12380 = vmatpush3.bf16.msra.mxu0 %v14498_v50  ;;  %v808_v25 = vld [vmem:[#allocation4 + $0x220] sm:$0xff] }
 0x213   :  { %v558_v2 = vadd.f32 %v8912_v0, %v14569_v37  ;;  %v8913_v10 = vpop.f32.mrb[52].mxu0  ;;  %12382 = vmatprep.subr.bf16.mxu0 %v14502_v51  ;;  %v812_v0 = vld [vmem:[#allocation4 + $0x240] sm:$0xff] }
 0x214   :  { %v8914_v11 = vpop.f32.mrb[53].mxu0 }
 0x215   :  { %v8915_v47 = vadd.f32 %v8914_v11, %v8913_v10  ;;  %10948 = vmatmul.mubr.msk.f32.gmra.mrb[72].mxu0 %vm593_vm0, %v558_v2  ;;  %v816_v2 = vld [vmem:[#allocation4 + $0x260] sm:$0xff]  ;;  %v821_v10 = vld [vmem:[#allocation4 + $0x288] sm:$0xff] }
 0x216   :  { %v820_v11 = vld [vmem:[#allocation4 + $0x280] sm:$0xff] }
 0x217   :  { %v563_v31 = vadd.f32 %v8915_v47, %v14571_v43  ;;  %v8916_v18 = vpop.f32.mrb[54].mxu0  ;;  %v825_v47 = vld [vmem:[#allocation4 + $0x2a8] sm:$0xff] }
 0x218   :  { %v8917_v9 = vpop.f32.mrb[55].mxu0 }
 0x219   :  { %v8918_v22 = vadd.f32 %v8917_v9, %v8916_v18  ;;  %10950 = vmatprep.mubr.msk.f32.mxu0 %vm593_vm0, %v563_v31  ;;  %v824_v31 = vld [vmem:[#allocation4 + $0x2a0] sm:$0xff]  ;;  %v829_v18 = vld [vmem:[#allocation4 + $0x2c8] sm:$0xff] }
 0x21a   :  { %v828_v9 = vld [vmem:[#allocation4 + $0x2c0] sm:$0xff] }
 0x21b   :  { %v568_v29 = vadd.f32 %v8918_v22, %v14573_v53  ;;  %v8919_v30 = vpop.f32.mrb[56].mxu0  ;;  %v833_v22 = vld [vmem:[#allocation4 + $0x2e8] sm:$0xff] }
 0x21c   :  { %v8920_v54 = vpop.f32.mrb[57].mxu0 }
 0x21d   :  { %v8921_v34 = vadd.f32 %v8920_v54, %v8919_v30  ;;  %10951 = vmatmul.mubr.msk.f32.gmra.mrb[74].mxu0 %vm593_vm0, %v568_v29  ;;  %v832_v29 = vld [vmem:[#allocation4 + $0x2e0] sm:$0xff]  ;;  %v807_v30 = vld [vmem:[#allocation4 + $0x218] sm:$0xff]  ;;  %v806_v54 = vld [vmem:[#allocation4 + $0x210] sm:$0xff] }
 0x21f   :  { %v573_v37 = vadd.f32 %v8921_v34, %v14575_v61  ;;  %v8922_v15 = vpop.f32.mrb[58].mxu0  ;;  %v811_v34 = vld [vmem:[#allocation4 + $0x238] sm:$0xff] }
 0x220   :  { %v8923_v35 = vpop.f32.mrb[59].mxu0 }
 0x221   :  { %v8924_v41 = vadd.f32 %v8923_v35, %v8922_v15  ;;  %10953 = vmatprep.mubr.msk.f32.mxu0 %vm593_vm0, %v573_v37  ;;  %v810_v37 = vld [vmem:[#allocation4 + $0x230] sm:$0xff]  ;;  %v815_v15 = vld [vmem:[#allocation4 + $0x258] sm:$0xff] }
 0x222   :  { %v814_v35 = vld [vmem:[#allocation4 + $0x250] sm:$0xff] }
 0x223   :  { %v578_v43 = vadd.f32 %v8924_v41, %v14577_v6  ;;  %v8925_v42 = vpop.f32.mrb[60].mxu0  ;;  %v809_v6 = vld [vmem:[#allocation4 + $0x228] sm:$0xff]  ;;  %v819_v41 = vld [vmem:[#allocation4 + $0x278] sm:$0xff] }
 0x224   :  { %v8926_v46 = vpop.f32.mrb[61].mxu0 }
 0x225   :  { %v8927_v58 = vadd.f32 %v8926_v46, %v8925_v42  ;;  %10954 = vmatmul.mubr.msk.f32.gmra.mrb[76].mxu0 %vm593_vm0, %v578_v43  ;;  %v818_v43 = vld [vmem:[#allocation4 + $0x270] sm:$0xff]  ;;  %v823_v42 = vld [vmem:[#allocation4 + $0x298] sm:$0xff] }
 0x226   :  { %v822_v46 = vld [vmem:[#allocation4 + $0x290] sm:$0xff] }
 0x227   :  { %v583_v53 = vadd.f32 %v8927_v58, %v14579_v17  ;;  %v8928_v21 = vpop.f32.mrb[62].mxu0  ;;  %v813_v17 = vld [vmem:[#allocation4 + $0x248] sm:$0xff]  ;;  %v827_v58 = vld [vmem:[#allocation4 + $0x2b8] sm:$0xff] }
 0x228   :  { %v8929_v49 = vpop.f32.mrb[63].mxu0 }
 0x229   :  { %v8930_v55 = vadd.f32 %v8929_v49, %v8928_v21  ;;  %10956 = vmatprep.mubr.msk.f32.mxu0 %vm593_vm0, %v583_v53  ;;  %v826_v53 = vld [vmem:[#allocation4 + $0x2b0] sm:$0xff]  ;;  %v831_v21 = vld [vmem:[#allocation4 + $0x2d8] sm:$0xff] }
 0x22a   :  { %v830_v49 = vld [vmem:[#allocation4 + $0x2d0] sm:$0xff] }
 0x22b   :  { %v588_v61 = vadd.f32 %v8930_v55, %v14581_v23  ;;  %v817_v23 = vld [vmem:[#allocation4 + $0x268] sm:$0xff]  ;;  %v835_v55 = vld [vmem:[#allocation4 + $0x2f8] sm:$0xff] }
 0x22d   :  { %10957 = vmatmul.mubr.msk.f32.gmra.mrb[78].mxu0 %vm593_vm0, %v588_v61  ;;  %v834_v61 = vld [vmem:[#allocation4 + $0x2f0] sm:$0xff] }
 0x22e   :  { %932 = vmatprep.mubr.f32.mxu0 %v805_v56  ;;  %v839_v56 = vld [vmem:[#allocation4 + $0x318] sm:$0xff] }
 0x231   :  { %933 = vmatmul.mubr.f32.vlgmr.msra.gmra.mrb[80].mxu0 %v804_v63  ;;  %v838_v63 = vld [vmem:[#allocation4 + $0x310] sm:$0xff] }
 0x232   :  { %12384 = vmatpush3.bf16.msra.mxu0 %v14506_v57  ;;  %937 = vmatprep.mubr.f32.mxu0 %v809_v6  ;;  %v843_v6 = vld [vmem:[#allocation4 + $0x338] sm:$0xff] }
 0x233   :  { %12386 = vmatprep.subr.bf16.mxu0 %v14510_v59 }
 0x235   :  { %938 = vmatmul.mubr.f32.gmra.mrb[82].mxu0 %v808_v25  ;;  %v842_v25 = vld [vmem:[#allocation4 + $0x330] sm:$0xff] }
 0x236   :  { %12388 = vmatpush3.bf16.msra.mxu0 %v14514_v1  ;;  %942 = vmatprep.mubr.f32.mxu0 %v813_v17  ;;  %v847_v17 = vld [vmem:[#allocation4 + $0x358] sm:$0xff] }
 0x237   :  { %12390 = vmatprep.subr.bf16.mxu0 %v14517_v4 }
 0x239   :  { %943 = vmatmul.mubr.f32.gmra.mrb[84].mxu0 %v812_v0  ;;  %v846_v0 = vld [vmem:[#allocation4 + $0x350] sm:$0xff] }
 0x23a   :  { %12392 = vmatpush3.bf16.msra.mxu0 %v14520_v12  ;;  %947 = vmatprep.mubr.f32.mxu0 %v817_v23  ;;  %v851_v23 = vld [vmem:[#allocation4 + $0x378] sm:$0xff] }
 0x23b   :  { %12394 = vmatprep.subr.bf16.mxu0 %v14523_v16 }
 0x23d   :  { %948 = vmatmul.mubr.f32.gmra.mrb[86].mxu0 %v816_v2  ;;  %v850_v2 = vld [vmem:[#allocation4 + $0x370] sm:$0xff] }
 0x23e   :  { %12396 = vmatpush3.bf16.msra.mxu0 %v14526_v24  ;;  %952 = vmatprep.mubr.f32.mxu0 %v821_v10  ;;  %v855_v10 = vld [vmem:[#allocation4 + $0x398] sm:$0xff] }
 0x23f   :  { %12398 = vmatprep.subr.bf16.mxu0 %v14529_v28 }
 0x241   :  { %953 = vmatmul.mubr.f32.gmra.mrb[88].mxu0 %v820_v11  ;;  %v854_v11 = vld [vmem:[#allocation4 + $0x390] sm:$0xff] }
 0x242   :  { %12400 = vmatpush3.bf16.msra.mxu0 %v14532_v36  ;;  %957 = vmatprep.mubr.f32.mxu0 %v825_v47  ;;  %v859_v47 = vld [vmem:[#allocation4 + $0x3b8] sm:$0xff] }
 0x243   :  { %12402 = vmatprep.subr.bf16.mxu0 %v14535_v40 }
 0x245   :  { %958 = vmatmul.mubr.f32.gmra.mrb[90].mxu0 %v824_v31  ;;  %v858_v31 = vld [vmem:[#allocation4 + $0x3b0] sm:$0xff] }
 0x246   :  { %12404 = vmatpush3.bf16.msra.mxu0 %v14538_v48  ;;  %962 = vmatprep.mubr.f32.mxu0 %v829_v18  ;;  %v863_v18 = vld [vmem:[#allocation4 + $0x3d8] sm:$0xff] }
 0x247   :  { %12406 = vmatprep.subr.bf16.mxu0 %v14541_v52 }
 0x249   :  { %963 = vmatmul.mubr.f32.gmra.mrb[92].mxu0 %v828_v9  ;;  %v862_v9 = vld [vmem:[#allocation4 + $0x3d0] sm:$0xff] }
 0x24a   :  { %12408 = vmatpush3.bf16.msra.mxu0 %v14544_v60  ;;  %967 = vmatprep.mubr.f32.mxu0 %v833_v22  ;;  %v867_v22 = vld [vmem:[#allocation4 + $0x3f8] sm:$0xff] }
 0x24b   :  { %12410 = vmatprep.subr.bf16.mxu0 %v14547_v62 }
 0x24d   :  { %968 = vmatmul.mubr.f32.gmra.mrb[94].mxu0 %v832_v29  ;;  %v866_v29 = vld [vmem:[#allocation4 + $0x3f0] sm:$0xff] }
 0x24e   :  { %12412 = vmatpush3.bf16.msra.mxu0 %v14550_v5  ;;  %1077 = vmatprep.mubr.f32.mxu0 %v807_v30  ;;  %v1159_v30 = vld [vmem:[#allocation6 + $0x10] sm:$0xff] }
 0x251   :  { %1078 = vmatmul.mubr.f32.vlgmr.msra.gmra.mrb[96].mxu0 %v806_v54  ;;  %v1160_v54 = vld [vmem:[#allocation6 + $0x18] sm:$0xff] }
 0x252   :  { %1082 = vmatprep.mubr.f32.mxu0 %v811_v34  ;;  %v12413_v34 = vpack.c.bf16 %v1160_v54, %v1159_v30  ;;  %v1379_v30 = vld [vmem:[#allocation4 + $0x440] sm:$0xff]  ;;  %v1384_v54 = vld [vmem:[#allocation4 + $0x468] sm:$0xff] }
 0x254   :  { %12414 = vmatprep.subr.bf16.mxu0 %v12413_v34 }
 0x255   :  { %1083 = vmatmul.mubr.f32.gmra.mrb[98].mxu0 %v810_v37 }
 0x256   :  { %1087 = vmatprep.mubr.f32.mxu0 %v815_v15  ;;  %12416 = vmatpush3.bf16.msra.mxu0 %v12413_v34  ;;  %v1383_v34 = vld [vmem:[#allocation4 + $0x460] sm:$0xff] }
 0x257   :  { %12450 = vmatprep.subr.bf16.mxu0 %v14502_v51 }
 0x259   :  { %1088 = vmatmul.mubr.f32.gmra.mrb[100].mxu0 %v814_v35 }
 0x25a   :  { %1092 = vmatprep.mubr.f32.mxu0 %v819_v41 }
 0x25d   :  { %1093 = vmatmul.mubr.f32.gmra.mrb[102].mxu0 %v818_v43 }
 0x25e   :  { %1097 = vmatprep.mubr.f32.mxu0 %v823_v42 }
 0x261   :  { %1098 = vmatmul.mubr.f32.gmra.mrb[104].mxu0 %v822_v46 }
 0x262   :  { %1102 = vmatprep.mubr.f32.mxu0 %v827_v58 }
 0x265   :  { %1103 = vmatmul.mubr.f32.gmra.mrb[106].mxu0 %v826_v53 }
 0x266   :  { %1107 = vmatprep.mubr.f32.mxu0 %v831_v21 }
 0x269   :  { %1108 = vmatmul.mubr.f32.gmra.mrb[108].mxu0 %v830_v49 }
 0x26a   :  { %1112 = vmatprep.mubr.f32.mxu0 %v835_v55 }
 0x26d   :  { %1113 = vmatmul.mubr.f32.gmra.mrb[110].mxu0 %v834_v61 }
 0x26e   :  { %1117 = vmatprep.mubr.f32.mxu0 %v839_v56 }
 0x271   :  { %1118 = vmatmul.mubr.f32.gmra.mrb[112].mxu0 %v838_v63 }
 0x272   :  { %1122 = vmatprep.mubr.f32.mxu0 %v843_v6 }
 0x275   :  { %1123 = vmatmul.mubr.f32.gmra.mrb[114].mxu0 %v842_v25 }
 0x276   :  { %1127 = vmatprep.mubr.f32.mxu0 %v847_v17 }
 0x279   :  { %1128 = vmatmul.mubr.f32.gmra.mrb[116].mxu0 %v846_v0 }
 0x27a   :  { %1132 = vmatprep.mubr.f32.mxu0 %v851_v23 }
 0x27d   :  { %1133 = vmatmul.mubr.f32.gmra.mrb[118].mxu0 %v850_v2 }
 0x27e   :  { %1137 = vmatprep.mubr.f32.mxu0 %v855_v10 }
 0x281   :  { %1138 = vmatmul.mubr.f32.gmra.mrb[120].mxu0 %v854_v11 }
 0x282   :  { %1142 = vmatprep.mubr.f32.mxu0 %v859_v47 }
 0x285   :  { %1143 = vmatmul.mubr.f32.gmra.mrb[122].mxu0 %v858_v31  ;;  %v1372_v31 = vld [vmem:[#allocation4 + $0x408] sm:$0xff] }
 0x286   :  { %1147 = vmatprep.mubr.f32.mxu0 %v863_v18  ;;  %v1371_v18 = vld [vmem:[#allocation4 + $0x400] sm:$0xff]  ;;  %1499 = vmatprep.mubr.f32.mxu1 %v1372_v31  ;;  %v1408_v31 = vld [vmem:[#allocation4 + $0x528] sm:$0xff] }
 0x287   :  { %1500 = vmatmul.mubr.f32.vlgmr.msra.gmra.mrb[16].mxu1 %v1371_v18  ;;  %v1407_v18 = vld [vmem:[#allocation4 + $0x520] sm:$0xff] }
 0x288   :  { %13763 = vmatpush3.bf16.msra.mxu1 %v14443_v7 }
 0x289   :  { %1148 = vmatmul.mubr.f32.gmra.mrb[124].mxu0 %v862_v9  ;;  %v1376_v9 = vld [vmem:[#allocation4 + $0x428] sm:$0xff]  ;;  %13756 = vmatprep.subr.bf16.mxu1 %v14445_v8 }
 0x28a   :  { %1152 = vmatprep.mubr.f32.mxu0 %v867_v22  ;;  %v1375_v22 = vld [vmem:[#allocation4 + $0x420] sm:$0xff]  ;;  %1504 = vmatprep.mubr.f32.mxu1 %v1376_v9 }
 0x28b   :  { %1505 = vmatmul.mubr.f32.gmra.mrb[18].mxu1 %v1375_v22 }
 0x28c   :  { %13764 = vmatpush3.bf16.msra.mxu1 %v14450_v13 }
 0x28d   :  { %1153 = vmatmul.mubr.f32.gmra.mrb[126].mxu0 %v866_v29  ;;  %v1380_v29 = vld [vmem:[#allocation4 + $0x448] sm:$0xff]  ;;  %13757 = vmatprep.subr.bf16.mxu1 %v14454_v14 }
 0x28e   :  { %1509 = vmatprep.mubr.f32.mxu1 %v1380_v29 }
 0x28f   :  { %1510 = vmatmul.mubr.f32.gmra.mrb[20].mxu1 %v1379_v30  ;;  %v1412_v30 = vld [vmem:[#allocation4 + $0x548] sm:$0xff] }
 0x290   :  { %13765 = vmatpush3.bf16.msra.mxu1 %v14458_v19  ;;  %1514 = vmatprep.mubr.f32.mxu1 %v1384_v54  ;;  %v1411_v54 = vld [vmem:[#allocation4 + $0x540] sm:$0xff] }
 0x291   :  { %13758 = vmatprep.subr.bf16.mxu1 %v14462_v20 }
 0x293   :  { %1515 = vmatmul.mubr.f32.gmra.mrb[22].mxu1 %v1383_v34 }
 0x294   :  { %13766 = vmatpush3.bf16.msra.mxu1 %v14466_v26 }
 0x295   :  { %13759 = vmatprep.subr.bf16.mxu1 %v14470_v27 }
 0x298   :  { %13767 = vmatpush3.bf16.msra.mxu1 %v14474_v32 }
 0x299   :  { %13760 = vmatprep.subr.bf16.mxu1 %v14478_v33 }
 0x29c   :  { %13768 = vmatpush3.bf16.msra.mxu1 %v14482_v38 }
 0x29d   :  { %13761 = vmatprep.subr.bf16.mxu1 %v14486_v39 }
 0x2a0   :  { %13769 = vmatpush3.bf16.msra.mxu1 %v14490_v44 }
 0x2a1   :  { %13762 = vmatprep.subr.bf16.mxu1 %v14494_v45 }
 0x2a4   :  { %13770 = vmatpush3.bf16.msra.mxu1 %v14498_v50 }
 0x2a5   :  { %12518 = vmatprep.subr.bf16.mxu1 %v14502_v51 }
 0x2a9   :  { %v9005_v37 = vpop.f32.mrb[0].mxu1 }
 0x2aa   :  { %v9006_v15 = vpop.f32.mrb[1].mxu1 }
 0x2ab   :  { %v14661_v35 = vadd.f32 %v9006_v15, %v9005_v37  ;;  %v1388_v37 = vld [vmem:[#allocation4 + $0x488] sm:$0xff]  ;;  %v1387_v15 = vld [vmem:[#allocation4 + $0x480] sm:$0xff] }
 0x2ac   :  { %1519 = vmatprep.mubr.f32.mxu1 %v1388_v37 }
 0x2ad   :  { %1520 = vmatmul.mubr.f32.gmra.mrb[24].mxu1 %v1387_v15 }
 0x2b5   :  { %v9008_v41 = vpop.f32.mrb[2].mxu1 }
 0x2b6   :  { %v9009_v43 = vpop.f32.mrb[3].mxu1 }
 0x2b7   :  { %v14663_v42 = vadd.f32 %v9009_v43, %v9008_v41  ;;  %v1392_v41 = vld [vmem:[#allocation4 + $0x4a8] sm:$0xff]  ;;  %v1391_v43 = vld [vmem:[#allocation4 + $0x4a0] sm:$0xff] }
 0x2b8   :  { %1524 = vmatprep.mubr.f32.mxu1 %v1392_v41  ;;  %v1416_v41 = vld [vmem:[#allocation4 + $0x568] sm:$0xff] }
 0x2b9   :  { %1525 = vmatmul.mubr.f32.gmra.mrb[26].mxu1 %v1391_v43  ;;  %v1415_v43 = vld [vmem:[#allocation4 + $0x560] sm:$0xff] }
 0x2be   :  { %v9011_v46 = vpop.f32.mrb[4].mxu1 }
 0x2bf   :  { %v9012_v58 = vpop.f32.mrb[5].mxu1 }
 0x2c0   :  { %v14665_v53 = vadd.f32 %v9012_v58, %v9011_v46  ;;  %v1396_v46 = vld [vmem:[#allocation4 + $0x4c8] sm:$0xff]  ;;  %v1395_v58 = vld [vmem:[#allocation4 + $0x4c0] sm:$0xff] }
 0x2c1   :  { %1529 = vmatprep.mubr.f32.mxu1 %v1396_v46 }
 0x2c2   :  { %v9014_v21 = vpop.f32.mrb[6].mxu1  ;;  %1530 = vmatmul.mubr.f32.gmra.mrb[28].mxu1 %v1395_v58 }
 0x2c3   :  { %v9015_v49 = vpop.f32.mrb[7].mxu1 }
 0x2c4   :  { %v14667_v55 = vadd.f32 %v9015_v49, %v9014_v21  ;;  %v1400_v21 = vld [vmem:[#allocation4 + $0x4e8] sm:$0xff]  ;;  %v1399_v49 = vld [vmem:[#allocation4 + $0x4e0] sm:$0xff] }
 0x2c5   :  { %1534 = vmatprep.mubr.f32.mxu1 %v1400_v21 }
 0x2c6   :  { %1535 = vmatmul.mubr.f32.gmra.mrb[30].mxu1 %v1399_v49  ;;  %v1420_v49 = vld [vmem:[#allocation4 + $0x588] sm:$0xff] }
 0x2c8   :  { %v9017_v61 = vpop.f32.mrb[8].mxu1 }
 0x2c9   :  { %v9018_v56 = vpop.f32.mrb[9].mxu1 }
 0x2ca   :  { %v14669_v63 = vadd.f32 %v9018_v56, %v9017_v61 }
 0x2cc   :  { %v9020_v6 = vpop.f32.mrb[10].mxu1 }
 0x2cd   :  { %v9021_v25 = vpop.f32.mrb[11].mxu1 }
 0x2ce   :  { %v14671_v17 = vadd.f32 %v9021_v25, %v9020_v6  ;;  %v1404_v25 = vld [vmem:[#allocation4 + $0x508] sm:$0xff] }
 0x2cf   :  { %1539 = vmatprep.mubr.f32.mxu1 %v1404_v25 }
 0x2d0   :  { %v9023_v0 = vpop.f32.mrb[12].mxu1 }
 0x2d1   :  { %v9024_v23 = vpop.f32.mrb[13].mxu1 }
 0x2d2   :  { %v14673_v2 = vadd.f32 %v9024_v23, %v9023_v0  ;;  %v1403_v0 = vld [vmem:[#allocation4 + $0x500] sm:$0xff] }
 0x2d3   :  { %1540 = vmatmul.mubr.f32.gmra.mrb[32].mxu1 %v1403_v0 }
 0x2d4   :  { %v9026_v10 = vpop.f32.mrb[14].mxu1  ;;  %1544 = vmatprep.mubr.f32.mxu1 %v1408_v31 }
 0x2d5   :  { %v9027_v11 = vpop.f32.mrb[15].mxu1 }
 0x2d6   :  { %v14675_v47 = vadd.f32 %v9027_v11, %v9026_v10 }
 0x2d7   :  { %1545 = vmatmul.mubr.f32.gmra.mrb[34].mxu1 %v1407_v18 }
 0x2d8   :  { %1549 = vmatprep.mubr.f32.mxu1 %v1412_v30  ;;  %v1427_v30 = vld [vmem:[#allocation4 + $0x5c0] sm:$0xff] }
 0x2db   :  { %1550 = vmatmul.mubr.f32.gmra.mrb[36].mxu1 %v1411_v54 }
 0x2dc   :  { %1554 = vmatprep.mubr.f32.mxu1 %v1416_v41  ;;  %v1432_v41 = vld [vmem:[#allocation4 + $0x5e8] sm:$0xff] }
 0x2df   :  { %1555 = vmatmul.mubr.f32.gmra.mrb[38].mxu1 %v1415_v43  ;;  %v1431_v43 = vld [vmem:[#allocation4 + $0x5e0] sm:$0xff] }
 0x2e0   :  { %1559 = vmatprep.mubr.f32.mxu1 %v1420_v49 }
 0x304   :  { %v8981_v61 = vpop.f32.mrb[80].mxu0 }
 0x305   :  { %v8982_v56 = vpop.f32.mrb[81].mxu0 }
 0x306   :  { %v8983_v6 = vadd.f32 %v8982_v56, %v8981_v61  ;;  %v1419_v61 = vld [vmem:[#allocation4 + $0x580] sm:$0xff] }
 0x307   :  { %1560 = vmatmul.mubr.f32.gmra.mrb[40].mxu1 %v1419_v61  ;;  %v1943_v61 = vld [vmem:[#allocation4 + $0x628] sm:$0xff] }
 0x308   :  { %v8984_v23 = vpop.f32.mrb[82].mxu0 }
 0x309   :  { %v8985_v10 = vpop.f32.mrb[83].mxu0 }
 0x30a   :  { %v14693_v11 = vadd.f32 %v8985_v10, %v8984_v23  ;;  %v1424_v23 = vld [vmem:[#allocation4 + $0x5a8] sm:$0xff]  ;;  %v1423_v10 = vld [vmem:[#allocation4 + $0x5a0] sm:$0xff] }
 0x30b   :  { %1564 = vmatprep.mubr.f32.mxu1 %v1424_v23 }
 0x30c   :  { %v8987_v9 = vpop.f32.mrb[84].mxu0  ;;  %1565 = vmatmul.mubr.f32.gmra.mrb[42].mxu1 %v1423_v10 }
 0x30d   :  { %v8988_v22 = vpop.f32.mrb[85].mxu0 }
 0x30e   :  { %v14695_v29 = vadd.f32 %v8988_v22, %v8987_v9  ;;  %v1428_v22 = vld [vmem:[#allocation4 + $0x5c8] sm:$0xff] }
 0x30f   :  { %1569 = vmatprep.mubr.f32.mxu1 %v1428_v22 }
 0x310   :  { %v8990_v34 = vpop.f32.mrb[86].mxu0  ;;  %1570 = vmatmul.mubr.f32.gmra.mrb[44].mxu1 %v1427_v30  ;;  %v1951_v30 = vld [vmem:[#allocation4 + $0x668] sm:$0xff] }
 0x311   :  { %v8991_v37 = vpop.f32.mrb[87].mxu0  ;;  %1574 = vmatprep.mubr.f32.mxu1 %v1432_v41 }
 0x312   :  { %v14697_v15 = vadd.f32 %v8991_v37, %v8990_v34 }
 0x314   :  { %v8993_v46 = vpop.f32.mrb[88].mxu0  ;;  %1575 = vmatmul.mubr.f32.gmra.mrb[46].mxu1 %v1431_v43 }
 0x315   :  { %v8994_v58 = vpop.f32.mrb[89].mxu0  ;;  %2071 = vmatprep.mubr.f32.mxu1 %v1943_v61  ;;  %v1954_v61 = vld [vmem:[#allocation4 + $0x680] sm:$0xff] }
 0x316   :  { %v14699_v21 = vadd.f32 %v8994_v58, %v8993_v46 }
 0x318   :  { %v8996_v56 = vpop.f32.mrb[90].mxu0 }
 0x319   :  { %v8997_v25 = vpop.f32.mrb[91].mxu0 }
 0x31a   :  { %v14701_v0 = vadd.f32 %v8997_v25, %v8996_v56  ;;  %v1942_v56 = vld [vmem:[#allocation4 + $0x620] sm:$0xff]  ;;  %v1947_v25 = vld [vmem:[#allocation4 + $0x648] sm:$0xff] }
 0x31b   :  { %2072 = vmatmul.mubr.f32.vlgmr.msra.gmra.mrb[48].mxu1 %v1942_v56 }
 0x31c   :  { %v8999_v31 = vpop.f32.mrb[92].mxu0  ;;  %2076 = vmatprep.mubr.f32.mxu1 %v1947_v25  ;;  %12520 = vmatpush3.bf16.msra.mxu1 %v14506_v57  ;;  %v1959_v25 = vld [vmem:[#allocation4 + $0x6a8] sm:$0xff] }
 0x31d   :  { %v9000_v18 = vpop.f32.mrb[93].mxu0  ;;  %12522 = vmatprep.subr.bf16.mxu1 %v14510_v59 }
 0x31e   :  { %v14703_v9 = vadd.f32 %v9000_v18, %v8999_v31  ;;  %v1946_v18 = vld [vmem:[#allocation4 + $0x640] sm:$0xff] }
 0x31f   :  { %2077 = vmatmul.mubr.f32.gmra.mrb[50].mxu1 %v1946_v18 }
 0x320   :  { %v9002_v54 = vpop.f32.mrb[94].mxu0  ;;  %2081 = vmatprep.mubr.f32.mxu1 %v1951_v30  ;;  %12524 = vmatpush3.bf16.msra.mxu1 %v14514_v1 }
 0x321   :  { %v9003_v34 = vpop.f32.mrb[95].mxu0  ;;  %12526 = vmatprep.subr.bf16.mxu1 %v14517_v4 }
 0x322   :  { %v14705_v37 = vadd.f32 %v9003_v34, %v9002_v54 }
 0x324   :  { %v9061_v46 = vpop.f32.mrb[96].mxu0  ;;  %12528 = vmatpush3.bf16.msra.mxu1 %v14520_v12 }
 0x325   :  { %v9062_v58 = vpop.f32.mrb[97].mxu0  ;;  %12530 = vmatprep.subr.bf16.mxu1 %v14523_v16 }
 0x326   :  { %v9063_v49 = vadd.f32 %v9062_v58, %v9061_v46  ;;  %v1955_v46 = vld [vmem:[#allocation4 + $0x688] sm:$0xff] }
 0x328   :  { %v1080_v23 = vadd.f32 %v9063_v49, %v8983_v6  ;;  %v9064_v10 = vpop.f32.mrb[98].mxu0  ;;  %v1950_v6 = vld [vmem:[#allocation4 + $0x660] sm:$0xff]  ;;  %12532 = vmatpush3.bf16.msra.mxu1 %v14526_v24 }
 0x329   :  { %v9065_v31 = vpop.f32.mrb[99].mxu0  ;;  %2082 = vmatmul.mubr.f32.gmra.mrb[52].mxu1 %v1950_v6  ;;  %12534 = vmatprep.subr.bf16.mxu1 %v14529_v28  ;;  %v1967_v6 = vld [vmem:[#allocation4 + $0x6e8] sm:$0xff] }
 0x32a   :  { %v9066_v22 = vadd.f32 %v9065_v31, %v9064_v10  ;;  %10963 = vmatprep.mubr.msk.f32.mxu0 %vm593_vm0, %v1080_v23  ;;  %2086 = vmatprep.mubr.f32.mxu1 %v1955_v46  ;;  %v1958_v31 = vld [vmem:[#allocation4 + $0x6a0] sm:$0xff] }
 0x32c   :  { %v1085_v54 = vadd.f32 %v9066_v22, %v14693_v11  ;;  %v9067_v34 = vpop.f32.mrb[100].mxu0  ;;  %v1963_v22 = vld [vmem:[#allocation4 + $0x6c8] sm:$0xff]  ;;  %12536 = vmatpush3.bf16.msra.mxu1 %v14532_v36 }
 0x32d   :  { %v9068_v41 = vpop.f32.mrb[101].mxu0  ;;  %2087 = vmatmul.mubr.f32.gmra.mrb[54].mxu1 %v1954_v61  ;;  %12538 = vmatprep.subr.bf16.mxu1 %v14535_v40 }
 0x32e   :  { %v9069_v43 = vadd.f32 %v9068_v41, %v9067_v34  ;;  %10964 = vmatmul.mubr.msk.f32.vlgmr.msra.gmra.mrb[64].mxu0 %vm593_vm0, %v1085_v54  ;;  %2091 = vmatprep.mubr.f32.mxu1 %v1959_v25  ;;  %v1962_v34 = vld [vmem:[#allocation4 + $0x6c0] sm:$0xff] }
 0x32f   :  { %12452 = vmatpush3.bf16.msra.mxu0 %v14506_v57  ;;  %v1970_v25 = vld [vmem:[#allocation4 + $0x700] sm:$0xff] }
 0x330   :  { %v1090_v58 = vadd.f32 %v9069_v43, %v14695_v29  ;;  %v9070_v49 = vpop.f32.mrb[102].mxu0  ;;  %12454 = vmatprep.subr.bf16.mxu0 %v14510_v59  ;;  %12540 = vmatpush3.bf16.msra.mxu1 %v14538_v48 }
 0x331   :  { %v9071_v11 = vpop.f32.mrb[103].mxu0  ;;  %2092 = vmatmul.mubr.f32.gmra.mrb[56].mxu1 %v1958_v31  ;;  %12542 = vmatprep.subr.bf16.mxu1 %v14541_v52 }
 0x332   :  { %v9072_v56 = vadd.f32 %v9071_v11, %v9070_v49  ;;  %10966 = vmatprep.mubr.msk.f32.mxu0 %vm593_vm0, %v1090_v58  ;;  %2096 = vmatprep.mubr.f32.mxu1 %v1963_v22  ;;  %v1966_v58 = vld [vmem:[#allocation4 + $0x6e0] sm:$0xff]  ;;  %v1971_v11 = vld [vmem:[#allocation4 + $0x708] sm:$0xff] }
 0x333   :  { %12456 = vmatpush3.bf16.msra.mxu0 %v14514_v1  ;;  %v1726_v22 = vld [vmem:[#allocation6 + $0x20] sm:$0xff] }
 0x334   :  { %v1095_v23 = vadd.f32 %v9072_v56, %v14697_v15  ;;  %v9073_v29 = vpop.f32.mrb[104].mxu0  ;;  %12458 = vmatprep.subr.bf16.mxu0 %v14517_v4  ;;  %12544 = vmatpush3.bf16.msra.mxu1 %v14544_v60 }
 0x335   :  { %v9074_v10 = vpop.f32.mrb[105].mxu0  ;;  %2097 = vmatmul.mubr.f32.gmra.mrb[58].mxu1 %v1962_v34  ;;  %12546 = vmatprep.subr.bf16.mxu1 %v14547_v62 }
 0x336   :  { %v9075_v18 = vadd.f32 %v9074_v10, %v9073_v29  ;;  %10967 = vmatmul.mubr.msk.f32.gmra.mrb[66].mxu0 %vm593_vm0, %v1095_v23  ;;  %2101 = vmatprep.mubr.f32.mxu1 %v1967_v6  ;;  %v1975_v29 = vld [vmem:[#allocation4 + $0x728] sm:$0xff] }
 0x337   :  { %12460 = vmatpush3.bf16.msra.mxu0 %v14520_v12 }
 0x338   :  { %v1100_v30 = vadd.f32 %v9075_v18, %v14699_v21  ;;  %v9076_v15 = vpop.f32.mrb[106].mxu0  ;;  %12462 = vmatprep.subr.bf16.mxu0 %v14523_v16  ;;  %v1974_v18 = vld [vmem:[#allocation4 + $0x720] sm:$0xff]  ;;  %12548 = vmatpush3.bf16.msra.mxu1 %v14550_v5 }
 0x339   :  { %v9077_v54 = vpop.f32.mrb[107].mxu0  ;;  %2102 = vmatmul.mubr.f32.gmra.mrb[60].mxu1 %v1966_v58  ;;  %12586 = vmatprep.subr.bf16.mxu1 %v14502_v51 }
 0x33a   :  { %v9078_v41 = vadd.f32 %v9077_v54, %v9076_v15  ;;  %10969 = vmatprep.mubr.msk.f32.mxu0 %vm593_vm0, %v1100_v30  ;;  %2106 = vmatprep.mubr.f32.mxu1 %v1971_v11  ;;  %v1727_v30 = vld [vmem:[#allocation6 + $0x28] sm:$0xff]  ;;  %v1982_v11 = vld [vmem:[#allocation4 + $0x760] sm:$0xff] }
 0x33b   :  { %12464 = vmatpush3.bf16.msra.mxu0 %v14526_v24  ;;  %v1979_v54 = vld [vmem:[#allocation4 + $0x748] sm:$0xff] }
 0x33c   :  { %v1105_v43 = vadd.f32 %v9078_v41, %v14701_v0  ;;  %v9079_v21 = vpop.f32.mrb[108].mxu0  ;;  %12466 = vmatprep.subr.bf16.mxu0 %v14529_v28  ;;  %v14753_v41 = vpack.c.bf16 %v1727_v30, %v1726_v22  ;;  %v1990_v22 = vld [vmem:[#allocation4 + $0x7a0] sm:$0xff] }
 0x33d   :  { %v9080_v46 = vpop.f32.mrb[109].mxu0  ;;  %2107 = vmatmul.mubr.f32.gmra.mrb[62].mxu1 %v1970_v25 }
 0x33e   :  { %v9081_v49 = vadd.f32 %v9080_v46, %v9079_v21  ;;  %10970 = vmatmul.mubr.msk.f32.gmra.mrb[68].mxu0 %vm593_vm0, %v1105_v43  ;;  %2111 = vmatprep.mubr.f32.mxu1 %v1975_v29  ;;  %v1978_v43 = vld [vmem:[#allocation4 + $0x740] sm:$0xff]  ;;  %v1983_v46 = vld [vmem:[#allocation4 + $0x768] sm:$0xff] }
 0x33f   :  { %12468 = vmatpush3.bf16.msra.mxu0 %v14532_v36  ;;  %v1986_v29 = vld [vmem:[#allocation4 + $0x780] sm:$0xff] }
 0x340   :  { %v1110_v61 = vadd.f32 %v9081_v49, %v14703_v9  ;;  %v9082_v0 = vpop.f32.mrb[110].mxu0  ;;  %12470 = vmatprep.subr.bf16.mxu0 %v14535_v40 }
 0x341   :  { %v9083_v56 = vpop.f32.mrb[111].mxu0  ;;  %2112 = vmatmul.mubr.f32.gmra.mrb[64].mxu1 %v1974_v18 }
 0x342   :  { %v9084_v23 = vadd.f32 %v9083_v56, %v9082_v0  ;;  %10972 = vmatprep.mubr.msk.f32.mxu0 %vm593_vm0, %v1110_v61  ;;  %2116 = vmatprep.mubr.f32.mxu1 %v1979_v54  ;;  %v1987_v0 = vld [vmem:[#allocation4 + $0x788] sm:$0xff] }
 0x343   :  { %12472 = vmatpush3.bf16.msra.mxu0 %v14538_v48 }
 0x344   :  { %v1115_v10 = vadd.f32 %v9084_v23, %v14705_v37  ;;  %v9085_v9 = vpop.f32.mrb[112].mxu0  ;;  %12474 = vmatprep.subr.bf16.mxu0 %v14541_v52 }
 0x345   :  { %v9086_v31 = vpop.f32.mrb[113].mxu0  ;;  %2117 = vmatmul.mubr.f32.gmra.mrb[66].mxu1 %v1978_v43 }
 0x346   :  { %v9087_v15 = vadd.f32 %v9086_v31, %v9085_v9  ;;  %10973 = vmatmul.mubr.msk.f32.gmra.mrb[70].mxu0 %vm593_vm0, %v1115_v10  ;;  %2121 = vmatprep.mubr.f32.mxu1 %v1983_v46 }
 0x347   :  { %12476 = vmatpush3.bf16.msra.mxu0 %v14544_v60 }
 0x348   :  { %v1120_v37 = vadd.f32 %v9087_v15, %v14661_v35  ;;  %v9088_v34 = vpop.f32.mrb[114].mxu0  ;;  %12478 = vmatprep.subr.bf16.mxu0 %v14547_v62 }
 0x349   :  { %v9089_v6 = vpop.f32.mrb[115].mxu0  ;;  %2122 = vmatmul.mubr.f32.gmra.mrb[68].mxu1 %v1982_v11 }
 0x34a   :  { %v9090_v21 = vadd.f32 %v9089_v6, %v9088_v34  ;;  %10975 = vmatprep.mubr.msk.f32.mxu0 %vm593_vm0, %v1120_v37  ;;  %2126 = vmatprep.mubr.f32.mxu1 %v1987_v0  ;;  %v1994_v34 = vld [vmem:[#allocation4 + $0x7c0] sm:$0xff]  ;;  %v1940_v0 = vld [vmem:[#allocation4 + $0x610] sm:$0xff] }
 0x34b   :  { %12480 = vmatpush3.bf16.msra.mxu0 %v14550_v5 }
 0x34c   :  { %v1125_v58 = vadd.f32 %v9090_v21, %v14663_v42  ;;  %v9091_v49 = vpop.f32.mrb[116].mxu0  ;;  %12482 = vmatprep.subr.bf16.mxu0 %v14753_v41  ;;  %v1991_v42 = vld [vmem:[#allocation4 + $0x7a8] sm:$0xff] }
 0x34d   :  { %v9092_v35 = vpop.f32.mrb[117].mxu0  ;;  %2127 = vmatmul.mubr.f32.gmra.mrb[70].mxu1 %v1986_v29  ;;  %v1944_v29 = vld [vmem:[#allocation4 + $0x630] sm:$0xff] }
 0x34e   :  { %v9093_v61 = vadd.f32 %v9092_v35, %v9091_v49  ;;  %10976 = vmatmul.mubr.msk.f32.gmra.mrb[72].mxu0 %vm593_vm0, %v1125_v58  ;;  %2131 = vmatprep.mubr.f32.mxu1 %v1991_v42  ;;  %v1998_v58 = vld [vmem:[#allocation4 + $0x7e0] sm:$0xff]  ;;  %v1378_v42 = vld [vmem:[#allocation4 + $0x438] sm:$0xff] }
 0x350   :  { %v1130_v56 = vadd.f32 %v9093_v61, %v14665_v53  ;;  %v9094_v25 = vpop.f32.mrb[118].mxu0  ;;  %v1995_v53 = vld [vmem:[#allocation4 + $0x7c8] sm:$0xff] }
 0x351   :  { %v9095_v23 = vpop.f32.mrb[119].mxu0  ;;  %2132 = vmatmul.mubr.f32.gmra.mrb[72].mxu1 %v1990_v22  ;;  %v1952_v22 = vld [vmem:[#allocation4 + $0x670] sm:$0xff] }
 0x352   :  { %v9096_v10 = vadd.f32 %v9095_v23, %v9094_v25  ;;  %10978 = vmatprep.mubr.msk.f32.mxu0 %vm593_vm0, %v1130_v56  ;;  %2136 = vmatprep.mubr.f32.mxu1 %v1995_v53  ;;  %v1374_v23 = vld [vmem:[#allocation4 + $0x418] sm:$0xff]  ;;  %v1381_v53 = vld [vmem:[#allocation4 + $0x450] sm:$0xff] }
 0x354   :  { %v1135_v9 = vadd.f32 %v9096_v10, %v14667_v55  ;;  %v9097_v31 = vpop.f32.mrb[120].mxu0  ;;  %v1999_v55 = vld [vmem:[#allocation4 + $0x7e8] sm:$0xff]  ;;  %v1373_v10 = vld [vmem:[#allocation4 + $0x410] sm:$0xff] }
 0x355   :  { %v9098_v18 = vpop.f32.mrb[121].mxu0  ;;  %2137 = vmatmul.mubr.f32.gmra.mrb[74].mxu1 %v1994_v34  ;;  %v1390_v34 = vld [vmem:[#allocation4 + $0x498] sm:$0xff] }
 0x356   :  { %v9099_v30 = vadd.f32 %v9098_v18, %v9097_v31  ;;  %10979 = vmatmul.mubr.msk.f32.gmra.mrb[74].mxu0 %vm593_vm0, %v1135_v9  ;;  %2141 = vmatprep.mubr.f32.mxu1 %v1999_v55  ;;  %v1948_v9 = vld [vmem:[#allocation4 + $0x650] sm:$0xff]  ;;  %v1382_v18 = vld [vmem:[#allocation4 + $0x458] sm:$0xff] }
 0x357   :  { %v1377_v31 = vld [vmem:[#allocation4 + $0x430] sm:$0xff]  ;;  %v1965_v55 = vld [vmem:[#allocation4 + $0x6d8] sm:$0xff] }
 0x358   :  { %v1140_v15 = vadd.f32 %v9099_v30, %v14669_v63  ;;  %v9100_v54 = vpop.f32.mrb[122].mxu0  ;;  %v1941_v63 = vld [vmem:[#allocation4 + $0x618] sm:$0xff] }
 0x359   :  { %v9101_v37 = vpop.f32.mrb[123].mxu0  ;;  %2142 = vmatmul.mubr.f32.gmra.mrb[76].mxu1 %v1998_v58  ;;  %v1957_v30 = vld [vmem:[#allocation4 + $0x698] sm:$0xff]  ;;  %v1393_v58 = vld [vmem:[#allocation4 + $0x4b0] sm:$0xff] }
 0x35a   :  { %v9102_v6 = vadd.f32 %v9101_v37, %v9100_v54  ;;  %10981 = vmatprep.mubr.msk.f32.mxu0 %vm593_vm0, %v1140_v15  ;;  %2211 = vmatprep.mubr.f32.mxu1 %v1941_v63  ;;  %v1386_v15 = vld [vmem:[#allocation4 + $0x478] sm:$0xff]  ;;  %v1956_v54 = vld [vmem:[#allocation4 + $0x690] sm:$0xff] }
 0x35b   :  { %v1385_v37 = vld [vmem:[#allocation4 + $0x470] sm:$0xff] }
 0x35c   :  { %v1145_v43 = vadd.f32 %v9102_v6, %v14671_v17  ;;  %v9103_v21 = vpop.f32.mrb[124].mxu0  ;;  %v1945_v17 = vld [vmem:[#allocation4 + $0x638] sm:$0xff]  ;;  %v1960_v6 = vld [vmem:[#allocation4 + $0x6b0] sm:$0xff] }
 0x35d   :  { %v9104_v46 = vpop.f32.mrb[125].mxu0  ;;  %2212 = vmatmul.mubr.f32.vlgmr.msra.gmra.mrb[78].mxu1 %v1940_v0  ;;  %v1397_v63 = vld [vmem:[#allocation4 + $0x4d0] sm:$0xff] }
 0x35e   :  { %v9105_v49 = vadd.f32 %v9104_v46, %v9103_v21  ;;  %10982 = vmatmul.mubr.msk.f32.gmra.mrb[76].mxu0 %vm593_vm0, %v1145_v43  ;;  %2216 = vmatprep.mubr.f32.mxu1 %v1945_v17  ;;  %v1389_v43 = vld [vmem:[#allocation4 + $0x490] sm:$0xff]  ;;  %v1394_v21 = vld [vmem:[#allocation4 + $0x4b8] sm:$0xff] }
 0x35f   :  { %12588 = vmatpush3.bf16.msra.mxu1 %v14506_v57  ;;  %v1964_v46 = vld [vmem:[#allocation4 + $0x6d0] sm:$0xff] }
 0x360   :  { %v1150_v35 = vadd.f32 %v9105_v49, %v14673_v2  ;;  %v9106_v11 = vpop.f32.mrb[126].mxu0  ;;  %v1949_v2 = vld [vmem:[#allocation4 + $0x658] sm:$0xff]  ;;  %12590 = vmatprep.subr.bf16.mxu1 %v14510_v59  ;;  %v1405_v0 = vld [vmem:[#allocation4 + $0x510] sm:$0xff] }
 0x361   :  { %v9107_v61 = vpop.f32.mrb[127].mxu0  ;;  %2217 = vmatmul.mubr.f32.gmra.mrb[80].mxu1 %v1944_v29  ;;  %v1398_v49 = vld [vmem:[#allocation4 + $0x4d8] sm:$0xff]  ;;  %v1409_v17 = vld [vmem:[#allocation4 + $0x530] sm:$0xff] }
 0x362   :  { %v9108_v56 = vadd.f32 %v9107_v61, %v9106_v11  ;;  %10984 = vmatprep.mubr.msk.f32.mxu0 %vm593_vm0, %v1150_v35  ;;  %2221 = vmatprep.mubr.f32.mxu1 %v1949_v2  ;;  %v1402_v35 = vld [vmem:[#allocation4 + $0x4f8] sm:$0xff]  ;;  %v1401_v11 = vld [vmem:[#allocation4 + $0x4f0] sm:$0xff] }
 0x363   :  { %12592 = vmatpush3.bf16.msra.mxu1 %v14514_v1  ;;  %v1406_v61 = vld [vmem:[#allocation4 + $0x518] sm:$0xff]  ;;  %v1417_v2 = vld [vmem:[#allocation4 + $0x570] sm:$0xff] }
 0x364   :  { %v1155_v25 = vadd.f32 %v9108_v56, %v14675_v47  ;;  %v1953_v47 = vld [vmem:[#allocation4 + $0x678] sm:$0xff]  ;;  %12594 = vmatprep.subr.bf16.mxu1 %v14517_v4 }
 0x365   :  { %2222 = vmatmul.mubr.f32.gmra.mrb[82].mxu1 %v1948_v9  ;;  %v1410_v56 = vld [vmem:[#allocation4 + $0x538] sm:$0xff] }
 0x366   :  { %10985 = vmatmul.mubr.msk.f32.gmra.mrb[78].mxu0 %vm593_vm0, %v1155_v25  ;;  %2226 = vmatprep.mubr.f32.mxu1 %v1953_v47  ;;  %v1414_v25 = vld [vmem:[#allocation4 + $0x558] sm:$0xff]  ;;  %v1425_v47 = vld [vmem:[#allocation4 + $0x5b0] sm:$0xff] }
 0x367   :  { %1644 = vmatprep.mubr.f32.mxu0 %v1374_v23  ;;  %12596 = vmatpush3.bf16.msra.mxu1 %v14520_v12  ;;  %v1413_v23 = vld [vmem:[#allocation4 + $0x550] sm:$0xff]  ;;  %v1418_v29 = vld [vmem:[#allocation4 + $0x578] sm:$0xff] }
 0x368   :  { %12598 = vmatprep.subr.bf16.mxu1 %v14523_v16  ;;  %v1426_v9 = vld [vmem:[#allocation4 + $0x5b8] sm:$0xff] }
 0x369   :  { %2227 = vmatmul.mubr.f32.gmra.mrb[84].mxu1 %v1952_v22  ;;  %v1434_v22 = vld [vmem:[#allocation4 + $0x5f8] sm:$0xff] }
 0x36a   :  { %1645 = vmatmul.mubr.f32.vlgmr.msra.gmra.mrb[128].mxu0 %v1373_v10  ;;  %2231 = vmatprep.mubr.f32.mxu1 %v1957_v30  ;;  %v1422_v10 = vld [vmem:[#allocation4 + $0x598] sm:$0xff]  ;;  %v1433_v30 = vld [vmem:[#allocation4 + $0x5f0] sm:$0xff] }
 0x36b   :  { %1649 = vmatprep.mubr.f32.mxu0 %v1378_v42  ;;  %12484 = vmatpush3.bf16.msra.mxu0 %v14753_v41  ;;  %v1961_v41 = vld [vmem:[#allocation4 + $0x6b8] sm:$0xff]  ;;  %v1421_v42 = vld [vmem:[#allocation4 + $0x590] sm:$0xff] }
 0x36c   :  { %12486 = vmatprep.subr.bf16.mxu0 %v14441_v3  ;;  %12600 = vmatpush3.bf16.msra.mxu1 %v14526_v24 }
 0x36d   :  { %12602 = vmatprep.subr.bf16.mxu1 %v14529_v28  ;;  %2232 = vmatmul.mubr.f32.gmra.mrb[86].mxu1 %v1956_v54 }
 0x36e   :  { %1650 = vmatmul.mubr.f32.gmra.mrb[130].mxu0 %v1377_v31  ;;  %2236 = vmatprep.mubr.f32.mxu1 %v1961_v41  ;;  %v1430_v31 = vld [vmem:[#allocation4 + $0x5d8] sm:$0xff] }
 0x36f   :  { %1654 = vmatprep.mubr.f32.mxu0 %v1382_v18  ;;  %v1429_v18 = vld [vmem:[#allocation4 + $0x5d0] sm:$0xff]  ;;  %v1969_v41 = vld [vmem:[#allocation4 + $0x6f8] sm:$0xff] }
 0x370   :  { %12604 = vmatpush3.bf16.msra.mxu1 %v14532_v36 }
 0x371   :  { %12606 = vmatprep.subr.bf16.mxu1 %v14535_v40  ;;  %2237 = vmatmul.mubr.f32.gmra.mrb[88].mxu1 %v1960_v6 }
 0x372   :  { %1655 = vmatmul.mubr.f32.gmra.mrb[132].mxu0 %v1381_v53  ;;  %2241 = vmatprep.mubr.f32.mxu1 %v1965_v55  ;;  %v9159_v53 = vpop.f32.mrb[16].mxu1  ;;  %v1973_v55 = vld [vmem:[#allocation4 + $0x718] sm:$0xff] }
 0x373   :  { %1659 = vmatprep.mubr.f32.mxu0 %v1386_v15  ;;  %v9160_v15 = vpop.f32.mrb[17].mxu1 }
 0x374   :  { %12608 = vmatpush3.bf16.msra.mxu1 %v14538_v48  ;;  %v14790_v54 = vadd.f32 %v9160_v15, %v9159_v53  ;;  %v1993_v53 = vld [vmem:[#allocation4 + $0x7b8] sm:$0xff] }
 0x375   :  { %12610 = vmatprep.subr.bf16.mxu1 %v14541_v52  ;;  %2242 = vmatmul.mubr.f32.gmra.mrb[90].mxu1 %v1964_v46 }
 0x376   :  { %1660 = vmatmul.mubr.f32.gmra.mrb[134].mxu0 %v1385_v37  ;;  %2246 = vmatprep.mubr.f32.mxu1 %v1969_v41  ;;  %v1968_v37 = vld [vmem:[#allocation4 + $0x6f0] sm:$0xff] }
 0x377   :  { %1664 = vmatprep.mubr.f32.mxu0 %v1390_v34  ;;  %v9162_v34 = vpop.f32.mrb[18].mxu1  ;;  %v1992_v41 = vld [vmem:[#allocation4 + $0x7b0] sm:$0xff] }
 0x378   :  { %12612 = vmatpush3.bf16.msra.mxu1 %v14544_v60  ;;  %v9163_v6 = vpop.f32.mrb[19].mxu1 }
 0x379   :  { %12614 = vmatprep.subr.bf16.mxu1 %v14547_v62  ;;  %2247 = vmatmul.mubr.f32.gmra.mrb[92].mxu1 %v1968_v37  ;;  %v9165_v46 = vpop.f32.mrb[20].mxu1 }
 0x37a   :  { %1665 = vmatmul.mubr.f32.gmra.mrb[136].mxu0 %v1389_v43  ;;  %v14792_v43 = vadd.f32 %v9163_v6, %v9162_v34  ;;  %2251 = vmatprep.mubr.f32.mxu1 %v1973_v55  ;;  %v1997_v6 = vld [vmem:[#allocation4 + $0x7d8] sm:$0xff] }
 0x37b   :  { %1669 = vmatprep.mubr.f32.mxu0 %v1394_v21  ;;  %v1972_v21 = vld [vmem:[#allocation4 + $0x710] sm:$0xff] }
 0x37c   :  { %12616 = vmatpush3.bf16.msra.mxu1 %v14550_v5 }
 0x37d   :  { %12622 = vmatprep.subr.bf16.mxu1 %v14441_v3  ;;  %2252 = vmatmul.mubr.f32.gmra.mrb[94].mxu1 %v1972_v21  ;;  %v1996_v21 = vld [vmem:[#allocation4 + $0x7d0] sm:$0xff] }
 0x37e   :  { %1670 = vmatmul.mubr.f32.gmra.mrb[138].mxu0 %v1393_v58  ;;  %v9166_v58 = vpop.f32.mrb[21].mxu1 }
 0x37f   :  { %1674 = vmatprep.mubr.f32.mxu0 %v1398_v49  ;;  %v1977_v49 = vld [vmem:[#allocation4 + $0x738] sm:$0xff] }
 0x380   :  { %2256 = vmatprep.mubr.f32.mxu1 %v1977_v49  ;;  %v2001_v49 = vld [vmem:[#allocation4 + $0x7f8] sm:$0xff] }
 0x382   :  { %1675 = vmatmul.mubr.f32.gmra.mrb[140].mxu0 %v1397_v63  ;;  %v14794_v63 = vadd.f32 %v9166_v58, %v9165_v46 }
 0x383   :  { %1679 = vmatprep.mubr.f32.mxu0 %v1402_v35  ;;  %v1976_v35 = vld [vmem:[#allocation4 + $0x730] sm:$0xff] }
 0x384   :  { %2257 = vmatmul.mubr.f32.gmra.mrb[96].mxu1 %v1976_v35 }
 0x386   :  { %1680 = vmatmul.mubr.f32.gmra.mrb[142].mxu0 %v1401_v11  ;;  %v9168_v11 = vpop.f32.mrb[22].mxu1 }
 0x387   :  { %1684 = vmatprep.mubr.f32.mxu0 %v1406_v61  ;;  %v9169_v61 = vpop.f32.mrb[23].mxu1 }
 0x38a   :  { %1685 = vmatmul.mubr.f32.gmra.mrb[144].mxu0 %v1405_v0  ;;  %v1981_v0 = vld [vmem:[#allocation4 + $0x758] sm:$0xff] }
 0x38b   :  { %1689 = vmatprep.mubr.f32.mxu0 %v1410_v56  ;;  %v14796_v56 = vadd.f32 %v9169_v61, %v9168_v11  ;;  %2261 = vmatprep.mubr.f32.mxu1 %v1981_v0  ;;  %v2000_v11 = vld [vmem:[#allocation4 + $0x7f0] sm:$0xff] }
 0x38e   :  { %1690 = vmatmul.mubr.f32.gmra.mrb[146].mxu0 %v1409_v17  ;;  %v1980_v17 = vld [vmem:[#allocation4 + $0x750] sm:$0xff] }
 0x38f   :  { %1694 = vmatprep.mubr.f32.mxu0 %v1414_v25  ;;  %2262 = vmatmul.mubr.f32.gmra.mrb[98].mxu1 %v1980_v17  ;;  %v9171_v25 = vpop.f32.mrb[24].mxu1 }
 0x392   :  { %1695 = vmatmul.mubr.f32.gmra.mrb[148].mxu0 %v1413_v23  ;;  %v9172_v23 = vpop.f32.mrb[25].mxu1 }
 0x393   :  { %1699 = vmatprep.mubr.f32.mxu0 %v1418_v29  ;;  %v1985_v29 = vld [vmem:[#allocation4 + $0x778] sm:$0xff] }
 0x394   :  { %2266 = vmatprep.mubr.f32.mxu1 %v1985_v29 }
 0x396   :  { %1700 = vmatmul.mubr.f32.gmra.mrb[150].mxu0 %v1417_v2  ;;  %v14798_v2 = vadd.f32 %v9172_v23, %v9171_v25 }
 0x397   :  { %1704 = vmatprep.mubr.f32.mxu0 %v1422_v10  ;;  %v1984_v10 = vld [vmem:[#allocation4 + $0x770] sm:$0xff] }
 0x398   :  { %2267 = vmatmul.mubr.f32.gmra.mrb[100].mxu1 %v1984_v10 }
 0x39a   :  { %1705 = vmatmul.mubr.f32.gmra.mrb[152].mxu0 %v1421_v42  ;;  %v9174_v42 = vpop.f32.mrb[26].mxu1 }
 0x39b   :  { %1709 = vmatprep.mubr.f32.mxu0 %v1426_v9  ;;  %v9175_v9 = vpop.f32.mrb[27].mxu1 }
 0x39e   :  { %1710 = vmatmul.mubr.f32.gmra.mrb[154].mxu0 %v1425_v47  ;;  %v1989_v47 = vld [vmem:[#allocation4 + $0x798] sm:$0xff] }
 0x39f   :  { %1714 = vmatprep.mubr.f32.mxu0 %v1430_v31  ;;  %v14800_v31 = vadd.f32 %v9175_v9, %v9174_v42  ;;  %2271 = vmatprep.mubr.f32.mxu1 %v1989_v47 }
 0x3a2   :  { %1715 = vmatmul.mubr.f32.gmra.mrb[156].mxu0 %v1429_v18  ;;  %v1988_v18 = vld [vmem:[#allocation4 + $0x790] sm:$0xff] }
 0x3a3   :  { %1719 = vmatprep.mubr.f32.mxu0 %v1434_v22  ;;  %2272 = vmatmul.mubr.f32.gmra.mrb[102].mxu1 %v1988_v18  ;;  %v9177_v22 = vpop.f32.mrb[28].mxu1 }
 0x3a4   :  { %2276 = vmatprep.mubr.f32.mxu1 %v1993_v53 }
 0x3a6   :  { %1720 = vmatmul.mubr.f32.gmra.mrb[158].mxu0 %v1433_v30  ;;  %v9178_v30 = vpop.f32.mrb[29].mxu1 }
 0x3a7   :  { %v14802_v15 = vadd.f32 %v9178_v30, %v9177_v22  ;;  %2277 = vmatmul.mubr.f32.gmra.mrb[104].mxu1 %v1992_v41  ;;  %v9180_v37 = vpop.f32.mrb[30].mxu1 }
 0x3a8   :  { %v9181_v34 = vpop.f32.mrb[31].mxu1  ;;  %2281 = vmatprep.mubr.f32.mxu1 %v1997_v6 }
 0x3a9   :  { %v14804_v55 = vadd.f32 %v9181_v34, %v9180_v37  ;;  %v9183_v46 = vpop.f32.mrb[32].mxu1 }
 0x3aa   :  { %v9184_v58 = vpop.f32.mrb[33].mxu1 }
 0x3ab   :  { %2282 = vmatmul.mubr.f32.gmra.mrb[106].mxu1 %v1996_v21  ;;  %v14806_v35 = vadd.f32 %v9184_v58, %v9183_v46  ;;  %v9186_v61 = vpop.f32.mrb[34].mxu1 }
 0x3ac   :  { %2286 = vmatprep.mubr.f32.mxu1 %v2001_v49  ;;  %v9187_v0 = vpop.f32.mrb[35].mxu1 }
 0x3ad   :  { %v14808_v17 = vadd.f32 %v9187_v0, %v9186_v61 }
 0x3ae   :  { %v9189_v25 = vpop.f32.mrb[36].mxu1 }
 0x3af   :  { %2287 = vmatmul.mubr.f32.gmra.mrb[108].mxu1 %v2000_v11  ;;  %v9190_v23 = vpop.f32.mrb[37].mxu1 }
 0x3b0   :  { %v14810_v29 = vadd.f32 %v9190_v23, %v9189_v25 }
 0x3b2   :  { %v9192_v10 = vpop.f32.mrb[38].mxu1 }
 0x3b3   :  { %v9193_v42 = vpop.f32.mrb[39].mxu1 }
 0x3b4   :  { %v14812_v9 = vadd.f32 %v9193_v42, %v9192_v10 }
 0x3da   :  { %v9195_v47 = vpop.f32.mrb[40].mxu1 }
 0x3db   :  { %v9196_v18 = vpop.f32.mrb[41].mxu1 }
 0x3dc   :  { %v14814_v22 = vadd.f32 %v9196_v18, %v9195_v47 }
 0x3df   :  { %v9198_v30 = vpop.f32.mrb[42].mxu1 }
 0x3e0   :  { %v9199_v53 = vpop.f32.mrb[43].mxu1 }
 0x3e1   :  { %v14816_v41 = vadd.f32 %v9199_v53, %v9198_v30 }
 0x3e3   :  { %v9201_v37 = vpop.f32.mrb[44].mxu1 }
 0x3e4   :  { %v9202_v34 = vpop.f32.mrb[45].mxu1 }
 0x3e5   :  { %v14818_v6 = vadd.f32 %v9202_v34, %v9201_v37 }
 0x3e7   :  { %v9204_v21 = vpop.f32.mrb[46].mxu1 }
 0x3e8   :  { %v9205_v46 = vpop.f32.mrb[47].mxu1 }
 0x3e9   :  { %v14820_v58 = vadd.f32 %v9205_v46, %v9204_v21 }
 0x3ee   :  { %v9340_v49 = vpop.f32.mrb[48].mxu1 }
 0x3ef   :  { %v9341_v11 = vpop.f32.mrb[49].mxu1 }
 0x3f0   :  { %v9342_v61 = vadd.f32 %v9341_v11, %v9340_v49 }
 0x3f2   :  { %v9343_v0 = vpop.f32.mrb[50].mxu1 }
 0x3f3   :  { %v9344_v25 = vpop.f32.mrb[51].mxu1 }
 0x3f4   :  { %v9345_v23 = vadd.f32 %v9344_v25, %v9343_v0 }
 0x3fc   :  { %v9346_v10 = vpop.f32.mrb[52].mxu1 }
 0x3fd   :  { %v9347_v42 = vpop.f32.mrb[53].mxu1 }
 0x3fe   :  { %v14822_v47 = vadd.f32 %v9347_v42, %v9346_v10 }
 0x400   :  { %v9349_v18 = vpop.f32.mrb[54].mxu1 }
 0x401   :  { %v9350_v30 = vpop.f32.mrb[55].mxu1 }
 0x402   :  { %v14824_v53 = vadd.f32 %v9350_v30, %v9349_v18 }
 0x404   :  { %v9352_v37 = vpop.f32.mrb[56].mxu1 }
 0x405   :  { %v9353_v34 = vpop.f32.mrb[57].mxu1 }
 0x406   :  { %v14826_v5 = vadd.f32 %v9353_v34, %v9352_v37 }
 0x408   :  { %v9355_v21 = vpop.f32.mrb[58].mxu1 }
 0x409   :  { %v9356_v46 = vpop.f32.mrb[59].mxu1 }
 0x40a   :  { %v14828_v62 = vadd.f32 %v9356_v46, %v9355_v21 }
 0x40c   :  { %v9358_v49 = vpop.f32.mrb[60].mxu1 }
 0x40d   :  { %v9359_v11 = vpop.f32.mrb[61].mxu1 }
 0x40e   :  { %v14830_v60 = vadd.f32 %v9359_v11, %v9358_v49 }
 0x410   :  { %v9361_v0 = vpop.f32.mrb[62].mxu1 }
 0x411   :  { %v9362_v25 = vpop.f32.mrb[63].mxu1 }
 0x412   :  { %v14832_v10 = vadd.f32 %v9362_v25, %v9361_v0 }
 0x414   :  { %v9364_v42 = vpop.f32.mrb[64].mxu1 }
 0x415   :  { %v9365_v52 = vpop.f32.mrb[65].mxu1 }
 0x416   :  { %v14834_v18 = vadd.f32 %v9365_v52, %v9364_v42 }
 0x418   :  { %v9367_v30 = vpop.f32.mrb[66].mxu1 }
 0x419   :  { %v9368_v48 = vpop.f32.mrb[67].mxu1 }
 0x41a   :  { %v14836_v37 = vadd.f32 %v9368_v48, %v9367_v30 }
 0x41c   :  { %v9370_v34 = vpop.f32.mrb[68].mxu1 }
 0x41d   :  { %v9371_v40 = vpop.f32.mrb[69].mxu1 }
 0x41e   :  { %v14838_v21 = vadd.f32 %v9371_v40, %v9370_v34 }
 0x420   :  { %v9373_v46 = vpop.f32.mrb[70].mxu1 }
 0x421   :  { %v9374_v36 = vpop.f32.mrb[71].mxu1 }
 0x422   :  { %v14840_v49 = vadd.f32 %v9374_v36, %v9373_v46 }
 0x424   :  { %v9376_v11 = vpop.f32.mrb[72].mxu1 }
 0x425   :  { %v9377_v28 = vpop.f32.mrb[73].mxu1 }
 0x426   :  { %v14842_v0 = vadd.f32 %v9377_v28, %v9376_v11 }
 0x428   :  { %v9379_v25 = vpop.f32.mrb[74].mxu1 }
 0x429   :  { %v9380_v24 = vpop.f32.mrb[75].mxu1 }
 0x42a   :  { %v14844_v52 = vadd.f32 %v9380_v24, %v9379_v25 }
 0x42c   :  { %v9382_v42 = vpop.f32.mrb[76].mxu1 }
 0x42d   :  { %v9383_v16 = vpop.f32.mrb[77].mxu1 }
 0x42e   :  { %v14846_v48 = vadd.f32 %v9383_v16, %v9382_v42 }
 0x430   :  { %v9417_v30 = vpop.f32.mrb[78].mxu1 }
 0x431   :  { %v9418_v12 = vpop.f32.mrb[79].mxu1 }
 0x432   :  { %v14848_v40 = vadd.f32 %v9418_v12, %v9417_v30 }
 0x434   :  { %15894 = vst [vmem:[#allocation40_spill] sm:$0xff] %v14848_v40  ;;  %v9420_v34 = vpop.f32.mrb[80].mxu1 }
 0x435   :  { %v9421_v4 = vpop.f32.mrb[81].mxu1 }
 0x436   :  { %v9422_v46 = vadd.f32 %v9421_v4, %v9420_v34 }
 0x438   :  { %v14850_v28 = vadd.f32 %v9422_v46, %v9342_v61  ;;  %v9423_v11 = vpop.f32.mrb[82].mxu1 }
 0x439   :  { %v9424_v57 = vpop.f32.mrb[83].mxu1 }
 0x43a   :  { %v9425_v51 = vadd.f32 %v9424_v57, %v9423_v11 }
 0x43c   :  { %v14854_v12 = vadd.f32 %v9425_v51, %v9345_v23  ;;  %v14856_v30 = vpop.f32.mrb[84].mxu1 }
 0x43d   :  { %v9239_v36 = vpop.f32.mrb[128].mxu0  ;;  %v14858_v40 = vpop.f32.mrb[85].mxu1 }
 0x43e   :  { %v9240_v1 = vpop.f32.mrb[129].mxu0 }
 0x43f   :  { %v9241_v59 = vadd.f32 %v9240_v1, %v9239_v36 }
 0x441   :  { %v1647_v24 = vadd.f32 %v9241_v59, %v14790_v54  ;;  %v9242_v25 = vpop.f32.mrb[130].mxu0  ;;  %v9429_v59 = vpop.f32.mrb[86].mxu1 }
 0x442   :  { %v9243_v16 = vpop.f32.mrb[131].mxu0  ;;  %v9430_v57 = vpop.f32.mrb[87].mxu1 }
 0x443   :  { %v9244_v42 = vadd.f32 %v9243_v16, %v9242_v25  ;;  %10991 = vmatprep.mubr.msk.f32.mxu0 %vm593_vm0, %v1647_v24  ;;  %v9431_v51 = vadd.f32 %v9430_v57, %v9429_v59 }
 0x444   :  { %v9432_v11 = vpop.f32.mrb[88].mxu1 }
 0x445   :  { %v1652_v1 = vadd.f32 %v9244_v42, %v14792_v43  ;;  %v9245_v4 = vpop.f32.mrb[132].mxu0  ;;  %v14867_v43 = vadd.f32 %v9431_v51, %v14824_v53  ;;  %v9433_v24 = vpop.f32.mrb[89].mxu1 }
 0x446   :  { %v9246_v61 = vpop.f32.mrb[133].mxu0 }
 0x447   :  { %v9247_v34 = vadd.f32 %v9246_v61, %v9245_v4  ;;  %10992 = vmatmul.mubr.msk.f32.vlgmr.msra.gmra.mrb[64].mxu0 %vm593_vm0, %v1652_v1 }
 0x448   :  { %12488 = vmatpush3.bf16.msra.mxu0 %v14443_v7  ;;  %v9435_v61 = vpop.f32.mrb[90].mxu1 }
 0x449   :  { %v1657_v54 = vadd.f32 %v9247_v34, %v14794_v63  ;;  %v9248_v36 = vpop.f32.mrb[134].mxu0  ;;  %12490 = vmatprep.subr.bf16.mxu0 %v14445_v8  ;;  %v9434_v63 = vadd.f32 %v9433_v24, %v9432_v11  ;;  %v9436_v53 = vpop.f32.mrb[91].mxu1 }
 0x44a   :  { %v9249_v23 = vpop.f32.mrb[135].mxu0 }
 0x44b   :  { %v9250_v46 = vadd.f32 %v9249_v23, %v9248_v36  ;;  %10994 = vmatprep.mubr.msk.f32.mxu0 %vm593_vm0, %v1657_v54  ;;  %v14874_v4 = vadd.f32 %v9434_v63, %v14826_v5 }
 0x44c   :  { %12492 = vmatpush3.bf16.msra.mxu0 %v14450_v13 }
 0x44d   :  { %v1662_v25 = vadd.f32 %v9250_v46, %v14796_v56  ;;  %v9251_v16 = vpop.f32.mrb[136].mxu0  ;;  %12494 = vmatprep.subr.bf16.mxu0 %v14454_v14  ;;  %v9437_v56 = vadd.f32 %v9436_v53, %v9435_v61 }
 0x44e   :  { %v9252_v42 = vpop.f32.mrb[137].mxu0 }
 0x44f   :  { %v9253_v1 = vadd.f32 %v9252_v42, %v9251_v16  ;;  %10995 = vmatmul.mubr.msk.f32.gmra.mrb[66].mxu0 %vm593_vm0, %v1662_v25  ;;  %v14881_v36 = vadd.f32 %v9437_v56, %v14828_v62 }
 0x450   :  { %12496 = vmatpush3.bf16.msra.mxu0 %v14458_v19 }
 0x451   :  { %v1667_v34 = vadd.f32 %v9253_v1, %v14798_v2  ;;  %v9254_v59 = vpop.f32.mrb[138].mxu0  ;;  %12498 = vmatprep.subr.bf16.mxu0 %v14462_v20 }
 0x452   :  { %v9255_v57 = vpop.f32.mrb[139].mxu0 }
 0x453   :  { %v9256_v54 = vadd.f32 %v9255_v57, %v9254_v59  ;;  %10997 = vmatprep.mubr.msk.f32.mxu0 %vm593_vm0, %v1667_v34 }
 0x454   :  { %12500 = vmatpush3.bf16.msra.mxu0 %v14466_v26 }
 0x455   :  { %v1672_v5 = vadd.f32 %v9256_v54, %v14800_v31  ;;  %v9257_v51 = vpop.f32.mrb[140].mxu0  ;;  %12502 = vmatprep.subr.bf16.mxu0 %v14470_v27 }
 0x456   :  { %v9258_v23 = vpop.f32.mrb[141].mxu0 }
 0x457   :  { %v9259_v2 = vadd.f32 %v9258_v23, %v9257_v51  ;;  %10998 = vmatmul.mubr.msk.f32.gmra.mrb[68].mxu0 %vm593_vm0, %v1672_v5 }
 0x458   :  { %12504 = vmatpush3.bf16.msra.mxu0 %v14474_v32 }
 0x459   :  { %v1677_v46 = vadd.f32 %v9259_v2, %v14802_v15  ;;  %v9260_v11 = vpop.f32.mrb[142].mxu0  ;;  %12506 = vmatprep.subr.bf16.mxu0 %v14478_v33 }
 0x45a   :  { %v9261_v62 = vpop.f32.mrb[143].mxu0 }
 0x45b   :  { %v9262_v24 = vadd.f32 %v9261_v62, %v9260_v11  ;;  %11000 = vmatprep.mubr.msk.f32.mxu0 %vm593_vm0, %v1677_v46 }
 0x45c   :  { %12508 = vmatpush3.bf16.msra.mxu0 %v14482_v38 }
 0x45d   :  { %v1682_v31 = vadd.f32 %v9262_v24, %v14804_v55  ;;  %v9263_v25 = vpop.f32.mrb[144].mxu0  ;;  %12510 = vmatprep.subr.bf16.mxu0 %v14486_v39 }
 0x45e   :  { %v9264_v16 = vpop.f32.mrb[145].mxu0 }
 0x45f   :  { %v9265_v63 = vadd.f32 %v9264_v16, %v9263_v25  ;;  %11001 = vmatmul.mubr.msk.f32.gmra.mrb[70].mxu0 %vm593_vm0, %v1682_v31 }
 0x460   :  { %12512 = vmatpush3.bf16.msra.mxu0 %v14490_v44 }
 0x461   :  { %v1687_v15 = vadd.f32 %v9265_v63, %v14806_v35  ;;  %v9266_v42 = vpop.f32.mrb[146].mxu0  ;;  %12514 = vmatprep.subr.bf16.mxu0 %v14494_v45 }
 0x462   :  { %v9267_v1 = vpop.f32.mrb[147].mxu0 }
 0x463   :  { %v9268_v61 = vadd.f32 %v9267_v1, %v9266_v42  ;;  %11003 = vmatprep.mubr.msk.f32.mxu0 %vm593_vm0, %v1687_v15  ;;  %v1939_v42 = vld [vmem:[#allocation4 + $0x608] sm:$0xff]  ;;  %v1938_v1 = vld [vmem:[#allocation4 + $0x600] sm:$0xff] }
 0x464   :  { %12516 = vmatpush3.bf16.msra.mxu0 %v14498_v50 }
 0x465   :  { %v1692_v55 = vadd.f32 %v9268_v61, %v14808_v17  ;;  %v9269_v53 = vpop.f32.mrb[148].mxu0 }
 0x466   :  { %v9270_v34 = vpop.f32.mrb[149].mxu0 }
 0x467   :  { %v9271_v59 = vadd.f32 %v9270_v34, %v9269_v53  ;;  %11004 = vmatmul.mubr.msk.f32.gmra.mrb[72].mxu0 %vm593_vm0, %v1692_v55 }
 0x469   :  { %v1697_v56 = vadd.f32 %v9271_v59, %v14810_v29  ;;  %v9272_v57 = vpop.f32.mrb[150].mxu0 }
 0x46a   :  { %v9273_v35 = vpop.f32.mrb[151].mxu0 }
 0x46b   :  { %v9274_v54 = vadd.f32 %v9273_v35, %v9272_v57  ;;  %11006 = vmatprep.mubr.msk.f32.mxu0 %vm593_vm0, %v1697_v56 }
 0x46d   :  { %v1702_v5 = vadd.f32 %v9274_v54, %v14812_v9  ;;  %v9275_v51 = vpop.f32.mrb[152].mxu0 }
 0x46e   :  { %v9276_v23 = vpop.f32.mrb[153].mxu0 }
 0x46f   :  { %v9277_v2 = vadd.f32 %v9276_v23, %v9275_v51  ;;  %11007 = vmatmul.mubr.msk.f32.gmra.mrb[74].mxu0 %vm593_vm0, %v1702_v5 }
 0x471   :  { %v1707_v17 = vadd.f32 %v9277_v2, %v14814_v22  ;;  %v9278_v46 = vpop.f32.mrb[154].mxu0 }
 0x472   :  { %v9279_v11 = vpop.f32.mrb[155].mxu0 }
 0x473   :  { %v9280_v62 = vadd.f32 %v9279_v11, %v9278_v46  ;;  %11009 = vmatprep.mubr.msk.f32.mxu0 %vm593_vm0, %v1707_v17 }
 0x475   :  { %v1712_v29 = vadd.f32 %v9280_v62, %v14816_v41  ;;  %v9281_v24 = vpop.f32.mrb[156].mxu0  ;;  %v9428_v41 = vadd.f32 %v14858_v40, %v14856_v30 }
 0x476   :  { %v9282_v31 = vpop.f32.mrb[157].mxu0 }
 0x477   :  { %v9283_v25 = vadd.f32 %v9282_v31, %v9281_v24  ;;  %11010 = vmatmul.mubr.msk.f32.gmra.mrb[76].mxu0 %vm593_vm0, %v1712_v29  ;;  %v14917_v61 = vadd.f32 %v9428_v41, %v14822_v47 }
 0x479   :  { %v1717_v9 = vadd.f32 %v9283_v25, %v14818_v6  ;;  %v9284_v16 = vpop.f32.mrb[158].mxu0  ;;  %v9438_v6 = vpop.f32.mrb[92].mxu1 }
 0x47a   :  { %v9285_v63 = vpop.f32.mrb[159].mxu0  ;;  %v9439_v55 = vpop.f32.mrb[93].mxu1 }
 0x47b   :  { %v9286_v15 = vadd.f32 %v9285_v63, %v9284_v16  ;;  %11012 = vmatprep.mubr.msk.f32.mxu0 %vm593_vm0, %v1717_v9  ;;  %v9440_v53 = vadd.f32 %v9439_v55, %v9438_v6  ;;  %v9441_v59 = vpop.f32.mrb[94].mxu1  ;;  %v2507_v6 = vld [vmem:[#allocation4 + $0x810] sm:$0xff]  ;;  %v2512_v55 = vld [vmem:[#allocation4 + $0x838] sm:$0xff] }
 0x47d   :  { %v1722_v22 = vadd.f32 %v9286_v15, %v14820_v58  ;;  %v14920_v34 = vadd.f32 %v9440_v53, %v14830_v60  ;;  %v9442_v58 = vpop.f32.mrb[95].mxu1  ;;  %v2515_v53 = vld [vmem:[#allocation4 + $0x850] sm:$0xff] }
 0x47e   :  { %v9443_v56 = vadd.f32 %v9442_v58, %v9441_v59  ;;  %v9444_v35 = vpop.f32.mrb[96].mxu1  ;;  %v2520_v59 = vld [vmem:[#allocation4 + $0x878] sm:$0xff]  ;;  %v2519_v58 = vld [vmem:[#allocation4 + $0x870] sm:$0xff] }
 0x47f   :  { %11013 = vmatmul.mubr.msk.f32.gmra.mrb[78].mxu0 %vm593_vm0, %v1722_v22  ;;  %v9445_v54 = vpop.f32.mrb[97].mxu1 }
 0x480   :  { %2066 = vmatprep.mubr.f32.mxu0 %v1939_v42  ;;  %v14923_v57 = vadd.f32 %v9443_v56, %v14832_v10  ;;  %v9446_v5 = vadd.f32 %v9445_v54, %v9444_v35  ;;  %v9447_v47 = vpop.f32.mrb[98].mxu1  ;;  %v2524_v56 = vld [vmem:[#allocation4 + $0x898] sm:$0xff]  ;;  %v2523_v35 = vld [vmem:[#allocation4 + $0x890] sm:$0xff] }
 0x481   :  { %v9448_v30 = vpop.f32.mrb[99].mxu1  ;;  %v2528_v54 = vld [vmem:[#allocation4 + $0x8b8] sm:$0xff] }
 0x482   :  { %v14926_v40 = vadd.f32 %v9446_v5, %v14834_v18  ;;  %v9449_v51 = vadd.f32 %v9448_v30, %v9447_v47  ;;  %v9450_v60 = vpop.f32.mrb[100].mxu1  ;;  %v2527_v5 = vld [vmem:[#allocation4 + $0x8b0] sm:$0xff]  ;;  %v2532_v47 = vld [vmem:[#allocation4 + $0x8d8] sm:$0xff] }
 0x483   :  { %2067 = vmatmul.mubr.f32.vlgmr.msra.gmra.mrb[160].mxu0 %v1938_v1  ;;  %v9451_v2 = vpop.f32.mrb[101].mxu1  ;;  %v2294_v1 = vld [vmem:[#allocation6 + $0x38] sm:$0xff]  ;;  %v2531_v30 = vld [vmem:[#allocation4 + $0x8d0] sm:$0xff] }
 0x484   :  { %v14929_v23 = vadd.f32 %v9449_v51, %v14836_v37  ;;  %v9452_v17 = vadd.f32 %v9451_v2, %v9450_v60  ;;  %v9453_v10 = vpop.f32.mrb[102].mxu1  ;;  %v2536_v51 = vld [vmem:[#allocation4 + $0x8f8] sm:$0xff]  ;;  %v2535_v60 = vld [vmem:[#allocation4 + $0x8f0] sm:$0xff] }
 0x485   :  { %v9454_v11 = vpop.f32.mrb[103].mxu1  ;;  %v2540_v2 = vld [vmem:[#allocation4 + $0x918] sm:$0xff] }
 0x486   :  { %v14932_v46 = vadd.f32 %v9452_v17, %v14838_v21  ;;  %v9455_v62 = vadd.f32 %v9454_v11, %v9453_v10  ;;  %v9456_v18 = vpop.f32.mrb[104].mxu1  ;;  %v2539_v17 = vld [vmem:[#allocation4 + $0x910] sm:$0xff]  ;;  %v2544_v10 = vld [vmem:[#allocation4 + $0x938] sm:$0xff] }
 0x487   :  { %v9457_v24 = vpop.f32.mrb[105].mxu1  ;;  %v2543_v11 = vld [vmem:[#allocation4 + $0x930] sm:$0xff] }
 0x488   :  { %v14935_v29 = vadd.f32 %v9455_v62, %v14840_v49  ;;  %v9458_v31 = vadd.f32 %v9457_v24, %v9456_v18  ;;  %v9459_v37 = vpop.f32.mrb[106].mxu1  ;;  %v2293_v49 = vld [vmem:[#allocation6 + $0x30] sm:$0xff]  ;;  %v2548_v62 = vld [vmem:[#allocation4 + $0x958] sm:$0xff] }
 0x489   :  { %v9460_v9 = vpop.f32.mrb[107].mxu1  ;;  %v12549_v41 = vpack.c.bf16 %v2294_v1, %v2293_v49  ;;  %v2547_v18 = vld [vmem:[#allocation4 + $0x950] sm:$0xff]  ;;  %v2552_v24 = vld [vmem:[#allocation4 + $0x978] sm:$0xff] }
 0x48a   :  { %v14938_v25 = vadd.f32 %v9458_v31, %v14842_v0  ;;  %v9461_v16 = vadd.f32 %v9460_v9, %v9459_v37  ;;  %v9462_v21 = vpop.f32.mrb[108].mxu1  ;;  %v2508_v0 = vld [vmem:[#allocation4 + $0x818] sm:$0xff]  ;;  %v2551_v31 = vld [vmem:[#allocation4 + $0x970] sm:$0xff] }
 0x48b   :  { %v9463_v15 = vpop.f32.mrb[109].mxu1  ;;  %12550 = vmatprep.subr.bf16.mxu0 %v12549_v41  ;;  %2778 = vmatprep.mubr.f32.mxu1 %v2508_v0  ;;  %v2556_v37 = vld [vmem:[#allocation4 + $0x998] sm:$0xff]  ;;  %v2555_v9 = vld [vmem:[#allocation4 + $0x990] sm:$0xff] }
 0x48c   :  { %v14941_v63 = vadd.f32 %v9461_v16, %v14844_v52  ;;  %v9464_v22 = vadd.f32 %v9463_v15, %v9462_v21  ;;  %12552 = vmatpush3.bf16.msra.mxu0 %v12549_v41  ;;  %2779 = vmatmul.mubr.f32.vlgmr.msra.gmra.mrb[110].mxu1 %v2507_v6  ;;  %v2511_v52 = vld [vmem:[#allocation4 + $0x830] sm:$0xff]  ;;  %v2560_v16 = vld [vmem:[#allocation4 + $0x9b8] sm:$0xff] }
 0x48d   :  { %12554 = vmatprep.subr.bf16.mxu0 %v14441_v3  ;;  %12624 = vmatpush3.bf16.msra.mxu1 %v14443_v7  ;;  %v2559_v21 = vld [vmem:[#allocation4 + $0x9b0] sm:$0xff]  ;;  %v2564_v15 = vld [vmem:[#allocation4 + $0x9d8] sm:$0xff] }
 0x48e   :  { %v14944_v42 = vadd.f32 %v9464_v22, %v14846_v48  ;;  %2783 = vmatprep.mubr.f32.mxu1 %v2512_v55  ;;  %12626 = vmatprep.subr.bf16.mxu1 %v14445_v8  ;;  %v2516_v48 = vld [vmem:[#allocation4 + $0x858] sm:$0xff]  ;;  %v2563_v22 = vld [vmem:[#allocation4 + $0x9d0] sm:$0xff] }
 0x48f   :  { %v2568_v49 = vld [vmem:[#allocation4 + $0x9f8] sm:$0xff]  ;;  %v2567_v1 = vld [vmem:[#allocation4 + $0x9f0] sm:$0xff] }
 0x490   :  { %2784 = vmatmul.mubr.f32.gmra.mrb[112].mxu1 %v2511_v52  ;;  %v15895_v55 = vld [vmem:[#allocation40_spill] sm:$0xff] }
 0x491   :  { %12628 = vmatpush3.bf16.msra.mxu1 %v14450_v13  ;;  %2788 = vmatprep.mubr.f32.mxu1 %v2516_v48  ;;  %v2525_v48 = vld [vmem:[#allocation4 + $0x8a0] sm:$0xff] }
 0x492   :  { %12630 = vmatprep.subr.bf16.mxu1 %v14454_v14 }
 0x494   :  { %2789 = vmatmul.mubr.f32.gmra.mrb[114].mxu1 %v2515_v53  ;;  %v2530_v53 = vld [vmem:[#allocation4 + $0x8c8] sm:$0xff] }
 0x495   :  { %12632 = vmatpush3.bf16.msra.mxu1 %v14458_v19  ;;  %2793 = vmatprep.mubr.f32.mxu1 %v2520_v59  ;;  %v2529_v59 = vld [vmem:[#allocation4 + $0x8c0] sm:$0xff] }
 0x496   :  { %12634 = vmatprep.subr.bf16.mxu1 %v14462_v20 }
 0x498   :  { %2794 = vmatmul.mubr.f32.gmra.mrb[116].mxu1 %v2519_v58  ;;  %v2534_v58 = vld [vmem:[#allocation4 + $0x8e8] sm:$0xff] }
 0x499   :  { %12636 = vmatpush3.bf16.msra.mxu1 %v14466_v26  ;;  %2798 = vmatprep.mubr.f32.mxu1 %v2524_v56  ;;  %v2533_v56 = vld [vmem:[#allocation4 + $0x8e0] sm:$0xff] }
 0x49a   :  { %12638 = vmatprep.subr.bf16.mxu1 %v14470_v27 }
 0x49c   :  { %2799 = vmatmul.mubr.f32.gmra.mrb[118].mxu1 %v2523_v35  ;;  %v2538_v35 = vld [vmem:[#allocation4 + $0x908] sm:$0xff] }
 0x49d   :  { %12640 = vmatpush3.bf16.msra.mxu1 %v14474_v32  ;;  %2803 = vmatprep.mubr.f32.mxu1 %v2528_v54  ;;  %v2537_v54 = vld [vmem:[#allocation4 + $0x900] sm:$0xff] }
 0x49e   :  { %12642 = vmatprep.subr.bf16.mxu1 %v14478_v33 }
 0x4a0   :  { %2804 = vmatmul.mubr.f32.gmra.mrb[120].mxu1 %v2527_v5  ;;  %v2542_v5 = vld [vmem:[#allocation4 + $0x928] sm:$0xff] }
 0x4a1   :  { %12644 = vmatpush3.bf16.msra.mxu1 %v14482_v38  ;;  %2808 = vmatprep.mubr.f32.mxu1 %v2532_v47  ;;  %v2541_v47 = vld [vmem:[#allocation4 + $0x920] sm:$0xff] }
 0x4a2   :  { %12646 = vmatprep.subr.bf16.mxu1 %v14486_v39 }
 0x4a4   :  { %2809 = vmatmul.mubr.f32.gmra.mrb[122].mxu1 %v2531_v30  ;;  %v2546_v30 = vld [vmem:[#allocation4 + $0x948] sm:$0xff] }
 0x4a5   :  { %12648 = vmatpush3.bf16.msra.mxu1 %v14490_v44  ;;  %2813 = vmatprep.mubr.f32.mxu1 %v2536_v51  ;;  %v2545_v51 = vld [vmem:[#allocation4 + $0x940] sm:$0xff] }
 0x4a6   :  { %12650 = vmatprep.subr.bf16.mxu1 %v14494_v45 }
 0x4a8   :  { %2814 = vmatmul.mubr.f32.gmra.mrb[124].mxu1 %v2535_v60  ;;  %v2550_v60 = vld [vmem:[#allocation4 + $0x968] sm:$0xff] }
 0x4a9   :  { %12652 = vmatpush3.bf16.msra.mxu1 %v14498_v50  ;;  %2818 = vmatprep.mubr.f32.mxu1 %v2540_v2  ;;  %v2549_v2 = vld [vmem:[#allocation4 + $0x960] sm:$0xff] }
 0x4aa   :  { %12690 = vmatprep.subr.bf16.mxu1 %v14441_v3 }
 0x4ac   :  { %2819 = vmatmul.mubr.f32.gmra.mrb[126].mxu1 %v2539_v17  ;;  %v2554_v17 = vld [vmem:[#allocation4 + $0x988] sm:$0xff] }
 0x4ad   :  { %2823 = vmatprep.mubr.f32.mxu1 %v2544_v10  ;;  %v2553_v10 = vld [vmem:[#allocation4 + $0x980] sm:$0xff] }
 0x4b0   :  { %2824 = vmatmul.mubr.f32.gmra.mrb[128].mxu1 %v2543_v11  ;;  %v2558_v11 = vld [vmem:[#allocation4 + $0x9a8] sm:$0xff] }
 0x4b1   :  { %2828 = vmatprep.mubr.f32.mxu1 %v2548_v62  ;;  %v2557_v62 = vld [vmem:[#allocation4 + $0x9a0] sm:$0xff] }
 0x4b4   :  { %2829 = vmatmul.mubr.f32.gmra.mrb[130].mxu1 %v2547_v18  ;;  %v2562_v18 = vld [vmem:[#allocation4 + $0x9c8] sm:$0xff] }
 0x4b5   :  { %2833 = vmatprep.mubr.f32.mxu1 %v2552_v24  ;;  %v2561_v24 = vld [vmem:[#allocation4 + $0x9c0] sm:$0xff] }
 0x4b8   :  { %2834 = vmatmul.mubr.f32.gmra.mrb[132].mxu1 %v2551_v31  ;;  %v2566_v31 = vld [vmem:[#allocation4 + $0x9e8] sm:$0xff] }
 0x4b9   :  { %2838 = vmatprep.mubr.f32.mxu1 %v2556_v37  ;;  %v2565_v37 = vld [vmem:[#allocation4 + $0x9e0] sm:$0xff] }
 0x4bc   :  { %2839 = vmatmul.mubr.f32.gmra.mrb[134].mxu1 %v2555_v9 }
 0x4bd   :  { %2843 = vmatprep.mubr.f32.mxu1 %v2560_v16 }
 0x4c0   :  { %2844 = vmatmul.mubr.f32.gmra.mrb[136].mxu1 %v2559_v21 }
 0x4c1   :  { %2848 = vmatprep.mubr.f32.mxu1 %v2564_v15 }
 0x4c4   :  { %2849 = vmatmul.mubr.f32.gmra.mrb[138].mxu1 %v2563_v22 }
 0x4c5   :  { %2853 = vmatprep.mubr.f32.mxu1 %v2568_v49 }
 0x4c8   :  { %2854 = vmatmul.mubr.f32.gmra.mrb[140].mxu1 %v2567_v1 }
 0x556   :  { %v9337_v41 = vpop.f32.mrb[160].mxu0 }
 0x557   :  { %v9338_v0 = vpop.f32.mrb[161].mxu0 }
 0x558   :  { %v9339_v6 = vadd.f32 %v9338_v0, %v9337_v41 }
 0x55a   :  { %v2214_v52 = vadd.f32 %v15895_v55, %v9339_v6 }
 0x55c   :  { %11019 = vmatprep.mubr.msk.f32.mxu0 %vm593_vm0, %v2214_v52 }
 0x55d   :  { %11020 = vmatmul.mubr.msk.f32.vlgmr.msra.gmra.mrb[64].mxu0 %vm593_vm0, %v14850_v28  ;;  %v2860_v28 = vld [vmem:[#allocation6 + $0x40] sm:$0xff] }
 0x55e   :  { %11022 = vmatprep.mubr.msk.f32.mxu0 %vm593_vm0, %v14854_v12  ;;  %12556 = vmatpush3.bf16.msra.mxu0 %v14443_v7  ;;  %v2861_v12 = vld [vmem:[#allocation6 + $0x48] sm:$0xff] }
 0x55f   :  { %12558 = vmatprep.subr.bf16.mxu0 %v14445_v8  ;;  %v9595_v9 = vpop.f32.mrb[110].mxu1 }
 0x560   :  { %v9596_v16 = vpop.f32.mrb[111].mxu1 }
 0x561   :  { %11023 = vmatmul.mubr.msk.f32.gmra.mrb[66].mxu0 %vm593_vm0, %v14917_v61  ;;  %v2510_v61 = vld [vmem:[#allocation4 + $0x828] sm:$0xff]  ;;  %v15011_v21 = vadd.f32 %v9596_v16, %v9595_v9 }
 0x562   :  { %11025 = vmatprep.mubr.msk.f32.mxu0 %vm593_vm0, %v14867_v43  ;;  %12560 = vmatpush3.bf16.msra.mxu0 %v14450_v13  ;;  %v2506_v43 = vld [vmem:[#allocation4 + $0x808] sm:$0xff] }
 0x563   :  { %12562 = vmatprep.subr.bf16.mxu0 %v14454_v14  ;;  %v9598_v15 = vpop.f32.mrb[112].mxu1  ;;  %v3073_v16 = vld [vmem:[#allocation4 + $0xa08] sm:$0xff] }
 0x564   :  { %v9599_v22 = vpop.f32.mrb[113].mxu1  ;;  %3200 = vmatprep.mubr.f32.mxu1 %v3073_v16  ;;  %v3132_v16 = vld [vmem:[#allocation4 + $0xbe0] sm:$0xff] }
 0x565   :  { %11026 = vmatmul.mubr.msk.f32.gmra.mrb[68].mxu0 %vm593_vm0, %v14874_v4  ;;  %v12617_v4 = vpack.c.bf16 %v2861_v12, %v2860_v28  ;;  %v15013_v49 = vadd.f32 %v9599_v22, %v9598_v15  ;;  %v3072_v15 = vld [vmem:[#allocation4 + $0xa00] sm:$0xff]  ;;  %v3077_v22 = vld [vmem:[#allocation4 + $0xa28] sm:$0xff] }
 0x566   :  { %11028 = vmatprep.mubr.msk.f32.mxu0 %vm593_vm0, %v14881_v36  ;;  %12564 = vmatpush3.bf16.msra.mxu0 %v14458_v19  ;;  %v2505_v36 = vld [vmem:[#allocation4 + $0x800] sm:$0xff] }
 0x567   :  { %12566 = vmatprep.subr.bf16.mxu0 %v14462_v20  ;;  %v9601_v1 = vpop.f32.mrb[114].mxu1  ;;  %3201 = vmatmul.mubr.f32.vlgmr.msra.gmra.mrb[142].mxu1 %v3072_v15 }
 0x568   :  { %v9602_v41 = vpop.f32.mrb[115].mxu1  ;;  %12692 = vmatpush3.bf16.msra.mxu1 %v14443_v7  ;;  %3205 = vmatprep.mubr.f32.mxu1 %v3077_v22 }
 0x569   :  { %11029 = vmatmul.mubr.msk.f32.gmra.mrb[70].mxu0 %vm593_vm0, %v14920_v34  ;;  %v2509_v34 = vld [vmem:[#allocation4 + $0x820] sm:$0xff]  ;;  %v15015_v0 = vadd.f32 %v9602_v41, %v9601_v1  ;;  %12694 = vmatprep.subr.bf16.mxu1 %v14445_v8  ;;  %v3081_v41 = vld [vmem:[#allocation4 + $0xa48] sm:$0xff] }
 0x56a   :  { %11031 = vmatprep.mubr.msk.f32.mxu0 %vm593_vm0, %v14923_v57  ;;  %12568 = vmatpush3.bf16.msra.mxu0 %v14466_v26  ;;  %v2514_v57 = vld [vmem:[#allocation4 + $0x848] sm:$0xff]  ;;  %v3076_v1 = vld [vmem:[#allocation4 + $0xa20] sm:$0xff] }
 0x56b   :  { %12570 = vmatprep.subr.bf16.mxu0 %v14470_v27  ;;  %v9604_v6 = vpop.f32.mrb[116].mxu1  ;;  %3206 = vmatmul.mubr.f32.gmra.mrb[144].mxu1 %v3076_v1 }
 0x56c   :  { %v9605_v55 = vpop.f32.mrb[117].mxu1  ;;  %12696 = vmatpush3.bf16.msra.mxu1 %v14450_v13  ;;  %3210 = vmatprep.mubr.f32.mxu1 %v3081_v41  ;;  %v3640_v41 = vld [vmem:[#allocation4 + $0xc08] sm:$0xff] }
 0x56d   :  { %11032 = vmatmul.mubr.msk.f32.gmra.mrb[72].mxu0 %vm593_vm0, %v14926_v40  ;;  %v15896_v40 = vld [vmem:[#allocation24_spill] sm:$0xff]  ;;  %v15017_v52 = vadd.f32 %v9605_v55, %v9604_v6  ;;  %12698 = vmatprep.subr.bf16.mxu1 %v14454_v14  ;;  %v3085_v55 = vld [vmem:[#allocation4 + $0xa68] sm:$0xff] }
 0x56e   :  { %11034 = vmatprep.mubr.msk.f32.mxu0 %vm593_vm0, %v14929_v23  ;;  %12572 = vmatpush3.bf16.msra.mxu0 %v14474_v32  ;;  %v2513_v23 = vld [vmem:[#allocation4 + $0x840] sm:$0xff] }
 0x56f   :  { %12574 = vmatprep.subr.bf16.mxu0 %v14478_v33  ;;  %v9607_v28 = vpop.f32.mrb[118].mxu1  ;;  %v3080_v6 = vld [vmem:[#allocation4 + $0xa40] sm:$0xff] }
 0x570   :  { %v9608_v12 = vpop.f32.mrb[119].mxu1  ;;  %3211 = vmatmul.mubr.f32.gmra.mrb[146].mxu1 %v3080_v6  ;;  %v3639_v6 = vld [vmem:[#allocation4 + $0xc00] sm:$0xff] }
 0x571   :  { %11035 = vmatmul.mubr.msk.f32.gmra.mrb[74].mxu0 %vm593_vm0, %v14932_v46  ;;  %v2518_v46 = vld [vmem:[#allocation4 + $0x868] sm:$0xff]  ;;  %12700 = vmatpush3.bf16.msra.mxu1 %v14458_v19 }
 0x572   :  { %11037 = vmatprep.mubr.msk.f32.mxu0 %vm593_vm0, %v14935_v29  ;;  %12576 = vmatpush3.bf16.msra.mxu0 %v14482_v38  ;;  %v2517_v29 = vld [vmem:[#allocation4 + $0x860] sm:$0xff] }
 0x573   :  { %12578 = vmatprep.subr.bf16.mxu0 %v14486_v39  ;;  %12702 = vmatprep.subr.bf16.mxu1 %v14462_v20 }
 0x574   :  { %3215 = vmatprep.mubr.f32.mxu1 %v3085_v55  ;;  %v3644_v55 = vld [vmem:[#allocation4 + $0xc28] sm:$0xff] }
 0x575   :  { %11038 = vmatmul.mubr.msk.f32.gmra.mrb[76].mxu0 %vm593_vm0, %v14938_v25  ;;  %v2522_v25 = vld [vmem:[#allocation4 + $0x888] sm:$0xff]  ;;  %12704 = vmatpush3.bf16.msra.mxu1 %v14466_v26 }
 0x576   :  { %11040 = vmatprep.mubr.msk.f32.mxu0 %vm593_vm0, %v14941_v63  ;;  %12580 = vmatpush3.bf16.msra.mxu0 %v14490_v44  ;;  %v2521_v63 = vld [vmem:[#allocation4 + $0x880] sm:$0xff] }
 0x577   :  { %12582 = vmatprep.subr.bf16.mxu0 %v14494_v45  ;;  %12706 = vmatprep.subr.bf16.mxu1 %v14470_v27 }
 0x579   :  { %11041 = vmatmul.mubr.msk.f32.gmra.mrb[78].mxu0 %vm593_vm0, %v14944_v42  ;;  %v2526_v42 = vld [vmem:[#allocation4 + $0x8a8] sm:$0xff]  ;;  %12708 = vmatpush3.bf16.msra.mxu1 %v14474_v32 }
 0x57a   :  { %12584 = vmatpush3.bf16.msra.mxu0 %v14498_v50  ;;  %2633 = vmatprep.mubr.f32.mxu0 %v2506_v43  ;;  %v15019_v43 = vadd.f32 %v9608_v12, %v9607_v28  ;;  %v3084_v28 = vld [vmem:[#allocation4 + $0xa60] sm:$0xff]  ;;  %v3089_v12 = vld [vmem:[#allocation4 + $0xa88] sm:$0xff] }
 0x57b   :  { %12618 = vmatprep.subr.bf16.mxu0 %v12617_v4  ;;  %3216 = vmatmul.mubr.f32.gmra.mrb[148].mxu1 %v3084_v28 }
 0x57c   :  { %3220 = vmatprep.mubr.f32.mxu1 %v3089_v12  ;;  %12710 = vmatprep.subr.bf16.mxu1 %v14478_v33 }
 0x57d   :  { %2634 = vmatmul.mubr.f32.vlgmr.msra.gmra.mrb[162].mxu0 %v2505_v36  ;;  %12712 = vmatpush3.bf16.msra.mxu1 %v14482_v38 }
 0x57e   :  { %2638 = vmatprep.mubr.f32.mxu0 %v2510_v61  ;;  %12620 = vmatpush3.bf16.msra.mxu0 %v12617_v4  ;;  %v9610_v4 = vpop.f32.mrb[120].mxu1 }
 0x57f   :  { %12654 = vmatprep.subr.bf16.mxu0 %v15896_v40  ;;  %v9611_v36 = vpop.f32.mrb[121].mxu1  ;;  %12714 = vmatprep.subr.bf16.mxu1 %v14486_v39 }
 0x580   :  { %v15021_v61 = vadd.f32 %v9611_v36, %v9610_v4  ;;  %v3088_v4 = vld [vmem:[#allocation4 + $0xa80] sm:$0xff]  ;;  %v3093_v36 = vld [vmem:[#allocation4 + $0xaa8] sm:$0xff] }
 0x581   :  { %2639 = vmatmul.mubr.f32.gmra.mrb[164].mxu0 %v2509_v34  ;;  %v9613_v34 = vpop.f32.mrb[122].mxu1  ;;  %3221 = vmatmul.mubr.f32.gmra.mrb[150].mxu1 %v3088_v4 }
 0x582   :  { %2643 = vmatprep.mubr.f32.mxu0 %v2514_v57  ;;  %v9614_v57 = vpop.f32.mrb[123].mxu1  ;;  %3225 = vmatprep.mubr.f32.mxu1 %v3093_v36  ;;  %v3643_v36 = vld [vmem:[#allocation4 + $0xc20] sm:$0xff] }
 0x583   :  { %12716 = vmatpush3.bf16.msra.mxu1 %v14490_v44 }
 0x584   :  { %12718 = vmatprep.subr.bf16.mxu1 %v14494_v45 }
 0x585   :  { %2644 = vmatmul.mubr.f32.gmra.mrb[166].mxu0 %v2513_v23  ;;  %v15023_v23 = vadd.f32 %v9614_v57, %v9613_v34  ;;  %v3092_v34 = vld [vmem:[#allocation4 + $0xaa0] sm:$0xff]  ;;  %v3097_v57 = vld [vmem:[#allocation4 + $0xac8] sm:$0xff] }
 0x586   :  { %2648 = vmatprep.mubr.f32.mxu0 %v2518_v46  ;;  %v9616_v46 = vpop.f32.mrb[124].mxu1  ;;  %3226 = vmatmul.mubr.f32.gmra.mrb[152].mxu1 %v3092_v34 }
 0x587   :  { %3230 = vmatprep.mubr.f32.mxu1 %v3097_v57  ;;  %12720 = vmatpush3.bf16.msra.mxu1 %v14498_v50  ;;  %v3648_v57 = vld [vmem:[#allocation4 + $0xc48] sm:$0xff] }
 0x588   :  { %12758 = vmatprep.subr.bf16.mxu1 %v14441_v3 }
 0x589   :  { %2649 = vmatmul.mubr.f32.gmra.mrb[168].mxu0 %v2517_v29  ;;  %v9617_v29 = vpop.f32.mrb[125].mxu1 }
 0x58a   :  { %2653 = vmatprep.mubr.f32.mxu0 %v2522_v25  ;;  %v15025_v25 = vadd.f32 %v9617_v29, %v9616_v46  ;;  %v3096_v46 = vld [vmem:[#allocation4 + $0xac0] sm:$0xff]  ;;  %v3101_v29 = vld [vmem:[#allocation4 + $0xae8] sm:$0xff] }
 0x58b   :  { %3231 = vmatmul.mubr.f32.gmra.mrb[154].mxu1 %v3096_v46 }
 0x58c   :  { %3235 = vmatprep.mubr.f32.mxu1 %v3101_v29 }
 0x58d   :  { %2654 = vmatmul.mubr.f32.gmra.mrb[170].mxu0 %v2521_v63  ;;  %v9619_v63 = vpop.f32.mrb[126].mxu1 }
 0x58e   :  { %2658 = vmatprep.mubr.f32.mxu0 %v2526_v42  ;;  %v9620_v42 = vpop.f32.mrb[127].mxu1 }
 0x591   :  { %2659 = vmatmul.mubr.f32.gmra.mrb[172].mxu0 %v2525_v48  ;;  %v15027_v48 = vadd.f32 %v9620_v42, %v9619_v63  ;;  %v3100_v63 = vld [vmem:[#allocation4 + $0xae0] sm:$0xff]  ;;  %v3105_v42 = vld [vmem:[#allocation4 + $0xb08] sm:$0xff] }
 0x592   :  { %2663 = vmatprep.mubr.f32.mxu0 %v2530_v53  ;;  %v9622_v53 = vpop.f32.mrb[128].mxu1  ;;  %3236 = vmatmul.mubr.f32.gmra.mrb[156].mxu1 %v3100_v63 }
 0x593   :  { %3240 = vmatprep.mubr.f32.mxu1 %v3105_v42 }
 0x595   :  { %2664 = vmatmul.mubr.f32.gmra.mrb[174].mxu0 %v2529_v59  ;;  %v9623_v59 = vpop.f32.mrb[129].mxu1 }
 0x596   :  { %2668 = vmatprep.mubr.f32.mxu0 %v2534_v58  ;;  %v15029_v58 = vadd.f32 %v9623_v59, %v9622_v53  ;;  %v3104_v53 = vld [vmem:[#allocation4 + $0xb00] sm:$0xff]  ;;  %v3109_v59 = vld [vmem:[#allocation4 + $0xb28] sm:$0xff] }
 0x597   :  { %3241 = vmatmul.mubr.f32.gmra.mrb[158].mxu1 %v3104_v53  ;;  %v3652_v53 = vld [vmem:[#allocation4 + $0xc68] sm:$0xff] }
 0x598   :  { %3245 = vmatprep.mubr.f32.mxu1 %v3109_v59  ;;  %v15897_v59 = vld [vmem:[#allocation25_spill] sm:$0xff] }
 0x599   :  { %2669 = vmatmul.mubr.f32.gmra.mrb[176].mxu0 %v2533_v56  ;;  %v9625_v56 = vpop.f32.mrb[130].mxu1 }
 0x59a   :  { %2673 = vmatprep.mubr.f32.mxu0 %v2538_v35  ;;  %v9626_v35 = vpop.f32.mrb[131].mxu1 }
 0x59d   :  { %2674 = vmatmul.mubr.f32.gmra.mrb[178].mxu0 %v2537_v54  ;;  %v15031_v54 = vadd.f32 %v9626_v35, %v9625_v56  ;;  %v3108_v56 = vld [vmem:[#allocation4 + $0xb20] sm:$0xff]  ;;  %v3113_v35 = vld [vmem:[#allocation4 + $0xb48] sm:$0xff] }
 0x59e   :  { %2678 = vmatprep.mubr.f32.mxu0 %v2542_v5  ;;  %v9628_v5 = vpop.f32.mrb[132].mxu1  ;;  %3246 = vmatmul.mubr.f32.gmra.mrb[160].mxu1 %v3108_v56 }
 0x59f   :  { %3250 = vmatprep.mubr.f32.mxu1 %v3113_v35 }
 0x5a1   :  { %2679 = vmatmul.mubr.f32.gmra.mrb[180].mxu0 %v2541_v47  ;;  %v9629_v47 = vpop.f32.mrb[133].mxu1 }
 0x5a2   :  { %2683 = vmatprep.mubr.f32.mxu0 %v2546_v30  ;;  %v15033_v30 = vadd.f32 %v9629_v47, %v9628_v5  ;;  %v3112_v5 = vld [vmem:[#allocation4 + $0xb40] sm:$0xff]  ;;  %v3117_v47 = vld [vmem:[#allocation4 + $0xb68] sm:$0xff] }
 0x5a3   :  { %3251 = vmatmul.mubr.f32.gmra.mrb[162].mxu1 %v3112_v5  ;;  %v15898_v5 = vld [vmem:[#allocation26_spill] sm:$0xff] }
 0x5a4   :  { %3255 = vmatprep.mubr.f32.mxu1 %v3117_v47  ;;  %v3651_v47 = vld [vmem:[#allocation4 + $0xc60] sm:$0xff] }
 0x5a5   :  { %2684 = vmatmul.mubr.f32.gmra.mrb[182].mxu0 %v2545_v51  ;;  %v9631_v51 = vpop.f32.mrb[134].mxu1 }
 0x5a6   :  { %2688 = vmatprep.mubr.f32.mxu0 %v2550_v60  ;;  %v9632_v60 = vpop.f32.mrb[135].mxu1 }
 0x5a9   :  { %2689 = vmatmul.mubr.f32.gmra.mrb[184].mxu0 %v2549_v2  ;;  %v15035_v2 = vadd.f32 %v9632_v60, %v9631_v51  ;;  %v3116_v51 = vld [vmem:[#allocation4 + $0xb60] sm:$0xff]  ;;  %v3121_v60 = vld [vmem:[#allocation4 + $0xb88] sm:$0xff] }
 0x5aa   :  { %2693 = vmatprep.mubr.f32.mxu0 %v2554_v17  ;;  %v9634_v17 = vpop.f32.mrb[136].mxu1  ;;  %3256 = vmatmul.mubr.f32.gmra.mrb[164].mxu1 %v3116_v51 }
 0x5ab   :  { %3260 = vmatprep.mubr.f32.mxu1 %v3121_v60  ;;  %v3656_v60 = vld [vmem:[#allocation4 + $0xc88] sm:$0xff] }
 0x5ad   :  { %2694 = vmatmul.mubr.f32.gmra.mrb[186].mxu0 %v2553_v10  ;;  %v9635_v10 = vpop.f32.mrb[137].mxu1 }
 0x5ae   :  { %2698 = vmatprep.mubr.f32.mxu0 %v2558_v11  ;;  %v15037_v11 = vadd.f32 %v9635_v10, %v9634_v17  ;;  %v3120_v17 = vld [vmem:[#allocation4 + $0xb80] sm:$0xff]  ;;  %v3125_v10 = vld [vmem:[#allocation4 + $0xba8] sm:$0xff] }
 0x5af   :  { %3261 = vmatmul.mubr.f32.gmra.mrb[166].mxu1 %v3120_v17  ;;  %v15899_v17 = vld [vmem:[#allocation27_spill] sm:$0xff] }
 0x5b0   :  { %3265 = vmatprep.mubr.f32.mxu1 %v3125_v10 }
 0x5b1   :  { %2699 = vmatmul.mubr.f32.gmra.mrb[188].mxu0 %v2557_v62  ;;  %v9637_v62 = vpop.f32.mrb[138].mxu1 }
 0x5b2   :  { %2703 = vmatprep.mubr.f32.mxu0 %v2562_v18  ;;  %v9638_v18 = vpop.f32.mrb[139].mxu1 }
 0x5b5   :  { %2704 = vmatmul.mubr.f32.gmra.mrb[190].mxu0 %v2561_v24  ;;  %v15039_v24 = vadd.f32 %v9638_v18, %v9637_v62  ;;  %v3124_v62 = vld [vmem:[#allocation4 + $0xba0] sm:$0xff]  ;;  %v3129_v18 = vld [vmem:[#allocation4 + $0xbc8] sm:$0xff] }
 0x5b6   :  { %2708 = vmatprep.mubr.f32.mxu0 %v2566_v31  ;;  %v9640_v31 = vpop.f32.mrb[140].mxu1  ;;  %3266 = vmatmul.mubr.f32.gmra.mrb[168].mxu1 %v3124_v62  ;;  %v15900_v62 = vld [vmem:[#allocation28_spill] sm:$0xff] }
 0x5b7   :  { %3270 = vmatprep.mubr.f32.mxu1 %v3129_v18 }
 0x5b9   :  { %2709 = vmatmul.mubr.f32.gmra.mrb[192].mxu0 %v2565_v37  ;;  %v9641_v37 = vpop.f32.mrb[141].mxu1 }
 0x5ba   :  { %v15041_v9 = vadd.f32 %v9641_v37, %v9640_v31  ;;  %v3128_v31 = vld [vmem:[#allocation4 + $0xbc0] sm:$0xff]  ;;  %v3133_v37 = vld [vmem:[#allocation4 + $0xbe8] sm:$0xff] }
 0x5bb   :  { %3271 = vmatmul.mubr.f32.gmra.mrb[170].mxu1 %v3128_v31  ;;  %v3655_v31 = vld [vmem:[#allocation4 + $0xc80] sm:$0xff] }
 0x5bc   :  { %3275 = vmatprep.mubr.f32.mxu1 %v3133_v37 }
 0x5bf   :  { %3276 = vmatmul.mubr.f32.gmra.mrb[172].mxu1 %v3132_v16  ;;  %v3660_v16 = vld [vmem:[#allocation4 + $0xca8] sm:$0xff] }
 0x5c0   :  { %3767 = vmatprep.mubr.f32.mxu1 %v3640_v41 }
 0x5c3   :  { %3768 = vmatmul.mubr.f32.vlgmr.msra.gmra.mrb[174].mxu1 %v3639_v6  ;;  %v3659_v6 = vld [vmem:[#allocation4 + $0xca0] sm:$0xff] }
 0x5c4   :  { %3772 = vmatprep.mubr.f32.mxu1 %v3644_v55  ;;  %12760 = vmatpush3.bf16.msra.mxu1 %v14443_v7 }
 0x5c5   :  { %12762 = vmatprep.subr.bf16.mxu1 %v14445_v8 }
 0x5c7   :  { %3773 = vmatmul.mubr.f32.gmra.mrb[176].mxu1 %v3643_v36  ;;  %v15904_v36 = vld [vmem:[#allocation32_spill] sm:$0xff] }
 0x5c8   :  { %3777 = vmatprep.mubr.f32.mxu1 %v3648_v57  ;;  %12764 = vmatpush3.bf16.msra.mxu1 %v14450_v13  ;;  %v3663_v57 = vld [vmem:[#allocation4 + $0xcc0] sm:$0xff] }
 0x5c9   :  { %12766 = vmatprep.subr.bf16.mxu1 %v14454_v14 }
 0x5cc   :  { %12768 = vmatpush3.bf16.msra.mxu1 %v14458_v19 }
 0x5cd   :  { %12770 = vmatprep.subr.bf16.mxu1 %v14462_v20 }
 0x5d0   :  { %12772 = vmatpush3.bf16.msra.mxu1 %v14466_v26 }
 0x5d1   :  { %12774 = vmatprep.subr.bf16.mxu1 %v14470_v27 }
 0x5d4   :  { %12776 = vmatpush3.bf16.msra.mxu1 %v14474_v32 }
 0x5d5   :  { %12778 = vmatprep.subr.bf16.mxu1 %v14478_v33 }
 0x5d8   :  { %12780 = vmatpush3.bf16.msra.mxu1 %v14482_v38 }
 0x5d9   :  { %12782 = vmatprep.subr.bf16.mxu1 %v14486_v39 }
 0x5dc   :  { %12784 = vmatpush3.bf16.msra.mxu1 %v14490_v44 }
 0x5dd   :  { %12786 = vmatprep.subr.bf16.mxu1 %v14494_v45 }
 0x5e0   :  { %12788 = vmatpush3.bf16.msra.mxu1 %v14498_v50 }
 0x5e1   :  { %12790 = vmatprep.subr.bf16.mxu1 %v15896_v40 }
 0x650   :  { %v9515_v15 = vpop.f32.mrb[162].mxu0 }
 0x651   :  { %v9516_v22 = vpop.f32.mrb[163].mxu0 }
 0x652   :  { %v9517_v1 = vadd.f32 %v9516_v22, %v9515_v15  ;;  %v15901_v15 = vld [vmem:[#allocation29_spill] sm:$0xff] }
 0x654   :  { %v2781_v28 = vadd.f32 %v15011_v21, %v9517_v1  ;;  %v9518_v12 = vpop.f32.mrb[164].mxu0  ;;  %v3647_v21 = vld [vmem:[#allocation4 + $0xc40] sm:$0xff]  ;;  %v15902_v1 = vld [vmem:[#allocation30_spill] sm:$0xff] }
 0x655   :  { %v9519_v4 = vpop.f32.mrb[165].mxu0  ;;  %3778 = vmatmul.mubr.f32.gmra.mrb[178].mxu1 %v3647_v21 }
 0x656   :  { %v9520_v34 = vadd.f32 %v9519_v4, %v9518_v12  ;;  %11047 = vmatprep.mubr.msk.f32.mxu0 %vm593_vm0, %v2781_v28  ;;  %3782 = vmatprep.mubr.f32.mxu1 %v3652_v53  ;;  %v3664_v28 = vld [vmem:[#allocation4 + $0xcc8] sm:$0xff]  ;;  %v15903_v12 = vld [vmem:[#allocation31_spill] sm:$0xff] }
 0x658   :  { %v2786_v46 = vadd.f32 %v15013_v49, %v9520_v34  ;;  %v9521_v29 = vpop.f32.mrb[166].mxu0 }
 0x659   :  { %v9522_v63 = vpop.f32.mrb[167].mxu0  ;;  %3783 = vmatmul.mubr.f32.gmra.mrb[180].mxu1 %v3651_v47  ;;  %v15907_v47 = vld [vmem:[#allocation35_spill] sm:$0xff] }
 0x65a   :  { %v9523_v42 = vadd.f32 %v9522_v63, %v9521_v29  ;;  %11048 = vmatmul.mubr.msk.f32.vlgmr.msra.gmra.mrb[64].mxu0 %vm593_vm0, %v2786_v46  ;;  %3787 = vmatprep.mubr.f32.mxu1 %v3656_v60  ;;  %v3668_v29 = vld [vmem:[#allocation4 + $0xce8] sm:$0xff]  ;;  %v15908_v60 = vld [vmem:[#allocation36_spill] sm:$0xff] }
 0x65b   :  { %12656 = vmatpush3.bf16.msra.mxu0 %v15897_v59  ;;  %v15905_v63 = vld [vmem:[#allocation33_spill] sm:$0xff] }
 0x65c   :  { %v2791_v56 = vadd.f32 %v15015_v0, %v9523_v42  ;;  %v9524_v35 = vpop.f32.mrb[168].mxu0  ;;  %12658 = vmatprep.subr.bf16.mxu0 %v15898_v5  ;;  %v15906_v42 = vld [vmem:[#allocation34_spill] sm:$0xff] }
 0x65d   :  { %v9525_v49 = vpop.f32.mrb[169].mxu0  ;;  %3788 = vmatmul.mubr.f32.gmra.mrb[182].mxu1 %v3655_v31  ;;  %v3428_v31 = vld [vmem:[#allocation6 + $0x58] sm:$0xff] }
 0x65e   :  { %v9526_v51 = vadd.f32 %v9525_v49, %v9524_v35  ;;  %11050 = vmatprep.mubr.msk.f32.mxu0 %vm593_vm0, %v2791_v56  ;;  %3792 = vmatprep.mubr.f32.mxu1 %v3660_v16  ;;  %v3667_v56 = vld [vmem:[#allocation4 + $0xce0] sm:$0xff]  ;;  %v3672_v49 = vld [vmem:[#allocation4 + $0xd08] sm:$0xff] }
 0x65f   :  { %12660 = vmatpush3.bf16.msra.mxu0 %v15899_v17  ;;  %v3676_v16 = vld [vmem:[#allocation4 + $0xd28] sm:$0xff] }
 0x660   :  { %v2796_v10 = vadd.f32 %v15017_v52, %v9526_v51  ;;  %v9527_v0 = vpop.f32.mrb[170].mxu0  ;;  %12662 = vmatprep.subr.bf16.mxu0 %v15900_v62 }
 0x661   :  { %v9528_v18 = vpop.f32.mrb[171].mxu0  ;;  %3793 = vmatmul.mubr.f32.gmra.mrb[184].mxu1 %v3659_v6 }
 0x662   :  { %v9529_v37 = vadd.f32 %v9528_v18, %v9527_v0  ;;  %11051 = vmatmul.mubr.msk.f32.gmra.mrb[66].mxu0 %vm593_vm0, %v2796_v10  ;;  %3797 = vmatprep.mubr.f32.mxu1 %v3664_v28  ;;  %v3671_v0 = vld [vmem:[#allocation4 + $0xd00] sm:$0xff]  ;;  %v3427_v18 = vld [vmem:[#allocation6 + $0x50] sm:$0xff] }
 0x663   :  { %12664 = vmatpush3.bf16.msra.mxu0 %v15901_v15  ;;  %v15106_v6 = vpack.c.bf16 %v3428_v31, %v3427_v18  ;;  %v3675_v28 = vld [vmem:[#allocation4 + $0xd20] sm:$0xff] }
 0x664   :  { %v2801_v22 = vadd.f32 %v15019_v43, %v9529_v37  ;;  %v9530_v52 = vpop.f32.mrb[172].mxu0  ;;  %12666 = vmatprep.subr.bf16.mxu0 %v15902_v1  ;;  %v3687_v18 = vld [vmem:[#allocation4 + $0xd80] sm:$0xff] }
 0x665   :  { %v9531_v41 = vpop.f32.mrb[173].mxu0  ;;  %3798 = vmatmul.mubr.f32.gmra.mrb[186].mxu1 %v3663_v57 }
 0x666   :  { %v9532_v55 = vadd.f32 %v9531_v41, %v9530_v52  ;;  %11053 = vmatprep.mubr.msk.f32.mxu0 %vm593_vm0, %v2801_v22  ;;  %3802 = vmatprep.mubr.f32.mxu1 %v3668_v29  ;;  %v15909_v22 = vld [vmem:[#allocation37_spill] sm:$0xff]  ;;  %v15910_v41 = vld [vmem:[#allocation38_spill] sm:$0xff] }
 0x667   :  { %12668 = vmatpush3.bf16.msra.mxu0 %v15903_v12  ;;  %v3679_v29 = vld [vmem:[#allocation4 + $0xd40] sm:$0xff] }
 0x668   :  { %v2806_v4 = vadd.f32 %v15021_v61, %v9532_v55  ;;  %v9533_v43 = vpop.f32.mrb[174].mxu0  ;;  %12670 = vmatprep.subr.bf16.mxu0 %v15904_v36 }
 0x669   :  { %v9534_v34 = vpop.f32.mrb[175].mxu0  ;;  %3803 = vmatmul.mubr.f32.gmra.mrb[188].mxu1 %v3667_v56 }
 0x66a   :  { %v9535_v46 = vadd.f32 %v9534_v34, %v9533_v43  ;;  %11054 = vmatmul.mubr.msk.f32.gmra.mrb[68].mxu0 %vm593_vm0, %v2806_v4  ;;  %3807 = vmatprep.mubr.f32.mxu1 %v3672_v49  ;;  %v3680_v43 = vld [vmem:[#allocation4 + $0xd48] sm:$0xff]  ;;  %v15911_v34 = vld [vmem:[#allocation39_spill] sm:$0xff]  ;;  %v3683_v49 = vld [vmem:[#allocation4 + $0xd60] sm:$0xff] }
 0x66b   :  { %12672 = vmatpush3.bf16.msra.mxu0 %v15905_v63 }
 0x66c   :  { %v2811_v21 = vadd.f32 %v15023_v23, %v9535_v46  ;;  %v9536_v61 = vpop.f32.mrb[176].mxu0  ;;  %12674 = vmatprep.subr.bf16.mxu0 %v15906_v42 }
 0x66d   :  { %v9537_v53 = vpop.f32.mrb[177].mxu0  ;;  %3808 = vmatmul.mubr.f32.gmra.mrb[190].mxu1 %v3671_v0 }
 0x66e   :  { %v9538_v35 = vadd.f32 %v9537_v53, %v9536_v61  ;;  %11056 = vmatprep.mubr.msk.f32.mxu0 %vm593_vm0, %v2811_v21  ;;  %3812 = vmatprep.mubr.f32.mxu1 %v3676_v16  ;;  %v3684_v61 = vld [vmem:[#allocation4 + $0xd68] sm:$0xff] }
 0x66f   :  { %12676 = vmatpush3.bf16.msra.mxu0 %v15907_v47 }
 0x670   :  { %v2816_v51 = vadd.f32 %v15025_v25, %v9538_v35  ;;  %v9539_v23 = vpop.f32.mrb[178].mxu0  ;;  %12678 = vmatprep.subr.bf16.mxu0 %v15908_v60 }
 0x671   :  { %v9540_v10 = vpop.f32.mrb[179].mxu0  ;;  %3813 = vmatmul.mubr.f32.gmra.mrb[192].mxu1 %v3675_v28 }
 0x672   :  { %v9541_v37 = vadd.f32 %v9540_v10, %v9539_v23  ;;  %11057 = vmatmul.mubr.msk.f32.gmra.mrb[70].mxu0 %vm593_vm0, %v2816_v51  ;;  %3817 = vmatprep.mubr.f32.mxu1 %v3680_v43 }
 0x673   :  { %12680 = vmatpush3.bf16.msra.mxu0 %v15909_v22 }
 0x674   :  { %v2821_v25 = vadd.f32 %v15027_v48, %v9541_v37  ;;  %v9542_v52 = vpop.f32.mrb[180].mxu0  ;;  %12682 = vmatprep.subr.bf16.mxu0 %v15910_v41 }
 0x675   :  { %v9543_v55 = vpop.f32.mrb[181].mxu0  ;;  %3818 = vmatmul.mubr.f32.gmra.mrb[194].mxu1 %v3679_v29 }
 0x676   :  { %v9544_v4 = vadd.f32 %v9543_v55, %v9542_v52  ;;  %11059 = vmatprep.mubr.msk.f32.mxu0 %vm593_vm0, %v2821_v25  ;;  %3822 = vmatprep.mubr.f32.mxu1 %v3684_v61  ;;  %v3691_v52 = vld [vmem:[#allocation4 + $0xda0] sm:$0xff] }
 0x677   :  { %12684 = vmatpush3.bf16.msra.mxu0 %v15911_v34  ;;  %v3699_v61 = vld [vmem:[#allocation4 + $0xde0] sm:$0xff] }
 0x678   :  { %v2826_v57 = vadd.f32 %v15029_v58, %v9544_v4  ;;  %v9545_v46 = vpop.f32.mrb[182].mxu0  ;;  %12686 = vmatprep.subr.bf16.mxu0 %v15106_v6  ;;  %v3688_v58 = vld [vmem:[#allocation4 + $0xd88] sm:$0xff] }
 0x679   :  { %v9546_v48 = vpop.f32.mrb[183].mxu0  ;;  %3823 = vmatmul.mubr.f32.gmra.mrb[196].mxu1 %v3683_v49  ;;  %v4206_v49 = vld [vmem:[#allocation4 + $0xe00] sm:$0xff] }
 0x67a   :  { %v9547_v21 = vadd.f32 %v9546_v48, %v9545_v46  ;;  %11060 = vmatmul.mubr.msk.f32.gmra.mrb[72].mxu0 %vm593_vm0, %v2826_v57  ;;  %3827 = vmatprep.mubr.f32.mxu1 %v3688_v58  ;;  %v3695_v57 = vld [vmem:[#allocation4 + $0xdc0] sm:$0xff]  ;;  %v3079_v58 = vld [vmem:[#allocation4 + $0xa38] sm:$0xff] }
 0x67c   :  { %v2831_v53 = vadd.f32 %v15031_v54, %v9547_v21  ;;  %v9548_v56 = vpop.f32.mrb[184].mxu0  ;;  %v3692_v54 = vld [vmem:[#allocation4 + $0xda8] sm:$0xff] }
 0x67d   :  { %v9549_v35 = vpop.f32.mrb[185].mxu0  ;;  %3828 = vmatmul.mubr.f32.gmra.mrb[198].mxu1 %v3687_v18  ;;  %v4214_v18 = vld [vmem:[#allocation4 + $0xe40] sm:$0xff] }
 0x67e   :  { %v9550_v51 = vadd.f32 %v9549_v35, %v9548_v56  ;;  %11062 = vmatprep.mubr.msk.f32.mxu0 %vm593_vm0, %v2831_v53  ;;  %3832 = vmatprep.mubr.f32.mxu1 %v3692_v54  ;;  %v3075_v35 = vld [vmem:[#allocation4 + $0xa18] sm:$0xff]  ;;  %v3082_v54 = vld [vmem:[#allocation4 + $0xa50] sm:$0xff] }
 0x680   :  { %v2836_v23 = vadd.f32 %v15033_v30, %v9550_v51  ;;  %v9551_v10 = vpop.f32.mrb[186].mxu0  ;;  %v3696_v30 = vld [vmem:[#allocation4 + $0xdc8] sm:$0xff] }
 0x681   :  { %v9552_v0 = vpop.f32.mrb[187].mxu0  ;;  %3833 = vmatmul.mubr.f32.gmra.mrb[200].mxu1 %v3691_v52  ;;  %v4211_v51 = vld [vmem:[#allocation4 + $0xe28] sm:$0xff]  ;;  %v3091_v52 = vld [vmem:[#allocation4 + $0xa98] sm:$0xff] }
 0x682   :  { %v9553_v31 = vadd.f32 %v9552_v0, %v9551_v10  ;;  %11063 = vmatmul.mubr.msk.f32.gmra.mrb[74].mxu0 %vm593_vm0, %v2836_v23  ;;  %3837 = vmatprep.mubr.f32.mxu1 %v3696_v30  ;;  %v4210_v23 = vld [vmem:[#allocation4 + $0xe20] sm:$0xff]  ;;  %v4215_v10 = vld [vmem:[#allocation4 + $0xe48] sm:$0xff]  ;;  %v3083_v0 = vld [vmem:[#allocation4 + $0xa58] sm:$0xff] }
 0x683   :  { %v4227_v30 = vld [vmem:[#allocation4 + $0xea8] sm:$0xff] }
 0x684   :  { %v2841_v37 = vadd.f32 %v15035_v2, %v9553_v31  ;;  %v9554_v16 = vpop.f32.mrb[188].mxu0  ;;  %v3700_v2 = vld [vmem:[#allocation4 + $0xde8] sm:$0xff] }
 0x685   :  { %v9555_v25 = vpop.f32.mrb[189].mxu0  ;;  %3838 = vmatmul.mubr.f32.gmra.mrb[202].mxu1 %v3695_v57  ;;  %v4219_v31 = vld [vmem:[#allocation4 + $0xe68] sm:$0xff] }
 0x686   :  { %v9556_v55 = vadd.f32 %v9555_v25, %v9554_v16  ;;  %11065 = vmatprep.mubr.msk.f32.mxu0 %vm593_vm0, %v2841_v37  ;;  %3842 = vmatprep.mubr.f32.mxu1 %v3700_v2  ;;  %v3087_v37 = vld [vmem:[#allocation4 + $0xa78] sm:$0xff]  ;;  %v4218_v16 = vld [vmem:[#allocation4 + $0xe60] sm:$0xff]  ;;  %v3086_v25 = vld [vmem:[#allocation4 + $0xa70] sm:$0xff] }
 0x687   :  { %v4231_v57 = vld [vmem:[#allocation4 + $0xec8] sm:$0xff]  ;;  %v3099_v2 = vld [vmem:[#allocation4 + $0xad8] sm:$0xff] }
 0x688   :  { %v2846_v28 = vadd.f32 %v15037_v11, %v9556_v55  ;;  %v9557_v4 = vpop.f32.mrb[190].mxu0  ;;  %v4207_v11 = vld [vmem:[#allocation4 + $0xe08] sm:$0xff]  ;;  %v4222_v55 = vld [vmem:[#allocation4 + $0xe80] sm:$0xff] }
 0x689   :  { %v9558_v43 = vpop.f32.mrb[191].mxu0  ;;  %3843 = vmatmul.mubr.f32.gmra.mrb[204].mxu1 %v3699_v61  ;;  %v3102_v61 = vld [vmem:[#allocation4 + $0xaf0] sm:$0xff] }
 0x68a   :  { %v9559_v46 = vadd.f32 %v9558_v43, %v9557_v4  ;;  %11066 = vmatmul.mubr.msk.f32.gmra.mrb[76].mxu0 %vm593_vm0, %v2846_v28  ;;  %4334 = vmatprep.mubr.f32.mxu1 %v4207_v11  ;;  %v3090_v28 = vld [vmem:[#allocation4 + $0xa90] sm:$0xff]  ;;  %v3095_v4 = vld [vmem:[#allocation4 + $0xab8] sm:$0xff]  ;;  %v4226_v43 = vld [vmem:[#allocation4 + $0xea0] sm:$0xff] }
 0x68b   :  { %v3106_v11 = vld [vmem:[#allocation4 + $0xb10] sm:$0xff] }
 0x68c   :  { %v2851_v48 = vadd.f32 %v15039_v24, %v9559_v46  ;;  %v9560_v29 = vpop.f32.mrb[192].mxu0  ;;  %v3074_v24 = vld [vmem:[#allocation4 + $0xa10] sm:$0xff] }
 0x68d   :  { %v9561_v21 = vpop.f32.mrb[193].mxu0  ;;  %4335 = vmatmul.mubr.f32.vlgmr.msra.gmra.mrb[206].mxu1 %v4206_v49  ;;  %v3094_v46 = vld [vmem:[#allocation4 + $0xab0] sm:$0xff]  ;;  %v3115_v49 = vld [vmem:[#allocation4 + $0xb58] sm:$0xff] }
 0x68e   :  { %v9562_v53 = vadd.f32 %v9561_v21, %v9560_v29  ;;  %11068 = vmatprep.mubr.msk.f32.mxu0 %vm593_vm0, %v2851_v48  ;;  %4339 = vmatprep.mubr.f32.mxu1 %v4211_v51  ;;  %v4230_v48 = vld [vmem:[#allocation4 + $0xec0] sm:$0xff]  ;;  %v3098_v29 = vld [vmem:[#allocation4 + $0xad0] sm:$0xff]  ;;  %v3103_v21 = vld [vmem:[#allocation4 + $0xaf8] sm:$0xff] }
 0x68f   :  { %12792 = vmatpush3.bf16.msra.mxu1 %v15897_v59  ;;  %v3114_v51 = vld [vmem:[#allocation4 + $0xb50] sm:$0xff] }
 0x690   :  { %v2856_v56 = vadd.f32 %v15041_v9, %v9562_v53  ;;  %12794 = vmatprep.subr.bf16.mxu1 %v15898_v5  ;;  %v3078_v9 = vld [vmem:[#allocation4 + $0xa30] sm:$0xff]  ;;  %v3107_v53 = vld [vmem:[#allocation4 + $0xb18] sm:$0xff] }
 0x691   :  { %4340 = vmatmul.mubr.f32.gmra.mrb[208].mxu1 %v4210_v23  ;;  %v3123_v23 = vld [vmem:[#allocation4 + $0xb98] sm:$0xff] }
 0x692   :  { %11069 = vmatmul.mubr.msk.f32.gmra.mrb[78].mxu0 %vm593_vm0, %v2856_v56  ;;  %4344 = vmatprep.mubr.f32.mxu1 %v4215_v10  ;;  %v3111_v56 = vld [vmem:[#allocation4 + $0xb38] sm:$0xff]  ;;  %v3122_v10 = vld [vmem:[#allocation4 + $0xb90] sm:$0xff] }
 0x693   :  { %3345 = vmatprep.mubr.f32.mxu0 %v3075_v35  ;;  %12796 = vmatpush3.bf16.msra.mxu1 %v15899_v17  ;;  %v3110_v35 = vld [vmem:[#allocation4 + $0xb30] sm:$0xff] }
 0x694   :  { %12798 = vmatprep.subr.bf16.mxu1 %v15900_v62 }
 0x695   :  { %4345 = vmatmul.mubr.f32.gmra.mrb[210].mxu1 %v4214_v18  ;;  %v3130_v18 = vld [vmem:[#allocation4 + $0xbd0] sm:$0xff] }
 0x696   :  { %3346 = vmatmul.mubr.f32.vlgmr.msra.gmra.mrb[194].mxu0 %v3074_v24  ;;  %4349 = vmatprep.mubr.f32.mxu1 %v4219_v31  ;;  %v3119_v24 = vld [vmem:[#allocation4 + $0xb78] sm:$0xff] }
 0x697   :  { %3350 = vmatprep.mubr.f32.mxu0 %v3079_v58  ;;  %12688 = vmatpush3.bf16.msra.mxu0 %v15106_v6  ;;  %v4223_v6 = vld [vmem:[#allocation4 + $0xe88] sm:$0xff]  ;;  %v3118_v58 = vld [vmem:[#allocation4 + $0xb70] sm:$0xff]  ;;  %v3135_v31 = vld [vmem:[#allocation4 + $0xbf8] sm:$0xff] }
 0x698   :  { %12722 = vmatprep.subr.bf16.mxu0 %v15896_v40  ;;  %12800 = vmatpush3.bf16.msra.mxu1 %v15901_v15 }
 0x699   :  { %12802 = vmatprep.subr.bf16.mxu1 %v15902_v1  ;;  %4350 = vmatmul.mubr.f32.gmra.mrb[212].mxu1 %v4218_v16 }
 0x69a   :  { %3351 = vmatmul.mubr.f32.gmra.mrb[196].mxu0 %v3078_v9  ;;  %4354 = vmatprep.mubr.f32.mxu1 %v4223_v6  ;;  %v3127_v9 = vld [vmem:[#allocation4 + $0xbb8] sm:$0xff]  ;;  %v4235_v6 = vld [vmem:[#allocation4 + $0xee8] sm:$0xff] }
 0x69b   :  { %3355 = vmatprep.mubr.f32.mxu0 %v3083_v0  ;;  %v3131_v0 = vld [vmem:[#allocation4 + $0xbd8] sm:$0xff] }
 0x69c   :  { %12804 = vmatpush3.bf16.msra.mxu1 %v15903_v12 }
 0x69d   :  { %12806 = vmatprep.subr.bf16.mxu1 %v15904_v36  ;;  %4355 = vmatmul.mubr.f32.gmra.mrb[214].mxu1 %v4222_v55 }
 0x69e   :  { %3356 = vmatmul.mubr.f32.gmra.mrb[198].mxu0 %v3082_v54  ;;  %4359 = vmatprep.mubr.f32.mxu1 %v4227_v30  ;;  %v3134_v54 = vld [vmem:[#allocation4 + $0xbf0] sm:$0xff]  ;;  %v4239_v30 = vld [vmem:[#allocation4 + $0xf08] sm:$0xff] }
 0x69f   :  { %3360 = vmatprep.mubr.f32.mxu0 %v3087_v37  ;;  %v9693_v37 = vpop.f32.mrb[142].mxu1 }
 0x6a0   :  { %12808 = vmatpush3.bf16.msra.mxu1 %v15905_v63  ;;  %v9694_v16 = vpop.f32.mrb[143].mxu1 }
 0x6a1   :  { %12810 = vmatprep.subr.bf16.mxu1 %v15906_v42  ;;  %4360 = vmatmul.mubr.f32.gmra.mrb[216].mxu1 %v4226_v43  ;;  %v9696_v55 = vpop.f32.mrb[144].mxu1 }
 0x6a2   :  { %3361 = vmatmul.mubr.f32.gmra.mrb[200].mxu0 %v3086_v25  ;;  %4364 = vmatprep.mubr.f32.mxu1 %v4231_v57  ;;  %v15143_v25 = vadd.f32 %v9694_v16, %v9693_v37  ;;  %v4258_v37 = vld [vmem:[#allocation4 + $0xfa0] sm:$0xff] }
 0x6a3   :  { %3365 = vmatprep.mubr.f32.mxu0 %v3091_v52  ;;  %v4234_v52 = vld [vmem:[#allocation4 + $0xee0] sm:$0xff] }
 0x6a4   :  { %12812 = vmatpush3.bf16.msra.mxu1 %v15907_v47 }
 0x6a5   :  { %12814 = vmatprep.subr.bf16.mxu1 %v15908_v60  ;;  %4365 = vmatmul.mubr.f32.gmra.mrb[218].mxu1 %v4230_v48  ;;  %v4242_v48 = vld [vmem:[#allocation4 + $0xf20] sm:$0xff] }
 0x6a6   :  { %3366 = vmatmul.mubr.f32.gmra.mrb[202].mxu0 %v3090_v28  ;;  %4369 = vmatprep.mubr.f32.mxu1 %v4235_v6  ;;  %v9697_v28 = vpop.f32.mrb[145].mxu1 }
 0x6a7   :  { %3370 = vmatprep.mubr.f32.mxu0 %v3095_v4  ;;  %v4238_v4 = vld [vmem:[#allocation4 + $0xf00] sm:$0xff]  ;;  %v15145_v43 = vadd.f32 %v9697_v28, %v9696_v55  ;;  %v9699_v57 = vpop.f32.mrb[146].mxu1 }
 0x6a8   :  { %12816 = vmatpush3.bf16.msra.mxu1 %v15909_v22 }
 0x6a9   :  { %12818 = vmatprep.subr.bf16.mxu1 %v15910_v41  ;;  %4370 = vmatmul.mubr.f32.gmra.mrb[220].mxu1 %v4234_v52  ;;  %v4263_v52 = vld [vmem:[#allocation4 + $0xfc8] sm:$0xff] }
 0x6aa   :  { %3371 = vmatmul.mubr.f32.gmra.mrb[204].mxu0 %v3094_v46  ;;  %4374 = vmatprep.mubr.f32.mxu1 %v4239_v30  ;;  %v4243_v46 = vld [vmem:[#allocation4 + $0xf28] sm:$0xff]  ;;  %v4262_v30 = vld [vmem:[#allocation4 + $0xfc0] sm:$0xff] }
 0x6ab   :  { %3375 = vmatprep.mubr.f32.mxu0 %v3099_v2  ;;  %v9700_v2 = vpop.f32.mrb[147].mxu1 }
 0x6ac   :  { %12820 = vmatpush3.bf16.msra.mxu1 %v15911_v34 }
 0x6ad   :  { %12858 = vmatprep.subr.bf16.mxu1 %v15896_v40  ;;  %v3126_v40 = vld [vmem:[#allocation4 + $0xbb0] sm:$0xff]  ;;  %4375 = vmatmul.mubr.f32.gmra.mrb[222].mxu1 %v4238_v4 }
 0x6ae   :  { %3376 = vmatmul.mubr.f32.gmra.mrb[206].mxu0 %v3098_v29  ;;  %4379 = vmatprep.mubr.f32.mxu1 %v4243_v46  ;;  %v15147_v29 = vadd.f32 %v9700_v2, %v9699_v57  ;;  %v4267_v57 = vld [vmem:[#allocation4 + $0xfe8] sm:$0xff]  ;;  %v4266_v2 = vld [vmem:[#allocation4 + $0xfe0] sm:$0xff] }
 0x6af   :  { %3380 = vmatprep.mubr.f32.mxu0 %v3103_v21  ;;  %v9702_v21 = vpop.f32.mrb[148].mxu1 }
 0x6b1   :  { %4380 = vmatmul.mubr.f32.gmra.mrb[224].mxu1 %v4242_v48 }
 0x6b2   :  { %3381 = vmatmul.mubr.f32.gmra.mrb[208].mxu0 %v3102_v61  ;;  %v4247_v61 = vld [vmem:[#allocation4 + $0xf48] sm:$0xff] }
 0x6b3   :  { %3385 = vmatprep.mubr.f32.mxu0 %v3107_v53  ;;  %v9703_v53 = vpop.f32.mrb[149].mxu1  ;;  %4384 = vmatprep.mubr.f32.mxu1 %v4247_v61  ;;  %v4209_v61 = vld [vmem:[#allocation4 + $0xe18] sm:$0xff] }
 0x6b6   :  { %3386 = vmatmul.mubr.f32.gmra.mrb[210].mxu0 %v3106_v11  ;;  %v4246_v11 = vld [vmem:[#allocation4 + $0xf40] sm:$0xff] }
 0x6b7   :  { %3390 = vmatprep.mubr.f32.mxu0 %v3111_v56  ;;  %v15149_v56 = vadd.f32 %v9703_v53, %v9702_v21  ;;  %4385 = vmatmul.mubr.f32.gmra.mrb[226].mxu1 %v4246_v11  ;;  %v4208_v11 = vld [vmem:[#allocation4 + $0xe10] sm:$0xff] }
 0x6ba   :  { %3391 = vmatmul.mubr.f32.gmra.mrb[212].mxu0 %v3110_v35  ;;  %v9705_v35 = vpop.f32.mrb[150].mxu1 }
 0x6bb   :  { %3395 = vmatprep.mubr.f32.mxu0 %v3115_v49  ;;  %v4251_v49 = vld [vmem:[#allocation4 + $0xf68] sm:$0xff] }
 0x6bc   :  { %4389 = vmatprep.mubr.f32.mxu1 %v4251_v49 }
 0x6be   :  { %3396 = vmatmul.mubr.f32.gmra.mrb[214].mxu0 %v3114_v51  ;;  %v9706_v51 = vpop.f32.mrb[151].mxu1 }
 0x6bf   :  { %3400 = vmatprep.mubr.f32.mxu0 %v3119_v24  ;;  %v4250_v24 = vld [vmem:[#allocation4 + $0xf60] sm:$0xff] }
 0x6c0   :  { %4390 = vmatmul.mubr.f32.gmra.mrb[228].mxu1 %v4250_v24 }
 0x6c2   :  { %3401 = vmatmul.mubr.f32.gmra.mrb[216].mxu0 %v3118_v58  ;;  %v15151_v58 = vadd.f32 %v9706_v51, %v9705_v35  ;;  %v4213_v51 = vld [vmem:[#allocation4 + $0xe38] sm:$0xff] }
 0x6c3   :  { %3405 = vmatprep.mubr.f32.mxu0 %v3123_v23  ;;  %v9708_v23 = vpop.f32.mrb[152].mxu1 }
 0x6c6   :  { %3406 = vmatmul.mubr.f32.gmra.mrb[218].mxu0 %v3122_v10  ;;  %v4255_v10 = vld [vmem:[#allocation4 + $0xf88] sm:$0xff] }
 0x6c7   :  { %3410 = vmatprep.mubr.f32.mxu0 %v3127_v9  ;;  %v9709_v9 = vpop.f32.mrb[153].mxu1  ;;  %4394 = vmatprep.mubr.f32.mxu1 %v4255_v10 }
 0x6ca   :  { %3411 = vmatmul.mubr.f32.gmra.mrb[220].mxu0 %v3126_v40  ;;  %v4254_v40 = vld [vmem:[#allocation4 + $0xf80] sm:$0xff] }
 0x6cb   :  { %3415 = vmatprep.mubr.f32.mxu0 %v3131_v0  ;;  %v15153_v0 = vadd.f32 %v9709_v9, %v9708_v23  ;;  %4395 = vmatmul.mubr.f32.gmra.mrb[230].mxu1 %v4254_v40  ;;  %v4212_v23 = vld [vmem:[#allocation4 + $0xe30] sm:$0xff]  ;;  %v4217_v40 = vld [vmem:[#allocation4 + $0xe58] sm:$0xff] }
 0x6ce   :  { %3416 = vmatmul.mubr.f32.gmra.mrb[222].mxu0 %v3130_v18  ;;  %v9711_v18 = vpop.f32.mrb[154].mxu1 }
 0x6cf   :  { %3420 = vmatprep.mubr.f32.mxu0 %v3135_v31  ;;  %v4259_v31 = vld [vmem:[#allocation4 + $0xfa8] sm:$0xff] }
 0x6d0   :  { %4399 = vmatprep.mubr.f32.mxu1 %v4259_v31  ;;  %v4216_v31 = vld [vmem:[#allocation4 + $0xe50] sm:$0xff] }
 0x6d1   :  { %4400 = vmatmul.mubr.f32.gmra.mrb[232].mxu1 %v4258_v37 }
 0x6d2   :  { %3421 = vmatmul.mubr.f32.gmra.mrb[224].mxu0 %v3134_v54  ;;  %v9712_v54 = vpop.f32.mrb[155].mxu1  ;;  %4404 = vmatprep.mubr.f32.mxu1 %v4263_v52 }
 0x6d3   :  { %v15155_v16 = vadd.f32 %v9712_v54, %v9711_v18  ;;  %v9714_v6 = vpop.f32.mrb[156].mxu1 }
 0x6d4   :  { %v9715_v55 = vpop.f32.mrb[157].mxu1 }
 0x6d5   :  { %v15157_v28 = vadd.f32 %v9715_v55, %v9714_v6  ;;  %4405 = vmatmul.mubr.f32.gmra.mrb[234].mxu1 %v4262_v30  ;;  %v9717_v4 = vpop.f32.mrb[158].mxu1  ;;  %v4221_v6 = vld [vmem:[#allocation4 + $0xe78] sm:$0xff]  ;;  %v4220_v55 = vld [vmem:[#allocation4 + $0xe70] sm:$0xff] }
 0x6d6   :  { %v9718_v46 = vpop.f32.mrb[159].mxu1  ;;  %4409 = vmatprep.mubr.f32.mxu1 %v4267_v57  ;;  %v4225_v57 = vld [vmem:[#allocation4 + $0xe98] sm:$0xff] }
 0x6d7   :  { %v15159_v48 = vadd.f32 %v9718_v46, %v9717_v4  ;;  %v9720_v21 = vpop.f32.mrb[160].mxu1 }
 0x6d8   :  { %v9721_v53 = vpop.f32.mrb[161].mxu1 }
 0x6d9   :  { %4410 = vmatmul.mubr.f32.gmra.mrb[236].mxu1 %v4266_v2  ;;  %v15161_v35 = vadd.f32 %v9721_v53, %v9720_v21  ;;  %v9723_v49 = vpop.f32.mrb[162].mxu1  ;;  %v4224_v2 = vld [vmem:[#allocation4 + $0xe90] sm:$0xff]  ;;  %v4229_v53 = vld [vmem:[#allocation4 + $0xeb8] sm:$0xff] }
 0x6da   :  { %4479 = vmatprep.mubr.f32.mxu1 %v4209_v61  ;;  %v9724_v24 = vpop.f32.mrb[163].mxu1 }
 0x6db   :  { %v15165_v10 = vadd.f32 %v9724_v24, %v9723_v49  ;;  %v9726_v9 = vpop.f32.mrb[164].mxu1  ;;  %v4228_v49 = vld [vmem:[#allocation4 + $0xeb0] sm:$0xff] }
 0x6dc   :  { %v9727_v18 = vpop.f32.mrb[165].mxu1 }
 0x6dd   :  { %4480 = vmatmul.mubr.f32.vlgmr.msra.gmra.mrb[238].mxu1 %v4208_v11  ;;  %v15169_v54 = vadd.f32 %v9727_v18, %v9726_v9  ;;  %v9729_v37 = vpop.f32.mrb[166].mxu1 }
 0x6de   :  { %12860 = vmatpush3.bf16.msra.mxu1 %v15897_v59  ;;  %4484 = vmatprep.mubr.f32.mxu1 %v4213_v51  ;;  %v9730_v52 = vpop.f32.mrb[167].mxu1 }
 0x6df   :  { %12862 = vmatprep.subr.bf16.mxu1 %v15898_v5  ;;  %v15173_v30 = vadd.f32 %v9730_v52, %v9729_v37  ;;  %v9732_v4 = vpop.f32.mrb[168].mxu1  ;;  %v4236_v37 = vld [vmem:[#allocation4 + $0xef0] sm:$0xff] }
 0x6e0   :  { %v9733_v46 = vpop.f32.mrb[169].mxu1  ;;  %v4240_v52 = vld [vmem:[#allocation4 + $0xf10] sm:$0xff] }
 0x6e1   :  { %4485 = vmatmul.mubr.f32.gmra.mrb[240].mxu1 %v4212_v23  ;;  %v15177_v21 = vadd.f32 %v9733_v46, %v9732_v4  ;;  %v9735_v61 = vpop.f32.mrb[170].mxu1  ;;  %v4233_v23 = vld [vmem:[#allocation4 + $0xed8] sm:$0xff]  ;;  %v4244_v4 = vld [vmem:[#allocation4 + $0xf30] sm:$0xff] }
 0x6e2   :  { %12864 = vmatpush3.bf16.msra.mxu1 %v15899_v17  ;;  %4489 = vmatprep.mubr.f32.mxu1 %v4217_v40  ;;  %v9736_v11 = vpop.f32.mrb[171].mxu1  ;;  %v4232_v40 = vld [vmem:[#allocation4 + $0xed0] sm:$0xff] }
 0x6e3   :  { %12866 = vmatprep.subr.bf16.mxu1 %v15900_v62  ;;  %v15181_v51 = vadd.f32 %v9736_v11, %v9735_v61  ;;  %v9738_v24 = vpop.f32.mrb[172].mxu1  ;;  %v4248_v46 = vld [vmem:[#allocation4 + $0xf50] sm:$0xff] }
 0x6e4   :  { %v9739_v9 = vpop.f32.mrb[173].mxu1  ;;  %v4252_v61 = vld [vmem:[#allocation4 + $0xf70] sm:$0xff] }
 0x6e5   :  { %4490 = vmatmul.mubr.f32.gmra.mrb[242].mxu1 %v4216_v31  ;;  %v15185_v18 = vadd.f32 %v9739_v9, %v9738_v24  ;;  %v4237_v31 = vld [vmem:[#allocation4 + $0xef8] sm:$0xff]  ;;  %v4256_v11 = vld [vmem:[#allocation4 + $0xf90] sm:$0xff] }
 0x6e6   :  { %12868 = vmatpush3.bf16.msra.mxu1 %v15901_v15  ;;  %4494 = vmatprep.mubr.f32.mxu1 %v4221_v6  ;;  %v4241_v6 = vld [vmem:[#allocation4 + $0xf18] sm:$0xff]  ;;  %v4260_v24 = vld [vmem:[#allocation4 + $0xfb0] sm:$0xff] }
 0x6e7   :  { %12870 = vmatprep.subr.bf16.mxu1 %v15902_v1  ;;  %v4264_v9 = vld [vmem:[#allocation4 + $0xfd0] sm:$0xff] }
 0x6e9   :  { %4495 = vmatmul.mubr.f32.gmra.mrb[244].mxu1 %v4220_v55  ;;  %v4245_v55 = vld [vmem:[#allocation4 + $0xf38] sm:$0xff] }
 0x6ea   :  { %12872 = vmatpush3.bf16.msra.mxu1 %v15903_v12  ;;  %4499 = vmatprep.mubr.f32.mxu1 %v4225_v57  ;;  %v4249_v57 = vld [vmem:[#allocation4 + $0xf58] sm:$0xff] }
 0x6eb   :  { %12874 = vmatprep.subr.bf16.mxu1 %v15904_v36 }
 0x6ed   :  { %4500 = vmatmul.mubr.f32.gmra.mrb[246].mxu1 %v4224_v2  ;;  %v4253_v2 = vld [vmem:[#allocation4 + $0xf78] sm:$0xff] }
 0x6ee   :  { %12876 = vmatpush3.bf16.msra.mxu1 %v15905_v63  ;;  %4504 = vmatprep.mubr.f32.mxu1 %v4229_v53  ;;  %v4257_v53 = vld [vmem:[#allocation4 + $0xf98] sm:$0xff] }
 0x6ef   :  { %12878 = vmatprep.subr.bf16.mxu1 %v15906_v42 }
 0x6f1   :  { %4505 = vmatmul.mubr.f32.gmra.mrb[248].mxu1 %v4228_v49  ;;  %v4261_v49 = vld [vmem:[#allocation4 + $0xfb8] sm:$0xff] }
 0x6f2   :  { %12880 = vmatpush3.bf16.msra.mxu1 %v15907_v47  ;;  %4509 = vmatprep.mubr.f32.mxu1 %v4233_v23  ;;  %v4265_v23 = vld [vmem:[#allocation4 + $0xfd8] sm:$0xff] }
 0x6f3   :  { %12882 = vmatprep.subr.bf16.mxu1 %v15908_v60 }
 0x6f5   :  { %4510 = vmatmul.mubr.f32.gmra.mrb[250].mxu1 %v4232_v40  ;;  %v4269_v40 = vld [vmem:[#allocation4 + $0xff8] sm:$0xff] }
 0x6f6   :  { %12884 = vmatpush3.bf16.msra.mxu1 %v15909_v22  ;;  %4514 = vmatprep.mubr.f32.mxu1 %v4237_v31  ;;  %v4268_v31 = vld [vmem:[#allocation4 + $0xff0] sm:$0xff] }
 0x6f7   :  { %12886 = vmatprep.subr.bf16.mxu1 %v15910_v41 }
 0x6f9   :  { %4515 = vmatmul.mubr.f32.gmra.mrb[252].mxu1 %v4236_v37 }
 0x6fa   :  { %12888 = vmatpush3.bf16.msra.mxu1 %v15911_v34  ;;  %4519 = vmatprep.mubr.f32.mxu1 %v4241_v6 }
 0x6fd   :  { %4520 = vmatmul.mubr.f32.gmra.mrb[254].mxu1 %v4240_v52 }
 0x6fe   :  { %4524 = vmatprep.mubr.f32.mxu1 %v4245_v55  ;;  %v9871_v55 = vpop.f32.mrb[174].mxu1 }
 0x701   :  { %4525 = vmatmul.mubr.f32.gmra.mrb[0].mxu1 %v4244_v4  ;;  %v9872_v4 = vpop.f32.mrb[175].mxu1 }
 0x702   :  { %4529 = vmatprep.mubr.f32.mxu1 %v4249_v57 }
 0x705   :  { %4530 = vmatmul.mubr.f32.gmra.mrb[2].mxu1 %v4248_v46 }
 0x706   :  { %4534 = vmatprep.mubr.f32.mxu1 %v4253_v2  ;;  %v15191_v2 = vadd.f32 %v9872_v4, %v9871_v55 }
 0x709   :  { %4535 = vmatmul.mubr.f32.gmra.mrb[4].mxu1 %v4252_v61  ;;  %v9874_v61 = vpop.f32.mrb[176].mxu1 }
 0x70a   :  { %4539 = vmatprep.mubr.f32.mxu1 %v4257_v53 }
 0x70d   :  { %4540 = vmatmul.mubr.f32.gmra.mrb[6].mxu1 %v4256_v11  ;;  %v9875_v11 = vpop.f32.mrb[177].mxu1 }
 0x70e   :  { %4544 = vmatprep.mubr.f32.mxu1 %v4261_v49 }
 0x711   :  { %4545 = vmatmul.mubr.f32.gmra.mrb[8].mxu1 %v4260_v24  ;;  %v15194_v24 = vadd.f32 %v9875_v11, %v9874_v61 }
 0x712   :  { %4549 = vmatprep.mubr.f32.mxu1 %v4265_v23 }
 0x715   :  { %4550 = vmatmul.mubr.f32.gmra.mrb[10].mxu1 %v4264_v9 }
 0x716   :  { %4554 = vmatprep.mubr.f32.mxu1 %v4269_v40 }
 0x719   :  { %4555 = vmatmul.mubr.f32.gmra.mrb[12].mxu1 %v4268_v31 }
 0x728   :  { %v9877_v23 = vpop.f32.mrb[178].mxu1 }
 0x729   :  { %v9878_v9 = vpop.f32.mrb[179].mxu1 }
 0x769   :  { %v9773_v37 = vpop.f32.mrb[194].mxu0 }
 0x76a   :  { %v9774_v6 = vpop.f32.mrb[195].mxu0 }
 0x76b   :  { %v9775_v52 = vadd.f32 %v9774_v6, %v9773_v37  ;;  %v15197_v37 = vadd.f32 %v9878_v9, %v9877_v23  ;;  %v9880_v6 = vpop.f32.mrb[180].mxu1 }
 0x76d   :  { %v3348_v57 = vadd.f32 %v9775_v52, %v15143_v25  ;;  %v9776_v46 = vpop.f32.mrb[196].mxu0  ;;  %v9881_v52 = vpop.f32.mrb[181].mxu1 }
 0x76e   :  { %v9777_v53 = vpop.f32.mrb[197].mxu0  ;;  %v15200_v4 = vadd.f32 %v9881_v52, %v9880_v6 }
 0x76f   :  { %v9778_v49 = vadd.f32 %v9777_v53, %v9776_v46  ;;  %11075 = vmatprep.mubr.msk.f32.mxu0 %vm593_vm0, %v3348_v57  ;;  %v9883_v46 = vpop.f32.mrb[182].mxu1 }
 0x770   :  { %v9884_v57 = vpop.f32.mrb[183].mxu1 }
 0x771   :  { %v3353_v40 = vadd.f32 %v9778_v49, %v15145_v43  ;;  %v9779_v31 = vpop.f32.mrb[198].mxu0  ;;  %v15205_v43 = vadd.f32 %v9884_v57, %v9883_v46  ;;  %v9886_v11 = vpop.f32.mrb[184].mxu1 }
 0x772   :  { %v9780_v25 = vpop.f32.mrb[199].mxu0  ;;  %v9887_v23 = vpop.f32.mrb[185].mxu1 }
 0x773   :  { %v9781_v55 = vadd.f32 %v9780_v25, %v9779_v31  ;;  %11076 = vmatmul.mubr.msk.f32.vlgmr.msra.gmra.mrb[64].mxu0 %vm593_vm0, %v3353_v40  ;;  %v15208_v40 = vadd.f32 %v9887_v23, %v9886_v11  ;;  %v9889_v31 = vpop.f32.mrb[186].mxu1 }
 0x774   :  { %12724 = vmatpush3.bf16.msra.mxu0 %v15897_v59  ;;  %v9890_v59 = vpop.f32.mrb[187].mxu1 }
 0x775   :  { %v3358_v61 = vadd.f32 %v9781_v55, %v15147_v29  ;;  %v9782_v53 = vpop.f32.mrb[200].mxu0  ;;  %12726 = vmatprep.subr.bf16.mxu0 %v15898_v5  ;;  %v15213_v5 = vadd.f32 %v9890_v59, %v9889_v31  ;;  %v9892_v25 = vpop.f32.mrb[188].mxu1 }
 0x776   :  { %v9783_v49 = vpop.f32.mrb[201].mxu0  ;;  %v9893_v55 = vpop.f32.mrb[189].mxu1 }
 0x777   :  { %v9784_v9 = vadd.f32 %v9783_v49, %v9782_v53  ;;  %11078 = vmatprep.mubr.msk.f32.mxu0 %vm593_vm0, %v3358_v61  ;;  %v15216_v57 = vadd.f32 %v9893_v55, %v9892_v25  ;;  %v9895_v61 = vpop.f32.mrb[190].mxu1 }
 0x778   :  { %12728 = vmatpush3.bf16.msra.mxu0 %v15899_v17  ;;  %v9896_v17 = vpop.f32.mrb[191].mxu1 }
 0x779   :  { %v3363_v6 = vadd.f32 %v9784_v9, %v15149_v56  ;;  %v9785_v29 = vpop.f32.mrb[202].mxu0  ;;  %12730 = vmatprep.subr.bf16.mxu0 %v15900_v62  ;;  %v15221_v62 = vadd.f32 %v9896_v17, %v9895_v61  ;;  %v9898_v11 = vpop.f32.mrb[192].mxu1 }
 0x77a   :  { %v9786_v52 = vpop.f32.mrb[203].mxu0  ;;  %v9899_v23 = vpop.f32.mrb[193].mxu1 }
 0x77b   :  { %v9787_v46 = vadd.f32 %v9786_v52, %v9785_v29  ;;  %11079 = vmatmul.mubr.msk.f32.gmra.mrb[66].mxu0 %vm593_vm0, %v3363_v6  ;;  %v15224_v31 = vadd.f32 %v9899_v23, %v9898_v11  ;;  %v9901_v59 = vpop.f32.mrb[194].mxu1 }
 0x77c   :  { %12732 = vmatpush3.bf16.msra.mxu0 %v15901_v15  ;;  %v9902_v15 = vpop.f32.mrb[195].mxu1 }
 0x77d   :  { %v3368_v53 = vadd.f32 %v9787_v46, %v15151_v58  ;;  %v9788_v56 = vpop.f32.mrb[204].mxu0  ;;  %12734 = vmatprep.subr.bf16.mxu0 %v15902_v1  ;;  %v15229_v1 = vadd.f32 %v9902_v15, %v9901_v59  ;;  %v9904_v29 = vpop.f32.mrb[196].mxu1 }
 0x77e   :  { %v9789_v49 = vpop.f32.mrb[205].mxu0  ;;  %v9905_v52 = vpop.f32.mrb[197].mxu1 }
 0x77f   :  { %v9790_v9 = vadd.f32 %v9789_v49, %v9788_v56  ;;  %11081 = vmatprep.mubr.msk.f32.mxu0 %vm593_vm0, %v3368_v53  ;;  %v15232_v46 = vadd.f32 %v9905_v52, %v9904_v29  ;;  %v9907_v61 = vpop.f32.mrb[198].mxu1  ;;  %v3994_v29 = vld [vmem:[#allocation6 + $0x60] sm:$0xff] }
 0x780   :  { %12736 = vmatpush3.bf16.msra.mxu0 %v15903_v12  ;;  %v9908_v12 = vpop.f32.mrb[199].mxu1 }
 0x781   :  { %v3373_v6 = vadd.f32 %v9790_v9, %v15153_v0  ;;  %v9791_v58 = vpop.f32.mrb[206].mxu0  ;;  %12738 = vmatprep.subr.bf16.mxu0 %v15904_v36  ;;  %v15237_v36 = vadd.f32 %v9908_v12, %v9907_v61  ;;  %v9910_v53 = vpop.f32.mrb[200].mxu1 }
 0x782   :  { %v9792_v25 = vpop.f32.mrb[207].mxu0  ;;  %v9911_v11 = vpop.f32.mrb[201].mxu1 }
 0x783   :  { %v9793_v55 = vadd.f32 %v9792_v25, %v9791_v58  ;;  %11082 = vmatmul.mubr.msk.f32.gmra.mrb[68].mxu0 %vm593_vm0, %v3373_v6  ;;  %v15240_v23 = vadd.f32 %v9911_v11, %v9910_v53  ;;  %v9913_v9 = vpop.f32.mrb[202].mxu1  ;;  %v3995_v25 = vld [vmem:[#allocation6 + $0x68] sm:$0xff] }
 0x784   :  { %12740 = vmatpush3.bf16.msra.mxu0 %v15905_v63  ;;  %v9914_v63 = vpop.f32.mrb[203].mxu1 }
 0x785   :  { %v3378_v17 = vadd.f32 %v9793_v55, %v15155_v16  ;;  %v9794_v0 = vpop.f32.mrb[208].mxu0  ;;  %12742 = vmatprep.subr.bf16.mxu0 %v15906_v42  ;;  %v15245_v42 = vadd.f32 %v9914_v63, %v9913_v9  ;;  %v9916_v15 = vpop.f32.mrb[204].mxu1 }
 0x786   :  { %v9795_v56 = vpop.f32.mrb[209].mxu0  ;;  %v9917_v58 = vpop.f32.mrb[205].mxu1 }
 0x787   :  { %v9796_v49 = vadd.f32 %v9795_v56, %v9794_v0  ;;  %11084 = vmatprep.mubr.msk.f32.mxu0 %vm593_vm0, %v3378_v17  ;;  %v15248_v55 = vadd.f32 %v9917_v58, %v9916_v15  ;;  %v10049_v61 = vpop.f32.mrb[206].mxu1  ;;  %v12753_v0 = vpack.c.bf16 %v3995_v25, %v3994_v29 }
 0x788   :  { %12744 = vmatpush3.bf16.msra.mxu0 %v15907_v47  ;;  %v10050_v47 = vpop.f32.mrb[207].mxu1 }
 0x789   :  { %v3383_v59 = vadd.f32 %v9796_v49, %v15157_v28  ;;  %v9797_v16 = vpop.f32.mrb[210].mxu0  ;;  %12746 = vmatprep.subr.bf16.mxu0 %v15908_v60  ;;  %v15253_v60 = vadd.f32 %v10050_v47, %v10049_v61  ;;  %v10052_v17 = vpop.f32.mrb[208].mxu1 }
 0x78a   :  { %v9798_v6 = vpop.f32.mrb[211].mxu0  ;;  %v10053_v56 = vpop.f32.mrb[209].mxu1 }
 0x78b   :  { %v9799_v52 = vadd.f32 %v9798_v6, %v9797_v16  ;;  %11085 = vmatmul.mubr.msk.f32.gmra.mrb[70].mxu0 %vm593_vm0, %v3383_v59  ;;  %v15256_v49 = vadd.f32 %v10053_v56, %v10052_v17  ;;  %v10055_v9 = vpop.f32.mrb[210].mxu1 }
 0x78c   :  { %12748 = vmatpush3.bf16.msra.mxu0 %v15909_v22  ;;  %v10056_v22 = vpop.f32.mrb[211].mxu1 }
 0x78d   :  { %v3388_v28 = vadd.f32 %v9799_v52, %v15159_v48  ;;  %v9800_v12 = vpop.f32.mrb[212].mxu0  ;;  %12750 = vmatprep.subr.bf16.mxu0 %v15910_v41  ;;  %v15260_v59 = vadd.f32 %v10056_v22, %v10055_v9  ;;  %v10058_v41 = vpop.f32.mrb[212].mxu1 }
 0x78e   :  { %v9801_v53 = vpop.f32.mrb[213].mxu0  ;;  %v10059_v15 = vpop.f32.mrb[213].mxu1 }
 0x78f   :  { %v9802_v11 = vadd.f32 %v9801_v53, %v9800_v12  ;;  %11087 = vmatprep.mubr.msk.f32.mxu0 %vm593_vm0, %v3388_v28  ;;  %v15263_v58 = vadd.f32 %v10059_v15, %v10058_v41  ;;  %v10061_v29 = vpop.f32.mrb[214].mxu1 }
 0x790   :  { %12752 = vmatpush3.bf16.msra.mxu0 %v15911_v34  ;;  %v10062_v25 = vpop.f32.mrb[215].mxu1 }
 0x791   :  { %v3393_v48 = vadd.f32 %v9802_v11, %v15161_v35  ;;  %v9803_v63 = vpop.f32.mrb[214].mxu0  ;;  %12754 = vmatprep.subr.bf16.mxu0 %v12753_v0  ;;  %v15266_v61 = vadd.f32 %v10062_v25, %v10061_v29  ;;  %v10064_v35 = vpop.f32.mrb[216].mxu1 }
 0x792   :  { %v9804_v16 = vpop.f32.mrb[215].mxu0  ;;  %v10065_v28 = vpop.f32.mrb[217].mxu1 }
 0x793   :  { %v9805_v6 = vadd.f32 %v9804_v16, %v9803_v63  ;;  %11088 = vmatmul.mubr.msk.f32.gmra.mrb[72].mxu0 %vm593_vm0, %v3393_v48  ;;  %v15269_v17 = vadd.f32 %v10065_v28, %v10064_v35  ;;  %v10067_v53 = vpop.f32.mrb[218].mxu1  ;;  %v3642_v28 = vld [vmem:[#allocation4 + $0xc18] sm:$0xff] }
 0x794   :  { %v10068_v56 = vpop.f32.mrb[219].mxu1 }
 0x795   :  { %v3398_v52 = vadd.f32 %v9805_v6, %v15165_v10  ;;  %v9806_v34 = vpop.f32.mrb[216].mxu0  ;;  %v15272_v22 = vadd.f32 %v10068_v56, %v10067_v53  ;;  %v3645_v53 = vld [vmem:[#allocation4 + $0xc30] sm:$0xff]  ;;  %v3650_v56 = vld [vmem:[#allocation4 + $0xc58] sm:$0xff] }
 0x796   :  { %v9807_v47 = vpop.f32.mrb[217].mxu0 }
 0x797   :  { %v9808_v12 = vadd.f32 %v9807_v47, %v9806_v34  ;;  %11090 = vmatprep.mubr.msk.f32.mxu0 %vm593_vm0, %v3398_v52 }
 0x799   :  { %v3403_v11 = vadd.f32 %v9808_v12, %v15169_v54  ;;  %v9809_v9 = vpop.f32.mrb[218].mxu0  ;;  %v3641_v12 = vld [vmem:[#allocation4 + $0xc10] sm:$0xff] }
 0x79a   :  { %v9810_v48 = vpop.f32.mrb[219].mxu0 }
 0x79b   :  { %v9811_v10 = vadd.f32 %v9810_v48, %v9809_v9  ;;  %11091 = vmatmul.mubr.msk.f32.gmra.mrb[74].mxu0 %vm593_vm0, %v3403_v11  ;;  %v3654_v11 = vld [vmem:[#allocation4 + $0xc78] sm:$0xff]  ;;  %v3653_v9 = vld [vmem:[#allocation4 + $0xc70] sm:$0xff] }
 0x79c   :  { %v3658_v48 = vld [vmem:[#allocation4 + $0xc98] sm:$0xff] }
 0x79d   :  { %v3408_v63 = vadd.f32 %v9811_v10, %v15173_v30  ;;  %v9812_v41 = vpop.f32.mrb[220].mxu0  ;;  %v3662_v10 = vld [vmem:[#allocation4 + $0xcb8] sm:$0xff] }
 0x79e   :  { %v9813_v16 = vpop.f32.mrb[221].mxu0 }
 0x79f   :  { %v9814_v15 = vadd.f32 %v9813_v16, %v9812_v41  ;;  %11093 = vmatprep.mubr.msk.f32.mxu0 %vm593_vm0, %v3408_v63  ;;  %v10070_v63 = vpop.f32.mrb[220].mxu1 }
 0x7a0   :  { %v10071_v41 = vpop.f32.mrb[221].mxu1 }
 0x7a1   :  { %v3413_v6 = vadd.f32 %v9814_v15, %v15177_v21  ;;  %v9815_v29 = vpop.f32.mrb[222].mxu0  ;;  %v3646_v21 = vld [vmem:[#allocation4 + $0xc38] sm:$0xff]  ;;  %v15283_v16 = vadd.f32 %v10071_v41, %v10070_v63 }
 0x7a2   :  { %v9816_v25 = vpop.f32.mrb[223].mxu0  ;;  %v3666_v15 = vld [vmem:[#allocation4 + $0xcd8] sm:$0xff] }
 0x7a3   :  { %v9817_v52 = vadd.f32 %v9816_v25, %v9815_v29  ;;  %11094 = vmatmul.mubr.msk.f32.gmra.mrb[76].mxu0 %vm593_vm0, %v3413_v6  ;;  %v10073_v6 = vpop.f32.mrb[222].mxu1 }
 0x7a4   :  { %v10074_v29 = vpop.f32.mrb[223].mxu1 }
 0x7a5   :  { %v3418_v54 = vadd.f32 %v9817_v52, %v15181_v51  ;;  %v9818_v34 = vpop.f32.mrb[224].mxu0  ;;  %v3649_v51 = vld [vmem:[#allocation4 + $0xc50] sm:$0xff]  ;;  %v15285_v25 = vadd.f32 %v10074_v29, %v10073_v6  ;;  %v3686_v6 = vld [vmem:[#allocation4 + $0xd78] sm:$0xff] }
 0x7a6   :  { %v9819_v35 = vpop.f32.mrb[225].mxu0  ;;  %v3665_v52 = vld [vmem:[#allocation4 + $0xcd0] sm:$0xff] }
 0x7a7   :  { %v9820_v47 = vadd.f32 %v9819_v35, %v9818_v34  ;;  %11096 = vmatprep.mubr.msk.f32.mxu0 %vm593_vm0, %v3418_v54  ;;  %v3670_v54 = vld [vmem:[#allocation4 + $0xcf8] sm:$0xff]  ;;  %v10076_v34 = vpop.f32.mrb[224].mxu1 }
 0x7a8   :  { %v10077_v35 = vpop.f32.mrb[225].mxu1 }
 0x7a9   :  { %v3423_v30 = vadd.f32 %v9820_v47, %v15185_v18  ;;  %v3657_v18 = vld [vmem:[#allocation4 + $0xc90] sm:$0xff]  ;;  %v15287_v47 = vadd.f32 %v10077_v35, %v10076_v34  ;;  %v3690_v35 = vld [vmem:[#allocation4 + $0xd98] sm:$0xff] }
 0x7aa   :  { %v3685_v34 = vld [vmem:[#allocation4 + $0xd70] sm:$0xff] }
 0x7ab   :  { %11097 = vmatmul.mubr.msk.f32.gmra.mrb[78].mxu0 %vm593_vm0, %v3423_v30  ;;  %v3669_v30 = vld [vmem:[#allocation4 + $0xcf0] sm:$0xff] }
 0x7ac   :  { %3912 = vmatprep.mubr.f32.mxu0 %v3642_v28  ;;  %v3674_v28 = vld [vmem:[#allocation4 + $0xd18] sm:$0xff] }
 0x7af   :  { %3913 = vmatmul.mubr.f32.vlgmr.msra.gmra.mrb[226].mxu0 %v3641_v12  ;;  %v10079_v12 = vpop.f32.mrb[226].mxu1 }
 0x7b0   :  { %3917 = vmatprep.mubr.f32.mxu0 %v3646_v21  ;;  %12756 = vmatpush3.bf16.msra.mxu0 %v12753_v0  ;;  %v3661_v0 = vld [vmem:[#allocation4 + $0xcb0] sm:$0xff]  ;;  %v10080_v21 = vpop.f32.mrb[227].mxu1 }
 0x7b3   :  { %3918 = vmatmul.mubr.f32.gmra.mrb[228].mxu0 %v3645_v53  ;;  %v15289_v53 = vadd.f32 %v10080_v21, %v10079_v12  ;;  %v3689_v21 = vld [vmem:[#allocation4 + $0xd90] sm:$0xff] }
 0x7b4   :  { %3922 = vmatprep.mubr.f32.mxu0 %v3650_v56  ;;  %v3673_v56 = vld [vmem:[#allocation4 + $0xd10] sm:$0xff] }
 0x7b7   :  { %3923 = vmatmul.mubr.f32.gmra.mrb[230].mxu0 %v3649_v51  ;;  %v3678_v51 = vld [vmem:[#allocation4 + $0xd38] sm:$0xff] }
 0x7b8   :  { %3927 = vmatprep.mubr.f32.mxu0 %v3654_v11  ;;  %v10082_v11 = vpop.f32.mrb[228].mxu1 }
 0x7bb   :  { %3928 = vmatmul.mubr.f32.gmra.mrb[232].mxu0 %v3653_v9  ;;  %v10083_v9 = vpop.f32.mrb[229].mxu1 }
 0x7bc   :  { %3932 = vmatprep.mubr.f32.mxu0 %v3658_v48  ;;  %v15291_v48 = vadd.f32 %v10083_v9, %v10082_v11  ;;  %v10085_v63 = vpop.f32.mrb[230].mxu1 }
 0x7bd   :  { %v10086_v41 = vpop.f32.mrb[231].mxu1 }
 0x7be   :  { %v10088_v29 = vpop.f32.mrb[232].mxu1 }
 0x7bf   :  { %3933 = vmatmul.mubr.f32.gmra.mrb[234].mxu0 %v3657_v18  ;;  %v3677_v18 = vld [vmem:[#allocation4 + $0xd30] sm:$0xff] }
 0x7c0   :  { %3937 = vmatprep.mubr.f32.mxu0 %v3662_v10  ;;  %v3682_v10 = vld [vmem:[#allocation4 + $0xd58] sm:$0xff] }
 0x7c3   :  { %3938 = vmatmul.mubr.f32.gmra.mrb[236].mxu0 %v3661_v0  ;;  %v15293_v0 = vadd.f32 %v10086_v41, %v10085_v63 }
 0x7c4   :  { %3942 = vmatprep.mubr.f32.mxu0 %v3666_v15  ;;  %v3681_v15 = vld [vmem:[#allocation4 + $0xd50] sm:$0xff] }
 0x7c7   :  { %3943 = vmatmul.mubr.f32.gmra.mrb[238].mxu0 %v3665_v52  ;;  %v10089_v52 = vpop.f32.mrb[233].mxu1 }
 0x7c8   :  { %3947 = vmatprep.mubr.f32.mxu0 %v3670_v54  ;;  %v15295_v54 = vadd.f32 %v10089_v52, %v10088_v29  ;;  %v3702_v29 = vld [vmem:[#allocation4 + $0xdf8] sm:$0xff] }
 0x7cb   :  { %3948 = vmatmul.mubr.f32.gmra.mrb[240].mxu0 %v3669_v30  ;;  %v10091_v30 = vpop.f32.mrb[234].mxu1 }
 0x7cc   :  { %3952 = vmatprep.mubr.f32.mxu0 %v3674_v28  ;;  %v10092_v28 = vpop.f32.mrb[235].mxu1 }
 0x7cd   :  { %v15297_v12 = vadd.f32 %v10092_v28, %v10091_v30  ;;  %v3701_v28 = vld [vmem:[#allocation4 + $0xdf0] sm:$0xff] }
 0x7cf   :  { %3953 = vmatmul.mubr.f32.gmra.mrb[242].mxu0 %v3673_v56  ;;  %v3694_v56 = vld [vmem:[#allocation4 + $0xdb8] sm:$0xff] }
 0x7d0   :  { %3957 = vmatprep.mubr.f32.mxu0 %v3678_v51  ;;  %v10094_v51 = vpop.f32.mrb[236].mxu1 }
 0x7d1   :  { %v10095_v11 = vpop.f32.mrb[237].mxu1 }
 0x7d2   :  { %v15299_v9 = vadd.f32 %v10095_v11, %v10094_v51  ;;  %v10129_v63 = vpop.f32.mrb[238].mxu1 }
 0x7d3   :  { %3958 = vmatmul.mubr.f32.gmra.mrb[244].mxu0 %v3677_v18  ;;  %v3693_v18 = vld [vmem:[#allocation4 + $0xdb0] sm:$0xff]  ;;  %v10130_v41 = vpop.f32.mrb[239].mxu1 }
 0x7d4   :  { %3962 = vmatprep.mubr.f32.mxu0 %v3682_v10  ;;  %v3698_v10 = vld [vmem:[#allocation4 + $0xdd8] sm:$0xff] }
 0x7d7   :  { %3963 = vmatmul.mubr.f32.gmra.mrb[246].mxu0 %v3681_v15  ;;  %v10131_v15 = vadd.f32 %v10130_v41, %v10129_v63 }
 0x7d8   :  { %3967 = vmatprep.mubr.f32.mxu0 %v3686_v6  ;;  %v3697_v6 = vld [vmem:[#allocation4 + $0xdd0] sm:$0xff] }
 0x7d9   :  { %v15302_v52 = vadd.f32 %v10131_v15, %v15253_v60 }
 0x7db   :  { %3968 = vmatmul.mubr.f32.gmra.mrb[248].mxu0 %v3685_v34  ;;  %v10132_v34 = vpop.f32.mrb[240].mxu1 }
 0x7dc   :  { %3972 = vmatprep.mubr.f32.mxu0 %v3690_v35  ;;  %v10133_v35 = vpop.f32.mrb[241].mxu1 }
 0x7dd   :  { %v10134_v30 = vadd.f32 %v10133_v35, %v10132_v34 }
 0x7df   :  { %3973 = vmatmul.mubr.f32.gmra.mrb[250].mxu0 %v3689_v21  ;;  %v15305_v21 = vadd.f32 %v10134_v30, %v15256_v49 }
 0x7e0   :  { %3977 = vmatprep.mubr.f32.mxu0 %v3694_v56  ;;  %v10135_v56 = vpop.f32.mrb[242].mxu1 }
 0x7e1   :  { %v10136_v51 = vpop.f32.mrb[243].mxu1 }
 0x7e2   :  { %v10137_v11 = vadd.f32 %v10136_v51, %v10135_v56 }
 0x7e3   :  { %3978 = vmatmul.mubr.f32.gmra.mrb[252].mxu0 %v3693_v18 }
 0x7e4   :  { %3982 = vmatprep.mubr.f32.mxu0 %v3698_v10  ;;  %v15308_v18 = vadd.f32 %v10137_v11, %v15260_v59  ;;  %v10138_v10 = vpop.f32.mrb[244].mxu1 }
 0x7e5   :  { %v10139_v63 = vpop.f32.mrb[245].mxu1 }
 0x7e6   :  { %v10140_v60 = vadd.f32 %v10139_v63, %v10138_v10  ;;  %v10141_v15 = vpop.f32.mrb[246].mxu1 }
 0x7e7   :  { %3983 = vmatmul.mubr.f32.gmra.mrb[254].mxu0 %v3697_v6  ;;  %v10142_v6 = vpop.f32.mrb[247].mxu1 }
 0x7e8   :  { %3987 = vmatprep.mubr.f32.mxu0 %v3702_v29  ;;  %v15311_v41 = vadd.f32 %v10140_v60, %v15263_v58  ;;  %v10143_v29 = vadd.f32 %v10142_v6, %v10141_v15  ;;  %v10144_v49 = vpop.f32.mrb[248].mxu1 }
 0x7e9   :  { %v10145_v35 = vpop.f32.mrb[249].mxu1 }
 0x7ea   :  { %v15314_v34 = vadd.f32 %v10143_v29, %v15266_v61  ;;  %v10146_v30 = vadd.f32 %v10145_v35, %v10144_v49  ;;  %v10147_v59 = vpop.f32.mrb[250].mxu1 }
 0x7eb   :  { %3988 = vmatmul.mubr.f32.gmra.mrb[0].mxu0 %v3701_v28  ;;  %v10148_v56 = vpop.f32.mrb[251].mxu1 }
 0x7ec   :  { %v15317_v28 = vadd.f32 %v10146_v30, %v15269_v17  ;;  %v10149_v51 = vadd.f32 %v10148_v56, %v10147_v59  ;;  %v10150_v58 = vpop.f32.mrb[252].mxu1 }
 0x7ed   :  { %v10151_v10 = vpop.f32.mrb[253].mxu1 }
 0x7ee   :  { %v15320_v11 = vadd.f32 %v10149_v51, %v15272_v22  ;;  %v10152_v63 = vadd.f32 %v10151_v10, %v10150_v58  ;;  %v10153_v61 = vpop.f32.mrb[254].mxu1 }
 0x7ef   :  { %v10154_v15 = vpop.f32.mrb[255].mxu1 }
 0x7f0   :  { %v15323_v60 = vadd.f32 %v10152_v63, %v15283_v16  ;;  %v10155_v6 = vadd.f32 %v10154_v15, %v10153_v61  ;;  %v10156_v17 = vpop.f32.mrb[0].mxu1 }
 0x7f1   :  { %v10157_v49 = vpop.f32.mrb[1].mxu1 }
 0x7f2   :  { %v15326_v29 = vadd.f32 %v10155_v6, %v15285_v25  ;;  %v10158_v35 = vadd.f32 %v10157_v49, %v10156_v17  ;;  %v10159_v22 = vpop.f32.mrb[2].mxu1 }
 0x7f3   :  { %v10160_v59 = vpop.f32.mrb[3].mxu1 }
 0x7f4   :  { %v15329_v30 = vadd.f32 %v10158_v35, %v15287_v47  ;;  %v10161_v56 = vadd.f32 %v10160_v59, %v10159_v22  ;;  %v10162_v16 = vpop.f32.mrb[4].mxu1 }
 0x7f5   :  { %v10163_v58 = vpop.f32.mrb[5].mxu1 }
 0x7f6   :  { %v15332_v51 = vadd.f32 %v10161_v56, %v15289_v53  ;;  %v10164_v10 = vadd.f32 %v10163_v58, %v10162_v16  ;;  %v10165_v25 = vpop.f32.mrb[6].mxu1 }
 0x7f7   :  { %v10166_v61 = vpop.f32.mrb[7].mxu1 }
 0x7f8   :  { %v15335_v63 = vadd.f32 %v10164_v10, %v15291_v48  ;;  %v10167_v15 = vadd.f32 %v10166_v61, %v10165_v25  ;;  %v10168_v47 = vpop.f32.mrb[8].mxu1  ;;  %v4562_v25 = vld [vmem:[#allocation6 + $0x78] sm:$0xff] }
 0x7f9   :  { %v10169_v17 = vpop.f32.mrb[9].mxu1 }
 0x7fa   :  { %v15338_v6 = vadd.f32 %v10167_v15, %v15293_v0  ;;  %v10170_v49 = vadd.f32 %v10169_v17, %v10168_v47  ;;  %v10171_v53 = vpop.f32.mrb[10].mxu1  ;;  %v4561_v0 = vld [vmem:[#allocation6 + $0x70] sm:$0xff]  ;;  %v4776_v15 = vld [vmem:[#allocation4 + $0x1018] sm:$0xff] }
 0x7fb   :  { %v10172_v22 = vpop.f32.mrb[11].mxu1  ;;  %v12821_v61 = vpack.c.bf16 %v4562_v25, %v4561_v0  ;;  %v4775_v47 = vld [vmem:[#allocation4 + $0x1010] sm:$0xff]  ;;  %5046 = vmatprep.mubr.f32.mxu1 %v4776_v15  ;;  %v4804_v25 = vld [vmem:[#allocation4 + $0x10f8] sm:$0xff] }
 0x7fc   :  { %v15341_v35 = vadd.f32 %v10170_v49, %v15295_v54  ;;  %v10173_v59 = vadd.f32 %v10172_v22, %v10171_v53  ;;  %v10174_v48 = vpop.f32.mrb[12].mxu1  ;;  %5047 = vmatmul.mubr.f32.vlgmr.msra.gmra.mrb[14].mxu1 %v4775_v47  ;;  %v4780_v54 = vld [vmem:[#allocation4 + $0x1038] sm:$0xff]  ;;  %v4779_v17 = vld [vmem:[#allocation4 + $0x1030] sm:$0xff] }
 0x7fd   :  { %v10175_v16 = vpop.f32.mrb[13].mxu1  ;;  %12822 = vmatprep.subr.bf16.mxu0 %v12821_v61  ;;  %5051 = vmatprep.mubr.f32.mxu1 %v4780_v54  ;;  %v4783_v49 = vld [vmem:[#allocation4 + $0x1050] sm:$0xff]  ;;  %v4788_v53 = vld [vmem:[#allocation4 + $0x1078] sm:$0xff] }
 0x7fe   :  { %v15344_v56 = vadd.f32 %v10173_v59, %v15297_v12  ;;  %v10176_v58 = vadd.f32 %v10175_v16, %v10174_v48  ;;  %v4784_v12 = vld [vmem:[#allocation4 + $0x1058] sm:$0xff]  ;;  %v4791_v59 = vld [vmem:[#allocation4 + $0x1090] sm:$0xff] }
 0x7ff   :  { %v4792_v22 = vld [vmem:[#allocation4 + $0x1098] sm:$0xff]  ;;  %v4795_v16 = vld [vmem:[#allocation4 + $0x10b0] sm:$0xff] }
 0x800   :  { %v15347_v10 = vadd.f32 %v10176_v58, %v15299_v9  ;;  %5052 = vmatmul.mubr.f32.gmra.mrb[16].mxu1 %v4779_v17  ;;  %v4787_v9 = vld [vmem:[#allocation4 + $0x1070] sm:$0xff]  ;;  %v4796_v48 = vld [vmem:[#allocation4 + $0x10b8] sm:$0xff] }
 0x801   :  { %5056 = vmatprep.mubr.f32.mxu1 %v4784_v12  ;;  %v4800_v58 = vld [vmem:[#allocation4 + $0x10d8] sm:$0xff]  ;;  %v4799_v0 = vld [vmem:[#allocation4 + $0x10d0] sm:$0xff] }
 0x802   :  { %v4803_v15 = vld [vmem:[#allocation4 + $0x10f0] sm:$0xff]  ;;  %v4808_v12 = vld [vmem:[#allocation4 + $0x1118] sm:$0xff] }
 0x804   :  { %5057 = vmatmul.mubr.f32.gmra.mrb[18].mxu1 %v4783_v49  ;;  %v4807_v49 = vld [vmem:[#allocation4 + $0x1110] sm:$0xff] }
 0x805   :  { %5061 = vmatprep.mubr.f32.mxu1 %v4788_v53 }
 0x808   :  { %5062 = vmatmul.mubr.f32.gmra.mrb[20].mxu1 %v4787_v9 }
 0x809   :  { %5066 = vmatprep.mubr.f32.mxu1 %v4792_v22 }
 0x80c   :  { %5067 = vmatmul.mubr.f32.gmra.mrb[22].mxu1 %v4791_v59 }
 0x80d   :  { %5071 = vmatprep.mubr.f32.mxu1 %v4796_v48  ;;  %v4812_v48 = vld [vmem:[#allocation4 + $0x1138] sm:$0xff] }
 0x810   :  { %5072 = vmatmul.mubr.f32.gmra.mrb[24].mxu1 %v4795_v16  ;;  %v4811_v16 = vld [vmem:[#allocation4 + $0x1130] sm:$0xff] }
 0x811   :  { %5076 = vmatprep.mubr.f32.mxu1 %v4800_v58 }
 0x814   :  { %5077 = vmatmul.mubr.f32.gmra.mrb[26].mxu1 %v4799_v0 }
 0x815   :  { %5081 = vmatprep.mubr.f32.mxu1 %v4804_v25 }
 0x818   :  { %5082 = vmatmul.mubr.f32.gmra.mrb[28].mxu1 %v4803_v15 }
 0x819   :  { %5086 = vmatprep.mubr.f32.mxu1 %v4808_v12 }
 0x81c   :  { %5087 = vmatmul.mubr.f32.gmra.mrb[30].mxu1 %v4807_v49 }
 0x81d   :  { %5091 = vmatprep.mubr.f32.mxu1 %v4812_v48  ;;  %v4823_v48 = vld [vmem:[#allocation4 + $0x1190] sm:$0xff] }
 0x820   :  { %5092 = vmatmul.mubr.f32.gmra.mrb[32].mxu1 %v4811_v16 }
 0x882   :  { %v9951_v47 = vpop.f32.mrb[226].mxu0 }
 0x883   :  { %v9952_v54 = vpop.f32.mrb[227].mxu0 }
 0x884   :  { %v9953_v17 = vadd.f32 %v9952_v54, %v9951_v47  ;;  %v4816_v47 = vld [vmem:[#allocation4 + $0x1158] sm:$0xff] }
 0x885   :  { %5096 = vmatprep.mubr.f32.mxu1 %v4816_v47 }
 0x886   :  { %v3915_v53 = vadd.f32 %v9953_v17, %v15191_v2  ;;  %v9954_v9 = vpop.f32.mrb[228].mxu0  ;;  %v4815_v2 = vld [vmem:[#allocation4 + $0x1150] sm:$0xff] }
 0x887   :  { %v9955_v22 = vpop.f32.mrb[229].mxu0  ;;  %5097 = vmatmul.mubr.f32.gmra.mrb[34].mxu1 %v4815_v2 }
 0x888   :  { %v9956_v59 = vadd.f32 %v9955_v22, %v9954_v9  ;;  %11103 = vmatprep.mubr.msk.f32.mxu0 %vm593_vm0, %v3915_v53  ;;  %v4819_v53 = vld [vmem:[#allocation4 + $0x1170] sm:$0xff] }
 0x88a   :  { %v3920_v58 = vadd.f32 %v9956_v59, %v15194_v24  ;;  %v9957_v0 = vpop.f32.mrb[230].mxu0  ;;  %v4820_v24 = vld [vmem:[#allocation4 + $0x1178] sm:$0xff] }
 0x88b   :  { %v9958_v25 = vpop.f32.mrb[231].mxu0  ;;  %5101 = vmatprep.mubr.f32.mxu1 %v4820_v24 }
 0x88c   :  { %v9959_v15 = vadd.f32 %v9958_v25, %v9957_v0  ;;  %11104 = vmatmul.mubr.msk.f32.vlgmr.msra.gmra.mrb[64].mxu0 %vm593_vm0, %v3920_v58  ;;  %5102 = vmatmul.mubr.f32.gmra.mrb[36].mxu1 %v4819_v53  ;;  %v4828_v25 = vld [vmem:[#allocation4 + $0x11b8] sm:$0xff] }
 0x88d   :  { %12824 = vmatpush3.bf16.msra.mxu0 %v12821_v61 }
 0x88e   :  { %v3925_v54 = vadd.f32 %v9959_v15, %v15197_v37  ;;  %v9960_v17 = vpop.f32.mrb[232].mxu0  ;;  %12826 = vmatprep.subr.bf16.mxu0 %v14441_v3  ;;  %v4824_v37 = vld [vmem:[#allocation4 + $0x1198] sm:$0xff] }
 0x88f   :  { %v9961_v12 = vpop.f32.mrb[233].mxu0  ;;  %5106 = vmatprep.mubr.f32.mxu1 %v4824_v37 }
 0x890   :  { %v9962_v49 = vadd.f32 %v9961_v12, %v9960_v17  ;;  %11106 = vmatprep.mubr.msk.f32.mxu0 %vm593_vm0, %v3925_v54  ;;  %5107 = vmatmul.mubr.f32.gmra.mrb[38].mxu1 %v4823_v48  ;;  %v4832_v17 = vld [vmem:[#allocation4 + $0x11d8] sm:$0xff] }
 0x891   :  { %5111 = vmatprep.mubr.f32.mxu1 %v4828_v25 }
 0x892   :  { %v3930_v9 = vadd.f32 %v9962_v49, %v15200_v4  ;;  %v9963_v22 = vpop.f32.mrb[234].mxu0  ;;  %v4827_v4 = vld [vmem:[#allocation4 + $0x11b0] sm:$0xff] }
 0x893   :  { %v9964_v59 = vpop.f32.mrb[235].mxu0 }
 0x894   :  { %v9965_v61 = vadd.f32 %v9964_v59, %v9963_v22  ;;  %11107 = vmatmul.mubr.msk.f32.gmra.mrb[66].mxu0 %vm593_vm0, %v3930_v9  ;;  %5112 = vmatmul.mubr.f32.gmra.mrb[40].mxu1 %v4827_v4  ;;  %v4836_v9 = vld [vmem:[#allocation4 + $0x11f8] sm:$0xff] }
 0x895   :  { %5116 = vmatprep.mubr.f32.mxu1 %v4832_v17 }
 0x896   :  { %v3935_v3 = vadd.f32 %v9965_v61, %v15205_v43  ;;  %v9966_v16 = vpop.f32.mrb[236].mxu0  ;;  %v4831_v43 = vld [vmem:[#allocation4 + $0x11d0] sm:$0xff] }
 0x897   :  { %v9967_v58 = vpop.f32.mrb[237].mxu0 }
 0x898   :  { %v9968_v0 = vadd.f32 %v9967_v58, %v9966_v16  ;;  %11109 = vmatprep.mubr.msk.f32.mxu0 %vm593_vm0, %v3935_v3  ;;  %5117 = vmatmul.mubr.f32.gmra.mrb[42].mxu1 %v4831_v43 }
 0x899   :  { %5121 = vmatprep.mubr.f32.mxu1 %v4836_v9 }
 0x89a   :  { %v3940_v15 = vadd.f32 %v9968_v0, %v15208_v40  ;;  %v9969_v47 = vpop.f32.mrb[238].mxu0  ;;  %v4835_v40 = vld [vmem:[#allocation4 + $0x11f0] sm:$0xff] }
 0x89b   :  { %v9970_v2 = vpop.f32.mrb[239].mxu0 }
 0x89c   :  { %v9971_v54 = vadd.f32 %v9970_v2, %v9969_v47  ;;  %11110 = vmatmul.mubr.msk.f32.gmra.mrb[68].mxu0 %vm593_vm0, %v3940_v15  ;;  %5122 = vmatmul.mubr.f32.gmra.mrb[44].mxu1 %v4835_v40 }
 0x89e   :  { %v3945_v12 = vadd.f32 %v9971_v54, %v15213_v5  ;;  %v9972_v49 = vpop.f32.mrb[240].mxu0 }
 0x89f   :  { %v9973_v24 = vpop.f32.mrb[241].mxu0 }
 0x8a0   :  { %v9974_v53 = vadd.f32 %v9973_v24, %v9972_v49  ;;  %11112 = vmatprep.mubr.msk.f32.mxu0 %vm593_vm0, %v3945_v12 }
 0x8a2   :  { %v3950_v22 = vadd.f32 %v9974_v53, %v15216_v57  ;;  %v9975_v59 = vpop.f32.mrb[242].mxu0 }
 0x8a3   :  { %v9976_v61 = vpop.f32.mrb[243].mxu0 }
 0x8a4   :  { %v9977_v37 = vadd.f32 %v9976_v61, %v9975_v59  ;;  %11113 = vmatmul.mubr.msk.f32.gmra.mrb[70].mxu0 %vm593_vm0, %v3950_v22 }
 0x8a6   :  { %v3955_v48 = vadd.f32 %v9977_v37, %v15221_v62  ;;  %v9978_v5 = vpop.f32.mrb[244].mxu0  ;;  %v4833_v37 = vld [vmem:[#allocation4 + $0x11e0] sm:$0xff] }
 0x8a7   :  { %v9979_v3 = vpop.f32.mrb[245].mxu0 }
 0x8a8   :  { %v9980_v16 = vadd.f32 %v9979_v3, %v9978_v5  ;;  %11115 = vmatprep.mubr.msk.f32.mxu0 %vm593_vm0, %v3955_v48 }
 0x8aa   :  { %v3960_v58 = vadd.f32 %v9980_v16, %v15224_v31  ;;  %v9981_v0 = vpop.f32.mrb[246].mxu0 }
 0x8ab   :  { %v9982_v25 = vpop.f32.mrb[247].mxu0 }
 0x8ac   :  { %v9983_v4 = vadd.f32 %v9982_v25, %v9981_v0  ;;  %11116 = vmatmul.mubr.msk.f32.gmra.mrb[72].mxu0 %vm593_vm0, %v3960_v58 }
 0x8ae   :  { %v3965_v57 = vadd.f32 %v9983_v4, %v15229_v1  ;;  %v9984_v15 = vpop.f32.mrb[248].mxu0 }
 0x8af   :  { %v9985_v47 = vpop.f32.mrb[249].mxu0 }
 0x8b0   :  { %v9986_v2 = vadd.f32 %v9985_v47, %v9984_v15  ;;  %11118 = vmatprep.mubr.msk.f32.mxu0 %vm593_vm0, %v3965_v57 }
 0x8b2   :  { %v3970_v62 = vadd.f32 %v9986_v2, %v15232_v46  ;;  %v9987_v54 = vpop.f32.mrb[250].mxu0 }
 0x8b3   :  { %v9988_v17 = vpop.f32.mrb[251].mxu0 }
 0x8b4   :  { %v9989_v43 = vadd.f32 %v9988_v17, %v9987_v54  ;;  %11119 = vmatmul.mubr.msk.f32.gmra.mrb[74].mxu0 %vm593_vm0, %v3970_v62 }
 0x8b6   :  { %v3975_v31 = vadd.f32 %v9989_v43, %v15237_v36  ;;  %v9990_v12 = vpop.f32.mrb[252].mxu0 }
 0x8b7   :  { %v9991_v49 = vpop.f32.mrb[253].mxu0 }
 0x8b8   :  { %v9992_v24 = vadd.f32 %v9991_v49, %v9990_v12  ;;  %11121 = vmatprep.mubr.msk.f32.mxu0 %vm593_vm0, %v3975_v31 }
 0x8ba   :  { %v3980_v1 = vadd.f32 %v9992_v24, %v15240_v23  ;;  %v9993_v53 = vpop.f32.mrb[254].mxu0  ;;  %v4798_v23 = vld [vmem:[#allocation4 + $0x10c8] sm:$0xff] }
 0x8bb   :  { %v9994_v9 = vpop.f32.mrb[255].mxu0 }
 0x8bc   :  { %v9995_v40 = vadd.f32 %v9994_v9, %v9993_v53  ;;  %11122 = vmatmul.mubr.msk.f32.gmra.mrb[76].mxu0 %vm593_vm0, %v3980_v1 }
 0x8be   :  { %v3985_v46 = vadd.f32 %v9995_v40, %v15245_v42  ;;  %v9996_v22 = vpop.f32.mrb[0].mxu0  ;;  %v4797_v42 = vld [vmem:[#allocation4 + $0x10c0] sm:$0xff] }
 0x8bf   :  { %v9997_v59 = vpop.f32.mrb[1].mxu0 }
 0x8c0   :  { %v9998_v61 = vadd.f32 %v9997_v59, %v9996_v22  ;;  %11124 = vmatprep.mubr.msk.f32.mxu0 %vm593_vm0, %v3985_v46 }
 0x8c2   :  { %v3990_v36 = vadd.f32 %v9998_v61, %v15248_v55  ;;  %v4802_v55 = vld [vmem:[#allocation4 + $0x10e8] sm:$0xff] }
 0x8c4   :  { %11125 = vmatmul.mubr.msk.f32.gmra.mrb[78].mxu0 %vm593_vm0, %v3990_v36 }
 0x8c5   :  { %11131 = vmatprep.mubr.msk.f32.mxu0 %vm593_vm0, %v15302_v52  ;;  %v4801_v52 = vld [vmem:[#allocation4 + $0x10e0] sm:$0xff] }
 0x8c8   :  { %11132 = vmatmul.mubr.msk.f32.vlgmr.msra.gmra.mrb[64].mxu0 %vm593_vm0, %v15305_v21  ;;  %v4806_v21 = vld [vmem:[#allocation4 + $0x1108] sm:$0xff] }
 0x8c9   :  { %11134 = vmatprep.mubr.msk.f32.mxu0 %vm593_vm0, %v15308_v18  ;;  %12828 = vmatpush3.bf16.msra.mxu0 %v14443_v7  ;;  %v5128_v7 = vld [vmem:[#allocation6 + $0x80] sm:$0xff] }
 0x8ca   :  { %12830 = vmatprep.subr.bf16.mxu0 %v14445_v8  ;;  %v5129_v8 = vld [vmem:[#allocation6 + $0x88] sm:$0xff]  ;;  %v4805_v18 = vld [vmem:[#allocation4 + $0x1100] sm:$0xff] }
 0x8cc   :  { %11135 = vmatmul.mubr.msk.f32.gmra.mrb[66].mxu0 %vm593_vm0, %v15311_v41  ;;  %v4810_v41 = vld [vmem:[#allocation4 + $0x1128] sm:$0xff] }
 0x8cd   :  { %11137 = vmatprep.mubr.msk.f32.mxu0 %vm593_vm0, %v15314_v34  ;;  %12832 = vmatpush3.bf16.msra.mxu0 %v14450_v13  ;;  %v4774_v13 = vld [vmem:[#allocation4 + $0x1008] sm:$0xff]  ;;  %v4809_v34 = vld [vmem:[#allocation4 + $0x1120] sm:$0xff] }
 0x8ce   :  { %12834 = vmatprep.subr.bf16.mxu0 %v14454_v14  ;;  %v12889_v14 = vpack.c.bf16 %v5129_v8, %v5128_v7 }
 0x8cf   :  { %v10307_v48 = vpop.f32.mrb[14].mxu1 }
 0x8d0   :  { %11138 = vmatmul.mubr.msk.f32.gmra.mrb[68].mxu0 %vm593_vm0, %v15317_v28  ;;  %v4814_v28 = vld [vmem:[#allocation4 + $0x1148] sm:$0xff]  ;;  %v10308_v5 = vpop.f32.mrb[15].mxu1 }
 0x8d1   :  { %11140 = vmatprep.mubr.msk.f32.mxu0 %vm593_vm0, %v15320_v11  ;;  %12836 = vmatpush3.bf16.msra.mxu0 %v14458_v19  ;;  %v4773_v19 = vld [vmem:[#allocation4 + $0x1000] sm:$0xff]  ;;  %v10309_v3 = vadd.f32 %v10308_v5, %v10307_v48 }
 0x8d2   :  { %12838 = vmatprep.subr.bf16.mxu0 %v14462_v20  ;;  %v4778_v20 = vld [vmem:[#allocation4 + $0x1028] sm:$0xff]  ;;  %v4813_v11 = vld [vmem:[#allocation4 + $0x1140] sm:$0xff] }
 0x8d3   :  { %v10310_v16 = vpop.f32.mrb[16].mxu1 }
 0x8d4   :  { %11141 = vmatmul.mubr.msk.f32.gmra.mrb[70].mxu0 %vm593_vm0, %v15323_v60  ;;  %v4818_v60 = vld [vmem:[#allocation4 + $0x1168] sm:$0xff]  ;;  %v10311_v58 = vpop.f32.mrb[17].mxu1 }
 0x8d5   :  { %11143 = vmatprep.mubr.msk.f32.mxu0 %vm593_vm0, %v15326_v29  ;;  %12840 = vmatpush3.bf16.msra.mxu0 %v14466_v26  ;;  %v4777_v26 = vld [vmem:[#allocation4 + $0x1020] sm:$0xff]  ;;  %v10312_v0 = vadd.f32 %v10311_v58, %v10310_v16 }
 0x8d6   :  { %12842 = vmatprep.subr.bf16.mxu0 %v14470_v27  ;;  %v4782_v27 = vld [vmem:[#allocation4 + $0x1048] sm:$0xff]  ;;  %v4817_v29 = vld [vmem:[#allocation4 + $0x1160] sm:$0xff] }
 0x8d7   :  { %v10313_v25 = vpop.f32.mrb[18].mxu1 }
 0x8d8   :  { %11144 = vmatmul.mubr.msk.f32.gmra.mrb[72].mxu0 %vm593_vm0, %v15329_v30  ;;  %v4822_v30 = vld [vmem:[#allocation4 + $0x1188] sm:$0xff]  ;;  %v10314_v4 = vpop.f32.mrb[19].mxu1 }
 0x8d9   :  { %11146 = vmatprep.mubr.msk.f32.mxu0 %vm593_vm0, %v15332_v51  ;;  %12844 = vmatpush3.bf16.msra.mxu0 %v14474_v32  ;;  %v4781_v32 = vld [vmem:[#allocation4 + $0x1040] sm:$0xff]  ;;  %v10315_v57 = vadd.f32 %v10314_v4, %v10313_v25 }
 0x8da   :  { %12846 = vmatprep.subr.bf16.mxu0 %v14478_v33  ;;  %v4786_v33 = vld [vmem:[#allocation4 + $0x1068] sm:$0xff]  ;;  %v4821_v51 = vld [vmem:[#allocation4 + $0x1180] sm:$0xff] }
 0x8db   :  { %v10316_v15 = vpop.f32.mrb[20].mxu1 }
 0x8dc   :  { %11147 = vmatmul.mubr.msk.f32.gmra.mrb[74].mxu0 %vm593_vm0, %v15335_v63  ;;  %v4826_v63 = vld [vmem:[#allocation4 + $0x11a8] sm:$0xff]  ;;  %v10317_v47 = vpop.f32.mrb[21].mxu1 }
 0x8dd   :  { %11149 = vmatprep.mubr.msk.f32.mxu0 %vm593_vm0, %v15338_v6  ;;  %12848 = vmatpush3.bf16.msra.mxu0 %v14482_v38  ;;  %v4785_v38 = vld [vmem:[#allocation4 + $0x1060] sm:$0xff]  ;;  %v10318_v2 = vadd.f32 %v10317_v47, %v10316_v15 }
 0x8de   :  { %12850 = vmatprep.subr.bf16.mxu0 %v14486_v39  ;;  %v4790_v39 = vld [vmem:[#allocation4 + $0x1088] sm:$0xff]  ;;  %v4825_v6 = vld [vmem:[#allocation4 + $0x11a0] sm:$0xff] }
 0x8df   :  { %v10319_v62 = vpop.f32.mrb[22].mxu1 }
 0x8e0   :  { %11150 = vmatmul.mubr.msk.f32.gmra.mrb[76].mxu0 %vm593_vm0, %v15341_v35  ;;  %v4830_v35 = vld [vmem:[#allocation4 + $0x11c8] sm:$0xff]  ;;  %v10320_v54 = vpop.f32.mrb[23].mxu1 }
 0x8e1   :  { %11152 = vmatprep.mubr.msk.f32.mxu0 %vm593_vm0, %v15344_v56  ;;  %12852 = vmatpush3.bf16.msra.mxu0 %v14490_v44  ;;  %v4789_v44 = vld [vmem:[#allocation4 + $0x1080] sm:$0xff]  ;;  %v10321_v17 = vadd.f32 %v10320_v54, %v10319_v62 }
 0x8e2   :  { %12854 = vmatprep.subr.bf16.mxu0 %v14494_v45  ;;  %v4794_v45 = vld [vmem:[#allocation4 + $0x10a8] sm:$0xff]  ;;  %v4829_v56 = vld [vmem:[#allocation4 + $0x11c0] sm:$0xff] }
 0x8e3   :  { %v10322_v43 = vpop.f32.mrb[24].mxu1 }
 0x8e4   :  { %11153 = vmatmul.mubr.msk.f32.gmra.mrb[78].mxu0 %vm593_vm0, %v15347_v10  ;;  %v4834_v10 = vld [vmem:[#allocation4 + $0x11e8] sm:$0xff]  ;;  %v10323_v31 = vpop.f32.mrb[25].mxu1 }
 0x8e5   :  { %12856 = vmatpush3.bf16.msra.mxu0 %v14498_v50  ;;  %4901 = vmatprep.mubr.f32.mxu0 %v4774_v13  ;;  %v4793_v50 = vld [vmem:[#allocation4 + $0x10a0] sm:$0xff]  ;;  %v10324_v12 = vadd.f32 %v10323_v31, %v10322_v43 }
 0x8e6   :  { %12890 = vmatprep.subr.bf16.mxu0 %v12889_v14 }
 0x8e7   :  { %v10325_v49 = vpop.f32.mrb[26].mxu1 }
 0x8e8   :  { %4902 = vmatmul.mubr.f32.vlgmr.msra.gmra.mrb[2].mxu0 %v4773_v19  ;;  %v10326_v24 = vpop.f32.mrb[27].mxu1 }
 0x8e9   :  { %4906 = vmatprep.mubr.f32.mxu0 %v4778_v20  ;;  %12892 = vmatpush3.bf16.msra.mxu0 %v12889_v14  ;;  %v10327_v1 = vadd.f32 %v10326_v24, %v10325_v49 }
 0x8eb   :  { %v10328_v53 = vpop.f32.mrb[28].mxu1 }
 0x8ec   :  { %4907 = vmatmul.mubr.f32.gmra.mrb[4].mxu0 %v4777_v26  ;;  %v10329_v9 = vpop.f32.mrb[29].mxu1 }
 0x8ed   :  { %4911 = vmatprep.mubr.f32.mxu0 %v4782_v27  ;;  %v15429_v40 = vadd.f32 %v10329_v9, %v10328_v53 }
 0x8ef   :  { %v10331_v46 = vpop.f32.mrb[30].mxu1 }
 0x8f0   :  { %4912 = vmatmul.mubr.f32.gmra.mrb[6].mxu0 %v4781_v32  ;;  %v10332_v22 = vpop.f32.mrb[31].mxu1 }
 0x8f1   :  { %4916 = vmatprep.mubr.f32.mxu0 %v4786_v33  ;;  %v15431_v59 = vadd.f32 %v10332_v22, %v10331_v46 }
 0x8f3   :  { %v10334_v61 = vpop.f32.mrb[32].mxu1 }
 0x8f4   :  { %4917 = vmatmul.mubr.f32.gmra.mrb[8].mxu0 %v4785_v38  ;;  %v10335_v36 = vpop.f32.mrb[33].mxu1 }
 0x8f5   :  { %4921 = vmatprep.mubr.f32.mxu0 %v4790_v39  ;;  %v15433_v7 = vadd.f32 %v10335_v36, %v10334_v61 }
 0x8f8   :  { %4922 = vmatmul.mubr.f32.gmra.mrb[10].mxu0 %v4789_v44 }
 0x8f9   :  { %4926 = vmatprep.mubr.f32.mxu0 %v4794_v45 }
 0x8fc   :  { %4927 = vmatmul.mubr.f32.gmra.mrb[12].mxu0 %v4793_v50 }
 0x8fd   :  { %4931 = vmatprep.mubr.f32.mxu0 %v4798_v23 }
 0x900   :  { %4932 = vmatmul.mubr.f32.gmra.mrb[14].mxu0 %v4797_v42 }
 0x901   :  { %4936 = vmatprep.mubr.f32.mxu0 %v4802_v55 }
 0x904   :  { %4937 = vmatmul.mubr.f32.gmra.mrb[16].mxu0 %v4801_v52 }
 0x905   :  { %4941 = vmatprep.mubr.f32.mxu0 %v4806_v21 }
 0x908   :  { %4942 = vmatmul.mubr.f32.gmra.mrb[18].mxu0 %v4805_v18 }
 0x909   :  { %4946 = vmatprep.mubr.f32.mxu0 %v4810_v41 }
 0x90c   :  { %4947 = vmatmul.mubr.f32.gmra.mrb[20].mxu0 %v4809_v34 }
 0x90d   :  { %4951 = vmatprep.mubr.f32.mxu0 %v4814_v28 }
 0x910   :  { %4952 = vmatmul.mubr.f32.gmra.mrb[22].mxu0 %v4813_v11 }
 0x911   :  { %4956 = vmatprep.mubr.f32.mxu0 %v4818_v60 }
 0x914   :  { %4957 = vmatmul.mubr.f32.gmra.mrb[24].mxu0 %v4817_v29 }
 0x915   :  { %4961 = vmatprep.mubr.f32.mxu0 %v4822_v30 }
 0x918   :  { %4962 = vmatmul.mubr.f32.gmra.mrb[26].mxu0 %v4821_v51 }
 0x919   :  { %4966 = vmatprep.mubr.f32.mxu0 %v4826_v63 }
 0x91c   :  { %4967 = vmatmul.mubr.f32.gmra.mrb[28].mxu0 %v4825_v6 }
 0x91d   :  { %4971 = vmatprep.mubr.f32.mxu0 %v4830_v35 }
 0x920   :  { %4972 = vmatmul.mubr.f32.gmra.mrb[30].mxu0 %v4829_v56 }
 0x921   :  { %4976 = vmatprep.mubr.f32.mxu0 %v4834_v10 }
 0x924   :  { %4977 = vmatmul.mubr.f32.gmra.mrb[32].mxu0 %v4833_v37 }
 0x95a   :  { %v10337_v8 = vpop.f32.mrb[34].mxu1 }
 0x95b   :  { %v10338_v13 = vpop.f32.mrb[35].mxu1 }
 0x95c   :  { %v15435_v14 = vadd.f32 %v10338_v13, %v10337_v8 }
 0x95f   :  { %v10340_v19 = vpop.f32.mrb[36].mxu1 }
 0x960   :  { %v10341_v20 = vpop.f32.mrb[37].mxu1 }
 0x961   :  { %v15437_v26 = vadd.f32 %v10341_v20, %v10340_v19 }
 0x963   :  { %v10343_v27 = vpop.f32.mrb[38].mxu1 }
 0x964   :  { %v10344_v32 = vpop.f32.mrb[39].mxu1 }
 0x965   :  { %v15439_v33 = vadd.f32 %v10344_v32, %v10343_v27 }
 0x967   :  { %v10346_v38 = vpop.f32.mrb[40].mxu1 }
 0x968   :  { %v10347_v39 = vpop.f32.mrb[41].mxu1 }
 0x969   :  { %v15441_v44 = vadd.f32 %v10347_v39, %v10346_v38 }
 0x96b   :  { %v10349_v45 = vpop.f32.mrb[42].mxu1 }
 0x96c   :  { %v10350_v50 = vpop.f32.mrb[43].mxu1 }
 0x96d   :  { %v15443_v23 = vadd.f32 %v10350_v50, %v10349_v45 }
 0x96f   :  { %v10352_v42 = vpop.f32.mrb[44].mxu1 }
 0x970   :  { %v10353_v55 = vpop.f32.mrb[45].mxu1 }
 0x971   :  { %v15445_v52 = vadd.f32 %v10353_v55, %v10352_v42 }
 0x9bb   :  { %v10227_v21 = vpop.f32.mrb[2].mxu0 }
 0x9bc   :  { %v10228_v18 = vpop.f32.mrb[3].mxu0 }
 0x9bd   :  { %v10229_v41 = vadd.f32 %v10228_v18, %v10227_v21 }
 0x9bf   :  { %v5049_v34 = vadd.f32 %v10309_v3, %v10229_v41  ;;  %v10230_v28 = vpop.f32.mrb[4].mxu0 }
 0x9c0   :  { %v10231_v11 = vpop.f32.mrb[5].mxu0 }
 0x9c1   :  { %v10232_v60 = vadd.f32 %v10231_v11, %v10230_v28  ;;  %11159 = vmatprep.mubr.msk.f32.mxu0 %vm593_vm0, %v5049_v34  ;;  %v5363_v34 = vld [vmem:[#allocation9] sm:$0xff]  ;;  %v15472_v28 = vld [vmem:[#allocation7] ss:$0 sm:$0xff] }
 0x9c2   :  { %11215 = vmatprep.mubr.f32.mxu1 %v5363_v34  ;;  %v5561_v34 = vld [vmem:[#allocation9 + $0x38] sm:$0xff] }
 0x9c3   :  { %v5054_v29 = vadd.f32 %v10312_v0, %v10232_v60  ;;  %v10233_v30 = vpop.f32.mrb[6].mxu0 }
 0x9c4   :  { %v10234_v51 = vpop.f32.mrb[7].mxu0 }
 0x9c5   :  { %v10235_v63 = vadd.f32 %v10234_v51, %v10233_v30  ;;  %11160 = vmatmul.mubr.msk.f32.vlgmr.msra.gmra.mrb[64].mxu0 %vm593_vm0, %v5054_v29 }
 0x9c7   :  { %v5059_v6 = vadd.f32 %v10315_v57, %v10235_v63  ;;  %v10236_v35 = vpop.f32.mrb[8].mxu0 }
 0x9c8   :  { %v10237_v56 = vpop.f32.mrb[9].mxu0 }
 0x9c9   :  { %v10238_v10 = vadd.f32 %v10237_v56, %v10236_v35  ;;  %11162 = vmatprep.mubr.msk.f32.mxu0 %vm593_vm0, %v5059_v6 }
 0x9cb   :  { %v5064_v37 = vadd.f32 %v10318_v2, %v10238_v10  ;;  %v10239_v48 = vpop.f32.mrb[10].mxu0 }
 0x9cc   :  { %v10240_v5 = vpop.f32.mrb[11].mxu0 }
 0x9cd   :  { %v10241_v3 = vadd.f32 %v10240_v5, %v10239_v48  ;;  %11163 = vmatmul.mubr.msk.f32.gmra.mrb[66].mxu0 %vm593_vm0, %v5064_v37 }
 0x9cf   :  { %v5069_v16 = vadd.f32 %v10321_v17, %v10241_v3  ;;  %v10242_v58 = vpop.f32.mrb[12].mxu0 }
 0x9d0   :  { %v10243_v0 = vpop.f32.mrb[13].mxu0 }
 0x9d1   :  { %v10244_v25 = vadd.f32 %v10243_v0, %v10242_v58  ;;  %11165 = vmatprep.mubr.msk.f32.mxu0 %vm593_vm0, %v5069_v16 }
 0x9d3   :  { %v5074_v4 = vadd.f32 %v10324_v12, %v10244_v25  ;;  %v10245_v15 = vpop.f32.mrb[14].mxu0 }
 0x9d4   :  { %v10246_v57 = vpop.f32.mrb[15].mxu0 }
 0x9d5   :  { %v10247_v47 = vadd.f32 %v10246_v57, %v10245_v15  ;;  %11166 = vmatmul.mubr.msk.f32.gmra.mrb[68].mxu0 %vm593_vm0, %v5074_v4 }
 0x9d7   :  { %v5079_v62 = vadd.f32 %v10327_v1, %v10247_v47  ;;  %v10248_v54 = vpop.f32.mrb[16].mxu0 }
 0x9d8   :  { %v10249_v2 = vpop.f32.mrb[17].mxu0 }
 0x9d9   :  { %v10250_v43 = vadd.f32 %v10249_v2, %v10248_v54  ;;  %11168 = vmatprep.mubr.msk.f32.mxu0 %vm593_vm0, %v5079_v62 }
 0x9db   :  { %v5084_v31 = vadd.f32 %v15429_v40, %v10250_v43  ;;  %v10251_v17 = vpop.f32.mrb[18].mxu0 }
 0x9dc   :  { %v10252_v49 = vpop.f32.mrb[19].mxu0 }
 0x9dd   :  { %v10253_v24 = vadd.f32 %v10252_v49, %v10251_v17  ;;  %11169 = vmatmul.mubr.msk.f32.gmra.mrb[70].mxu0 %vm593_vm0, %v5084_v31 }
 0x9df   :  { %v5089_v12 = vadd.f32 %v15431_v59, %v10253_v24  ;;  %v10254_v53 = vpop.f32.mrb[20].mxu0 }
 0x9e0   :  { %v10255_v9 = vpop.f32.mrb[21].mxu0 }
 0x9e1   :  { %v10256_v46 = vadd.f32 %v10255_v9, %v10254_v53  ;;  %11171 = vmatprep.mubr.msk.f32.mxu0 %vm593_vm0, %v5089_v12 }
 0x9e3   :  { %v5094_v1 = vadd.f32 %v15433_v7, %v10256_v46  ;;  %v10257_v22 = vpop.f32.mrb[22].mxu0 }
 0x9e4   :  { %v10258_v61 = vpop.f32.mrb[23].mxu0 }
 0x9e5   :  { %v10259_v36 = vadd.f32 %v10258_v61, %v10257_v22  ;;  %11172 = vmatmul.mubr.msk.f32.gmra.mrb[72].mxu0 %vm593_vm0, %v5094_v1 }
 0x9e7   :  { %v5099_v40 = vadd.f32 %v15435_v14, %v10259_v36  ;;  %v10260_v8 = vpop.f32.mrb[24].mxu0 }
 0x9e8   :  { %v10261_v13 = vpop.f32.mrb[25].mxu0 }
 0x9e9   :  { %v10262_v19 = vadd.f32 %v10261_v13, %v10260_v8  ;;  %11174 = vmatprep.mubr.msk.f32.mxu0 %vm593_vm0, %v5099_v40 }
 0x9eb   :  { %v5104_v59 = vadd.f32 %v15437_v26, %v10262_v19  ;;  %v10263_v20 = vpop.f32.mrb[26].mxu0 }
 0x9ec   :  { %v10264_v27 = vpop.f32.mrb[27].mxu0 }
 0x9ed   :  { %v10265_v32 = vadd.f32 %v10264_v27, %v10263_v20  ;;  %11175 = vmatmul.mubr.msk.f32.gmra.mrb[74].mxu0 %vm593_vm0, %v5104_v59 }
 0x9ef   :  { %v5109_v7 = vadd.f32 %v15439_v33, %v10265_v32  ;;  %v10266_v38 = vpop.f32.mrb[28].mxu0 }
 0x9f0   :  { %v10267_v39 = vpop.f32.mrb[29].mxu0 }
 0x9f1   :  { %v10268_v45 = vadd.f32 %v10267_v39, %v10266_v38  ;;  %11177 = vmatprep.mubr.msk.f32.mxu0 %vm593_vm0, %v5109_v7 }
 0x9f3   :  { %v5114_v14 = vadd.f32 %v15441_v44, %v10268_v45  ;;  %v10269_v50 = vpop.f32.mrb[30].mxu0 }
 0x9f4   :  { %v10270_v42 = vpop.f32.mrb[31].mxu0 }
 0x9f5   :  { %v10271_v55 = vadd.f32 %v10270_v42, %v10269_v50  ;;  %11178 = vmatmul.mubr.msk.f32.gmra.mrb[76].mxu0 %vm593_vm0, %v5114_v14 }
 0x9f7   :  { %v5119_v26 = vadd.f32 %v15443_v23, %v10271_v55  ;;  %v10272_v21 = vpop.f32.mrb[32].mxu0  ;;  %v5364_v55 = vld [vmem:[#allocation9 + $0x8] sm:$0xff] }
 0x9f8   :  { %v10273_v18 = vpop.f32.mrb[33].mxu0 }
 0x9f9   :  { %v10274_v41 = vadd.f32 %v10273_v18, %v10272_v21  ;;  %11180 = vmatprep.mubr.msk.f32.mxu0 %vm593_vm0, %v5119_v26  ;;  %v5365_v26 = vld [vmem:[#allocation9 + $0x10] sm:$0xff]  ;;  %v5366_v21 = vld [vmem:[#allocation9 + $0x18] sm:$0xff]  ;;  %v5558_v18 = vld [vmem:[#allocation9 + $0x20] sm:$0xff] }
 0x9fb   :  { %v5124_v33 = vadd.f32 %v15445_v52, %v10274_v41  ;;  %v5559_v41 = vld [vmem:[#allocation9 + $0x28] sm:$0xff] }
 0x9fd   :  { %11181 = vmatmul.mubr.msk.f32.gmra.mrb[78].mxu0 %vm593_vm0, %v5124_v33  ;;  %v5560_v33 = vld [vmem:[#allocation9 + $0x30] sm:$0xff] }
 0xa98   :  { %v11161_v44 = vpop.f32.mrb[64].mxu0 }
 0xa99   :  { %v13771_v11 = vadd.f32 %v11161_v44, %v15472_v28  ;;  %v5244_v60 = vpop.f32.mrb[65].mxu0  ;;  %v5452_v44 = vld [vmem:[#allocation10] sm:$0xff] }
 0xa9a   :  { %v13772_v29 = vadd.f32 %v15472_v28, %v5244_v60 }
 0xa9b   :  { %v5340_v23 = vmax.f32 %v13771_v11, 0.0  ;;  %v5453_v11 = vld [vmem:[#allocation10 + $0x8] sm:$0xff] }
 0xa9c   :  { %v5339_v30 = vmax.f32 %v13772_v29, 0.0  ;;  %v12925_v60 = vpack.c.bf16 %v5453_v11, %v5452_v44  ;;  %v5454_v29 = vld [vmem:[#allocation10 + $0x10] sm:$0xff] }
 0xa9d   :  { %v5654_v11 = vld [vmem:[#allocation10 + $0xb0] sm:$0xff] }
 0xa9e   :  { %v15476_v51 = vpack.c.bf16 %v5340_v23, %v5339_v30  ;;  %12926 = vmatprep.subr.bf16.mxu0 %v12925_v60  ;;  %v5455_v23 = vld [vmem:[#allocation10 + $0x18] sm:$0xff] }
 0xa9f   :  { %12928 = vmatpush3.bf16.msra.mxu0 %v12925_v60  ;;  %v12929_v30 = vpack.c.bf16 %v5455_v23, %v5454_v29  ;;  %v5655_v60 = vld [vmem:[#allocation10 + $0xb8] sm:$0xff]  ;;  %v6735_v23 = vld [vmem:[#allocation9 + $0xe8] sm:$0xff] }
 0xaa0   :  { %v11164_v63 = vpop.f32.mrb[66].mxu0  ;;  %12894 = vmatprep.subr.bf16.mxu1 %v15476_v51  ;;  %v13001_v29 = vpack.c.bf16 %v5655_v60, %v5654_v11  ;;  %v6047_v11 = vld [vmem:[#allocation10 + $0x1b8] sm:$0xff] }
 0xaa1   :  { %v13773_v52 = vadd.f32 %v11164_v63, %v15472_v28  ;;  %v5254_v6 = vpop.f32.mrb[67].mxu0  ;;  %12896 = vmatpush3.bf16.msra.mxu1 %v15476_v51  ;;  %12930 = vmatprep.subr.bf16.mxu0 %v12929_v30  ;;  %v5456_v63 = vld [vmem:[#allocation10 + $0x20] sm:$0xff] }
 0xaa2   :  { %v13774_v35 = vadd.f32 %v15472_v28, %v5254_v6 }
 0xaa3   :  { %v5342_v56 = vmax.f32 %v13773_v52, 0.0  ;;  %12932 = vmatpush3.bf16.msra.mxu0 %v12929_v30  ;;  %v5457_v52 = vld [vmem:[#allocation10 + $0x28] sm:$0xff]  ;;  %v5656_v30 = vld [vmem:[#allocation10 + $0xc0] sm:$0xff] }
 0xaa4   :  { %v5341_v10 = vmax.f32 %v13774_v35, 0.0  ;;  %v12933_v6 = vpack.c.bf16 %v5457_v52, %v5456_v63  ;;  %v5755_v35 = vld [vmem:[#allocation9 + $0x48] sm:$0xff]  ;;  %v6736_v52 = vld [vmem:[#allocation9 + $0xf0] sm:$0xff] }
 0xaa5   :  { %v5657_v63 = vld [vmem:[#allocation10 + $0xc8] sm:$0xff] }
 0xaa6   :  { %v15482_v37 = vpack.c.bf16 %v5342_v56, %v5341_v10  ;;  %v5756_v56 = vld [vmem:[#allocation9 + $0x50] sm:$0xff]  ;;  %12934 = vmatprep.subr.bf16.mxu0 %v12933_v6 }
 0xaa7   :  { %12936 = vmatpush3.bf16.msra.mxu0 %v12933_v6  ;;  %v5458_v10 = vld [vmem:[#allocation10 + $0x30] sm:$0xff]  ;;  %v13005_v6 = vpack.c.bf16 %v5657_v63, %v5656_v30 }
 0xaa8   :  { %v11167_v48 = vpop.f32.mrb[68].mxu0  ;;  %12898 = vmatprep.subr.bf16.mxu1 %v15482_v37  ;;  %v6050_v63 = vld [vmem:[#allocation10 + $0x1d0] sm:$0xff] }
 0xaa9   :  { %v13775_v5 = vadd.f32 %v11167_v48, %v15472_v28  ;;  %v5264_v3 = vpop.f32.mrb[69].mxu0  ;;  %12900 = vmatpush3.bf16.msra.mxu1 %v15482_v37  ;;  %v5459_v48 = vld [vmem:[#allocation10 + $0x38] sm:$0xff] }
 0xaaa   :  { %v13776_v16 = vadd.f32 %v15472_v28, %v5264_v3  ;;  %v5757_v3 = vld [vmem:[#allocation9 + $0x58] sm:$0xff] }
 0xaab   :  { %v5344_v58 = vmax.f32 %v13775_v5, 0.0  ;;  %v12937_v5 = vpack.c.bf16 %v5459_v48, %v5458_v10  ;;  %v6737_v10 = vld [vmem:[#allocation9 + $0xf8] sm:$0xff]  ;;  %v6930_v48 = vld [vmem:[#allocation9 + $0x100] sm:$0xff] }
 0xaac   :  { %v5343_v0 = vmax.f32 %v13776_v16, 0.0  ;;  %v5950_v16 = vld [vmem:[#allocation9 + $0x60] sm:$0xff] }
 0xaad   :  { %12938 = vmatprep.subr.bf16.mxu0 %v12937_v5 }
 0xaae   :  { %v15488_v25 = vpack.c.bf16 %v5344_v58, %v5343_v0  ;;  %12940 = vmatpush3.bf16.msra.mxu0 %v12937_v5  ;;  %v5460_v58 = vld [vmem:[#allocation10 + $0x40] sm:$0xff]  ;;  %v5461_v0 = vld [vmem:[#allocation10 + $0x48] sm:$0xff] }
 0xab0   :  { %v11170_v4 = vpop.f32.mrb[70].mxu0  ;;  %12902 = vmatprep.subr.bf16.mxu1 %v15488_v25 }
 0xab1   :  { %v13777_v15 = vadd.f32 %v11170_v4, %v15472_v28  ;;  %v5274_v57 = vpop.f32.mrb[71].mxu0  ;;  %12904 = vmatpush3.bf16.msra.mxu1 %v15488_v25  ;;  %v12941_v4 = vpack.c.bf16 %v5461_v0, %v5460_v58  ;;  %v5662_v58 = vld [vmem:[#allocation10 + $0xf0] sm:$0xff]  ;;  %v5663_v0 = vld [vmem:[#allocation10 + $0xf8] sm:$0xff] }
 0xab2   :  { %v13778_v47 = vadd.f32 %v15472_v28, %v5274_v57  ;;  %v5463_v57 = vld [vmem:[#allocation10 + $0x58] sm:$0xff] }
 0xab3   :  { %v5346_v62 = vmax.f32 %v13777_v15, 0.0  ;;  %12942 = vmatprep.subr.bf16.mxu0 %v12941_v4  ;;  %v5462_v15 = vld [vmem:[#allocation10 + $0x50] sm:$0xff] }
 0xab4   :  { %v5345_v54 = vmax.f32 %v13778_v47, 0.0  ;;  %12944 = vmatpush3.bf16.msra.mxu0 %v12941_v4  ;;  %v12945_v47 = vpack.c.bf16 %v5463_v57, %v5462_v15  ;;  %v13017_v4 = vpack.c.bf16 %v5663_v0, %v5662_v58  ;;  %v5845_v15 = vld [vmem:[#allocation10 + $0x108] sm:$0xff]  ;;  %v6238_v0 = vld [vmem:[#allocation10 + $0x210] sm:$0xff] }
 0xab6   :  { %v15494_v2 = vpack.c.bf16 %v5346_v62, %v5345_v54  ;;  %12946 = vmatprep.subr.bf16.mxu0 %v12945_v47  ;;  %v5464_v62 = vld [vmem:[#allocation10 + $0x60] sm:$0xff]  ;;  %v5465_v54 = vld [vmem:[#allocation10 + $0x68] sm:$0xff] }
 0xab8   :  { %v11173_v43 = vpop.f32.mrb[72].mxu0  ;;  %12906 = vmatprep.subr.bf16.mxu1 %v15494_v2  ;;  %12948 = vmatpush3.bf16.msra.mxu0 %v12945_v47  ;;  %v5846_v47 = vld [vmem:[#allocation10 + $0x110] sm:$0xff] }
 0xab9   :  { %v13779_v31 = vadd.f32 %v11173_v43, %v15472_v28  ;;  %v5284_v17 = vpop.f32.mrb[73].mxu0  ;;  %12908 = vmatpush3.bf16.msra.mxu1 %v15494_v2  ;;  %v12949_v43 = vpack.c.bf16 %v5465_v54, %v5464_v62 }
 0xaba   :  { %v13780_v49 = vadd.f32 %v15472_v28, %v5284_v17  ;;  %v5467_v17 = vld [vmem:[#allocation10 + $0x78] sm:$0xff] }
 0xabb   :  { %v5348_v24 = vmax.f32 %v13779_v31, 0.0  ;;  %12950 = vmatprep.subr.bf16.mxu0 %v12949_v43  ;;  %v5466_v31 = vld [vmem:[#allocation10 + $0x70] sm:$0xff] }
 0xabc   :  { %v5347_v12 = vmax.f32 %v13780_v49, 0.0  ;;  %12952 = vmatpush3.bf16.msra.mxu0 %v12949_v43  ;;  %v12953_v49 = vpack.c.bf16 %v5467_v17, %v5466_v31  ;;  %v5849_v31 = vld [vmem:[#allocation10 + $0x128] sm:$0xff] }
 0xabe   :  { %v15500_v53 = vpack.c.bf16 %v5348_v24, %v5347_v12  ;;  %12954 = vmatprep.subr.bf16.mxu0 %v12953_v49  ;;  %v5648_v24 = vld [vmem:[#allocation10 + $0x80] sm:$0xff]  ;;  %v5649_v12 = vld [vmem:[#allocation10 + $0x88] sm:$0xff] }
 0xac0   :  { %v11176_v9 = vpop.f32.mrb[74].mxu0  ;;  %12910 = vmatprep.subr.bf16.mxu1 %v15500_v53  ;;  %12956 = vmatpush3.bf16.msra.mxu0 %v12953_v49 }
 0xac1   :  { %v13781_v46 = vadd.f32 %v11176_v9, %v15472_v28  ;;  %v5294_v1 = vpop.f32.mrb[75].mxu0  ;;  %12912 = vmatpush3.bf16.msra.mxu1 %v15500_v53  ;;  %v15565_v9 = vpack.c.bf16 %v5649_v12, %v5648_v24  ;;  %v5850_v24 = vld [vmem:[#allocation10 + $0x130] sm:$0xff]  ;;  %v5851_v12 = vld [vmem:[#allocation10 + $0x138] sm:$0xff] }
 0xac2   :  { %v13782_v22 = vadd.f32 %v15472_v28, %v5294_v1  ;;  %v5952_v1 = vld [vmem:[#allocation9 + $0x70] sm:$0xff] }
 0xac3   :  { %v5350_v61 = vmax.f32 %v13781_v46, 0.0  ;;  %12990 = vmatprep.subr.bf16.mxu0 %v15565_v9  ;;  %v5951_v46 = vld [vmem:[#allocation9 + $0x68] sm:$0xff] }
 0xac4   :  { %v5349_v36 = vmax.f32 %v13782_v22, 0.0  ;;  %v5953_v22 = vld [vmem:[#allocation9 + $0x78] sm:$0xff] }
 0xac6   :  { %v15506_v40 = vpack.c.bf16 %v5350_v61, %v5349_v36  ;;  %v6146_v61 = vld [vmem:[#allocation9 + $0x80] sm:$0xff]  ;;  %v6147_v36 = vld [vmem:[#allocation9 + $0x88] sm:$0xff] }
 0xac8   :  { %v11179_v8 = vpop.f32.mrb[76].mxu0  ;;  %12914 = vmatprep.subr.bf16.mxu1 %v15506_v40 }
 0xac9   :  { %v13783_v13 = vadd.f32 %v11179_v8, %v15472_v28  ;;  %v5304_v19 = vpop.f32.mrb[77].mxu0  ;;  %12916 = vmatpush3.bf16.msra.mxu1 %v15506_v40  ;;  %v6148_v8 = vld [vmem:[#allocation9 + $0x90] sm:$0xff] }
 0xaca   :  { %v13784_v59 = vadd.f32 %v15472_v28, %v5304_v19  ;;  %v6342_v19 = vld [vmem:[#allocation9 + $0xa0] sm:$0xff] }
 0xacb   :  { %v5352_v20 = vmax.f32 %v13783_v13, 0.0  ;;  %v6149_v13 = vld [vmem:[#allocation9 + $0x98] sm:$0xff] }
 0xacc   :  { %v5351_v27 = vmax.f32 %v13784_v59, 0.0  ;;  %v6343_v59 = vld [vmem:[#allocation9 + $0xa8] sm:$0xff] }
 0xace   :  { %v15512_v32 = vpack.c.bf16 %v5352_v20, %v5351_v27  ;;  %v6344_v20 = vld [vmem:[#allocation9 + $0xb0] sm:$0xff]  ;;  %v6345_v27 = vld [vmem:[#allocation9 + $0xb8] sm:$0xff] }
 0xad0   :  { %v11182_v7 = vpop.f32.mrb[78].mxu0  ;;  %12918 = vmatprep.subr.bf16.mxu1 %v15512_v32 }
 0xad1   :  { %v13785_v38 = vadd.f32 %v11182_v7, %v15472_v28  ;;  %v5314_v39 = vpop.f32.mrb[79].mxu0  ;;  %12920 = vmatpush3.bf16.msra.mxu1 %v15512_v32  ;;  %v6538_v7 = vld [vmem:[#allocation9 + $0xc0] sm:$0xff] }
 0xad2   :  { %v13786_v45 = vadd.f32 %v15472_v28, %v5314_v39  ;;  %v5754_v28 = vld [vmem:[#allocation9 + $0x40] sm:$0xff]  ;;  %v6540_v39 = vld [vmem:[#allocation9 + $0xd0] sm:$0xff] }
 0xad3   :  { %v5354_v14 = vmax.f32 %v13785_v38, 0.0  ;;  %v6539_v38 = vld [vmem:[#allocation9 + $0xc8] sm:$0xff] }
 0xad4   :  { %v5353_v50 = vmax.f32 %v13786_v45, 0.0  ;;  %v6541_v45 = vld [vmem:[#allocation9 + $0xd8] sm:$0xff] }
 0xad6   :  { %v15518_v42 = vpack.c.bf16 %v5354_v14, %v5353_v50  ;;  %v6734_v14 = vld [vmem:[#allocation9 + $0xe0] sm:$0xff]  ;;  %v5650_v50 = vld [vmem:[#allocation10 + $0x90] sm:$0xff] }
 0xad8   :  { %12922 = vmatprep.subr.bf16.mxu1 %v15518_v42 }
 0xad9   :  { %12924 = vmatpush3.bf16.msra.mxu1 %v15518_v42 }
 0xada   :  { %12958 = vmatprep.subr.bf16.mxu1 %v15476_v51 }
 0xadc   :  { %11216 = vmatmul.mubr.f32.vlgmr.msra.gmra.mrb[46].mxu1 %v5364_v55  ;;  %v5651_v55 = vld [vmem:[#allocation10 + $0x98] sm:$0xff] }
 0xadd   :  { %12960 = vmatpush3.bf16.msra.mxu1 %v15476_v51  ;;  %11218 = vmatprep.mubr.f32.mxu1 %v5365_v26 }
 0xade   :  { %12962 = vmatprep.subr.bf16.mxu1 %v15482_v37 }
 0xae0   :  { %11219 = vmatmul.mubr.f32.gmra.mrb[48].mxu1 %v5366_v21 }
 0xae1   :  { %12964 = vmatpush3.bf16.msra.mxu1 %v15482_v37  ;;  %11291 = vmatprep.mubr.f32.mxu1 %v5558_v18  ;;  %v12993_v18 = vpack.c.bf16 %v5651_v55, %v5650_v50  ;;  %v6043_v50 = vld [vmem:[#allocation10 + $0x198] sm:$0xff] }
 0xae2   :  { %12966 = vmatprep.subr.bf16.mxu1 %v15488_v25 }
 0xae5   :  { %12968 = vmatpush3.bf16.msra.mxu1 %v15488_v25 }
 0xae6   :  { %12970 = vmatprep.subr.bf16.mxu1 %v15494_v2 }
 0xae9   :  { %12972 = vmatpush3.bf16.msra.mxu1 %v15494_v2 }
 0xaea   :  { %12974 = vmatprep.subr.bf16.mxu1 %v15500_v53 }
 0xaed   :  { %12976 = vmatpush3.bf16.msra.mxu1 %v15500_v53 }
 0xaee   :  { %12978 = vmatprep.subr.bf16.mxu1 %v15506_v40 }
 0xaf1   :  { %12980 = vmatpush3.bf16.msra.mxu1 %v15506_v40 }
 0xaf2   :  { %12982 = vmatprep.subr.bf16.mxu1 %v15512_v32 }
 0xaf5   :  { %12984 = vmatpush3.bf16.msra.mxu1 %v15512_v32 }
 0xaf6   :  { %12986 = vmatprep.subr.bf16.mxu1 %v15518_v42 }
 0xaf9   :  { %12988 = vmatpush3.bf16.msra.mxu1 %v15518_v42 }
 0xafa   :  { %13022 = vmatprep.subr.bf16.mxu1 %v15476_v51 }
 0xafc   :  { %11292 = vmatmul.mubr.f32.vlgmr.msra.gmra.mrb[50].mxu1 %v5559_v41  ;;  %v5652_v41 = vld [vmem:[#allocation10 + $0xa0] sm:$0xff] }
 0xafd   :  { %13024 = vmatpush3.bf16.msra.mxu1 %v15476_v51  ;;  %11294 = vmatprep.mubr.f32.mxu1 %v5560_v33  ;;  %v5653_v33 = vld [vmem:[#allocation10 + $0xa8] sm:$0xff] }
 0xafe   :  { %13026 = vmatprep.subr.bf16.mxu1 %v15482_v37 }
 0xb00   :  { %11295 = vmatmul.mubr.f32.gmra.mrb[52].mxu1 %v5561_v34 }
 0xb01   :  { %13028 = vmatpush3.bf16.msra.mxu1 %v15482_v37  ;;  %11367 = vmatprep.mubr.f32.mxu1 %v5754_v28  ;;  %v12997_v28 = vpack.c.bf16 %v5653_v33, %v5652_v41  ;;  %v6045_v41 = vld [vmem:[#allocation10 + $0x1a8] sm:$0xff] }
 0xb02   :  { %13030 = vmatprep.subr.bf16.mxu1 %v15488_v25 }
 0xb05   :  { %13032 = vmatpush3.bf16.msra.mxu1 %v15488_v25 }
 0xb06   :  { %13034 = vmatprep.subr.bf16.mxu1 %v15494_v2 }
 0xb09   :  { %13036 = vmatpush3.bf16.msra.mxu1 %v15494_v2 }
 0xb0a   :  { %13038 = vmatprep.subr.bf16.mxu1 %v15500_v53 }
 0xb0d   :  { %13040 = vmatpush3.bf16.msra.mxu1 %v15500_v53 }
 0xb0e   :  { %13042 = vmatprep.subr.bf16.mxu1 %v15506_v40 }
 0xb11   :  { %13044 = vmatpush3.bf16.msra.mxu1 %v15506_v40 }
 0xb12   :  { %13046 = vmatprep.subr.bf16.mxu1 %v15512_v32 }
 0xb15   :  { %13048 = vmatpush3.bf16.msra.mxu1 %v15512_v32 }
 0xb16   :  { %13050 = vmatprep.subr.bf16.mxu1 %v15518_v42 }
 0xb19   :  { %13052 = vmatpush3.bf16.msra.mxu1 %v15518_v42 }
 0xb1a   :  { %13086 = vmatprep.subr.bf16.mxu1 %v15476_v51 }
 0xb1c   :  { %11368 = vmatmul.mubr.f32.vlgmr.msra.gmra.mrb[54].mxu1 %v5755_v35  ;;  %v5658_v35 = vld [vmem:[#allocation10 + $0xd0] sm:$0xff] }
 0xb1d   :  { %13088 = vmatpush3.bf16.msra.mxu1 %v15476_v51  ;;  %11370 = vmatprep.mubr.f32.mxu1 %v5756_v56  ;;  %v5659_v56 = vld [vmem:[#allocation10 + $0xd8] sm:$0xff] }
 0xb1e   :  { %13090 = vmatprep.subr.bf16.mxu1 %v15482_v37  ;;  %v13009_v5 = vpack.c.bf16 %v5659_v56, %v5658_v35  ;;  %v6052_v35 = vld [vmem:[#allocation10 + $0x1e0] sm:$0xff]  ;;  %v6053_v56 = vld [vmem:[#allocation10 + $0x1e8] sm:$0xff] }
 0xb20   :  { %11371 = vmatmul.mubr.f32.gmra.mrb[56].mxu1 %v5757_v3  ;;  %v5660_v3 = vld [vmem:[#allocation10 + $0xe0] sm:$0xff] }
 0xb21   :  { %13092 = vmatpush3.bf16.msra.mxu1 %v15482_v37  ;;  %11443 = vmatprep.mubr.f32.mxu1 %v5950_v16  ;;  %v5661_v16 = vld [vmem:[#allocation10 + $0xe8] sm:$0xff] }
 0xb22   :  { %13094 = vmatprep.subr.bf16.mxu1 %v15488_v25 }
 0xb25   :  { %13096 = vmatpush3.bf16.msra.mxu1 %v15488_v25 }
 0xb26   :  { %13098 = vmatprep.subr.bf16.mxu1 %v15494_v2 }
 0xb29   :  { %13100 = vmatpush3.bf16.msra.mxu1 %v15494_v2 }
 0xb2a   :  { %13102 = vmatprep.subr.bf16.mxu1 %v15500_v53 }
 0xb2d   :  { %13104 = vmatpush3.bf16.msra.mxu1 %v15500_v53 }
 0xb2e   :  { %13106 = vmatprep.subr.bf16.mxu1 %v15506_v40 }
 0xb31   :  { %13108 = vmatpush3.bf16.msra.mxu1 %v15506_v40 }
 0xb32   :  { %13110 = vmatprep.subr.bf16.mxu1 %v15512_v32 }
 0xb35   :  { %13112 = vmatpush3.bf16.msra.mxu1 %v15512_v32 }
 0xb36   :  { %13114 = vmatprep.subr.bf16.mxu1 %v15518_v42 }
 0xb39   :  { %13116 = vmatpush3.bf16.msra.mxu1 %v15518_v42 }
 0xb3a   :  { %13150 = vmatprep.subr.bf16.mxu1 %v15476_v51 }
 0xb3c   :  { %11444 = vmatmul.mubr.f32.vlgmr.msra.gmra.mrb[58].mxu1 %v5951_v46  ;;  %v5852_v46 = vld [vmem:[#allocation10 + $0x140] sm:$0xff] }
 0xb3d   :  { %13152 = vmatpush3.bf16.msra.mxu1 %v15476_v51  ;;  %11446 = vmatprep.mubr.f32.mxu1 %v5952_v1  ;;  %v5853_v1 = vld [vmem:[#allocation10 + $0x148] sm:$0xff] }
 0xb3e   :  { %13154 = vmatprep.subr.bf16.mxu1 %v15482_v37 }
 0xb40   :  { %11447 = vmatmul.mubr.f32.gmra.mrb[60].mxu1 %v5953_v22  ;;  %v6932_v22 = vld [vmem:[#allocation9 + $0x110] sm:$0xff] }
 0xb41   :  { %13156 = vmatpush3.bf16.msra.mxu1 %v15482_v37  ;;  %11519 = vmatprep.mubr.f32.mxu1 %v6146_v61  ;;  %v13069_v61 = vpack.c.bf16 %v5853_v1, %v5852_v46  ;;  %v6248_v46 = vld [vmem:[#allocation10 + $0x260] sm:$0xff]  ;;  %v6249_v1 = vld [vmem:[#allocation10 + $0x268] sm:$0xff] }
 0xb42   :  { %13158 = vmatprep.subr.bf16.mxu1 %v15488_v25 }
 0xb45   :  { %13160 = vmatpush3.bf16.msra.mxu1 %v15488_v25 }
 0xb46   :  { %13162 = vmatprep.subr.bf16.mxu1 %v15494_v2 }
 0xb49   :  { %13164 = vmatpush3.bf16.msra.mxu1 %v15494_v2 }
 0xb4a   :  { %13166 = vmatprep.subr.bf16.mxu1 %v15500_v53 }
 0xb4d   :  { %13168 = vmatpush3.bf16.msra.mxu1 %v15500_v53 }
 0xb4e   :  { %13170 = vmatprep.subr.bf16.mxu1 %v15506_v40 }
 0xb51   :  { %13172 = vmatpush3.bf16.msra.mxu1 %v15506_v40 }
 0xb52   :  { %13174 = vmatprep.subr.bf16.mxu1 %v15512_v32 }
 0xb55   :  { %13176 = vmatpush3.bf16.msra.mxu1 %v15512_v32 }
 0xb56   :  { %13178 = vmatprep.subr.bf16.mxu1 %v15518_v42 }
 0xb59   :  { %13180 = vmatpush3.bf16.msra.mxu1 %v15518_v42 }
 0xb5a   :  { %13214 = vmatprep.subr.bf16.mxu1 %v15476_v51 }
 0xb5c   :  { %11520 = vmatmul.mubr.f32.vlgmr.msra.gmra.mrb[62].mxu1 %v6147_v36  ;;  %v5854_v36 = vld [vmem:[#allocation10 + $0x150] sm:$0xff] }
 0xb5d   :  { %13216 = vmatpush3.bf16.msra.mxu1 %v15476_v51  ;;  %11522 = vmatprep.mubr.f32.mxu1 %v6148_v8  ;;  %v5855_v8 = vld [vmem:[#allocation10 + $0x158] sm:$0xff] }
 0xb5e   :  { %13218 = vmatprep.subr.bf16.mxu1 %v15482_v37 }
 0xb60   :  { %11523 = vmatmul.mubr.f32.gmra.mrb[64].mxu1 %v6149_v13  ;;  %v13073_v13 = vpack.c.bf16 %v5855_v8, %v5854_v36  ;;  %v6432_v8 = vld [vmem:[#allocation10 + $0x280] sm:$0xff] }
 0xb61   :  { %13220 = vmatpush3.bf16.msra.mxu1 %v15482_v37  ;;  %11595 = vmatprep.mubr.f32.mxu1 %v6342_v19  ;;  %v5856_v19 = vld [vmem:[#allocation10 + $0x160] sm:$0xff] }
 0xb62   :  { %13222 = vmatprep.subr.bf16.mxu1 %v15488_v25 }
 0xb65   :  { %13224 = vmatpush3.bf16.msra.mxu1 %v15488_v25 }
 0xb66   :  { %13226 = vmatprep.subr.bf16.mxu1 %v15494_v2 }
 0xb69   :  { %13228 = vmatpush3.bf16.msra.mxu1 %v15494_v2 }
 0xb6a   :  { %13230 = vmatprep.subr.bf16.mxu1 %v15500_v53 }
 0xb6d   :  { %13232 = vmatpush3.bf16.msra.mxu1 %v15500_v53 }
 0xb6e   :  { %13234 = vmatprep.subr.bf16.mxu1 %v15506_v40 }
 0xb71   :  { %13236 = vmatpush3.bf16.msra.mxu1 %v15506_v40 }
 0xb72   :  { %13238 = vmatprep.subr.bf16.mxu1 %v15512_v32 }
 0xb75   :  { %13240 = vmatpush3.bf16.msra.mxu1 %v15512_v32 }
 0xb76   :  { %13242 = vmatprep.subr.bf16.mxu1 %v15518_v42 }
 0xb79   :  { %13244 = vmatpush3.bf16.msra.mxu1 %v15518_v42 }
 0xb7a   :  { %13278 = vmatprep.subr.bf16.mxu1 %v15476_v51 }
 0xb7c   :  { %11596 = vmatmul.mubr.f32.vlgmr.msra.gmra.mrb[66].mxu1 %v6343_v59  ;;  %v5857_v59 = vld [vmem:[#allocation10 + $0x168] sm:$0xff] }
 0xb7d   :  { %13280 = vmatpush3.bf16.msra.mxu1 %v15476_v51  ;;  %11598 = vmatprep.mubr.f32.mxu1 %v6344_v20  ;;  %v5858_v20 = vld [vmem:[#allocation10 + $0x170] sm:$0xff] }
 0xb7e   :  { %13282 = vmatprep.subr.bf16.mxu1 %v15482_v37 }
 0xb80   :  { %11599 = vmatmul.mubr.f32.gmra.mrb[68].mxu1 %v6345_v27  ;;  %v5859_v27 = vld [vmem:[#allocation10 + $0x178] sm:$0xff] }
 0xb81   :  { %13284 = vmatpush3.bf16.msra.mxu1 %v15482_v37  ;;  %11671 = vmatprep.mubr.f32.mxu1 %v6538_v7  ;;  %v13081_v7 = vpack.c.bf16 %v5859_v27, %v5858_v20 }
 0xb82   :  { %13286 = vmatprep.subr.bf16.mxu1 %v15488_v25 }
 0xb85   :  { %13288 = vmatpush3.bf16.msra.mxu1 %v15488_v25 }
 0xb86   :  { %13290 = vmatprep.subr.bf16.mxu1 %v15494_v2 }
 0xb89   :  { %13292 = vmatpush3.bf16.msra.mxu1 %v15494_v2 }
 0xb8a   :  { %13294 = vmatprep.subr.bf16.mxu1 %v15500_v53 }
 0xb8d   :  { %13296 = vmatpush3.bf16.msra.mxu1 %v15500_v53 }
 0xb8e   :  { %13298 = vmatprep.subr.bf16.mxu1 %v15506_v40 }
 0xb91   :  { %13300 = vmatpush3.bf16.msra.mxu1 %v15506_v40 }
 0xb92   :  { %13302 = vmatprep.subr.bf16.mxu1 %v15512_v32 }
 0xb95   :  { %13304 = vmatpush3.bf16.msra.mxu1 %v15512_v32 }
 0xb96   :  { %13306 = vmatprep.subr.bf16.mxu1 %v15518_v42 }
 0xb99   :  { %13308 = vmatpush3.bf16.msra.mxu1 %v15518_v42 }
 0xb9a   :  { %13342 = vmatprep.subr.bf16.mxu1 %v15476_v51 }
 0xb9c   :  { %11672 = vmatmul.mubr.f32.vlgmr.msra.gmra.mrb[70].mxu1 %v6539_v38  ;;  %v6040_v38 = vld [vmem:[#allocation10 + $0x180] sm:$0xff] }
 0xb9d   :  { %13344 = vmatpush3.bf16.msra.mxu1 %v15476_v51  ;;  %11674 = vmatprep.mubr.f32.mxu1 %v6540_v39  ;;  %v6041_v39 = vld [vmem:[#allocation10 + $0x188] sm:$0xff] }
 0xb9e   :  { %13346 = vmatprep.subr.bf16.mxu1 %v15482_v37 }
 0xba0   :  { %11675 = vmatmul.mubr.f32.gmra.mrb[72].mxu1 %v6541_v45  ;;  %v13117_v45 = vpack.c.bf16 %v6041_v39, %v6040_v38  ;;  %v6436_v38 = vld [vmem:[#allocation10 + $0x2a0] sm:$0xff]  ;;  %v6437_v39 = vld [vmem:[#allocation10 + $0x2a8] sm:$0xff] }
 0xba1   :  { %13348 = vmatpush3.bf16.msra.mxu1 %v15482_v37  ;;  %11747 = vmatprep.mubr.f32.mxu1 %v6734_v14  ;;  %v6042_v14 = vld [vmem:[#allocation10 + $0x190] sm:$0xff] }
 0xba2   :  { %13350 = vmatprep.subr.bf16.mxu1 %v15488_v25 }
 0xba5   :  { %13352 = vmatpush3.bf16.msra.mxu1 %v15488_v25 }
 0xba6   :  { %13354 = vmatprep.subr.bf16.mxu1 %v15494_v2 }
 0xba9   :  { %13356 = vmatpush3.bf16.msra.mxu1 %v15494_v2 }
 0xbaa   :  { %13358 = vmatprep.subr.bf16.mxu1 %v15500_v53 }
 0xbad   :  { %13360 = vmatpush3.bf16.msra.mxu1 %v15500_v53 }
 0xbae   :  { %13362 = vmatprep.subr.bf16.mxu1 %v15506_v40 }
 0xbaf   :  { %v11217_v26 = vpop.f32.mrb[46].mxu1 }
 0xbb0   :  { %v5433_v21 = vpop.f32.mrb[47].mxu1 }
 0xbb1   :  { %13364 = vmatpush3.bf16.msra.mxu1 %v15506_v40  ;;  %11253 = vmatprep.mubr.f32.mxu0 %v5433_v21  ;;  %v13121_v21 = vpack.c.bf16 %v6043_v50, %v6042_v14  ;;  %v13253_v14 = vpack.c.bf16 %v6437_v39, %v6436_v38  ;;  %v6832_v38 = vld [vmem:[#allocation10 + $0x3c0] sm:$0xff]  ;;  %v6833_v39 = vld [vmem:[#allocation10 + $0x3c8] sm:$0xff] }
 0xbb2   :  { %13366 = vmatprep.subr.bf16.mxu1 %v15512_v32  ;;  %11254 = vmatmul.mubr.f32.vlgmr.msra.gmra.mrb[34].mxu0 %v11217_v26 }
 0xbb3   :  { %12992 = vmatpush3.bf16.msra.mxu0 %v15565_v9  ;;  %v11220_v34 = vpop.f32.mrb[48].mxu1  ;;  %v6931_v9 = vld [vmem:[#allocation9 + $0x108] sm:$0xff] }
 0xbb4   :  { %12994 = vmatprep.subr.bf16.mxu0 %v12993_v18  ;;  %v5443_v44 = vpop.f32.mrb[49].mxu1 }
 0xbb5   :  { %13368 = vmatpush3.bf16.msra.mxu1 %v15512_v32  ;;  %11256 = vmatprep.mubr.f32.mxu0 %v5443_v44  ;;  %v6046_v44 = vld [vmem:[#allocation10 + $0x1b0] sm:$0xff] }
 0xbb6   :  { %13370 = vmatprep.subr.bf16.mxu1 %v15518_v42  ;;  %11257 = vmatmul.mubr.f32.gmra.mrb[36].mxu0 %v11220_v34  ;;  %v13129_v60 = vpack.c.bf16 %v6047_v11, %v6046_v44  ;;  %v6444_v11 = vld [vmem:[#allocation10 + $0x2e0] sm:$0xff] }
 0xbb7   :  { %12996 = vmatpush3.bf16.msra.mxu0 %v12993_v18  ;;  %v6044_v18 = vld [vmem:[#allocation10 + $0x1a0] sm:$0xff] }
 0xbb8   :  { %12998 = vmatprep.subr.bf16.mxu0 %v12997_v28  ;;  %v13125_v34 = vpack.c.bf16 %v6045_v41, %v6044_v18  ;;  %v6440_v18 = vld [vmem:[#allocation10 + $0x2c0] sm:$0xff]  ;;  %v6441_v41 = vld [vmem:[#allocation10 + $0x2c8] sm:$0xff] }
 0xbb9   :  { %13372 = vmatpush3.bf16.msra.mxu1 %v15518_v42 }
 0xbba   :  { %13406 = vmatprep.subr.bf16.mxu1 %v15476_v51 }
 0xbbb   :  { %13000 = vmatpush3.bf16.msra.mxu0 %v12997_v28 }
 0xbbc   :  { %11748 = vmatmul.mubr.f32.vlgmr.msra.gmra.mrb[74].mxu1 %v6735_v23  ;;  %13002 = vmatprep.subr.bf16.mxu0 %v13001_v29  ;;  %v6049_v23 = vld [vmem:[#allocation10 + $0x1c8] sm:$0xff] }
 0xbbd   :  { %13408 = vmatpush3.bf16.msra.mxu1 %v15476_v51  ;;  %11750 = vmatprep.mubr.f32.mxu1 %v6736_v52  ;;  %v13013_v51 = vpack.c.bf16 %v5661_v16, %v5660_v3  ;;  %v6051_v52 = vld [vmem:[#allocation10 + $0x1d8] sm:$0xff]  ;;  %v6236_v16 = vld [vmem:[#allocation10 + $0x200] sm:$0xff] }
 0xbbe   :  { %13410 = vmatprep.subr.bf16.mxu1 %v15482_v37 }
 0xbbf   :  { %13004 = vmatpush3.bf16.msra.mxu0 %v13001_v29  ;;  %v6048_v29 = vld [vmem:[#allocation10 + $0x1c0] sm:$0xff] }
 0xbc0   :  { %13006 = vmatprep.subr.bf16.mxu0 %v13005_v6  ;;  %11751 = vmatmul.mubr.f32.gmra.mrb[76].mxu1 %v6737_v10  ;;  %v13133_v30 = vpack.c.bf16 %v6049_v23, %v6048_v29  ;;  %v13141_v10 = vpack.c.bf16 %v6053_v56, %v6052_v35  ;;  %v6446_v23 = vld [vmem:[#allocation10 + $0x2f0] sm:$0xff] }
 0xbc1   :  { %13412 = vmatpush3.bf16.msra.mxu1 %v15482_v37  ;;  %11823 = vmatprep.mubr.f32.mxu1 %v6930_v48  ;;  %v5844_v37 = vld [vmem:[#allocation10 + $0x100] sm:$0xff]  ;;  %v6054_v48 = vld [vmem:[#allocation10 + $0x1f0] sm:$0xff] }
 0xbc2   :  { %13414 = vmatprep.subr.bf16.mxu1 %v15488_v25  ;;  %v13053_v57 = vpack.c.bf16 %v5845_v15, %v5844_v37  ;;  %v6630_v56 = vld [vmem:[#allocation10 + $0x310] sm:$0xff] }
 0xbc3   :  { %13008 = vmatpush3.bf16.msra.mxu0 %v13005_v6  ;;  %v13137_v6 = vpack.c.bf16 %v6051_v52, %v6050_v63  ;;  %v6628_v52 = vld [vmem:[#allocation10 + $0x300] sm:$0xff] }
 0xbc4   :  { %13010 = vmatprep.subr.bf16.mxu0 %v13009_v5 }
 0xbc5   :  { %13416 = vmatpush3.bf16.msra.mxu1 %v15488_v25  ;;  %v5847_v25 = vld [vmem:[#allocation10 + $0x118] sm:$0xff] }
 0xbc6   :  { %13418 = vmatprep.subr.bf16.mxu1 %v15494_v2  ;;  %v13057_v43 = vpack.c.bf16 %v5847_v25, %v5846_v47  ;;  %v6240_v47 = vld [vmem:[#allocation10 + $0x220] sm:$0xff]  ;;  %v6241_v25 = vld [vmem:[#allocation10 + $0x228] sm:$0xff] }
 0xbc7   :  { %13012 = vmatpush3.bf16.msra.mxu0 %v13009_v5  ;;  %v6055_v5 = vld [vmem:[#allocation10 + $0x1f8] sm:$0xff] }
 0xbc8   :  { %13014 = vmatprep.subr.bf16.mxu0 %v13013_v51  ;;  %v13145_v3 = vpack.c.bf16 %v6055_v5, %v6054_v48 }
 0xbc9   :  { %13420 = vmatpush3.bf16.msra.mxu1 %v15494_v2  ;;  %v5848_v2 = vld [vmem:[#allocation10 + $0x120] sm:$0xff] }
 0xbca   :  { %13422 = vmatprep.subr.bf16.mxu1 %v15500_v53 }
 0xbcb   :  { %13016 = vmatpush3.bf16.msra.mxu0 %v13013_v51  ;;  %v6237_v51 = vld [vmem:[#allocation10 + $0x208] sm:$0xff] }
 0xbcc   :  { %13018 = vmatprep.subr.bf16.mxu0 %v13017_v4  ;;  %v13181_v58 = vpack.c.bf16 %v6237_v51, %v6236_v16  ;;  %v6632_v16 = vld [vmem:[#allocation10 + $0x320] sm:$0xff]  ;;  %v6633_v51 = vld [vmem:[#allocation10 + $0x328] sm:$0xff] }
 0xbcd   :  { %13424 = vmatpush3.bf16.msra.mxu1 %v15500_v53  ;;  %v13061_v53 = vpack.c.bf16 %v5849_v31, %v5848_v2  ;;  %v6242_v2 = vld [vmem:[#allocation10 + $0x230] sm:$0xff]  ;;  %v6243_v31 = vld [vmem:[#allocation10 + $0x238] sm:$0xff] }
 0xbce   :  { %13426 = vmatprep.subr.bf16.mxu1 %v15506_v40 }
 0xbcf   :  { %13020 = vmatpush3.bf16.msra.mxu0 %v13017_v4  ;;  %v11293_v62 = vpop.f32.mrb[50].mxu1  ;;  %v6239_v4 = vld [vmem:[#allocation10 + $0x218] sm:$0xff] }
 0xbd0   :  { %v5628_v54 = vpop.f32.mrb[51].mxu1  ;;  %13054 = vmatprep.subr.bf16.mxu0 %v13053_v57 }
 0xbd1   :  { %13428 = vmatpush3.bf16.msra.mxu1 %v15506_v40  ;;  %11329 = vmatprep.mubr.f32.mxu0 %v5628_v54  ;;  %v13065_v40 = vpack.c.bf16 %v5851_v12, %v5850_v24  ;;  %v13189_v54 = vpack.c.bf16 %v6241_v25, %v6240_v47  ;;  %v6246_v12 = vld [vmem:[#allocation10 + $0x250] sm:$0xff]  ;;  %v6636_v47 = vld [vmem:[#allocation10 + $0x340] sm:$0xff]  ;;  %v6637_v25 = vld [vmem:[#allocation10 + $0x348] sm:$0xff] }
 0xbd2   :  { %13430 = vmatprep.subr.bf16.mxu1 %v15512_v32  ;;  %11330 = vmatmul.mubr.f32.vlgmr.msra.gmra.mrb[34].mxu0 %v11293_v62 }
 0xbd3   :  { %13056 = vmatpush3.bf16.msra.mxu0 %v13053_v57  ;;  %v11296_v17 = vpop.f32.mrb[52].mxu1  ;;  %v13185_v57 = vpack.c.bf16 %v6239_v4, %v6238_v0  ;;  %v13317_v0 = vpack.c.bf16 %v6633_v51, %v6632_v16  ;;  %v7028_v16 = vld [vmem:[#allocation10 + $0x440] sm:$0xff]  ;;  %v7029_v51 = vld [vmem:[#allocation10 + $0x448] sm:$0xff] }
 0xbd4   :  { %13058 = vmatprep.subr.bf16.mxu0 %v13057_v43  ;;  %v5638_v49 = vpop.f32.mrb[53].mxu1 }
 0xbd5   :  { %13432 = vmatpush3.bf16.msra.mxu1 %v15512_v32  ;;  %11332 = vmatprep.mubr.f32.mxu0 %v5638_v49  ;;  %v6933_v32 = vld [vmem:[#allocation9 + $0x118] sm:$0xff]  ;;  %v6245_v49 = vld [vmem:[#allocation10 + $0x248] sm:$0xff] }
 0xbd6   :  { %13434 = vmatprep.subr.bf16.mxu1 %v15518_v42  ;;  %11333 = vmatmul.mubr.f32.gmra.mrb[36].mxu0 %v11296_v17  ;;  %v13193_v17 = vpack.c.bf16 %v6243_v31, %v6242_v2  ;;  %v6640_v31 = vld [vmem:[#allocation10 + $0x360] sm:$0xff] }
 0xbd7   :  { %13060 = vmatpush3.bf16.msra.mxu0 %v13057_v43 }
 0xbd8   :  { %13062 = vmatprep.subr.bf16.mxu0 %v13061_v53 }
 0xbd9   :  { %13436 = vmatpush3.bf16.msra.mxu1 %v15518_v42  ;;  %v13077_v42 = vpack.c.bf16 %v5857_v59, %v5856_v19  ;;  %v6434_v59 = vld [vmem:[#allocation10 + $0x290] sm:$0xff] }
 0xbdb   :  { %13064 = vmatpush3.bf16.msra.mxu0 %v13061_v53  ;;  %v6244_v53 = vld [vmem:[#allocation10 + $0x240] sm:$0xff] }
 0xbdc   :  { %11824 = vmatmul.mubr.f32.vlgmr.msra.gmra.mrb[78].mxu1 %v6931_v9  ;;  %13066 = vmatprep.subr.bf16.mxu0 %v13065_v40  ;;  %v13197_v24 = vpack.c.bf16 %v6245_v49, %v6244_v53  ;;  %v6642_v49 = vld [vmem:[#allocation10 + $0x370] sm:$0xff] }
 0xbdd   :  { %11826 = vmatprep.mubr.f32.mxu1 %v6932_v22  ;;  %v13205_v22 = vpack.c.bf16 %v6249_v1, %v6248_v46  ;;  %v6826_v1 = vld [vmem:[#allocation10 + $0x390] sm:$0xff] }
 0xbdf   :  { %13068 = vmatpush3.bf16.msra.mxu0 %v13065_v40  ;;  %v6247_v40 = vld [vmem:[#allocation10 + $0x258] sm:$0xff] }
 0xbe0   :  { %11827 = vmatmul.mubr.f32.gmra.mrb[80].mxu1 %v6933_v32  ;;  %13070 = vmatprep.subr.bf16.mxu0 %v13069_v61  ;;  %v13201_v9 = vpack.c.bf16 %v6247_v40, %v6246_v12  ;;  %v6251_v32 = vld [vmem:[#allocation10 + $0x278] sm:$0xff]  ;;  %v6824_v40 = vld [vmem:[#allocation10 + $0x380] sm:$0xff] }
 0xbe3   :  { %13072 = vmatpush3.bf16.msra.mxu0 %v13069_v61  ;;  %v6250_v61 = vld [vmem:[#allocation10 + $0x270] sm:$0xff] }
 0xbe4   :  { %13074 = vmatprep.subr.bf16.mxu0 %v13073_v13  ;;  %v13209_v36 = vpack.c.bf16 %v6251_v32, %v6250_v61 }
 0xbe7   :  { %13076 = vmatpush3.bf16.msra.mxu0 %v13073_v13  ;;  %v6433_v13 = vld [vmem:[#allocation10 + $0x288] sm:$0xff] }
 0xbe8   :  { %13078 = vmatprep.subr.bf16.mxu0 %v13077_v42  ;;  %v13245_v19 = vpack.c.bf16 %v6433_v13, %v6432_v8  ;;  %v6828_v8 = vld [vmem:[#allocation10 + $0x3a0] sm:$0xff]  ;;  %v6829_v13 = vld [vmem:[#allocation10 + $0x3a8] sm:$0xff] }
 0xbeb   :  { %13080 = vmatpush3.bf16.msra.mxu0 %v13077_v42  ;;  %v6435_v42 = vld [vmem:[#allocation10 + $0x298] sm:$0xff] }
 0xbec   :  { %13082 = vmatprep.subr.bf16.mxu0 %v13081_v7 }
 0xbef   :  { %13084 = vmatpush3.bf16.msra.mxu0 %v13081_v7  ;;  %v11369_v55 = vpop.f32.mrb[54].mxu1  ;;  %v13249_v7 = vpack.c.bf16 %v6435_v42, %v6434_v59  ;;  %v13381_v59 = vpack.c.bf16 %v6829_v13, %v6828_v8 }
 0xbf0   :  { %v5824_v26 = vpop.f32.mrb[55].mxu1  ;;  %13118 = vmatprep.subr.bf16.mxu0 %v13117_v45 }
 0xbf1   :  { %11405 = vmatprep.mubr.f32.mxu0 %v5824_v26  ;;  %v6439_v26 = vld [vmem:[#allocation10 + $0x2b8] sm:$0xff] }
 0xbf2   :  { %11406 = vmatmul.mubr.f32.vlgmr.msra.gmra.mrb[34].mxu0 %v11369_v55  ;;  %v6438_v55 = vld [vmem:[#allocation10 + $0x2b0] sm:$0xff] }
 0xbf3   :  { %13120 = vmatpush3.bf16.msra.mxu0 %v13117_v45  ;;  %v11372_v33 = vpop.f32.mrb[56].mxu1 }
 0xbf4   :  { %13122 = vmatprep.subr.bf16.mxu0 %v13121_v21  ;;  %v5834_v28 = vpop.f32.mrb[57].mxu1 }
 0xbf5   :  { %11408 = vmatprep.mubr.f32.mxu0 %v5834_v28  ;;  %v6443_v28 = vld [vmem:[#allocation10 + $0x2d8] sm:$0xff] }
 0xbf6   :  { %11409 = vmatmul.mubr.f32.gmra.mrb[36].mxu0 %v11372_v33  ;;  %v13261_v33 = vpack.c.bf16 %v6441_v41, %v6440_v18  ;;  %v6838_v41 = vld [vmem:[#allocation10 + $0x3f0] sm:$0xff] }
 0xbf7   :  { %13124 = vmatpush3.bf16.msra.mxu0 %v13121_v21  ;;  %v13257_v21 = vpack.c.bf16 %v6439_v26, %v6438_v55  ;;  %v6836_v26 = vld [vmem:[#allocation10 + $0x3e0] sm:$0xff] }
 0xbf8   :  { %13126 = vmatprep.subr.bf16.mxu0 %v13125_v34 }
 0xbfb   :  { %13128 = vmatpush3.bf16.msra.mxu0 %v13125_v34  ;;  %v6442_v34 = vld [vmem:[#allocation10 + $0x2d0] sm:$0xff] }
 0xbfc   :  { %13130 = vmatprep.subr.bf16.mxu0 %v13129_v60  ;;  %v13265_v44 = vpack.c.bf16 %v6443_v28, %v6442_v34  ;;  %v7020_v28 = vld [vmem:[#allocation10 + $0x400] sm:$0xff] }
 0xbff   :  { %13132 = vmatpush3.bf16.msra.mxu0 %v13129_v60  ;;  %v6445_v60 = vld [vmem:[#allocation10 + $0x2e8] sm:$0xff] }
 0xc00   :  { %13134 = vmatprep.subr.bf16.mxu0 %v13133_v30  ;;  %v13269_v29 = vpack.c.bf16 %v6445_v60, %v6444_v11  ;;  %v7022_v60 = vld [vmem:[#allocation10 + $0x410] sm:$0xff] }
 0xc03   :  { %13136 = vmatpush3.bf16.msra.mxu0 %v13133_v30  ;;  %v6447_v30 = vld [vmem:[#allocation10 + $0x2f8] sm:$0xff] }
 0xc04   :  { %13138 = vmatprep.subr.bf16.mxu0 %v13137_v6  ;;  %v13273_v63 = vpack.c.bf16 %v6447_v30, %v6446_v23 }
 0xc07   :  { %13140 = vmatpush3.bf16.msra.mxu0 %v13137_v6  ;;  %v6629_v6 = vld [vmem:[#allocation10 + $0x308] sm:$0xff] }
 0xc08   :  { %13142 = vmatprep.subr.bf16.mxu0 %v13141_v10  ;;  %v13309_v35 = vpack.c.bf16 %v6629_v6, %v6628_v52  ;;  %v7024_v52 = vld [vmem:[#allocation10 + $0x420] sm:$0xff]  ;;  %v7025_v6 = vld [vmem:[#allocation10 + $0x428] sm:$0xff] }
 0xc0b   :  { %13144 = vmatpush3.bf16.msra.mxu0 %v13141_v10  ;;  %v6631_v10 = vld [vmem:[#allocation10 + $0x318] sm:$0xff] }
 0xc0c   :  { %13146 = vmatprep.subr.bf16.mxu0 %v13145_v3 }
 0xc0f   :  { %13148 = vmatpush3.bf16.msra.mxu0 %v13145_v3  ;;  %v11445_v37 = vpop.f32.mrb[58].mxu1  ;;  %v13313_v3 = vpack.c.bf16 %v6631_v10, %v6630_v56  ;;  %v13445_v56 = vpack.c.bf16 %v7025_v6, %v7024_v52  ;;  %v7225_v52 = vld [vmem:[#allocation15 + $0x68] sm:$0xff]  ;;  %v7789_v6 = vld [vmem:[#allocation13 + $0x20] sm:$0xff] }
 0xc10   :  { %v6020_v15 = vpop.f32.mrb[59].mxu1  ;;  %13182 = vmatprep.subr.bf16.mxu0 %v13181_v58 }
 0xc11   :  { %11481 = vmatprep.mubr.f32.mxu0 %v6020_v15  ;;  %v6635_v15 = vld [vmem:[#allocation10 + $0x338] sm:$0xff] }
 0xc12   :  { %11482 = vmatmul.mubr.f32.vlgmr.msra.gmra.mrb[34].mxu0 %v11445_v37  ;;  %v6634_v37 = vld [vmem:[#allocation10 + $0x330] sm:$0xff] }
 0xc13   :  { %13184 = vmatpush3.bf16.msra.mxu0 %v13181_v58  ;;  %v11448_v62 = vpop.f32.mrb[60].mxu1 }
 0xc14   :  { %13186 = vmatprep.subr.bf16.mxu0 %v13185_v57  ;;  %v6030_v43 = vpop.f32.mrb[61].mxu1 }
 0xc15   :  { %11484 = vmatprep.mubr.f32.mxu0 %v6030_v43  ;;  %v6639_v43 = vld [vmem:[#allocation10 + $0x358] sm:$0xff] }
 0xc16   :  { %11485 = vmatmul.mubr.f32.gmra.mrb[36].mxu0 %v11448_v62  ;;  %v13325_v62 = vpack.c.bf16 %v6637_v25, %v6636_v47  ;;  %v7034_v25 = vld [vmem:[#allocation10 + $0x470] sm:$0xff] }
 0xc17   :  { %13188 = vmatpush3.bf16.msra.mxu0 %v13185_v57  ;;  %v13321_v57 = vpack.c.bf16 %v6635_v15, %v6634_v37  ;;  %v7032_v15 = vld [vmem:[#allocation10 + $0x460] sm:$0xff] }
 0xc18   :  { %13190 = vmatprep.subr.bf16.mxu0 %v13189_v54 }
 0xc1b   :  { %13192 = vmatpush3.bf16.msra.mxu0 %v13189_v54  ;;  %v6638_v54 = vld [vmem:[#allocation10 + $0x350] sm:$0xff] }
 0xc1c   :  { %13194 = vmatprep.subr.bf16.mxu0 %v13193_v17  ;;  %v13329_v2 = vpack.c.bf16 %v6639_v43, %v6638_v54 }
 0xc1f   :  { %13196 = vmatpush3.bf16.msra.mxu0 %v13193_v17  ;;  %v6641_v17 = vld [vmem:[#allocation10 + $0x368] sm:$0xff] }
 0xc20   :  { %13198 = vmatprep.subr.bf16.mxu0 %v13197_v24  ;;  %v13333_v53 = vpack.c.bf16 %v6641_v17, %v6640_v31 }
 0xc23   :  { %13200 = vmatpush3.bf16.msra.mxu0 %v13197_v24  ;;  %v6643_v24 = vld [vmem:[#allocation10 + $0x378] sm:$0xff] }
 0xc24   :  { %13202 = vmatprep.subr.bf16.mxu0 %v13201_v9  ;;  %v13337_v12 = vpack.c.bf16 %v6643_v24, %v6642_v49  ;;  %v14233_v49 = vmov 0.0   ;;  %v8760_v24 = vld [vmem:[#allocation12] ss:$0 sm:$0xff] }
 0xc25   :  { %11875 = vmatprep.mubr.msk.f32.mxu1 %vm14232_vm1, %v14233_v49 }
 0xc27   :  { %13204 = vmatpush3.bf16.msra.mxu0 %v13201_v9  ;;  %v6825_v9 = vld [vmem:[#allocation10 + $0x388] sm:$0xff] }
 0xc28   :  { %13206 = vmatprep.subr.bf16.mxu0 %v13205_v22  ;;  %v13373_v46 = vpack.c.bf16 %v6825_v9, %v6824_v40 }
 0xc2b   :  { %13208 = vmatpush3.bf16.msra.mxu0 %v13205_v22  ;;  %v6827_v22 = vld [vmem:[#allocation10 + $0x398] sm:$0xff] }
 0xc2c   :  { %13210 = vmatprep.subr.bf16.mxu0 %v13209_v36 }
 0xc2f   :  { %13212 = vmatpush3.bf16.msra.mxu0 %v13209_v36  ;;  %v11521_v20 = vpop.f32.mrb[62].mxu1  ;;  %v13377_v36 = vpack.c.bf16 %v6827_v22, %v6826_v1 }
 0xc30   :  { %v6216_v27 = vpop.f32.mrb[63].mxu1  ;;  %13246 = vmatprep.subr.bf16.mxu0 %v13245_v19 }
 0xc31   :  { %11557 = vmatprep.mubr.f32.mxu0 %v6216_v27  ;;  %v6831_v27 = vld [vmem:[#allocation10 + $0x3b8] sm:$0xff] }
 0xc32   :  { %11558 = vmatmul.mubr.f32.vlgmr.msra.gmra.mrb[34].mxu0 %v11521_v20  ;;  %v6830_v20 = vld [vmem:[#allocation10 + $0x3b0] sm:$0xff] }
 0xc33   :  { %13248 = vmatpush3.bf16.msra.mxu0 %v13245_v19  ;;  %v11524_v45 = vpop.f32.mrb[64].mxu1 }
 0xc34   :  { %13250 = vmatprep.subr.bf16.mxu0 %v13249_v7  ;;  %v6226_v50 = vpop.f32.mrb[65].mxu1 }
 0xc35   :  { %11560 = vmatprep.mubr.f32.mxu0 %v6226_v50  ;;  %v6835_v50 = vld [vmem:[#allocation10 + $0x3d8] sm:$0xff] }
 0xc36   :  { %11561 = vmatmul.mubr.f32.gmra.mrb[36].mxu0 %v11524_v45  ;;  %v13389_v45 = vpack.c.bf16 %v6833_v39, %v6832_v38  ;;  %v7300_v38 = vld [vmem:[#allocation13 + $0x8] sm:$0xff] }
 0xc37   :  { %13252 = vmatpush3.bf16.msra.mxu0 %v13249_v7  ;;  %v13385_v7 = vpack.c.bf16 %v6831_v27, %v6830_v20  ;;  %v7212_v20 = vld [vmem:[#allocation15] sm:$0xff]  ;;  %v7213_v27 = vld [vmem:[#allocation15 + $0x8] sm:$0xff] }
 0xc38   :  { %13254 = vmatprep.subr.bf16.mxu0 %v13253_v14  ;;  %v13476_v39 = vpack.c.bf16 %v7213_v27, %v7212_v20  ;;  %v7389_v20 = vld [vmem:[#allocation15 + $0xf0] sm:$0xff]  ;;  %v7390_v27 = vld [vmem:[#allocation15 + $0xf8] sm:$0xff] }
 0xc3b   :  { %13256 = vmatpush3.bf16.msra.mxu0 %v13253_v14  ;;  %v6834_v14 = vld [vmem:[#allocation10 + $0x3d0] sm:$0xff] }
 0xc3c   :  { %13258 = vmatprep.subr.bf16.mxu0 %v13257_v21  ;;  %v13393_v55 = vpack.c.bf16 %v6835_v50, %v6834_v14  ;;  %v7215_v14 = vld [vmem:[#allocation15 + $0x18] sm:$0xff] }
 0xc3f   :  { %13260 = vmatpush3.bf16.msra.mxu0 %v13257_v21  ;;  %v6837_v21 = vld [vmem:[#allocation10 + $0x3e8] sm:$0xff] }
 0xc40   :  { %13262 = vmatprep.subr.bf16.mxu0 %v13261_v33  ;;  %v13397_v18 = vpack.c.bf16 %v6837_v21, %v6836_v26  ;;  %v7217_v26 = vld [vmem:[#allocation15 + $0x28] sm:$0xff] }
 0xc41   :  { %v7463_v21 = vld [vmem:[#allocation13 + $0x10] sm:$0xff] }
 0xc43   :  { %13264 = vmatpush3.bf16.msra.mxu0 %v13261_v33  ;;  %v6839_v33 = vld [vmem:[#allocation10 + $0x3f8] sm:$0xff] }
 0xc44   :  { %13266 = vmatprep.subr.bf16.mxu0 %v13265_v44  ;;  %v13401_v34 = vpack.c.bf16 %v6839_v33, %v6838_v41  ;;  %v7218_v41 = vld [vmem:[#allocation15 + $0x30] sm:$0xff]  ;;  %v7219_v33 = vld [vmem:[#allocation15 + $0x38] sm:$0xff] }
 0xc47   :  { %13268 = vmatpush3.bf16.msra.mxu0 %v13265_v44  ;;  %v7021_v44 = vld [vmem:[#allocation10 + $0x408] sm:$0xff] }
 0xc48   :  { %13270 = vmatprep.subr.bf16.mxu0 %v13269_v29  ;;  %v13437_v11 = vpack.c.bf16 %v7021_v44, %v7020_v28  ;;  %v7220_v28 = vld [vmem:[#allocation15 + $0x40] sm:$0xff]  ;;  %v7221_v44 = vld [vmem:[#allocation15 + $0x48] sm:$0xff] }
 0xc4b   :  { %13272 = vmatpush3.bf16.msra.mxu0 %v13269_v29  ;;  %v7023_v29 = vld [vmem:[#allocation10 + $0x418] sm:$0xff] }
 0xc4c   :  { %13274 = vmatprep.subr.bf16.mxu0 %v13273_v63 }
 0xc4f   :  { %13276 = vmatpush3.bf16.msra.mxu0 %v13273_v63  ;;  %v11597_v48 = vpop.f32.mrb[66].mxu1  ;;  %v13441_v63 = vpack.c.bf16 %v7023_v29, %v7022_v60  ;;  %v13488_v60 = vpack.c.bf16 %v7221_v44, %v7220_v28  ;;  %v7222_v29 = vld [vmem:[#allocation15 + $0x50] sm:$0xff] }
 0xc50   :  { %v6412_v5 = vpop.f32.mrb[67].mxu1  ;;  %13310 = vmatprep.subr.bf16.mxu0 %v13309_v35  ;;  %v7544_v44 = vld [vmem:[#allocation15 + $0x130] sm:$0xff] }
 0xc51   :  { %11633 = vmatprep.mubr.f32.mxu0 %v6412_v5  ;;  %v7027_v5 = vld [vmem:[#allocation10 + $0x438] sm:$0xff] }
 0xc52   :  { %11634 = vmatmul.mubr.f32.vlgmr.msra.gmra.mrb[34].mxu0 %v11597_v48  ;;  %v7026_v48 = vld [vmem:[#allocation10 + $0x430] sm:$0xff] }
 0xc53   :  { %13312 = vmatpush3.bf16.msra.mxu0 %v13309_v35  ;;  %v11600_v58 = vpop.f32.mrb[68].mxu1 }
 0xc54   :  { %13314 = vmatprep.subr.bf16.mxu0 %v13313_v3  ;;  %v6422_v4 = vpop.f32.mrb[69].mxu1 }
 0xc55   :  { %11636 = vmatprep.mubr.f32.mxu0 %v6422_v4  ;;  %v7031_v4 = vld [vmem:[#allocation10 + $0x458] sm:$0xff] }
 0xc56   :  { %11637 = vmatmul.mubr.f32.gmra.mrb[36].mxu0 %v11600_v58  ;;  %v13453_v58 = vpack.c.bf16 %v7029_v51, %v7028_v16  ;;  %v8278_v16 = vld [vmem:[#allocation13 + $0x38] sm:$0xff]  ;;  %v8441_v51 = vld [vmem:[#allocation13 + $0x40] sm:$0xff] }
 0xc57   :  { %13316 = vmatpush3.bf16.msra.mxu0 %v13313_v3  ;;  %v13449_v3 = vpack.c.bf16 %v7027_v5, %v7026_v48  ;;  %v7952_v5 = vld [vmem:[#allocation13 + $0x28] sm:$0xff] }
 0xc58   :  { %13318 = vmatprep.subr.bf16.mxu0 %v13317_v0 }
 0xc5b   :  { %13320 = vmatpush3.bf16.msra.mxu0 %v13317_v0  ;;  %v7030_v0 = vld [vmem:[#allocation10 + $0x450] sm:$0xff] }
 0xc5c   :  { %13322 = vmatprep.subr.bf16.mxu0 %v13321_v57  ;;  %v13457_v37 = vpack.c.bf16 %v7031_v4, %v7030_v0  ;;  %v7376_v0 = vld [vmem:[#allocation15 + $0x88] sm:$0xff] }
 0xc5f   :  { %13324 = vmatpush3.bf16.msra.mxu0 %v13321_v57  ;;  %v7033_v57 = vld [vmem:[#allocation10 + $0x468] sm:$0xff] }
 0xc60   :  { %13326 = vmatprep.subr.bf16.mxu0 %v13325_v62  ;;  %v13461_v47 = vpack.c.bf16 %v7033_v57, %v7032_v15  ;;  %v7378_v15 = vld [vmem:[#allocation15 + $0x98] sm:$0xff] }
 0xc63   :  { %13328 = vmatpush3.bf16.msra.mxu0 %v13325_v62  ;;  %v7035_v62 = vld [vmem:[#allocation10 + $0x478] sm:$0xff] }
 0xc64   :  { %13330 = vmatprep.subr.bf16.mxu0 %v13329_v2  ;;  %v13465_v54 = vpack.c.bf16 %v7035_v62, %v7034_v25 }
 0xc67   :  { %13332 = vmatpush3.bf16.msra.mxu0 %v13329_v2 }
 0xc68   :  { %13334 = vmatprep.subr.bf16.mxu0 %v13333_v53 }
 0xc6b   :  { %13336 = vmatpush3.bf16.msra.mxu0 %v13333_v53  ;;  %v14231_v53 = vmov 0.0|0.0  }
 0xc6c   :  { %13338 = vmatprep.subr.bf16.mxu0 %v13337_v12  ;;  %13469 = vmatprep.subr.bf16.mxu1 %v14231_v53 }
 0xc6f   :  { %13340 = vmatpush3.bf16.msra.mxu0 %v13337_v12  ;;  %v11673_v61 = vpop.f32.mrb[70].mxu1 }
 0xc70   :  { %v6608_v32 = vpop.f32.mrb[71].mxu1  ;;  %13374 = vmatprep.subr.bf16.mxu0 %v13373_v46 }
 0xc71   :  { %11709 = vmatprep.mubr.f32.mxu0 %v6608_v32 }
 0xc72   :  { %11710 = vmatmul.mubr.f32.vlgmr.msra.gmra.mrb[34].mxu0 %v11673_v61 }
 0xc73   :  { %13376 = vmatpush3.bf16.msra.mxu0 %v13373_v46  ;;  %v11676_v19 = vpop.f32.mrb[72].mxu1 }
 0xc74   :  { %13378 = vmatprep.subr.bf16.mxu0 %v13377_v36  ;;  %v6618_v42 = vpop.f32.mrb[73].mxu1 }
 0xc75   :  { %11712 = vmatprep.mubr.f32.mxu0 %v6618_v42 }
 0xc76   :  { %11713 = vmatmul.mubr.f32.gmra.mrb[36].mxu0 %v11676_v19 }
 0xc77   :  { %13380 = vmatpush3.bf16.msra.mxu0 %v13377_v36 }
 0xc78   :  { %13382 = vmatprep.subr.bf16.mxu0 %v13381_v59 }
 0xc7b   :  { %13384 = vmatpush3.bf16.msra.mxu0 %v13381_v59 }
 0xc7c   :  { %13386 = vmatprep.subr.bf16.mxu0 %v13385_v7 }
 0xc7f   :  { %13388 = vmatpush3.bf16.msra.mxu0 %v13385_v7  ;;  %v7137_v7 = vld [vmem:[#allocation13] sm:$0xff] }
 0xc80   :  { %13390 = vmatprep.subr.bf16.mxu0 %v13389_v45 }
 0xc83   :  { %13392 = vmatpush3.bf16.msra.mxu0 %v13389_v45  ;;  %v7214_v45 = vld [vmem:[#allocation15 + $0x10] sm:$0xff] }
 0xc84   :  { %13394 = vmatprep.subr.bf16.mxu0 %v13393_v55  ;;  %v13479_v50 = vpack.c.bf16 %v7215_v14, %v7214_v45  ;;  %v7538_v45 = vld [vmem:[#allocation15 + $0x100] sm:$0xff]  ;;  %v7539_v14 = vld [vmem:[#allocation15 + $0x108] sm:$0xff] }
 0xc87   :  { %13396 = vmatpush3.bf16.msra.mxu0 %v13393_v55  ;;  %v7216_v55 = vld [vmem:[#allocation15 + $0x20] sm:$0xff] }
 0xc88   :  { %13398 = vmatprep.subr.bf16.mxu0 %v13397_v18 }
 0xc8b   :  { %13400 = vmatpush3.bf16.msra.mxu0 %v13397_v18  ;;  %v13482_v18 = vpack.c.bf16 %v7217_v26, %v7216_v55  ;;  %v7540_v55 = vld [vmem:[#allocation15 + $0x110] sm:$0xff]  ;;  %v7541_v26 = vld [vmem:[#allocation15 + $0x118] sm:$0xff] }
 0xc8c   :  { %13402 = vmatprep.subr.bf16.mxu0 %v13401_v34 }
 0xc8f   :  { %13404 = vmatpush3.bf16.msra.mxu0 %v13401_v34  ;;  %v11749_v23 = vpop.f32.mrb[74].mxu1  ;;  %v13485_v34 = vpack.c.bf16 %v7219_v33, %v7218_v41  ;;  %v13539_v41 = vpack.c.bf16 %v7541_v26, %v7540_v55  ;;  %v7542_v33 = vld [vmem:[#allocation15 + $0x120] sm:$0xff]  ;;  %v7870_v55 = vld [vmem:[#allocation15 + $0x230] sm:$0xff]  ;;  %v7871_v26 = vld [vmem:[#allocation15 + $0x238] sm:$0xff] }
 0xc90   :  { %v6804_v30 = vpop.f32.mrb[75].mxu1  ;;  %13438 = vmatprep.subr.bf16.mxu0 %v13437_v11 }
 0xc91   :  { %11785 = vmatprep.mubr.f32.mxu0 %v6804_v30 }
 0xc92   :  { %11786 = vmatmul.mubr.f32.vlgmr.msra.gmra.mrb[34].mxu0 %v11749_v23  ;;  %v7223_v23 = vld [vmem:[#allocation15 + $0x58] sm:$0xff] }
 0xc93   :  { %13440 = vmatpush3.bf16.msra.mxu0 %v13437_v11  ;;  %v11752_v35 = vpop.f32.mrb[76].mxu1  ;;  %v7626_v11 = vld [vmem:[#allocation13 + $0x18] sm:$0xff]  ;;  %v13491_v30 = vpack.c.bf16 %v7223_v23, %v7222_v29  ;;  %v7546_v29 = vld [vmem:[#allocation15 + $0x140] sm:$0xff]  ;;  %v7547_v23 = vld [vmem:[#allocation15 + $0x148] sm:$0xff] }
 0xc94   :  { %13442 = vmatprep.subr.bf16.mxu0 %v13441_v63  ;;  %v6814_v10 = vpop.f32.mrb[77].mxu1 }
 0xc95   :  { %11788 = vmatprep.mubr.f32.mxu0 %v6814_v10  ;;  %v7227_v10 = vld [vmem:[#allocation15 + $0x78] sm:$0xff] }
 0xc96   :  { %11789 = vmatmul.mubr.f32.gmra.mrb[36].mxu0 %v11752_v35 }
 0xc97   :  { %13444 = vmatpush3.bf16.msra.mxu0 %v13441_v63  ;;  %v7224_v63 = vld [vmem:[#allocation15 + $0x60] sm:$0xff] }
 0xc98   :  { %13446 = vmatprep.subr.bf16.mxu0 %v13445_v56  ;;  %v13494_v35 = vpack.c.bf16 %v7225_v52, %v7224_v63  ;;  %v7548_v63 = vld [vmem:[#allocation15 + $0x150] sm:$0xff]  ;;  %v7549_v52 = vld [vmem:[#allocation15 + $0x158] sm:$0xff] }
 0xc9b   :  { %13448 = vmatpush3.bf16.msra.mxu0 %v13445_v56  ;;  %v7226_v56 = vld [vmem:[#allocation15 + $0x70] sm:$0xff] }
 0xc9c   :  { %13450 = vmatprep.subr.bf16.mxu0 %v13449_v3  ;;  %v13497_v48 = vpack.c.bf16 %v7227_v10, %v7226_v56  ;;  %v7551_v56 = vld [vmem:[#allocation15 + $0x168] sm:$0xff] }
 0xc9f   :  { %13452 = vmatpush3.bf16.msra.mxu0 %v13449_v3  ;;  %v8115_v3 = vld [vmem:[#allocation13 + $0x30] sm:$0xff] }
 0xca0   :  { %13454 = vmatprep.subr.bf16.mxu0 %v13453_v58 }
 0xca3   :  { %13456 = vmatpush3.bf16.msra.mxu0 %v13453_v58  ;;  %v7375_v58 = vld [vmem:[#allocation15 + $0x80] sm:$0xff] }
 0xca4   :  { %13458 = vmatprep.subr.bf16.mxu0 %v13457_v37  ;;  %v13506_v4 = vpack.c.bf16 %v7376_v0, %v7375_v58 }
 0xca7   :  { %13460 = vmatpush3.bf16.msra.mxu0 %v13457_v37  ;;  %v7377_v37 = vld [vmem:[#allocation15 + $0x90] sm:$0xff] }
 0xca8   :  { %13462 = vmatprep.subr.bf16.mxu0 %v13461_v47 }
 0xcab   :  { %13464 = vmatpush3.bf16.msra.mxu0 %v13461_v47 }
 0xcac   :  { %13466 = vmatprep.subr.bf16.mxu0 %v13465_v54 }
 0xcaf   :  { %v11825_v43 = vpop.f32.mrb[78].mxu1  ;;  %13468 = vmatpush3.bf16.msra.mxu0 %v13465_v54  ;;  %v13509_v54 = vpack.c.bf16 %v7378_v15, %v7377_v37  ;;  %v7704_v37 = vld [vmem:[#allocation15 + $0x198] sm:$0xff] }
 0xcb0   :  { %v7000_v2 = vpop.f32.mrb[79].mxu1  ;;  %13499 = vmatprep.subr.bf16.mxu0 %v14231_v53 }
 0xcb1   :  { %11861 = vmatprep.mubr.f32.mxu0 %v7000_v2  ;;  %v7380_v2 = vld [vmem:[#allocation15 + $0xa8] sm:$0xff] }
 0xcb2   :  { %11862 = vmatmul.mubr.f32.vlgmr.msra.gmra.mrb[34].mxu0 %v11825_v43  ;;  %v7379_v43 = vld [vmem:[#allocation15 + $0xa0] sm:$0xff] }
 0xcb3   :  { %v11828_v31 = vpop.f32.mrb[80].mxu1 }
 0xcb4   :  { %v7010_v17 = vpop.f32.mrb[81].mxu1 }
 0xcb5   :  { %11864 = vmatprep.mubr.f32.mxu0 %v7010_v17  ;;  %v7381_v17 = vld [vmem:[#allocation15 + $0xb0] sm:$0xff] }
 0xcb6   :  { %11865 = vmatmul.mubr.f32.gmra.mrb[36].mxu0 %v11828_v31  ;;  %v13512_v31 = vpack.c.bf16 %v7380_v2, %v7379_v43  ;;  %v7708_v43 = vld [vmem:[#allocation15 + $0x1b8] sm:$0xff] }
 0xcb7   :  { %11921 = vmatprep.mubr.msk.f32.mxu0 %vm14232_vm1, %v14233_v49 }
 0xd85   :  { %v11863_v12 = vpop.f32.mrb[34].mxu0 }
 0xd86   :  { %v13787_v40 = vadd.f32 %v11863_v12, %v8760_v24  ;;  %v7102_v9 = vpop.f32.mrb[35].mxu0 }
 0xd87   :  { %v13788_v46 = vadd.f32 %v8760_v24, %v7102_v9 }
 0xd88   :  { %v7126_v1 = vmax.f32 %v13787_v40, 0.0 }
 0xd89   :  { %v7125_v22 = vmax.f32 %v13788_v46, 0.0  ;;  %v11866_v61 = vpop.f32.mrb[36].mxu0  ;;  %v7383_v46 = vld [vmem:[#allocation15 + $0xc0] sm:$0xff] }
 0xd8a   :  { %v13789_v32 = vadd.f32 %v11866_v61, %v8760_v24  ;;  %v7112_v36 = vpop.f32.mrb[37].mxu0  ;;  %v7385_v61 = vld [vmem:[#allocation15 + $0xd0] sm:$0xff] }
 0xd8b   :  { %v15660_v8 = vpack.c.bf16 %v7126_v1, %v7125_v22  ;;  %v13790_v13 = vadd.f32 %v8760_v24, %v7112_v36  ;;  %v7382_v24 = vld [vmem:[#allocation15 + $0xb8] sm:$0xff]  ;;  %v7384_v1 = vld [vmem:[#allocation15 + $0xc8] sm:$0xff] }
 0xd8c   :  { %v7128_v19 = vmax.f32 %v13789_v32, 0.0  ;;  %v13515_v9 = vpack.c.bf16 %v7382_v24, %v7381_v17  ;;  %v13518_v22 = vpack.c.bf16 %v7384_v1, %v7383_v46  ;;  %v7386_v32 = vld [vmem:[#allocation15 + $0xd8] sm:$0xff]  ;;  %v7710_v17 = vld [vmem:[#allocation15 + $0x1c8] sm:$0xff]  ;;  %v7713_v46 = vld [vmem:[#allocation15 + $0x1e0] sm:$0xff] }
 0xd8d   :  { %v7127_v59 = vmax.f32 %v13790_v13, 0.0  ;;  %13471 = vmatpush3.bf16.msra.mxu1 %v15660_v8  ;;  %13501 = vmatpush3.bf16.msra.mxu0 %v15660_v8  ;;  %v13521_v13 = vpack.c.bf16 %v7386_v32, %v7385_v61  ;;  %v7714_v1 = vld [vmem:[#allocation15 + $0x1e8] sm:$0xff]  ;;  %v7715_v61 = vld [vmem:[#allocation15 + $0x1f0] sm:$0xff]  ;;  %v7716_v32 = vld [vmem:[#allocation15 + $0x1f8] sm:$0xff] }
 0xd8e   :  { %13472 = vmatprep.subr.bf16.mxu1 %v14231_v53  ;;  %13502 = vmatprep.subr.bf16.mxu0 %v14231_v53 }
 0xd8f   :  { %v15666_v42 = vpack.c.bf16 %v7128_v19, %v7127_v59  ;;  %v7387_v19 = vld [vmem:[#allocation15 + $0xe0] sm:$0xff]  ;;  %v7388_v59 = vld [vmem:[#allocation15 + $0xe8] sm:$0xff] }
 0xd91   :  { %13474 = vmatpush3.bf16.msra.mxu1 %v15666_v42  ;;  %13504 = vmatpush3.bf16.msra.mxu0 %v15666_v42 }
 0xd92   :  { %13529 = vmatprep.subr.bf16.mxu0 %v14231_v53  ;;  %13475 = vmatprep.subr.bf16.mxu1 %v14231_v53 }
 0xd94   :  { %11876 = vmatmul.mubr.msk.f32.vlgmr.msra.gmra.mrb[82].mxu1 %vm7138_vm2, %v7137_v7  ;;  %11922 = vmatmul.mubr.msk.f32.vlgmr.msra.gmra.mrb[38].mxu0 %vm7138_vm2, %v7300_v38 }
 0xd95   :  { %13531 = vmatpush3.bf16.msra.mxu0 %v15660_v8  ;;  %11967 = vmatprep.mubr.msk.f32.mxu0 %vm14232_vm1, %v14233_v49 }
 0xd96   :  { %13532 = vmatprep.subr.bf16.mxu0 %v14231_v53  ;;  %13477 = vmatpush3.bf16.msra.mxu1 %v13476_v39  ;;  %v13527_v39 = vpack.c.bf16 %v7390_v27, %v7389_v20  ;;  %v7866_v20 = vld [vmem:[#allocation15 + $0x210] sm:$0xff]  ;;  %v7867_v27 = vld [vmem:[#allocation15 + $0x218] sm:$0xff] }
 0xd97   :  { %13478 = vmatprep.subr.bf16.mxu1 %v14231_v53  ;;  %11910 = vmatprep.mubr.msk.f32.mxu1 %vm14232_vm1, %v14233_v49 }
 0xd99   :  { %13534 = vmatpush3.bf16.msra.mxu0 %v15666_v42 }
 0xd9a   :  { %13559 = vmatprep.subr.bf16.mxu0 %v14231_v53  ;;  %13480 = vmatpush3.bf16.msra.mxu1 %v13479_v50  ;;  %v13536_v50 = vpack.c.bf16 %v7539_v14, %v7538_v45  ;;  %v7868_v45 = vld [vmem:[#allocation15 + $0x220] sm:$0xff]  ;;  %v7869_v14 = vld [vmem:[#allocation15 + $0x228] sm:$0xff] }
 0xd9b   :  { %13481 = vmatprep.subr.bf16.mxu1 %v14231_v53 }
 0xd9c   :  { %11968 = vmatmul.mubr.msk.f32.vlgmr.msra.gmra.mrb[40].mxu0 %vm7138_vm2, %v7463_v21 }
 0xd9d   :  { %13561 = vmatpush3.bf16.msra.mxu0 %v15660_v8  ;;  %12013 = vmatprep.mubr.msk.f32.mxu0 %vm14232_vm1, %v14233_v49 }
 0xd9e   :  { %13562 = vmatprep.subr.bf16.mxu0 %v14231_v53  ;;  %13483 = vmatpush3.bf16.msra.mxu1 %v13482_v18 }
 0xd9f   :  { %13484 = vmatprep.subr.bf16.mxu1 %v14231_v53 }
 0xda1   :  { %13564 = vmatpush3.bf16.msra.mxu0 %v15666_v42 }
 0xda2   :  { %13589 = vmatprep.subr.bf16.mxu0 %v14231_v53  ;;  %13486 = vmatpush3.bf16.msra.mxu1 %v13485_v34  ;;  %v7543_v34 = vld [vmem:[#allocation15 + $0x128] sm:$0xff] }
 0xda3   :  { %13487 = vmatprep.subr.bf16.mxu1 %v14231_v53  ;;  %v13542_v28 = vpack.c.bf16 %v7543_v34, %v7542_v33  ;;  %v7874_v34 = vld [vmem:[#allocation15 + $0x250] sm:$0xff] }
 0xda4   :  { %12014 = vmatmul.mubr.msk.f32.vlgmr.msra.gmra.mrb[42].mxu0 %vm7138_vm2, %v7626_v11  ;;  %v7545_v11 = vld [vmem:[#allocation15 + $0x138] sm:$0xff] }
 0xda5   :  { %13591 = vmatpush3.bf16.msra.mxu0 %v15660_v8  ;;  %12059 = vmatprep.mubr.msk.f32.mxu0 %vm14232_vm1, %v14233_v49 }
 0xda6   :  { %13592 = vmatprep.subr.bf16.mxu0 %v14231_v53  ;;  %13489 = vmatpush3.bf16.msra.mxu1 %v13488_v60  ;;  %v13545_v60 = vpack.c.bf16 %v7545_v11, %v7544_v44  ;;  %v7876_v11 = vld [vmem:[#allocation15 + $0x260] sm:$0xff] }
 0xda7   :  { %13490 = vmatprep.subr.bf16.mxu1 %v14231_v53 }
 0xda9   :  { %13594 = vmatpush3.bf16.msra.mxu0 %v15666_v42 }
 0xdaa   :  { %13619 = vmatprep.subr.bf16.mxu0 %v14231_v53  ;;  %13492 = vmatpush3.bf16.msra.mxu1 %v13491_v30  ;;  %v13548_v30 = vpack.c.bf16 %v7547_v23, %v7546_v29  ;;  %v7878_v23 = vld [vmem:[#allocation15 + $0x270] sm:$0xff] }
 0xdab   :  { %13493 = vmatprep.subr.bf16.mxu1 %v14231_v53 }
 0xdac   :  { %12060 = vmatmul.mubr.msk.f32.vlgmr.msra.gmra.mrb[44].mxu0 %vm7138_vm2, %v7789_v6  ;;  %v13551_v6 = vpack.c.bf16 %v7549_v52, %v7548_v63  ;;  %v8027_v52 = vld [vmem:[#allocation15 + $0x280] sm:$0xff] }
 0xdad   :  { %13621 = vmatpush3.bf16.msra.mxu0 %v15660_v8  ;;  %12105 = vmatprep.mubr.msk.f32.mxu0 %vm14232_vm1, %v14233_v49 }
 0xdae   :  { %13622 = vmatprep.subr.bf16.mxu0 %v14231_v53  ;;  %13495 = vmatpush3.bf16.msra.mxu1 %v13494_v35  ;;  %v7550_v35 = vld [vmem:[#allocation15 + $0x160] sm:$0xff] }
 0xdaf   :  { %13496 = vmatprep.subr.bf16.mxu1 %v14231_v53  ;;  %v13554_v10 = vpack.c.bf16 %v7551_v56, %v7550_v35  ;;  %v8029_v56 = vld [vmem:[#allocation15 + $0x290] sm:$0xff] }
 0xdb1   :  { %13624 = vmatpush3.bf16.msra.mxu0 %v15666_v42 }
 0xdb2   :  { %13649 = vmatprep.subr.bf16.mxu0 %v14231_v53  ;;  %13498 = vmatpush3.bf16.msra.mxu1 %v13497_v48  ;;  %v7552_v48 = vld [vmem:[#allocation15 + $0x170] sm:$0xff] }
 0xdb3   :  { %13505 = vmatprep.subr.bf16.mxu1 %v14231_v53 }
 0xdb4   :  { %12106 = vmatmul.mubr.msk.f32.vlgmr.msra.gmra.mrb[46].mxu0 %vm7138_vm2, %v7952_v5  ;;  %v7553_v5 = vld [vmem:[#allocation15 + $0x178] sm:$0xff] }
 0xdb5   :  { %13651 = vmatpush3.bf16.msra.mxu0 %v15660_v8  ;;  %12151 = vmatprep.mubr.msk.f32.mxu0 %vm14232_vm1, %v14233_v49 }
 0xdb6   :  { %13652 = vmatprep.subr.bf16.mxu0 %v14231_v53 }
 0xdb9   :  { %13654 = vmatpush3.bf16.msra.mxu0 %v15666_v42 }
 0xdba   :  { %13679 = vmatprep.subr.bf16.mxu0 %v14231_v53 }
 0xdbc   :  { %12152 = vmatmul.mubr.msk.f32.vlgmr.msra.gmra.mrb[48].mxu0 %vm7138_vm2, %v8115_v3  ;;  %v13557_v3 = vpack.c.bf16 %v7553_v5, %v7552_v48 }
 0xdbd   :  { %13681 = vmatpush3.bf16.msra.mxu0 %v15660_v8  ;;  %12197 = vmatprep.mubr.msk.f32.mxu0 %vm14232_vm1, %v14233_v49 }
 0xdbe   :  { %13682 = vmatprep.subr.bf16.mxu0 %v14231_v53 }
 0xdc1   :  { %13684 = vmatpush3.bf16.msra.mxu0 %v15666_v42 }
 0xdc2   :  { %13709 = vmatprep.subr.bf16.mxu0 %v14231_v53 }
 0xdc4   :  { %12198 = vmatmul.mubr.msk.f32.vlgmr.msra.gmra.mrb[50].mxu0 %vm7138_vm2, %v8278_v16  ;;  %v7701_v16 = vld [vmem:[#allocation15 + $0x180] sm:$0xff] }
 0xdc5   :  { %13711 = vmatpush3.bf16.msra.mxu0 %v15660_v8  ;;  %12243 = vmatprep.mubr.msk.f32.mxu0 %vm14232_vm1, %v14233_v49 }
 0xdc6   :  { %13712 = vmatprep.subr.bf16.mxu0 %v14231_v53 }
 0xdc9   :  { %13714 = vmatpush3.bf16.msra.mxu0 %v15666_v42  ;;  %v13524_v42 = vpack.c.bf16 %v7388_v59, %v7387_v19  ;;  %v7865_v19 = vld [vmem:[#allocation15 + $0x208] sm:$0xff] }
 0xdcc   :  { %12244 = vmatmul.mubr.msk.f32.vlgmr.msra.gmra.mrb[52].mxu0 %vm7138_vm2, %v8441_v51  ;;  %v7702_v51 = vld [vmem:[#allocation15 + $0x188] sm:$0xff] }
 0xdcd   :  { %v13566_v58 = vpack.c.bf16 %v7702_v51, %v7701_v16  ;;  %v8031_v16 = vld [vmem:[#allocation15 + $0x2a0] sm:$0xff]  ;;  %v8032_v51 = vld [vmem:[#allocation15 + $0x2a8] sm:$0xff] }
 0xe67   :  { %v7208_v57 = vpop.f32.mrb[82].mxu1  ;;  %v7370_v47 = vpop.f32.mrb[38].mxu0 }
 0xe68   :  { %11911 = vmatmul.mubr.f32.vlgmr.msra.gmra.mrb[84].mxu1 %v7208_v57  ;;  %v11877_v25 = vpop.f32.mrb[83].mxu1  ;;  %v11923_v62 = vpop.f32.mrb[39].mxu0 }
 0xe69   :  { %13507 = vmatpush3.bf16.msra.mxu1 %v13506_v4  ;;  %11956 = vmatprep.mubr.msk.f32.mxu1 %vm14232_vm1, %v14233_v49  ;;  %v7703_v4 = vld [vmem:[#allocation15 + $0x190] sm:$0xff]  ;;  %v7706_v25 = vld [vmem:[#allocation15 + $0x1a8] sm:$0xff] }
 0xe6a   :  { %13508 = vmatprep.subr.bf16.mxu1 %v14231_v53  ;;  %v13569_v57 = vpack.c.bf16 %v7704_v37, %v7703_v4  ;;  %v8033_v4 = vld [vmem:[#allocation15 + $0x2b0] sm:$0xff]  ;;  %v8034_v37 = vld [vmem:[#allocation15 + $0x2b8] sm:$0xff] }
 0xe6d   :  { %13510 = vmatpush3.bf16.msra.mxu1 %v13509_v54  ;;  %v7707_v54 = vld [vmem:[#allocation15 + $0x1b0] sm:$0xff] }
 0xe6e   :  { %13511 = vmatprep.subr.bf16.mxu1 %v14231_v53  ;;  %v13575_v2 = vpack.c.bf16 %v7708_v43, %v7707_v54  ;;  %v8039_v43 = vld [vmem:[#allocation15 + $0x2e0] sm:$0xff] }
 0xe6f   :  { %v15736_v12 = vpop.f32.mrb[40].mxu0 }
 0xe70   :  { %v11969_v40 = vpop.f32.mrb[41].mxu0 }
 0xe71   :  { %13513 = vmatpush3.bf16.msra.mxu1 %v13512_v31  ;;  %v7709_v31 = vld [vmem:[#allocation15 + $0x1c0] sm:$0xff]  ;;  %v7712_v40 = vld [vmem:[#allocation15 + $0x1d8] sm:$0xff] }
 0xe72   :  { %13514 = vmatprep.subr.bf16.mxu1 %v14231_v53  ;;  %v13578_v24 = vpack.c.bf16 %v7710_v17, %v7709_v31  ;;  %v8041_v17 = vld [vmem:[#allocation15 + $0x2f0] sm:$0xff] }
 0xe75   :  { %13516 = vmatpush3.bf16.msra.mxu1 %v13515_v9 }
 0xe76   :  { %13517 = vmatprep.subr.bf16.mxu1 %v14231_v53 }
 0xe77   :  { %v15740_v36 = vpop.f32.mrb[42].mxu0 }
 0xe78   :  { %v12015_v8 = vpop.f32.mrb[43].mxu0 }
 0xe79   :  { %13519 = vmatpush3.bf16.msra.mxu1 %v13518_v22  ;;  %v13584_v22 = vpack.c.bf16 %v7714_v1, %v7713_v46  ;;  %v13587_v8 = vpack.c.bf16 %v7716_v32, %v7715_v61  ;;  %v8192_v1 = vld [vmem:[#allocation15 + $0x310] sm:$0xff]  ;;  %v8194_v32 = vld [vmem:[#allocation15 + $0x320] sm:$0xff] }
 0xe7a   :  { %13520 = vmatprep.subr.bf16.mxu1 %v14231_v53 }
 0xe7d   :  { %13522 = vmatpush3.bf16.msra.mxu1 %v13521_v13  ;;  %v7864_v13 = vld [vmem:[#allocation15 + $0x200] sm:$0xff] }
 0xe7e   :  { %13523 = vmatprep.subr.bf16.mxu1 %v14231_v53  ;;  %v13596_v59 = vpack.c.bf16 %v7865_v19, %v7864_v13  ;;  %v8196_v19 = vld [vmem:[#allocation15 + $0x330] sm:$0xff] }
 0xe7f   :  { %v15744_v7 = vpop.f32.mrb[44].mxu0 }
 0xe80   :  { %v12061_v38 = vpop.f32.mrb[45].mxu0 }
 0xe81   :  { %13525 = vmatpush3.bf16.msra.mxu1 %v13524_v42 }
 0xe82   :  { %13526 = vmatprep.subr.bf16.mxu1 %v14231_v53 }
 0xe85   :  { %13528 = vmatpush3.bf16.msra.mxu1 %v13527_v39  ;;  %v13599_v39 = vpack.c.bf16 %v7867_v27, %v7866_v20  ;;  %v8199_v27 = vld [vmem:[#allocation15 + $0x348] sm:$0xff] }
 0xe86   :  { %13535 = vmatprep.subr.bf16.mxu1 %v14231_v53 }
 0xe87   :  { %v15748_v21 = vpop.f32.mrb[46].mxu0 }
 0xe88   :  { %11957 = vmatmul.mubr.f32.vlgmr.msra.gmra.mrb[84].mxu1 %v7370_v47  ;;  %v12107_v18 = vpop.f32.mrb[47].mxu0  ;;  %v7705_v47 = vld [vmem:[#allocation15 + $0x1a0] sm:$0xff] }
 0xe89   :  { %13537 = vmatpush3.bf16.msra.mxu1 %v13536_v50  ;;  %12002 = vmatprep.mubr.msk.f32.mxu1 %vm14232_vm1, %v14233_v49  ;;  %v13572_v62 = vpack.c.bf16 %v7706_v25, %v7705_v47  ;;  %v13602_v50 = vpack.c.bf16 %v7869_v14, %v7868_v45  ;;  %v13605_v18 = vpack.c.bf16 %v7871_v26, %v7870_v55  ;;  %v8037_v25 = vld [vmem:[#allocation15 + $0x2d0] sm:$0xff]  ;;  %v8201_v45 = vld [vmem:[#allocation15 + $0x358] sm:$0xff]  ;;  %v8203_v55 = vld [vmem:[#allocation15 + $0x368] sm:$0xff] }
 0xe8a   :  { %13538 = vmatprep.subr.bf16.mxu1 %v14231_v53 }
 0xe8d   :  { %13540 = vmatpush3.bf16.msra.mxu1 %v13539_v41  ;;  %v7873_v41 = vld [vmem:[#allocation15 + $0x248] sm:$0xff] }
 0xe8e   :  { %13541 = vmatprep.subr.bf16.mxu1 %v14231_v53 }
 0xe8f   :  { %v15759_v0 = vpop.f32.mrb[48].mxu0 }
 0xe90   :  { %v12153_v15 = vpop.f32.mrb[49].mxu0 }
 0xe91   :  { %13543 = vmatpush3.bf16.msra.mxu1 %v13542_v28  ;;  %v7875_v28 = vld [vmem:[#allocation15 + $0x258] sm:$0xff]  ;;  %v13635_v15 = vpack.c.bf16 %v8034_v37, %v8033_v4  ;;  %v8367_v4 = vld [vmem:[#allocation15 + $0x3f0] sm:$0xff] }
 0xe92   :  { %13544 = vmatprep.subr.bf16.mxu1 %v14231_v53  ;;  %v13611_v44 = vpack.c.bf16 %v7875_v28, %v7874_v34  ;;  %v8354_v34 = vld [vmem:[#allocation15 + $0x388] sm:$0xff]  ;;  %v8368_v37 = vld [vmem:[#allocation15 + $0x3f8] sm:$0xff] }
 0xe95   :  { %13546 = vmatpush3.bf16.msra.mxu1 %v13545_v60  ;;  %v7877_v60 = vld [vmem:[#allocation15 + $0x268] sm:$0xff] }
 0xe96   :  { %13547 = vmatprep.subr.bf16.mxu1 %v14231_v53  ;;  %v13614_v29 = vpack.c.bf16 %v7877_v60, %v7876_v11  ;;  %v8356_v11 = vld [vmem:[#allocation15 + $0x398] sm:$0xff] }
 0xe97   :  { %v15772_v42 = vpop.f32.mrb[50].mxu0 }
 0xe98   :  { %v12199_v38 = vpop.f32.mrb[51].mxu0 }
 0xe99   :  { %13549 = vmatpush3.bf16.msra.mxu1 %v13548_v30  ;;  %v7879_v30 = vld [vmem:[#allocation15 + $0x278] sm:$0xff] }
 0xe9a   :  { %13550 = vmatprep.subr.bf16.mxu1 %v14231_v53  ;;  %v13617_v63 = vpack.c.bf16 %v7879_v30, %v7878_v23  ;;  %v8358_v23 = vld [vmem:[#allocation15 + $0x3a8] sm:$0xff] }
 0xe9d   :  { %13552 = vmatpush3.bf16.msra.mxu1 %v13551_v6  ;;  %v8028_v6 = vld [vmem:[#allocation15 + $0x288] sm:$0xff] }
 0xe9e   :  { %13553 = vmatprep.subr.bf16.mxu1 %v14231_v53  ;;  %v13626_v35 = vpack.c.bf16 %v8028_v6, %v8027_v52  ;;  %v8360_v52 = vld [vmem:[#allocation15 + $0x3b8] sm:$0xff] }
 0xe9f   :  { %v15786_v48 = vpop.f32.mrb[52].mxu0 }
 0xea0   :  { %v12245_v5 = vpop.f32.mrb[53].mxu0 }
 0xea1   :  { %13555 = vmatpush3.bf16.msra.mxu1 %v13554_v10  ;;  %v8030_v10 = vld [vmem:[#allocation15 + $0x298] sm:$0xff] }
 0xea2   :  { %13556 = vmatprep.subr.bf16.mxu1 %v14231_v53  ;;  %v8364_v5 = vld [vmem:[#allocation15 + $0x3d8] sm:$0xff] }
 0xea5   :  { %13558 = vmatpush3.bf16.msra.mxu1 %v13557_v3  ;;  %v13629_v3 = vpack.c.bf16 %v8030_v10, %v8029_v56  ;;  %v8363_v10 = vld [vmem:[#allocation15 + $0x3d0] sm:$0xff] }
 0xea6   :  { %13565 = vmatprep.subr.bf16.mxu1 %v14231_v53 }
 0xea8   :  { %12003 = vmatmul.mubr.f32.vlgmr.msra.gmra.mrb[84].mxu1 %v15736_v12  ;;  %v7711_v12 = vld [vmem:[#allocation15 + $0x1d0] sm:$0xff] }
 0xea9   :  { %13567 = vmatpush3.bf16.msra.mxu1 %v13566_v58  ;;  %12048 = vmatprep.mubr.msk.f32.mxu1 %vm14232_vm1, %v14233_v49  ;;  %v13581_v9 = vpack.c.bf16 %v7712_v40, %v7711_v12  ;;  %v13632_v58 = vpack.c.bf16 %v8032_v51, %v8031_v16  ;;  %v8190_v40 = vld [vmem:[#allocation15 + $0x300] sm:$0xff]  ;;  %v8366_v51 = vld [vmem:[#allocation15 + $0x3e8] sm:$0xff] }
 0xeaa   :  { %13568 = vmatprep.subr.bf16.mxu1 %v14231_v53  ;;  %v8365_v16 = vld [vmem:[#allocation15 + $0x3e0] sm:$0xff] }
 0xead   :  { %13570 = vmatpush3.bf16.msra.mxu1 %v13569_v57  ;;  %v8036_v57 = vld [vmem:[#allocation15 + $0x2c8] sm:$0xff] }
 0xeae   :  { %13571 = vmatprep.subr.bf16.mxu1 %v14231_v53 }
 0xeb1   :  { %13573 = vmatpush3.bf16.msra.mxu1 %v13572_v62  ;;  %v8038_v62 = vld [vmem:[#allocation15 + $0x2d8] sm:$0xff] }
 0xeb2   :  { %13574 = vmatprep.subr.bf16.mxu1 %v14231_v53  ;;  %v13641_v54 = vpack.c.bf16 %v8038_v62, %v8037_v25  ;;  %v8518_v25 = vld [vmem:[#allocation15 + $0x410] sm:$0xff]  ;;  %v8519_v62 = vld [vmem:[#allocation15 + $0x418] sm:$0xff] }
 0xeb5   :  { %13576 = vmatpush3.bf16.msra.mxu1 %v13575_v2  ;;  %v8040_v2 = vld [vmem:[#allocation15 + $0x2e8] sm:$0xff] }
 0xeb6   :  { %13577 = vmatprep.subr.bf16.mxu1 %v14231_v53  ;;  %v13644_v31 = vpack.c.bf16 %v8040_v2, %v8039_v43  ;;  %v8520_v43 = vld [vmem:[#allocation15 + $0x420] sm:$0xff]  ;;  %v8521_v2 = vld [vmem:[#allocation15 + $0x428] sm:$0xff] }
 0xeb9   :  { %13579 = vmatpush3.bf16.msra.mxu1 %v13578_v24  ;;  %v8042_v24 = vld [vmem:[#allocation15 + $0x2f8] sm:$0xff] }
 0xeba   :  { %13580 = vmatprep.subr.bf16.mxu1 %v14231_v53  ;;  %v13647_v12 = vpack.c.bf16 %v8042_v24, %v8041_v17  ;;  %v8522_v17 = vld [vmem:[#allocation15 + $0x430] sm:$0xff]  ;;  %v8523_v24 = vld [vmem:[#allocation15 + $0x438] sm:$0xff] }
 0xebd   :  { %13582 = vmatpush3.bf16.msra.mxu1 %v13581_v9  ;;  %v8191_v9 = vld [vmem:[#allocation15 + $0x308] sm:$0xff] }
 0xebe   :  { %13583 = vmatprep.subr.bf16.mxu1 %v14231_v53  ;;  %v13656_v46 = vpack.c.bf16 %v8191_v9, %v8190_v40  ;;  %v8525_v40 = vld [vmem:[#allocation15 + $0x448] sm:$0xff] }
 0xec1   :  { %13585 = vmatpush3.bf16.msra.mxu1 %v13584_v22  ;;  %v8193_v22 = vld [vmem:[#allocation15 + $0x318] sm:$0xff] }
 0xec2   :  { %13586 = vmatprep.subr.bf16.mxu1 %v14231_v53  ;;  %v13659_v61 = vpack.c.bf16 %v8193_v22, %v8192_v1  ;;  %v8528_v22 = vld [vmem:[#allocation15 + $0x460] sm:$0xff] }
 0xec5   :  { %13588 = vmatpush3.bf16.msra.mxu1 %v13587_v8  ;;  %v8195_v8 = vld [vmem:[#allocation15 + $0x328] sm:$0xff] }
 0xec6   :  { %13595 = vmatprep.subr.bf16.mxu1 %v14231_v53  ;;  %v13662_v13 = vpack.c.bf16 %v8195_v8, %v8194_v32  ;;  %v8530_v8 = vld [vmem:[#allocation15 + $0x470] sm:$0xff] }
 0xec8   :  { %12049 = vmatmul.mubr.f32.vlgmr.msra.gmra.mrb[84].mxu1 %v15740_v36  ;;  %v7872_v36 = vld [vmem:[#allocation15 + $0x240] sm:$0xff] }
 0xec9   :  { %13597 = vmatpush3.bf16.msra.mxu1 %v13596_v59  ;;  %12094 = vmatprep.mubr.msk.f32.mxu1 %vm14232_vm1, %v14233_v49  ;;  %v13608_v33 = vpack.c.bf16 %v7873_v41, %v7872_v36  ;;  %v8197_v59 = vld [vmem:[#allocation15 + $0x338] sm:$0xff] }
 0xeca   :  { %13598 = vmatprep.subr.bf16.mxu1 %v14231_v53  ;;  %v13665_v20 = vpack.c.bf16 %v8197_v59, %v8196_v19  ;;  %v8205_v36 = vld [vmem:[#allocation15 + $0x378] sm:$0xff]  ;;  %v8761_v59 = vld [vmem:[#allocation16] ss:$0 sm:$0xff] }
 0xecd   :  { %13600 = vmatpush3.bf16.msra.mxu1 %v13599_v39  ;;  %v8200_v39 = vld [vmem:[#allocation15 + $0x350] sm:$0xff] }
 0xece   :  { %13601 = vmatprep.subr.bf16.mxu1 %v14231_v53  ;;  %v13671_v14 = vpack.c.bf16 %v8201_v45, %v8200_v39 }
 0xed1   :  { %13603 = vmatpush3.bf16.msra.mxu1 %v13602_v50  ;;  %v8202_v50 = vld [vmem:[#allocation15 + $0x360] sm:$0xff] }
 0xed2   :  { %13604 = vmatprep.subr.bf16.mxu1 %v14231_v53  ;;  %v13674_v26 = vpack.c.bf16 %v8203_v55, %v8202_v50 }
 0xed5   :  { %13606 = vmatpush3.bf16.msra.mxu1 %v13605_v18  ;;  %v8204_v18 = vld [vmem:[#allocation15 + $0x370] sm:$0xff] }
 0xed6   :  { %13607 = vmatprep.subr.bf16.mxu1 %v14231_v53  ;;  %v13677_v41 = vpack.c.bf16 %v8205_v36, %v8204_v18 }
 0xed9   :  { %13609 = vmatpush3.bf16.msra.mxu1 %v13608_v33  ;;  %v8353_v33 = vld [vmem:[#allocation15 + $0x380] sm:$0xff] }
 0xeda   :  { %13610 = vmatprep.subr.bf16.mxu1 %v14231_v53  ;;  %v13686_v28 = vpack.c.bf16 %v8354_v34, %v8353_v33 }
 0xedd   :  { %13612 = vmatpush3.bf16.msra.mxu1 %v13611_v44  ;;  %v8355_v44 = vld [vmem:[#allocation15 + $0x390] sm:$0xff] }
 0xede   :  { %13613 = vmatprep.subr.bf16.mxu1 %v14231_v53  ;;  %v13689_v60 = vpack.c.bf16 %v8356_v11, %v8355_v44 }
 0xee1   :  { %13615 = vmatpush3.bf16.msra.mxu1 %v13614_v29  ;;  %v8357_v29 = vld [vmem:[#allocation15 + $0x3a0] sm:$0xff] }
 0xee2   :  { %13616 = vmatprep.subr.bf16.mxu1 %v14231_v53  ;;  %v13692_v30 = vpack.c.bf16 %v8358_v23, %v8357_v29 }
 0xee5   :  { %13618 = vmatpush3.bf16.msra.mxu1 %v13617_v63  ;;  %v8359_v63 = vld [vmem:[#allocation15 + $0x3b0] sm:$0xff] }
 0xee6   :  { %13625 = vmatprep.subr.bf16.mxu1 %v14231_v53  ;;  %v13695_v6 = vpack.c.bf16 %v8360_v52, %v8359_v63 }
 0xee8   :  { %12095 = vmatmul.mubr.f32.vlgmr.msra.gmra.mrb[84].mxu1 %v15744_v7  ;;  %v8035_v7 = vld [vmem:[#allocation15 + $0x2c0] sm:$0xff] }
 0xee9   :  { %13627 = vmatpush3.bf16.msra.mxu1 %v13626_v35  ;;  %12140 = vmatprep.mubr.msk.f32.mxu1 %vm14232_vm1, %v14233_v49  ;;  %v13638_v47 = vpack.c.bf16 %v8036_v57, %v8035_v7  ;;  %v8362_v35 = vld [vmem:[#allocation15 + $0x3c8] sm:$0xff]  ;;  %v8516_v7 = vld [vmem:[#allocation15 + $0x400] sm:$0xff] }
 0xeea   :  { %13628 = vmatprep.subr.bf16.mxu1 %v14231_v53  ;;  %v8517_v57 = vld [vmem:[#allocation15 + $0x408] sm:$0xff] }
 0xeed   :  { %13630 = vmatpush3.bf16.msra.mxu1 %v13629_v3  ;;  %v13701_v3 = vpack.c.bf16 %v8364_v5, %v8363_v10 }
 0xeee   :  { %13631 = vmatprep.subr.bf16.mxu1 %v14231_v53 }
 0xef1   :  { %13633 = vmatpush3.bf16.msra.mxu1 %v13632_v58  ;;  %v13704_v58 = vpack.c.bf16 %v8366_v51, %v8365_v16 }
 0xef2   :  { %13634 = vmatprep.subr.bf16.mxu1 %v14231_v53 }
 0xef5   :  { %13636 = vmatpush3.bf16.msra.mxu1 %v13635_v15  ;;  %v13707_v15 = vpack.c.bf16 %v8368_v37, %v8367_v4 }
 0xef6   :  { %13637 = vmatprep.subr.bf16.mxu1 %v14231_v53 }
 0xef9   :  { %13639 = vmatpush3.bf16.msra.mxu1 %v13638_v47  ;;  %v13716_v47 = vpack.c.bf16 %v8517_v57, %v8516_v7 }
 0xefa   :  { %13640 = vmatprep.subr.bf16.mxu1 %v14231_v53 }
 0xefd   :  { %13642 = vmatpush3.bf16.msra.mxu1 %v13641_v54  ;;  %v13719_v54 = vpack.c.bf16 %v8519_v62, %v8518_v25 }
 0xefe   :  { %13643 = vmatprep.subr.bf16.mxu1 %v14231_v53 }
 0xf01   :  { %13645 = vmatpush3.bf16.msra.mxu1 %v13644_v31  ;;  %v13722_v31 = vpack.c.bf16 %v8521_v2, %v8520_v43 }
 0xf02   :  { %13646 = vmatprep.subr.bf16.mxu1 %v14231_v53 }
 0xf05   :  { %13648 = vmatpush3.bf16.msra.mxu1 %v13647_v12  ;;  %v13725_v12 = vpack.c.bf16 %v8523_v24, %v8522_v17 }
 0xf06   :  { %13655 = vmatprep.subr.bf16.mxu1 %v14231_v53 }
 0xf08   :  { %12141 = vmatmul.mubr.f32.vlgmr.msra.gmra.mrb[84].mxu1 %v15748_v21  ;;  %v8198_v21 = vld [vmem:[#allocation15 + $0x340] sm:$0xff] }
 0xf09   :  { %13657 = vmatpush3.bf16.msra.mxu1 %v13656_v46  ;;  %12186 = vmatprep.mubr.msk.f32.mxu1 %vm14232_vm1, %v14233_v49  ;;  %v13668_v38 = vpack.c.bf16 %v8199_v27, %v8198_v21  ;;  %v8527_v46 = vld [vmem:[#allocation15 + $0x458] sm:$0xff] }
 0xf0a   :  { %13658 = vmatprep.subr.bf16.mxu1 %v14231_v53 }
 0xf0d   :  { %13660 = vmatpush3.bf16.msra.mxu1 %v13659_v61  ;;  %v8529_v61 = vld [vmem:[#allocation15 + $0x468] sm:$0xff] }
 0xf0e   :  { %13661 = vmatprep.subr.bf16.mxu1 %v14231_v53  ;;  %v13734_v32 = vpack.c.bf16 %v8529_v61, %v8528_v22 }
 0xf11   :  { %13663 = vmatpush3.bf16.msra.mxu1 %v13662_v13  ;;  %v8531_v13 = vld [vmem:[#allocation15 + $0x478] sm:$0xff] }
 0xf12   :  { %13664 = vmatprep.subr.bf16.mxu1 %v14231_v53  ;;  %v13737_v19 = vpack.c.bf16 %v8531_v13, %v8530_v8 }
 0xf15   :  { %13666 = vmatpush3.bf16.msra.mxu1 %v13665_v20 }
 0xf16   :  { %13667 = vmatprep.subr.bf16.mxu1 %v14231_v53 }
 0xf19   :  { %13669 = vmatpush3.bf16.msra.mxu1 %v13668_v38 }
 0xf1a   :  { %13670 = vmatprep.subr.bf16.mxu1 %v14231_v53 }
 0xf1d   :  { %13672 = vmatpush3.bf16.msra.mxu1 %v13671_v14 }
 0xf1e   :  { %13673 = vmatprep.subr.bf16.mxu1 %v14231_v53 }
 0xf21   :  { %13675 = vmatpush3.bf16.msra.mxu1 %v13674_v26 }
 0xf22   :  { %13676 = vmatprep.subr.bf16.mxu1 %v14231_v53 }
 0xf25   :  { %13678 = vmatpush3.bf16.msra.mxu1 %v13677_v41 }
 0xf26   :  { %13685 = vmatprep.subr.bf16.mxu1 %v14231_v53 }
 0xf28   :  { %12187 = vmatmul.mubr.f32.vlgmr.msra.gmra.mrb[84].mxu1 %v15759_v0  ;;  %v8361_v0 = vld [vmem:[#allocation15 + $0x3c0] sm:$0xff] }
 0xf29   :  { %13687 = vmatpush3.bf16.msra.mxu1 %v13686_v28  ;;  %12232 = vmatprep.mubr.msk.f32.mxu1 %vm14232_vm1, %v14233_v49  ;;  %v13698_v56 = vpack.c.bf16 %v8362_v35, %v8361_v0 }
 0xf2a   :  { %13688 = vmatprep.subr.bf16.mxu1 %v14231_v53 }
 0xf2d   :  { %13690 = vmatpush3.bf16.msra.mxu1 %v13689_v60 }
 0xf2e   :  { %13691 = vmatprep.subr.bf16.mxu1 %v14231_v53 }
 0xf31   :  { %13693 = vmatpush3.bf16.msra.mxu1 %v13692_v30 }
 0xf32   :  { %13694 = vmatprep.subr.bf16.mxu1 %v14231_v53 }
 0xf35   :  { %13696 = vmatpush3.bf16.msra.mxu1 %v13695_v6 }
 0xf36   :  { %13697 = vmatprep.subr.bf16.mxu1 %v14231_v53 }
 0xf39   :  { %13699 = vmatpush3.bf16.msra.mxu1 %v13698_v56 }
 0xf3a   :  { %13700 = vmatprep.subr.bf16.mxu1 %v14231_v53 }
 0xf3d   :  { %13702 = vmatpush3.bf16.msra.mxu1 %v13701_v3 }
 0xf3e   :  { %13703 = vmatprep.subr.bf16.mxu1 %v14231_v53 }
 0xf41   :  { %13705 = vmatpush3.bf16.msra.mxu1 %v13704_v58 }
 0xf42   :  { %13706 = vmatprep.subr.bf16.mxu1 %v14231_v53 }
 0xf45   :  { %13708 = vmatpush3.bf16.msra.mxu1 %v13707_v15 }
 0xf46   :  { %13715 = vmatprep.subr.bf16.mxu1 %v14231_v53 }
 0xf48   :  { %12233 = vmatmul.mubr.f32.vlgmr.msra.gmra.mrb[84].mxu1 %v15772_v42  ;;  %v8524_v42 = vld [vmem:[#allocation15 + $0x440] sm:$0xff] }
 0xf49   :  { %13717 = vmatpush3.bf16.msra.mxu1 %v13716_v47  ;;  %12278 = vmatprep.mubr.msk.f32.mxu1 %vm14232_vm1, %v14233_v49  ;;  %v13728_v9 = vpack.c.bf16 %v8525_v40, %v8524_v42  ;;  %v8526_v49 = vld [vmem:[#allocation15 + $0x450] sm:$0xff] }
 0xf4a   :  { %13718 = vmatprep.subr.bf16.mxu1 %v14231_v53  ;;  %v13731_v1 = vpack.c.bf16 %v8527_v46, %v8526_v49 }
 0xf4d   :  { %13720 = vmatpush3.bf16.msra.mxu1 %v13719_v54 }
 0xf4e   :  { %13721 = vmatprep.subr.bf16.mxu1 %v14231_v53 }
 0xf51   :  { %13723 = vmatpush3.bf16.msra.mxu1 %v13722_v31 }
 0xf52   :  { %13724 = vmatprep.subr.bf16.mxu1 %v14231_v53 }
 0xf55   :  { %13726 = vmatpush3.bf16.msra.mxu1 %v13725_v12 }
 0xf56   :  { %13727 = vmatprep.subr.bf16.mxu1 %v14231_v53 }
 0xf59   :  { %13729 = vmatpush3.bf16.msra.mxu1 %v13728_v9 }
 0xf5a   :  { %13730 = vmatprep.subr.bf16.mxu1 %v14231_v53 }
 0xf5d   :  { %13732 = vmatpush3.bf16.msra.mxu1 %v13731_v1 }
 0xf5e   :  { %13733 = vmatprep.subr.bf16.mxu1 %v14231_v53 }
 0xf61   :  { %13735 = vmatpush3.bf16.msra.mxu1 %v13734_v32 }
 0xf62   :  { %13736 = vmatprep.subr.bf16.mxu1 %v14231_v53 }
 0xf65   :  { %13738 = vmatpush3.bf16.msra.mxu1 %v13737_v19 }
 0xf68   :  { %12279 = vmatmul.mubr.f32.vlgmr.msra.gmra.mrb[84].mxu1 %v15786_v48 }
0x103b   :  { %v8598_v20 = vpop.f32.mrb[84].mxu1 }
0x103c   :  { %v13791_v21 = vadd.f32 %v8761_v59, %v8598_v20  ;;  %v12280_v27 = vpop.f32.mrb[85].mxu1 }
0x103e   :  { %v8603_v38 = vmax.f32 %v13791_v21, 0.0 }
0x1040   :  { %8604 = vst [vmem:[%s15845_s10] sm:$0xff] %v8603_v38 }
0x1041   :  { %8609 = vsyncpa [#allocation3], 1 }
0x1042   :  { %8610 = vsyncpa [#allocation5], 1 }
0x1043   :  { %8611 = vsyncpa [#allocation8], 1 }
0x1044   :  { %8612 = vsyncpa [#allocation11], 1 }
0x1045   :  { %8613 = vsyncpa [#allocation14], 1 }
0x1046   :  { %8614 = vsyncpa [#allocation17], 1 }

</bundles_post_ra>
